<compile_context>
chip_gen: v5e
topology: v5e:2x2
jax: 0.10.0
libtpu: 0.0.40
codegen_flags: <defaults>
</compile_context>

<pallas_src>
import functools

import jax
import jax.numpy as jnp
from jax.experimental import pallas as pl
from jax.experimental.pallas import tpu as pltpu


def _round_up(x, m):
    return ((x + m - 1) // m) * m


def _lstm_gen_kernel(x_ref, wih_ref, whh_ref, bg_ref, wlin_ref, blin_ref,
                     out_ref, h_sc, c_sc,
                     *, h_pad, t_chunk, b_tile, seq_len, compute_dtype):
    t = pl.program_id(1)
    Hp = h_pad

    # h0 = c0 = 0 at the first time-chunk of each batch tile.
    @pl.when(t == 0)
    def _():
        h_sc[...] = jnp.zeros_like(h_sc)
        c_sc[...] = jnp.zeros_like(c_sc)

    # ---- Hoisted input projection: one large-M MXU pass per chunk ----------
    # x block is (t_chunk*b_tile, Dp); the (b_ih + b_hh) bias is folded in so
    # the (1,4Hp)->(rows,4Hp) broadcast happens once per chunk, not per step.
    gates_x = (jnp.dot(x_ref[...], wih_ref[...],
                       preferred_element_type=jnp.float32)
               + bg_ref[...])                       # (t_chunk*b_tile, 4Hp) f32

    needs_mask = (seq_len % t_chunk) != 0           # compile-time decision

    # Statically unrolled recurrence: per step only the small (b_tile,Hp) @
    # (Hp,4Hp) recurrent matmul + f32 elementwise gates.
    for i in range(t_chunk):
        g_x = gates_x[i * b_tile:(i + 1) * b_tile, :]   # sublane-aligned view
        gates = g_x + jnp.dot(h_sc[...].astype(compute_dtype), whh_ref[...],
                              preferred_element_type=jnp.float32)

        # Lane-aligned per-gate slabs (PyTorch order: i, f, g, o).
        i_g = jax.nn.sigmoid(gates[:, 0 * Hp:1 * Hp])
        f_g = jax.nn.sigmoid(gates[:, 1 * Hp:2 * Hp])
        g_g = jnp.tanh(gates[:, 2 * Hp:3 * Hp])
        o_g = jax.nn.sigmoid(gates[:, 3 * Hp:4 * Hp])

        c_new = f_g * c_sc[...] + i_g * g_g
        h_new = o_g * jnp.tanh(c_new)

        if needs_mask:
            # Tail timesteps (only on the final chunk) skip the state update
            # entirely; full chunks pay one scalar compare + branch, not
            # per-step vector selects.
            @pl.when(t * t_chunk + i < seq_len)
            def _(c_new=c_new, h_new=h_new):
                c_sc[...] = c_new
                h_sc[...] = h_new
        else:
            c_sc[...] = c_new
            h_sc[...] = h_new

    # ---- Final Linear on the last timestep's hidden state ------------------
    # NOTE: the output block's index_map is constant along the sequential
    # ("arbitrary") time axis, so it stays resident and is written exactly
    # once, here.  Do not reorder the grid / change the out index_map without
    # revisiting this invariant.
    @pl.when(t == pl.num_programs(1) - 1)
    def _():
        out_ref[...] = (jnp.dot(h_sc[...].astype(compute_dtype), wlin_ref[...],
                                preferred_element_type=jnp.float32)
                        + blin_ref[...]).astype(out_ref.dtype)


def prepare_generator_weights(params, *, compute_dtype=jnp.float32):
    """Pad / transpose / gate-align the weights ONCE (cache alongside params).

    compute_dtype=jnp.bfloat16 gives bf16 matmul operands with f32
    accumulation (the right setting for v6e/v7x MXUs at production sizes);
    float32 matches the PyTorch reference bit-closely (and suits v5e).
    """
    w_ih, w_hh = params["w_ih"], params["w_hh"]      # (4H, D), (4H, H)
    b_ih, b_hh = params["b_ih"], params["b_hh"]      # (4H,), (4H,)
    w_lin, b_lin = params["w_lin"], params["b_lin"]  # (out, H), (out,)
    H = w_hh.shape[1]
    D = w_ih.shape[1]
    output_dim = w_lin.shape[0]

    Hp = _round_up(H, 128)
    Dp = _round_up(D, 128)
    Op = _round_up(output_dim, 128)

    # Per-gate zero-padding H -> Hp so every gate occupies a 128-lane-aligned
    # slab of the 4*Hp gate vector.  Padded gate columns have zero weight and
    # bias => i=f=o=0.5, g=0 there, so padded c,h stay exactly 0 forever.
    def pad_gate_rows(w):  # (4H, K) -> (4Hp, K)
        w4 = w.reshape(4, H, -1)
        w4 = jnp.pad(w4, ((0, 0), (0, Hp - H), (0, 0)))
        return w4.reshape(4 * Hp, -1)

    w_ih_t = jnp.pad(pad_gate_rows(w_ih).T, ((0, Dp - D), (0, 0)))     # (Dp, 4Hp)
    w_hh_t = jnp.pad(pad_gate_rows(w_hh).T, ((0, Hp - H), (0, 0)))     # (Hp, 4Hp)
    b_g = jnp.pad((b_ih + b_hh).reshape(4, H),
                  ((0, 0), (0, Hp - H))).reshape(1, 4 * Hp)            # (1, 4Hp)
    w_lin_t = jnp.pad(w_lin.T, ((0, Hp - H), (0, Op - output_dim)))    # (Hp, Op)
    b_lin_p = jnp.pad(b_lin, (0, Op - output_dim)).reshape(1, Op)      # (1, Op)

    return {
        "w_ih_t": w_ih_t.astype(compute_dtype),
        "w_hh_t": w_hh_t.astype(compute_dtype),
        "b_gates": b_g.astype(jnp.float32),      # biases stay f32 (accumulator dtype)
        "w_lin_t": w_lin_t.astype(compute_dtype),
        "b_lin": b_lin_p.astype(jnp.float32),
        "dims": (D, H, output_dim),
        "padded_dims": (Dp, Hp, Op),
        "compute_dtype": compute_dtype,
    }


def generator_forward(x, prep, *, t_chunk=None, b_tile=None):
    """x: (B, T, input_dim) float32; prep from prepare_generator_weights.
    Returns (B, output_dim) float32."""
    B, T, input_dim = x.shape
    D, H, output_dim = prep["dims"]
    Dp, Hp, Op = prep["padded_dims"]
    cdt = prep["compute_dtype"]
    assert input_dim == D, "x feature dim does not match prepared weights"

    Bp = _round_up(B, 8)
    if b_tile is None:
        # Keep nb=1 unless a per-core tile would still fill the MXU M-dim
        # (>=128-256 rows); splitting a thin batch across the v7x megacore
        # only shrinks already-poor MXU row occupancy.
        b_tile = Bp
    b_tile = _round_up(min(b_tile, Bp), 8)
    assert Bp % b_tile == 0, "b_tile must divide the padded batch"
    nb = Bp // b_tile

    if t_chunk is None:
        t_chunk = T if T <= 32 else 32   # amortize ~0.35us per-grid-step overhead
    t_chunk = max(1, min(t_chunk, T))
    Tp = _round_up(T, t_chunk)
    nt = Tp // t_chunk
    # No (8,128) constraint on t_chunk: time is a leading squeezed block dim;
    # the x block's last two dims are (t_chunk*b_tile, Dp), both aligned.

    # Lay x out so each grid step reads one lane/sublane-dense slab:
    #   x4[b, t, i*b_tile + r, :] = x[b*b_tile + r, t*t_chunk + i, :]
    x_p = jnp.pad(x, ((0, Bp - B), (0, Tp - T), (0, Dp - D)))
    x4 = (x_p.transpose(1, 0, 2)
              .reshape(nt, t_chunk, nb, b_tile, Dp)
              .transpose(2, 0, 1, 3, 4)
              .reshape(nb, nt, t_chunk * b_tile, Dp)
              .astype(cdt))

    kernel = functools.partial(_lstm_gen_kernel, h_pad=Hp, t_chunk=t_chunk,
                               b_tile=b_tile, seq_len=T, compute_dtype=cdt)

    # Scoped-VMEM budget sized to the actual resident working set (defaults of
    # ~16/32 MiB are far below physical and reject production-size weights).
    wdt = jnp.dtype(cdt).itemsize
    resident = (
        (Dp * 4 * Hp + Hp * 4 * Hp + Hp * Op) * wdt      # weights (single-buffered)
        + (4 * Hp + Op) * 4                              # biases (f32)
        + 2 * t_chunk * b_tile * Dp * wdt                # double-buffered x chunk
        + 2 * b_tile * Op * 4                            # output block
        + 2 * b_tile * Hp * 4                            # h/c scratch
        + t_chunk * b_tile * 4 * Hp * 4                  # in-flight gates_x value
    )
    vmem_limit = min(max(int(1.5 * resident) + (2 << 20), 16 << 20), 64 << 20)

    weight_args = (prep["w_ih_t"], prep["w_hh_t"], prep["b_gates"],
                   prep["w_lin_t"], prep["b_lin"])

    def build(single_buffer_weights):
        def const_spec(shape):
            idx = (0,) * len(shape)
            if single_buffer_weights:
                # Constant index_map => one resident buffer suffices; halves
                # weight VMEM vs. default double buffering (key on v7x 64 MiB).
                return pl.BlockSpec(shape, lambda b, t: idx,
                                    pipeline_mode=pl.Buffered(1))
            return pl.BlockSpec(shape, lambda b, t: idx)

        return pl.pallas_call(
            kernel,
            out_shape=jax.ShapeDtypeStruct((Bp, Op), jnp.float32),
            grid_spec=pltpu.PrefetchScalarGridSpec(
                num_scalar_prefetch=0,
                grid=(nb, nt),
                in_specs=[
                    pl.BlockSpec((None, None, t_chunk * b_tile, Dp),
                                 lambda b, t: (b, t, 0, 0)),       # x chunk
                    const_spec((Dp, 4 * Hp)),                       # W_ih^T
                    const_spec((Hp, 4 * Hp)),                       # W_hh^T
                    const_spec((1, 4 * Hp)),                        # b_ih + b_hh
                    const_spec((Hp, Op)),                           # W_lin^T
                    const_spec((1, Op)),                            # b_lin
                ],
                out_specs=pl.BlockSpec((b_tile, Op), lambda b, t: (b, 0)),
                scratch_shapes=[
                    pltpu.VMEM((b_tile, Hp), jnp.float32),   # h state
                    pltpu.VMEM((b_tile, Hp), jnp.float32),   # c state
                ],
            ),
            compiler_params=pltpu.CompilerParams(
                dimension_semantics=("parallel", "arbitrary"),
                vmem_limit_bytes=vmem_limit),
        )

    try:
        out_p = build(True)(x4, *weight_args)
    except Exception:
        # Fallback for jax versions where pipeline_mode=pl.Buffered(1) is not
        # accepted on pallas_call BlockSpecs: default double buffering.
        out_p = build(False)(x4, *weight_args)

    return out_p[:B, :output_dim]


def init_params(key, input_dim, hidden_dim, output_dim):
    """Deterministic init mimicking PyTorch's U(-1/sqrt(H), 1/sqrt(H))."""
    ks = jax.random.split(key, 6)
    bound = 1.0 / jnp.sqrt(jnp.float32(hidden_dim))
    u = lambda k, shape: jax.random.uniform(k, shape, jnp.float32, -bound, bound)
    return {
        "w_ih": u(ks[0], (4 * hidden_dim, input_dim)),
        "w_hh": u(ks[1], (4 * hidden_dim, hidden_dim)),
        "b_ih": u(ks[2], (4 * hidden_dim,)),
        "b_hh": u(ks[3], (4 * hidden_dim,)),
        "w_lin": u(ks[4], (output_dim, hidden_dim)),
        "b_lin": u(ks[5], (output_dim,)),
    }


def _reference_forward(x, params):
    """Pure-JAX reference of the PyTorch Generator forward."""
    B, T, _ = x.shape
    H = params["w_hh"].shape[1]
    wih_t = params["w_ih"].T
    whh_t = params["w_hh"].T
    b = (params["b_ih"] + params["b_hh"])[None, :]
    h = jnp.zeros((B, H), jnp.float32)
    c = jnp.zeros((B, H), jnp.float32)

    def step(carry, x_t):
        h, c = carry
        gates = x_t @ wih_t + h @ whh_t + b
        i = jax.nn.sigmoid(gates[:, 0 * H:1 * H])
        f = jax.nn.sigmoid(gates[:, 1 * H:2 * H])
        g = jnp.tanh(gates[:, 2 * H:3 * H])
        o = jax.nn.sigmoid(gates[:, 3 * H:4 * H])
        c = f * c + i * g
        h = o * jnp.tanh(c)
        return (h, c), None

    (h, _), _ = jax.lax.scan(step, (h, c), jnp.transpose(x, (1, 0, 2)))
    return h @ params["w_lin"].T + params["b_lin"][None, :]


if __name__ == "__main__":
    B, T = 2, 8
    input_dim, hidden_dim, output_dim = 4, 32, 4

    key = jax.random.PRNGKey(0)
    kx, kp = jax.random.split(key)
    x = jax.random.normal(kx, (B, T, input_dim), jnp.float32)
    params = init_params(kp, input_dim, hidden_dim, output_dim)

    ref = _reference_forward(x, params)

    # f32 path (bit-close to the reference; the right setting for v5e).
    prep_f32 = prepare_generator_weights(params, compute_dtype=jnp.float32)
    out = generator_forward(x, prep_f32)
    jax.block_until_ready(out)
    assert out.shape == (B, output_dim)
    assert jnp.allclose(out, ref, atol=1e-5, rtol=1e-5), "f32 mismatch vs reference"

    # bf16-operand / f32-accumulate path (v6e/v7x MXU configuration).
    prep_bf16 = prepare_generator_weights(params, compute_dtype=jnp.bfloat16)
    out_bf16 = generator_forward(x, prep_bf16)
    jax.block_until_ready(out_bf16)
    assert out_bf16.shape == (B, output_dim)
    assert jnp.allclose(out_bf16, ref, atol=5e-2, rtol=5e-2), "bf16 mismatch vs reference"

    print("KERNEL_OK")
</pallas_src>

<mosaic_0001>
module attributes {stable_mosaic.version = 11 : i64} {
  func.func @_lstm_gen_kernel(%arg0: i32, %arg1: i32, %arg2: memref<1x1x64x128xf32, #tpu.memory_space<vmem>>, %arg3: memref<128x512xf32, #tpu.memory_space<vmem>>, %arg4: memref<128x512xf32, #tpu.memory_space<vmem>>, %arg5: memref<1x512xf32, #tpu.memory_space<vmem>>, %arg6: memref<128x128xf32, #tpu.memory_space<vmem>>, %arg7: memref<1x128xf32, #tpu.memory_space<vmem>>, %arg8: memref<8x128xf32, #tpu.memory_space<vmem>>, %arg9: memref<8x128xf32, #tpu.memory_space<vmem>>, %arg10: memref<8x128xf32, #tpu.memory_space<vmem>>) attributes {dimension_semantics = [#tpu.dimension_semantics<parallel>, #tpu.dimension_semantics<arbitrary>], iteration_bounds = array<i64: 1, 1>, scalar_prefetch = 0 : i64, scratch_operands = 2 : i64, tpu.core_type = #tpu.core_type<tc>, window_params = [{transform_indices = @transform_0, window_bounds = array<i64: 1, 1, 64, 128>}, {pipeline_mode = #tpu.pipeline_mode<synchronous>, transform_indices = @transform_1, window_bounds = array<i64: 128, 512>}, {pipeline_mode = #tpu.pipeline_mode<synchronous>, transform_indices = @transform_2, window_bounds = array<i64: 128, 512>}, {pipeline_mode = #tpu.pipeline_mode<synchronous>, transform_indices = @transform_3, window_bounds = array<i64: 1, 512>}, {pipeline_mode = #tpu.pipeline_mode<synchronous>, transform_indices = @transform_4, window_bounds = array<i64: 128, 128>}, {pipeline_mode = #tpu.pipeline_mode<synchronous>, transform_indices = @transform_5, window_bounds = array<i64: 1, 128>}, {transform_indices = @transform_6, window_bounds = array<i64: 8, 128>}]} {
    %c0_i32 = arith.constant 0 : i32
    %0 = arith.cmpi eq, %arg1, %c0_i32 : i32
    %1 = arith.extui %0 : i1 to i32
    %c0_i32_0 = arith.constant 0 : i32
    %2 = arith.cmpi ne, %1, %c0_i32_0 : i32
    scf.if %2 {
      %cst_122 = arith.constant 0.000000e+00 : f32
      %277 = vector.broadcast %cst_122 : f32 to vector<8x128xf32>
      %c0_123 = arith.constant 0 : index
      %c0_124 = arith.constant 0 : index
      %278 = vector.load %arg9[%c0_123, %c0_124] : memref<8x128xf32, #tpu.memory_space<vmem>>, vector<8x128xf32>
      tpu.vector_store %arg9[%c0_123, %c0_124], %277 {strides = array<i32>} : memref<8x128xf32, #tpu.memory_space<vmem>>, vector<8x128xf32>,
      %cst_125 = arith.constant 0.000000e+00 : f32
      %279 = vector.broadcast %cst_125 : f32 to vector<8x128xf32>
      %c0_126 = arith.constant 0 : index
      %c0_127 = arith.constant 0 : index
      %280 = vector.load %arg10[%c0_126, %c0_127] : memref<8x128xf32, #tpu.memory_space<vmem>>, vector<8x128xf32>
      tpu.vector_store %arg10[%c0_126, %c0_127], %279 {strides = array<i32>} : memref<8x128xf32, #tpu.memory_space<vmem>>, vector<8x128xf32>,
    } else {
    }
    %c0 = arith.constant 0 : index
    %c0_1 = arith.constant 0 : index
    %c0_2 = arith.constant 0 : index
    %c0_3 = arith.constant 0 : index
    %3 = vector.load %arg2[%c0, %c0_1, %c0_2, %c0_3] : memref<1x1x64x128xf32, #tpu.memory_space<vmem>>, vector<1x1x64x128xf32>
    %4 = vector.shape_cast %3 : vector<1x1x64x128xf32> to vector<64x128xf32>
    %c0_4 = arith.constant 0 : index
    %c0_5 = arith.constant 0 : index
    %5 = vector.load %arg3[%c0_4, %c0_5] : memref<128x512xf32, #tpu.memory_space<vmem>>, vector<128x512xf32>
    %cst = arith.constant dense<0.000000e+00> : vector<64x512xf32>
    %6 = tpu.matmul %4, %5, %cst {dimension_numbers = #tpu.dot_dimension_numbers<[1], [0], [0], [1], [0, 0, 1, 1], [], []>} : vector<64x128xf32>, vector<128x512xf32>, vector<64x512xf32> -> vector<64x512xf32>
    %c0_6 = arith.constant 0 : index
    %c0_7 = arith.constant 0 : index
    %7 = vector.load %arg5[%c0_6, %c0_7] : memref<1x512xf32, #tpu.memory_space<vmem>>, vector<1x512xf32>
    %8 = vector.broadcast %7 : vector<1x512xf32> to vector<64x512xf32>
    %9 = arith.addf %6, %8 : vector<64x512xf32>
    %10 = vector.extract_strided_slice %9 {offsets = [0, 0], sizes = [8, 512], strides = [1, 1]} : vector<64x512xf32> to vector<8x512xf32>
    %c0_8 = arith.constant 0 : index
    %c0_9 = arith.constant 0 : index
    %11 = vector.load %arg9[%c0_8, %c0_9] : memref<8x128xf32, #tpu.memory_space<vmem>>, vector<8x128xf32>
    %c0_10 = arith.constant 0 : index
    %c0_11 = arith.constant 0 : index
    %12 = vector.load %arg4[%c0_10, %c0_11] : memref<128x512xf32, #tpu.memory_space<vmem>>, vector<128x512xf32>
    %cst_12 = arith.constant dense<0.000000e+00> : vector<8x512xf32>
    %13 = tpu.matmul %11, %12, %cst_12 {dimension_numbers = #tpu.dot_dimension_numbers<[1], [0], [0], [1], [0, 0, 1, 1], [], []>} : vector<8x128xf32>, vector<128x512xf32>, vector<8x512xf32> -> vector<8x512xf32>
    %14 = arith.addf %10, %13 : vector<8x512xf32>
    %15 = vector.extract_strided_slice %14 {offsets = [0, 0], sizes = [8, 128], strides = [1, 1]} : vector<8x512xf32> to vector<8x128xf32>
    %16 = arith.negf %15 : vector<8x128xf32>
    %17 = math.exp %16 : vector<8x128xf32>
    %cst_13 = arith.constant 1.000000e+00 : f32
    %18 = vector.broadcast %cst_13 : f32 to vector<8x128xf32>
    %19 = arith.addf %18, %17 : vector<8x128xf32>
    %20 = arith.divf %18, %19 : vector<8x128xf32>
    %21 = vector.extract_strided_slice %14 {offsets = [0, 128], sizes = [8, 128], strides = [1, 1]} : vector<8x512xf32> to vector<8x128xf32>
    %22 = arith.negf %21 : vector<8x128xf32>
    %23 = math.exp %22 : vector<8x128xf32>
    %cst_14 = arith.constant 1.000000e+00 : f32
    %24 = vector.broadcast %cst_14 : f32 to vector<8x128xf32>
    %25 = arith.addf %24, %23 : vector<8x128xf32>
    %26 = arith.divf %24, %25 : vector<8x128xf32>
    %27 = vector.extract_strided_slice %14 {offsets = [0, 256], sizes = [8, 128], strides = [1, 1]} : vector<8x512xf32> to vector<8x128xf32>
    %28 = math.tanh %27 : vector<8x128xf32>
    %29 = vector.extract_strided_slice %14 {offsets = [0, 384], sizes = [8, 128], strides = [1, 1]} : vector<8x512xf32> to vector<8x128xf32>
    %30 = arith.negf %29 : vector<8x128xf32>
    %31 = math.exp %30 : vector<8x128xf32>
    %cst_15 = arith.constant 1.000000e+00 : f32
    %32 = vector.broadcast %cst_15 : f32 to vector<8x128xf32>
    %33 = arith.addf %32, %31 : vector<8x128xf32>
    %34 = arith.divf %32, %33 : vector<8x128xf32>
    %c0_16 = arith.constant 0 : index
    %c0_17 = arith.constant 0 : index
    %35 = vector.load %arg10[%c0_16, %c0_17] : memref<8x128xf32, #tpu.memory_space<vmem>>, vector<8x128xf32>
    %36 = arith.mulf %26, %35 : vector<8x128xf32>
    %37 = arith.mulf %20, %28 : vector<8x128xf32>
    %38 = arith.addf %36, %37 : vector<8x128xf32>
    %39 = math.tanh %38 : vector<8x128xf32>
    %40 = arith.mulf %34, %39 : vector<8x128xf32>
    %c0_18 = arith.constant 0 : index
    %c0_19 = arith.constant 0 : index
    %41 = vector.load %arg10[%c0_18, %c0_19] : memref<8x128xf32, #tpu.memory_space<vmem>>, vector<8x128xf32>
    tpu.vector_store %arg10[%c0_18, %c0_19], %38 {strides = array<i32>} : memref<8x128xf32, #tpu.memory_space<vmem>>, vector<8x128xf32>,
    %c0_20 = arith.constant 0 : index
    %c0_21 = arith.constant 0 : index
    %42 = vector.load %arg9[%c0_20, %c0_21] : memref<8x128xf32, #tpu.memory_space<vmem>>, vector<8x128xf32>
    tpu.vector_store %arg9[%c0_20, %c0_21], %40 {strides = array<i32>} : memref<8x128xf32, #tpu.memory_space<vmem>>, vector<8x128xf32>,
    %43 = vector.extract_strided_slice %9 {offsets = [8, 0], sizes = [8, 512], strides = [1, 1]} : vector<64x512xf32> to vector<8x512xf32>
    %c0_22 = arith.constant 0 : index
    %c0_23 = arith.constant 0 : index
    %44 = vector.load %arg9[%c0_22, %c0_23] : memref<8x128xf32, #tpu.memory_space<vmem>>, vector<8x128xf32>
    %c0_24 = arith.constant 0 : index
    %c0_25 = arith.constant 0 : index
    %45 = vector.load %arg4[%c0_24, %c0_25] : memref<128x512xf32, #tpu.memory_space<vmem>>, vector<128x512xf32>
    %cst_26 = arith.constant dense<0.000000e+00> : vector<8x512xf32>
    %46 = tpu.matmul %44, %45, %cst_26 {dimension_numbers = #tpu.dot_dimension_numbers<[1], [0], [0], [1], [0, 0, 1, 1], [], []>} : vector<8x128xf32>, vector<128x512xf32>, vector<8x512xf32> -> vector<8x512xf32>
    %47 = arith.addf %43, %46 : vector<8x512xf32>
    %48 = vector.extract_strided_slice %47 {offsets = [0, 0], sizes = [8, 128], strides = [1, 1]} : vector<8x512xf32> to vector<8x128xf32>
    %49 = arith.negf %48 : vector<8x128xf32>
    %50 = math.exp %49 : vector<8x128xf32>
    %cst_27 = arith.constant 1.000000e+00 : f32
    %51 = vector.broadcast %cst_27 : f32 to vector<8x128xf32>
    %52 = arith.addf %51, %50 : vector<8x128xf32>
    %53 = arith.divf %51, %52 : vector<8x128xf32>
    %54 = vector.extract_strided_slice %47 {offsets = [0, 128], sizes = [8, 128], strides = [1, 1]} : vector<8x512xf32> to vector<8x128xf32>
    %55 = arith.negf %54 : vector<8x128xf32>
    %56 = math.exp %55 : vector<8x128xf32>
    %cst_28 = arith.constant 1.000000e+00 : f32
    %57 = vector.broadcast %cst_28 : f32 to vector<8x128xf32>
    %58 = arith.addf %57, %56 : vector<8x128xf32>
    %59 = arith.divf %57, %58 : vector<8x128xf32>
    %60 = vector.extract_strided_slice %47 {offsets = [0, 256], sizes = [8, 128], strides = [1, 1]} : vector<8x512xf32> to vector<8x128xf32>
    %61 = math.tanh %60 : vector<8x128xf32>
    %62 = vector.extract_strided_slice %47 {offsets = [0, 384], sizes = [8, 128], strides = [1, 1]} : vector<8x512xf32> to vector<8x128xf32>
    %63 = arith.negf %62 : vector<8x128xf32>
    %64 = math.exp %63 : vector<8x128xf32>
    %cst_29 = arith.constant 1.000000e+00 : f32
    %65 = vector.broadcast %cst_29 : f32 to vector<8x128xf32>
    %66 = arith.addf %65, %64 : vector<8x128xf32>
    %67 = arith.divf %65, %66 : vector<8x128xf32>
    %c0_30 = arith.constant 0 : index
    %c0_31 = arith.constant 0 : index
    %68 = vector.load %arg10[%c0_30, %c0_31] : memref<8x128xf32, #tpu.memory_space<vmem>>, vector<8x128xf32>
    %69 = arith.mulf %59, %68 : vector<8x128xf32>
    %70 = arith.mulf %53, %61 : vector<8x128xf32>
    %71 = arith.addf %69, %70 : vector<8x128xf32>
    %72 = math.tanh %71 : vector<8x128xf32>
    %73 = arith.mulf %67, %72 : vector<8x128xf32>
    %c0_32 = arith.constant 0 : index
    %c0_33 = arith.constant 0 : index
    %74 = vector.load %arg10[%c0_32, %c0_33] : memref<8x128xf32, #tpu.memory_space<vmem>>, vector<8x128xf32>
    tpu.vector_store %arg10[%c0_32, %c0_33], %71 {strides = array<i32>} : memref<8x128xf32, #tpu.memory_space<vmem>>, vector<8x128xf32>,
    %c0_34 = arith.constant 0 : index
    %c0_35 = arith.constant 0 : index
    %75 = vector.load %arg9[%c0_34, %c0_35] : memref<8x128xf32, #tpu.memory_space<vmem>>, vector<8x128xf32>
    tpu.vector_store %arg9[%c0_34, %c0_35], %73 {strides = array<i32>} : memref<8x128xf32, #tpu.memory_space<vmem>>, vector<8x128xf32>,
    %76 = vector.extract_strided_slice %9 {offsets = [16, 0], sizes = [8, 512], strides = [1, 1]} : vector<64x512xf32> to vector<8x512xf32>
    %c0_36 = arith.constant 0 : index
    %c0_37 = arith.constant 0 : index
    %77 = vector.load %arg9[%c0_36, %c0_37] : memref<8x128xf32, #tpu.memory_space<vmem>>, vector<8x128xf32>
    %c0_38 = arith.constant 0 : index
    %c0_39 = arith.constant 0 : index
    %78 = vector.load %arg4[%c0_38, %c0_39] : memref<128x512xf32, #tpu.memory_space<vmem>>, vector<128x512xf32>
    %cst_40 = arith.constant dense<0.000000e+00> : vector<8x512xf32>
    %79 = tpu.matmul %77, %78, %cst_40 {dimension_numbers = #tpu.dot_dimension_numbers<[1], [0], [0], [1], [0, 0, 1, 1], [], []>} : vector<8x128xf32>, vector<128x512xf32>, vector<8x512xf32> -> vector<8x512xf32>
    %80 = arith.addf %76, %79 : vector<8x512xf32>
    %81 = vector.extract_strided_slice %80 {offsets = [0, 0], sizes = [8, 128], strides = [1, 1]} : vector<8x512xf32> to vector<8x128xf32>
    %82 = arith.negf %81 : vector<8x128xf32>
    %83 = math.exp %82 : vector<8x128xf32>
    %cst_41 = arith.constant 1.000000e+00 : f32
    %84 = vector.broadcast %cst_41 : f32 to vector<8x128xf32>
    %85 = arith.addf %84, %83 : vector<8x128xf32>
    %86 = arith.divf %84, %85 : vector<8x128xf32>
    %87 = vector.extract_strided_slice %80 {offsets = [0, 128], sizes = [8, 128], strides = [1, 1]} : vector<8x512xf32> to vector<8x128xf32>
    %88 = arith.negf %87 : vector<8x128xf32>
    %89 = math.exp %88 : vector<8x128xf32>
    %cst_42 = arith.constant 1.000000e+00 : f32
    %90 = vector.broadcast %cst_42 : f32 to vector<8x128xf32>
    %91 = arith.addf %90, %89 : vector<8x128xf32>
    %92 = arith.divf %90, %91 : vector<8x128xf32>
    %93 = vector.extract_strided_slice %80 {offsets = [0, 256], sizes = [8, 128], strides = [1, 1]} : vector<8x512xf32> to vector<8x128xf32>
    %94 = math.tanh %93 : vector<8x128xf32>
    %95 = vector.extract_strided_slice %80 {offsets = [0, 384], sizes = [8, 128], strides = [1, 1]} : vector<8x512xf32> to vector<8x128xf32>
    %96 = arith.negf %95 : vector<8x128xf32>
    %97 = math.exp %96 : vector<8x128xf32>
    %cst_43 = arith.constant 1.000000e+00 : f32
    %98 = vector.broadcast %cst_43 : f32 to vector<8x128xf32>
    %99 = arith.addf %98, %97 : vector<8x128xf32>
    %100 = arith.divf %98, %99 : vector<8x128xf32>
    %c0_44 = arith.constant 0 : index
    %c0_45 = arith.constant 0 : index
    %101 = vector.load %arg10[%c0_44, %c0_45] : memref<8x128xf32, #tpu.memory_space<vmem>>, vector<8x128xf32>
    %102 = arith.mulf %92, %101 : vector<8x128xf32>
    %103 = arith.mulf %86, %94 : vector<8x128xf32>
    %104 = arith.addf %102, %103 : vector<8x128xf32>
    %105 = math.tanh %104 : vector<8x128xf32>
    %106 = arith.mulf %100, %105 : vector<8x128xf32>
    %c0_46 = arith.constant 0 : index
    %c0_47 = arith.constant 0 : index
    %107 = vector.load %arg10[%c0_46, %c0_47] : memref<8x128xf32, #tpu.memory_space<vmem>>, vector<8x128xf32>
    tpu.vector_store %arg10[%c0_46, %c0_47], %104 {strides = array<i32>} : memref<8x128xf32, #tpu.memory_space<vmem>>, vector<8x128xf32>,
    %c0_48 = arith.constant 0 : index
    %c0_49 = arith.constant 0 : index
    %108 = vector.load %arg9[%c0_48, %c0_49] : memref<8x128xf32, #tpu.memory_space<vmem>>, vector<8x128xf32>
    tpu.vector_store %arg9[%c0_48, %c0_49], %106 {strides = array<i32>} : memref<8x128xf32, #tpu.memory_space<vmem>>, vector<8x128xf32>,
    %109 = vector.extract_strided_slice %9 {offsets = [24, 0], sizes = [8, 512], strides = [1, 1]} : vector<64x512xf32> to vector<8x512xf32>
    %c0_50 = arith.constant 0 : index
    %c0_51 = arith.constant 0 : index
    %110 = vector.load %arg9[%c0_50, %c0_51] : memref<8x128xf32, #tpu.memory_space<vmem>>, vector<8x128xf32>
    %c0_52 = arith.constant 0 : index
    %c0_53 = arith.constant 0 : index
    %111 = vector.load %arg4[%c0_52, %c0_53] : memref<128x512xf32, #tpu.memory_space<vmem>>, vector<128x512xf32>
    %cst_54 = arith.constant dense<0.000000e+00> : vector<8x512xf32>
    %112 = tpu.matmul %110, %111, %cst_54 {dimension_numbers = #tpu.dot_dimension_numbers<[1], [0], [0], [1], [0, 0, 1, 1], [], []>} : vector<8x128xf32>, vector<128x512xf32>, vector<8x512xf32> -> vector<8x512xf32>
    %113 = arith.addf %109, %112 : vector<8x512xf32>
    %114 = vector.extract_strided_slice %113 {offsets = [0, 0], sizes = [8, 128], strides = [1, 1]} : vector<8x512xf32> to vector<8x128xf32>
    %115 = arith.negf %114 : vector<8x128xf32>
    %116 = math.exp %115 : vector<8x128xf32>
    %cst_55 = arith.constant 1.000000e+00 : f32
    %117 = vector.broadcast %cst_55 : f32 to vector<8x128xf32>
    %118 = arith.addf %117, %116 : vector<8x128xf32>
    %119 = arith.divf %117, %118 : vector<8x128xf32>
    %120 = vector.extract_strided_slice %113 {offsets = [0, 128], sizes = [8, 128], strides = [1, 1]} : vector<8x512xf32> to vector<8x128xf32>
    %121 = arith.negf %120 : vector<8x128xf32>
    %122 = math.exp %121 : vector<8x128xf32>
    %cst_56 = arith.constant 1.000000e+00 : f32
    %123 = vector.broadcast %cst_56 : f32 to vector<8x128xf32>
    %124 = arith.addf %123, %122 : vector<8x128xf32>
    %125 = arith.divf %123, %124 : vector<8x128xf32>
    %126 = vector.extract_strided_slice %113 {offsets = [0, 256], sizes = [8, 128], strides = [1, 1]} : vector<8x512xf32> to vector<8x128xf32>
    %127 = math.tanh %126 : vector<8x128xf32>
    %128 = vector.extract_strided_slice %113 {offsets = [0, 384], sizes = [8, 128], strides = [1, 1]} : vector<8x512xf32> to vector<8x128xf32>
    %129 = arith.negf %128 : vector<8x128xf32>
    %130 = math.exp %129 : vector<8x128xf32>
    %cst_57 = arith.constant 1.000000e+00 : f32
    %131 = vector.broadcast %cst_57 : f32 to vector<8x128xf32>
    %132 = arith.addf %131, %130 : vector<8x128xf32>
    %133 = arith.divf %131, %132 : vector<8x128xf32>
    %c0_58 = arith.constant 0 : index
    %c0_59 = arith.constant 0 : index
    %134 = vector.load %arg10[%c0_58, %c0_59] : memref<8x128xf32, #tpu.memory_space<vmem>>, vector<8x128xf32>
    %135 = arith.mulf %125, %134 : vector<8x128xf32>
    %136 = arith.mulf %119, %127 : vector<8x128xf32>
    %137 = arith.addf %135, %136 : vector<8x128xf32>
    %138 = math.tanh %137 : vector<8x128xf32>
    %139 = arith.mulf %133, %138 : vector<8x128xf32>
    %c0_60 = arith.constant 0 : index
    %c0_61 = arith.constant 0 : index
    %140 = vector.load %arg10[%c0_60, %c0_61] : memref<8x128xf32, #tpu.memory_space<vmem>>, vector<8x128xf32>
    tpu.vector_store %arg10[%c0_60, %c0_61], %137 {strides = array<i32>} : memref<8x128xf32, #tpu.memory_space<vmem>>, vector<8x128xf32>,
    %c0_62 = arith.constant 0 : index
    %c0_63 = arith.constant 0 : index
    %141 = vector.load %arg9[%c0_62, %c0_63] : memref<8x128xf32, #tpu.memory_space<vmem>>, vector<8x128xf32>
    tpu.vector_store %arg9[%c0_62, %c0_63], %139 {strides = array<i32>} : memref<8x128xf32, #tpu.memory_space<vmem>>, vector<8x128xf32>,
    %142 = vector.extract_strided_slice %9 {offsets = [32, 0], sizes = [8, 512], strides = [1, 1]} : vector<64x512xf32> to vector<8x512xf32>
    %c0_64 = arith.constant 0 : index
    %c0_65 = arith.constant 0 : index
    %143 = vector.load %arg9[%c0_64, %c0_65] : memref<8x128xf32, #tpu.memory_space<vmem>>, vector<8x128xf32>
    %c0_66 = arith.constant 0 : index
    %c0_67 = arith.constant 0 : index
    %144 = vector.load %arg4[%c0_66, %c0_67] : memref<128x512xf32, #tpu.memory_space<vmem>>, vector<128x512xf32>
    %cst_68 = arith.constant dense<0.000000e+00> : vector<8x512xf32>
    %145 = tpu.matmul %143, %144, %cst_68 {dimension_numbers = #tpu.dot_dimension_numbers<[1], [0], [0], [1], [0, 0, 1, 1], [], []>} : vector<8x128xf32>, vector<128x512xf32>, vector<8x512xf32> -> vector<8x512xf32>
    %146 = arith.addf %142, %145 : vector<8x512xf32>
    %147 = vector.extract_strided_slice %146 {offsets = [0, 0], sizes = [8, 128], strides = [1, 1]} : vector<8x512xf32> to vector<8x128xf32>
    %148 = arith.negf %147 : vector<8x128xf32>
    %149 = math.exp %148 : vector<8x128xf32>
    %cst_69 = arith.constant 1.000000e+00 : f32
    %150 = vector.broadcast %cst_69 : f32 to vector<8x128xf32>
    %151 = arith.addf %150, %149 : vector<8x128xf32>
    %152 = arith.divf %150, %151 : vector<8x128xf32>
    %153 = vector.extract_strided_slice %146 {offsets = [0, 128], sizes = [8, 128], strides = [1, 1]} : vector<8x512xf32> to vector<8x128xf32>
    %154 = arith.negf %153 : vector<8x128xf32>
    %155 = math.exp %154 : vector<8x128xf32>
    %cst_70 = arith.constant 1.000000e+00 : f32
    %156 = vector.broadcast %cst_70 : f32 to vector<8x128xf32>
    %157 = arith.addf %156, %155 : vector<8x128xf32>
    %158 = arith.divf %156, %157 : vector<8x128xf32>
    %159 = vector.extract_strided_slice %146 {offsets = [0, 256], sizes = [8, 128], strides = [1, 1]} : vector<8x512xf32> to vector<8x128xf32>
    %160 = math.tanh %159 : vector<8x128xf32>
    %161 = vector.extract_strided_slice %146 {offsets = [0, 384], sizes = [8, 128], strides = [1, 1]} : vector<8x512xf32> to vector<8x128xf32>
    %162 = arith.negf %161 : vector<8x128xf32>
    %163 = math.exp %162 : vector<8x128xf32>
    %cst_71 = arith.constant 1.000000e+00 : f32
    %164 = vector.broadcast %cst_71 : f32 to vector<8x128xf32>
    %165 = arith.addf %164, %163 : vector<8x128xf32>
    %166 = arith.divf %164, %165 : vector<8x128xf32>
    %c0_72 = arith.constant 0 : index
    %c0_73 = arith.constant 0 : index
    %167 = vector.load %arg10[%c0_72, %c0_73] : memref<8x128xf32, #tpu.memory_space<vmem>>, vector<8x128xf32>
    %168 = arith.mulf %158, %167 : vector<8x128xf32>
    %169 = arith.mulf %152, %160 : vector<8x128xf32>
    %170 = arith.addf %168, %169 : vector<8x128xf32>
    %171 = math.tanh %170 : vector<8x128xf32>
    %172 = arith.mulf %166, %171 : vector<8x128xf32>
    %c0_74 = arith.constant 0 : index
    %c0_75 = arith.constant 0 : index
    %173 = vector.load %arg10[%c0_74, %c0_75] : memref<8x128xf32, #tpu.memory_space<vmem>>, vector<8x128xf32>
    tpu.vector_store %arg10[%c0_74, %c0_75], %170 {strides = array<i32>} : memref<8x128xf32, #tpu.memory_space<vmem>>, vector<8x128xf32>,
    %c0_76 = arith.constant 0 : index
    %c0_77 = arith.constant 0 : index
    %174 = vector.load %arg9[%c0_76, %c0_77] : memref<8x128xf32, #tpu.memory_space<vmem>>, vector<8x128xf32>
    tpu.vector_store %arg9[%c0_76, %c0_77], %172 {strides = array<i32>} : memref<8x128xf32, #tpu.memory_space<vmem>>, vector<8x128xf32>,
    %175 = vector.extract_strided_slice %9 {offsets = [40, 0], sizes = [8, 512], strides = [1, 1]} : vector<64x512xf32> to vector<8x512xf32>
    %c0_78 = arith.constant 0 : index
    %c0_79 = arith.constant 0 : index
    %176 = vector.load %arg9[%c0_78, %c0_79] : memref<8x128xf32, #tpu.memory_space<vmem>>, vector<8x128xf32>
    %c0_80 = arith.constant 0 : index
    %c0_81 = arith.constant 0 : index
    %177 = vector.load %arg4[%c0_80, %c0_81] : memref<128x512xf32, #tpu.memory_space<vmem>>, vector<128x512xf32>
    %cst_82 = arith.constant dense<0.000000e+00> : vector<8x512xf32>
    %178 = tpu.matmul %176, %177, %cst_82 {dimension_numbers = #tpu.dot_dimension_numbers<[1], [0], [0], [1], [0, 0, 1, 1], [], []>} : vector<8x128xf32>, vector<128x512xf32>, vector<8x512xf32> -> vector<8x512xf32>
    %179 = arith.addf %175, %178 : vector<8x512xf32>
    %180 = vector.extract_strided_slice %179 {offsets = [0, 0], sizes = [8, 128], strides = [1, 1]} : vector<8x512xf32> to vector<8x128xf32>
    %181 = arith.negf %180 : vector<8x128xf32>
    %182 = math.exp %181 : vector<8x128xf32>
    %cst_83 = arith.constant 1.000000e+00 : f32
    %183 = vector.broadcast %cst_83 : f32 to vector<8x128xf32>
    %184 = arith.addf %183, %182 : vector<8x128xf32>
    %185 = arith.divf %183, %184 : vector<8x128xf32>
    %186 = vector.extract_strided_slice %179 {offsets = [0, 128], sizes = [8, 128], strides = [1, 1]} : vector<8x512xf32> to vector<8x128xf32>
    %187 = arith.negf %186 : vector<8x128xf32>
    %188 = math.exp %187 : vector<8x128xf32>
    %cst_84 = arith.constant 1.000000e+00 : f32
    %189 = vector.broadcast %cst_84 : f32 to vector<8x128xf32>
    %190 = arith.addf %189, %188 : vector<8x128xf32>
    %191 = arith.divf %189, %190 : vector<8x128xf32>
    %192 = vector.extract_strided_slice %179 {offsets = [0, 256], sizes = [8, 128], strides = [1, 1]} : vector<8x512xf32> to vector<8x128xf32>
    %193 = math.tanh %192 : vector<8x128xf32>
    %194 = vector.extract_strided_slice %179 {offsets = [0, 384], sizes = [8, 128], strides = [1, 1]} : vector<8x512xf32> to vector<8x128xf32>
    %195 = arith.negf %194 : vector<8x128xf32>
    %196 = math.exp %195 : vector<8x128xf32>
    %cst_85 = arith.constant 1.000000e+00 : f32
    %197 = vector.broadcast %cst_85 : f32 to vector<8x128xf32>
    %198 = arith.addf %197, %196 : vector<8x128xf32>
    %199 = arith.divf %197, %198 : vector<8x128xf32>
    %c0_86 = arith.constant 0 : index
    %c0_87 = arith.constant 0 : index
    %200 = vector.load %arg10[%c0_86, %c0_87] : memref<8x128xf32, #tpu.memory_space<vmem>>, vector<8x128xf32>
    %201 = arith.mulf %191, %200 : vector<8x128xf32>
    %202 = arith.mulf %185, %193 : vector<8x128xf32>
    %203 = arith.addf %201, %202 : vector<8x128xf32>
    %204 = math.tanh %203 : vector<8x128xf32>
    %205 = arith.mulf %199, %204 : vector<8x128xf32>
    %c0_88 = arith.constant 0 : index
    %c0_89 = arith.constant 0 : index
    %206 = vector.load %arg10[%c0_88, %c0_89] : memref<8x128xf32, #tpu.memory_space<vmem>>, vector<8x128xf32>
    tpu.vector_store %arg10[%c0_88, %c0_89], %203 {strides = array<i32>} : memref<8x128xf32, #tpu.memory_space<vmem>>, vector<8x128xf32>,
    %c0_90 = arith.constant 0 : index
    %c0_91 = arith.constant 0 : index
    %207 = vector.load %arg9[%c0_90, %c0_91] : memref<8x128xf32, #tpu.memory_space<vmem>>, vector<8x128xf32>
    tpu.vector_store %arg9[%c0_90, %c0_91], %205 {strides = array<i32>} : memref<8x128xf32, #tpu.memory_space<vmem>>, vector<8x128xf32>,
    %208 = vector.extract_strided_slice %9 {offsets = [48, 0], sizes = [8, 512], strides = [1, 1]} : vector<64x512xf32> to vector<8x512xf32>
    %c0_92 = arith.constant 0 : index
    %c0_93 = arith.constant 0 : index
    %209 = vector.load %arg9[%c0_92, %c0_93] : memref<8x128xf32, #tpu.memory_space<vmem>>, vector<8x128xf32>
    %c0_94 = arith.constant 0 : index
    %c0_95 = arith.constant 0 : index
    %210 = vector.load %arg4[%c0_94, %c0_95] : memref<128x512xf32, #tpu.memory_space<vmem>>, vector<128x512xf32>
    %cst_96 = arith.constant dense<0.000000e+00> : vector<8x512xf32>
    %211 = tpu.matmul %209, %210, %cst_96 {dimension_numbers = #tpu.dot_dimension_numbers<[1], [0], [0], [1], [0, 0, 1, 1], [], []>} : vector<8x128xf32>, vector<128x512xf32>, vector<8x512xf32> -> vector<8x512xf32>
    %212 = arith.addf %208, %211 : vector<8x512xf32>
    %213 = vector.extract_strided_slice %212 {offsets = [0, 0], sizes = [8, 128], strides = [1, 1]} : vector<8x512xf32> to vector<8x128xf32>
    %214 = arith.negf %213 : vector<8x128xf32>
    %215 = math.exp %214 : vector<8x128xf32>
    %cst_97 = arith.constant 1.000000e+00 : f32
    %216 = vector.broadcast %cst_97 : f32 to vector<8x128xf32>
    %217 = arith.addf %216, %215 : vector<8x128xf32>
    %218 = arith.divf %216, %217 : vector<8x128xf32>
    %219 = vector.extract_strided_slice %212 {offsets = [0, 128], sizes = [8, 128], strides = [1, 1]} : vector<8x512xf32> to vector<8x128xf32>
    %220 = arith.negf %219 : vector<8x128xf32>
    %221 = math.exp %220 : vector<8x128xf32>
    %cst_98 = arith.constant 1.000000e+00 : f32
    %222 = vector.broadcast %cst_98 : f32 to vector<8x128xf32>
    %223 = arith.addf %222, %221 : vector<8x128xf32>
    %224 = arith.divf %222, %223 : vector<8x128xf32>
    %225 = vector.extract_strided_slice %212 {offsets = [0, 256], sizes = [8, 128], strides = [1, 1]} : vector<8x512xf32> to vector<8x128xf32>
    %226 = math.tanh %225 : vector<8x128xf32>
    %227 = vector.extract_strided_slice %212 {offsets = [0, 384], sizes = [8, 128], strides = [1, 1]} : vector<8x512xf32> to vector<8x128xf32>
    %228 = arith.negf %227 : vector<8x128xf32>
    %229 = math.exp %228 : vector<8x128xf32>
    %cst_99 = arith.constant 1.000000e+00 : f32
    %230 = vector.broadcast %cst_99 : f32 to vector<8x128xf32>
    %231 = arith.addf %230, %229 : vector<8x128xf32>
    %232 = arith.divf %230, %231 : vector<8x128xf32>
    %c0_100 = arith.constant 0 : index
    %c0_101 = arith.constant 0 : index
    %233 = vector.load %arg10[%c0_100, %c0_101] : memref<8x128xf32, #tpu.memory_space<vmem>>, vector<8x128xf32>
    %234 = arith.mulf %224, %233 : vector<8x128xf32>
    %235 = arith.mulf %218, %226 : vector<8x128xf32>
    %236 = arith.addf %234, %235 : vector<8x128xf32>
    %237 = math.tanh %236 : vector<8x128xf32>
    %238 = arith.mulf %232, %237 : vector<8x128xf32>
    %c0_102 = arith.constant 0 : index
    %c0_103 = arith.constant 0 : index
    %239 = vector.load %arg10[%c0_102, %c0_103] : memref<8x128xf32, #tpu.memory_space<vmem>>, vector<8x128xf32>
    tpu.vector_store %arg10[%c0_102, %c0_103], %236 {strides = array<i32>} : memref<8x128xf32, #tpu.memory_space<vmem>>, vector<8x128xf32>,
    %c0_104 = arith.constant 0 : index
    %c0_105 = arith.constant 0 : index
    %240 = vector.load %arg9[%c0_104, %c0_105] : memref<8x128xf32, #tpu.memory_space<vmem>>, vector<8x128xf32>
    tpu.vector_store %arg9[%c0_104, %c0_105], %238 {strides = array<i32>} : memref<8x128xf32, #tpu.memory_space<vmem>>, vector<8x128xf32>,
    %241 = vector.extract_strided_slice %9 {offsets = [56, 0], sizes = [8, 512], strides = [1, 1]} : vector<64x512xf32> to vector<8x512xf32>
    %c0_106 = arith.constant 0 : index
    %c0_107 = arith.constant 0 : index
    %242 = vector.load %arg9[%c0_106, %c0_107] : memref<8x128xf32, #tpu.memory_space<vmem>>, vector<8x128xf32>
    %c0_108 = arith.constant 0 : index
    %c0_109 = arith.constant 0 : index
    %243 = vector.load %arg4[%c0_108, %c0_109] : memref<128x512xf32, #tpu.memory_space<vmem>>, vector<128x512xf32>
    %cst_110 = arith.constant dense<0.000000e+00> : vector<8x512xf32>
    %244 = tpu.matmul %242, %243, %cst_110 {dimension_numbers = #tpu.dot_dimension_numbers<[1], [0], [0], [1], [0, 0, 1, 1], [], []>} : vector<8x128xf32>, vector<128x512xf32>, vector<8x512xf32> -> vector<8x512xf32>
    %245 = arith.addf %241, %244 : vector<8x512xf32>
    %246 = vector.extract_strided_slice %245 {offsets = [0, 0], sizes = [8, 128], strides = [1, 1]} : vector<8x512xf32> to vector<8x128xf32>
    %247 = arith.negf %246 : vector<8x128xf32>
    %248 = math.exp %247 : vector<8x128xf32>
    %cst_111 = arith.constant 1.000000e+00 : f32
    %249 = vector.broadcast %cst_111 : f32 to vector<8x128xf32>
    %250 = arith.addf %249, %248 : vector<8x128xf32>
    %251 = arith.divf %249, %250 : vector<8x128xf32>
    %252 = vector.extract_strided_slice %245 {offsets = [0, 128], sizes = [8, 128], strides = [1, 1]} : vector<8x512xf32> to vector<8x128xf32>
    %253 = arith.negf %252 : vector<8x128xf32>
    %254 = math.exp %253 : vector<8x128xf32>
    %cst_112 = arith.constant 1.000000e+00 : f32
    %255 = vector.broadcast %cst_112 : f32 to vector<8x128xf32>
    %256 = arith.addf %255, %254 : vector<8x128xf32>
    %257 = arith.divf %255, %256 : vector<8x128xf32>
    %258 = vector.extract_strided_slice %245 {offsets = [0, 256], sizes = [8, 128], strides = [1, 1]} : vector<8x512xf32> to vector<8x128xf32>
    %259 = math.tanh %258 : vector<8x128xf32>
    %260 = vector.extract_strided_slice %245 {offsets = [0, 384], sizes = [8, 128], strides = [1, 1]} : vector<8x512xf32> to vector<8x128xf32>
    %261 = arith.negf %260 : vector<8x128xf32>
    %262 = math.exp %261 : vector<8x128xf32>
    %cst_113 = arith.constant 1.000000e+00 : f32
    %263 = vector.broadcast %cst_113 : f32 to vector<8x128xf32>
    %264 = arith.addf %263, %262 : vector<8x128xf32>
    %265 = arith.divf %263, %264 : vector<8x128xf32>
    %c0_114 = arith.constant 0 : index
    %c0_115 = arith.constant 0 : index
    %266 = vector.load %arg10[%c0_114, %c0_115] : memref<8x128xf32, #tpu.memory_space<vmem>>, vector<8x128xf32>
    %267 = arith.mulf %257, %266 : vector<8x128xf32>
    %268 = arith.mulf %251, %259 : vector<8x128xf32>
    %269 = arith.addf %267, %268 : vector<8x128xf32>
    %270 = math.tanh %269 : vector<8x128xf32>
    %271 = arith.mulf %265, %270 : vector<8x128xf32>
    %c0_116 = arith.constant 0 : index
    %c0_117 = arith.constant 0 : index
    %272 = vector.load %arg10[%c0_116, %c0_117] : memref<8x128xf32, #tpu.memory_space<vmem>>, vector<8x128xf32>
    tpu.vector_store %arg10[%c0_116, %c0_117], %269 {strides = array<i32>} : memref<8x128xf32, #tpu.memory_space<vmem>>, vector<8x128xf32>,
    %c0_118 = arith.constant 0 : index
    %c0_119 = arith.constant 0 : index
    %273 = vector.load %arg9[%c0_118, %c0_119] : memref<8x128xf32, #tpu.memory_space<vmem>>, vector<8x128xf32>
    tpu.vector_store %arg9[%c0_118, %c0_119], %271 {strides = array<i32>} : memref<8x128xf32, #tpu.memory_space<vmem>>, vector<8x128xf32>,
    %c0_i32_120 = arith.constant 0 : i32
    %274 = arith.cmpi eq, %arg1, %c0_i32_120 : i32
    %275 = arith.extui %274 : i1 to i32
    %c0_i32_121 = arith.constant 0 : i32
    %276 = arith.cmpi ne, %275, %c0_i32_121 : i32
    scf.if %276 {
      %c0_122 = arith.constant 0 : index
      %c0_123 = arith.constant 0 : index
      %277 = vector.load %arg9[%c0_122, %c0_123] : memref<8x128xf32, #tpu.memory_space<vmem>>, vector<8x128xf32>
      %c0_124 = arith.constant 0 : index
      %c0_125 = arith.constant 0 : index
      %278 = vector.load %arg6[%c0_124, %c0_125] : memref<128x128xf32, #tpu.memory_space<vmem>>, vector<128x128xf32>
      %cst_126 = arith.constant dense<0.000000e+00> : vector<8x128xf32>
      %279 = tpu.matmul %277, %278, %cst_126 {dimension_numbers = #tpu.dot_dimension_numbers<[1], [0], [0], [1], [0, 0, 1, 1], [], []>} : vector<8x128xf32>, vector<128x128xf32>, vector<8x128xf32> -> vector<8x128xf32>
      %c0_127 = arith.constant 0 : index
      %c0_128 = arith.constant 0 : index
      %280 = vector.load %arg7[%c0_127, %c0_128] : memref<1x128xf32, #tpu.memory_space<vmem>>, vector<1x128xf32>
      %281 = vector.broadcast %280 : vector<1x128xf32> to vector<8x128xf32>
      %282 = arith.addf %279, %281 : vector<8x128xf32>
      %c0_129 = arith.constant 0 : index
      %c0_130 = arith.constant 0 : index
      %283 = vector.load %arg8[%c0_129, %c0_130] : memref<8x128xf32, #tpu.memory_space<vmem>>, vector<8x128xf32>
      tpu.vector_store %arg8[%c0_129, %c0_130], %282 {strides = array<i32>} : memref<8x128xf32, #tpu.memory_space<vmem>>, vector<8x128xf32>,
    } else {
    }
    return
  }
  func.func @transform_0(%arg0: i32, %arg1: i32) -> (i32, i32, i32, i32) {
    %c0_i32 = arith.constant 0 : i32
    %c0_i32_0 = arith.constant 0 : i32
    %c0_i32_1 = arith.constant 0 : i32
    return %arg0, %arg1, %c0_i32, %c0_i32_0 : i32, i32, i32, i32
  }
  func.func @transform_1(%arg0: i32, %arg1: i32) -> (i32, i32) {
    %c0_i32 = arith.constant 0 : i32
    %c0_i32_0 = arith.constant 0 : i32
    %c0_i32_1 = arith.constant 0 : i32
    return %c0_i32, %c0_i32_0 : i32, i32
  }
  func.func @transform_2(%arg0: i32, %arg1: i32) -> (i32, i32) {
    %c0_i32 = arith.constant 0 : i32
    %c0_i32_0 = arith.constant 0 : i32
    %c0_i32_1 = arith.constant 0 : i32
    return %c0_i32, %c0_i32_0 : i32, i32
  }
  func.func @transform_3(%arg0: i32, %arg1: i32) -> (i32, i32) {
    %c0_i32 = arith.constant 0 : i32
    %c0_i32_0 = arith.constant 0 : i32
    %c0_i32_1 = arith.constant 0 : i32
    return %c0_i32, %c0_i32_0 : i32, i32
  }
  func.func @transform_4(%arg0: i32, %arg1: i32) -> (i32, i32) {
    %c0_i32 = arith.constant 0 : i32
    %c0_i32_0 = arith.constant 0 : i32
    %c0_i32_1 = arith.constant 0 : i32
    return %c0_i32, %c0_i32_0 : i32, i32
  }
  func.func @transform_5(%arg0: i32, %arg1: i32) -> (i32, i32) {
    %c0_i32 = arith.constant 0 : i32
    %c0_i32_0 = arith.constant 0 : i32
    %c0_i32_1 = arith.constant 0 : i32
    return %c0_i32, %c0_i32_0 : i32, i32
  }
  func.func @transform_6(%arg0: i32, %arg1: i32) -> (i32, i32) {
    %c0_i32 = arith.constant 0 : i32
    %c0_i32_0 = arith.constant 0 : i32
    return %arg0, %c0_i32 : i32, i32
  }
}

module attributes {stable_mosaic.version = 11 : i64} {
  func.func @_lstm_gen_kernel(%arg0: i32, %arg1: i32, %arg2: memref<1x1x64x128xf32, #tpu.memory_space<vmem>>, %arg3: memref<128x512xf32, #tpu.memory_space<vmem>>, %arg4: memref<128x512xf32, #tpu.memory_space<vmem>>, %arg5: memref<1x512xf32, #tpu.memory_space<vmem>>, %arg6: memref<128x128xf32, #tpu.memory_space<vmem>>, %arg7: memref<1x128xf32, #tpu.memory_space<vmem>>, %arg8: memref<8x128xf32, #tpu.memory_space<vmem>>, %arg9: memref<8x128xf32, #tpu.memory_space<vmem>>, %arg10: memref<8x128xf32, #tpu.memory_space<vmem>>) attributes {dimension_semantics = [#tpu.dimension_semantics<parallel>, #tpu.dimension_semantics<arbitrary>], iteration_bounds = array<i64: 1, 1>, scalar_prefetch = 0 : i64, scratch_operands = 2 : i64, tpu.core_type = #tpu.core_type<tc>, window_params = [{transform_indices = @transform_0, window_bounds = array<i64: 1, 1, 64, 128>}, {pipeline_mode = #tpu.pipeline_mode<synchronous>, transform_indices = @transform_1, window_bounds = array<i64: 128, 512>}, {pipeline_mode = #tpu.pipeline_mode<synchronous>, transform_indices = @transform_2, window_bounds = array<i64: 128, 512>}, {pipeline_mode = #tpu.pipeline_mode<synchronous>, transform_indices = @transform_3, window_bounds = array<i64: 1, 512>}, {pipeline_mode = #tpu.pipeline_mode<synchronous>, transform_indices = @transform_4, window_bounds = array<i64: 128, 128>}, {pipeline_mode = #tpu.pipeline_mode<synchronous>, transform_indices = @transform_5, window_bounds = array<i64: 1, 128>}, {transform_indices = @transform_6, window_bounds = array<i64: 8, 128>}]} {
    %c0_i32 = arith.constant 0 : i32
    %0 = arith.cmpi eq, %arg1, %c0_i32 : i32
    %1 = arith.extui %0 : i1 to i32
    %c0_i32_0 = arith.constant 0 : i32
    %2 = arith.cmpi ne, %1, %c0_i32_0 : i32
    scf.if %2 {
      %cst_122 = arith.constant 0.000000e+00 : f32
      %277 = vector.broadcast %cst_122 : f32 to vector<8x128xf32>
      %c0_123 = arith.constant 0 : index
      %c0_124 = arith.constant 0 : index
      %278 = vector.load %arg9[%c0_123, %c0_124] : memref<8x128xf32, #tpu.memory_space<vmem>>, vector<8x128xf32>
      tpu.vector_store %arg9[%c0_123, %c0_124], %277 {strides = array<i32>} : memref<8x128xf32, #tpu.memory_space<vmem>>, vector<8x128xf32>,
      %cst_125 = arith.constant 0.000000e+00 : f32
      %279 = vector.broadcast %cst_125 : f32 to vector<8x128xf32>
      %c0_126 = arith.constant 0 : index
      %c0_127 = arith.constant 0 : index
      %280 = vector.load %arg10[%c0_126, %c0_127] : memref<8x128xf32, #tpu.memory_space<vmem>>, vector<8x128xf32>
      tpu.vector_store %arg10[%c0_126, %c0_127], %279 {strides = array<i32>} : memref<8x128xf32, #tpu.memory_space<vmem>>, vector<8x128xf32>,
    } else {
    }
    %c0 = arith.constant 0 : index
    %c0_1 = arith.constant 0 : index
    %c0_2 = arith.constant 0 : index
    %c0_3 = arith.constant 0 : index
    %3 = vector.load %arg2[%c0, %c0_1, %c0_2, %c0_3] : memref<1x1x64x128xf32, #tpu.memory_space<vmem>>, vector<1x1x64x128xf32>
    %4 = vector.shape_cast %3 : vector<1x1x64x128xf32> to vector<64x128xf32>
    %c0_4 = arith.constant 0 : index
    %c0_5 = arith.constant 0 : index
    %5 = vector.load %arg3[%c0_4, %c0_5] : memref<128x512xf32, #tpu.memory_space<vmem>>, vector<128x512xf32>
    %cst = arith.constant dense<0.000000e+00> : vector<64x512xf32>
    %6 = tpu.matmul %4, %5, %cst {dimension_numbers = #tpu.dot_dimension_numbers<[1], [0], [0], [1], [0, 0, 1, 1], [], []>} : vector<64x128xf32>, vector<128x512xf32>, vector<64x512xf32> -> vector<64x512xf32>
    %c0_6 = arith.constant 0 : index
    %c0_7 = arith.constant 0 : index
    %7 = vector.load %arg5[%c0_6, %c0_7] : memref<1x512xf32, #tpu.memory_space<vmem>>, vector<1x512xf32>
    %8 = vector.broadcast %7 : vector<1x512xf32> to vector<64x512xf32>
    %9 = arith.addf %6, %8 : vector<64x512xf32>
    %10 = vector.extract_strided_slice %9 {offsets = [0, 0], sizes = [8, 512], strides = [1, 1]} : vector<64x512xf32> to vector<8x512xf32>
    %c0_8 = arith.constant 0 : index
    %c0_9 = arith.constant 0 : index
    %11 = vector.load %arg9[%c0_8, %c0_9] : memref<8x128xf32, #tpu.memory_space<vmem>>, vector<8x128xf32>
    %c0_10 = arith.constant 0 : index
    %c0_11 = arith.constant 0 : index
    %12 = vector.load %arg4[%c0_10, %c0_11] : memref<128x512xf32, #tpu.memory_space<vmem>>, vector<128x512xf32>
    %cst_12 = arith.constant dense<0.000000e+00> : vector<8x512xf32>
    %13 = tpu.matmul %11, %12, %cst_12 {dimension_numbers = #tpu.dot_dimension_numbers<[1], [0], [0], [1], [0, 0, 1, 1], [], []>} : vector<8x128xf32>, vector<128x512xf32>, vector<8x512xf32> -> vector<8x512xf32>
    %14 = arith.addf %10, %13 : vector<8x512xf32>
    %15 = vector.extract_strided_slice %14 {offsets = [0, 0], sizes = [8, 128], strides = [1, 1]} : vector<8x512xf32> to vector<8x128xf32>
    %16 = arith.negf %15 : vector<8x128xf32>
    %17 = math.exp %16 : vector<8x128xf32>
    %cst_13 = arith.constant 1.000000e+00 : f32
    %18 = vector.broadcast %cst_13 : f32 to vector<8x128xf32>
    %19 = arith.addf %18, %17 : vector<8x128xf32>
    %20 = arith.divf %18, %19 : vector<8x128xf32>
    %21 = vector.extract_strided_slice %14 {offsets = [0, 128], sizes = [8, 128], strides = [1, 1]} : vector<8x512xf32> to vector<8x128xf32>
    %22 = arith.negf %21 : vector<8x128xf32>
    %23 = math.exp %22 : vector<8x128xf32>
    %cst_14 = arith.constant 1.000000e+00 : f32
    %24 = vector.broadcast %cst_14 : f32 to vector<8x128xf32>
    %25 = arith.addf %24, %23 : vector<8x128xf32>
    %26 = arith.divf %24, %25 : vector<8x128xf32>
    %27 = vector.extract_strided_slice %14 {offsets = [0, 256], sizes = [8, 128], strides = [1, 1]} : vector<8x512xf32> to vector<8x128xf32>
    %28 = math.tanh %27 : vector<8x128xf32>
    %29 = vector.extract_strided_slice %14 {offsets = [0, 384], sizes = [8, 128], strides = [1, 1]} : vector<8x512xf32> to vector<8x128xf32>
    %30 = arith.negf %29 : vector<8x128xf32>
    %31 = math.exp %30 : vector<8x128xf32>
    %cst_15 = arith.constant 1.000000e+00 : f32
    %32 = vector.broadcast %cst_15 : f32 to vector<8x128xf32>
    %33 = arith.addf %32, %31 : vector<8x128xf32>
    %34 = arith.divf %32, %33 : vector<8x128xf32>
    %c0_16 = arith.constant 0 : index
    %c0_17 = arith.constant 0 : index
    %35 = vector.load %arg10[%c0_16, %c0_17] : memref<8x128xf32, #tpu.memory_space<vmem>>, vector<8x128xf32>
    %36 = arith.mulf %26, %35 : vector<8x128xf32>
    %37 = arith.mulf %20, %28 : vector<8x128xf32>
    %38 = arith.addf %36, %37 : vector<8x128xf32>
    %39 = math.tanh %38 : vector<8x128xf32>
    %40 = arith.mulf %34, %39 : vector<8x128xf32>
    %c0_18 = arith.constant 0 : index
    %c0_19 = arith.constant 0 : index
    %41 = vector.load %arg10[%c0_18, %c0_19] : memref<8x128xf32, #tpu.memory_space<vmem>>, vector<8x128xf32>
    tpu.vector_store %arg10[%c0_18, %c0_19], %38 {strides = array<i32>} : memref<8x128xf32, #tpu.memory_space<vmem>>, vector<8x128xf32>,
    %c0_20 = arith.constant 0 : index
    %c0_21 = arith.constant 0 : index
    %42 = vector.load %arg9[%c0_20, %c0_21] : memref<8x128xf32, #tpu.memory_space<vmem>>, vector<8x128xf32>
    tpu.vector_store %arg9[%c0_20, %c0_21], %40 {strides = array<i32>} : memref<8x128xf32, #tpu.memory_space<vmem>>, vector<8x128xf32>,
    %43 = vector.extract_strided_slice %9 {offsets = [8, 0], sizes = [8, 512], strides = [1, 1]} : vector<64x512xf32> to vector<8x512xf32>
    %c0_22 = arith.constant 0 : index
    %c0_23 = arith.constant 0 : index
    %44 = vector.load %arg9[%c0_22, %c0_23] : memref<8x128xf32, #tpu.memory_space<vmem>>, vector<8x128xf32>
    %c0_24 = arith.constant 0 : index
    %c0_25 = arith.constant 0 : index
    %45 = vector.load %arg4[%c0_24, %c0_25] : memref<128x512xf32, #tpu.memory_space<vmem>>, vector<128x512xf32>
    %cst_26 = arith.constant dense<0.000000e+00> : vector<8x512xf32>
    %46 = tpu.matmul %44, %45, %cst_26 {dimension_numbers = #tpu.dot_dimension_numbers<[1], [0], [0], [1], [0, 0, 1, 1], [], []>} : vector<8x128xf32>, vector<128x512xf32>, vector<8x512xf32> -> vector<8x512xf32>
    %47 = arith.addf %43, %46 : vector<8x512xf32>
    %48 = vector.extract_strided_slice %47 {offsets = [0, 0], sizes = [8, 128], strides = [1, 1]} : vector<8x512xf32> to vector<8x128xf32>
    %49 = arith.negf %48 : vector<8x128xf32>
    %50 = math.exp %49 : vector<8x128xf32>
    %cst_27 = arith.constant 1.000000e+00 : f32
    %51 = vector.broadcast %cst_27 : f32 to vector<8x128xf32>
    %52 = arith.addf %51, %50 : vector<8x128xf32>
    %53 = arith.divf %51, %52 : vector<8x128xf32>
    %54 = vector.extract_strided_slice %47 {offsets = [0, 128], sizes = [8, 128], strides = [1, 1]} : vector<8x512xf32> to vector<8x128xf32>
    %55 = arith.negf %54 : vector<8x128xf32>
    %56 = math.exp %55 : vector<8x128xf32>
    %cst_28 = arith.constant 1.000000e+00 : f32
    %57 = vector.broadcast %cst_28 : f32 to vector<8x128xf32>
    %58 = arith.addf %57, %56 : vector<8x128xf32>
    %59 = arith.divf %57, %58 : vector<8x128xf32>
    %60 = vector.extract_strided_slice %47 {offsets = [0, 256], sizes = [8, 128], strides = [1, 1]} : vector<8x512xf32> to vector<8x128xf32>
    %61 = math.tanh %60 : vector<8x128xf32>
    %62 = vector.extract_strided_slice %47 {offsets = [0, 384], sizes = [8, 128], strides = [1, 1]} : vector<8x512xf32> to vector<8x128xf32>
    %63 = arith.negf %62 : vector<8x128xf32>
    %64 = math.exp %63 : vector<8x128xf32>
    %cst_29 = arith.constant 1.000000e+00 : f32
    %65 = vector.broadcast %cst_29 : f32 to vector<8x128xf32>
    %66 = arith.addf %65, %64 : vector<8x128xf32>
    %67 = arith.divf %65, %66 : vector<8x128xf32>
    %c0_30 = arith.constant 0 : index
    %c0_31 = arith.constant 0 : index
    %68 = vector.load %arg10[%c0_30, %c0_31] : memref<8x128xf32, #tpu.memory_space<vmem>>, vector<8x128xf32>
    %69 = arith.mulf %59, %68 : vector<8x128xf32>
    %70 = arith.mulf %53, %61 : vector<8x128xf32>
    %71 = arith.addf %69, %70 : vector<8x128xf32>
    %72 = math.tanh %71 : vector<8x128xf32>
    %73 = arith.mulf %67, %72 : vector<8x128xf32>
    %c0_32 = arith.constant 0 : index
    %c0_33 = arith.constant 0 : index
    %74 = vector.load %arg10[%c0_32, %c0_33] : memref<8x128xf32, #tpu.memory_space<vmem>>, vector<8x128xf32>
    tpu.vector_store %arg10[%c0_32, %c0_33], %71 {strides = array<i32>} : memref<8x128xf32, #tpu.memory_space<vmem>>, vector<8x128xf32>,
    %c0_34 = arith.constant 0 : index
    %c0_35 = arith.constant 0 : index
    %75 = vector.load %arg9[%c0_34, %c0_35] : memref<8x128xf32, #tpu.memory_space<vmem>>, vector<8x128xf32>
    tpu.vector_store %arg9[%c0_34, %c0_35], %73 {strides = array<i32>} : memref<8x128xf32, #tpu.memory_space<vmem>>, vector<8x128xf32>,
    %76 = vector.extract_strided_slice %9 {offsets = [16, 0], sizes = [8, 512], strides = [1, 1]} : vector<64x512xf32> to vector<8x512xf32>
    %c0_36 = arith.constant 0 : index
    %c0_37 = arith.constant 0 : index
    %77 = vector.load %arg9[%c0_36, %c0_37] : memref<8x128xf32, #tpu.memory_space<vmem>>, vector<8x128xf32>
    %c0_38 = arith.constant 0 : index
    %c0_39 = arith.constant 0 : index
    %78 = vector.load %arg4[%c0_38, %c0_39] : memref<128x512xf32, #tpu.memory_space<vmem>>, vector<128x512xf32>
    %cst_40 = arith.constant dense<0.000000e+00> : vector<8x512xf32>
    %79 = tpu.matmul %77, %78, %cst_40 {dimension_numbers = #tpu.dot_dimension_numbers<[1], [0], [0], [1], [0, 0, 1, 1], [], []>} : vector<8x128xf32>, vector<128x512xf32>, vector<8x512xf32> -> vector<8x512xf32>
    %80 = arith.addf %76, %79 : vector<8x512xf32>
    %81 = vector.extract_strided_slice %80 {offsets = [0, 0], sizes = [8, 128], strides = [1, 1]} : vector<8x512xf32> to vector<8x128xf32>
    %82 = arith.negf %81 : vector<8x128xf32>
    %83 = math.exp %82 : vector<8x128xf32>
    %cst_41 = arith.constant 1.000000e+00 : f32
    %84 = vector.broadcast %cst_41 : f32 to vector<8x128xf32>
    %85 = arith.addf %84, %83 : vector<8x128xf32>
    %86 = arith.divf %84, %85 : vector<8x128xf32>
    %87 = vector.extract_strided_slice %80 {offsets = [0, 128], sizes = [8, 128], strides = [1, 1]} : vector<8x512xf32> to vector<8x128xf32>
    %88 = arith.negf %87 : vector<8x128xf32>
    %89 = math.exp %88 : vector<8x128xf32>
    %cst_42 = arith.constant 1.000000e+00 : f32
    %90 = vector.broadcast %cst_42 : f32 to vector<8x128xf32>
    %91 = arith.addf %90, %89 : vector<8x128xf32>
    %92 = arith.divf %90, %91 : vector<8x128xf32>
    %93 = vector.extract_strided_slice %80 {offsets = [0, 256], sizes = [8, 128], strides = [1, 1]} : vector<8x512xf32> to vector<8x128xf32>
    %94 = math.tanh %93 : vector<8x128xf32>
    %95 = vector.extract_strided_slice %80 {offsets = [0, 384], sizes = [8, 128], strides = [1, 1]} : vector<8x512xf32> to vector<8x128xf32>
    %96 = arith.negf %95 : vector<8x128xf32>
    %97 = math.exp %96 : vector<8x128xf32>
    %cst_43 = arith.constant 1.000000e+00 : f32
    %98 = vector.broadcast %cst_43 : f32 to vector<8x128xf32>
    %99 = arith.addf %98, %97 : vector<8x128xf32>
    %100 = arith.divf %98, %99 : vector<8x128xf32>
    %c0_44 = arith.constant 0 : index
    %c0_45 = arith.constant 0 : index
    %101 = vector.load %arg10[%c0_44, %c0_45] : memref<8x128xf32, #tpu.memory_space<vmem>>, vector<8x128xf32>
    %102 = arith.mulf %92, %101 : vector<8x128xf32>
    %103 = arith.mulf %86, %94 : vector<8x128xf32>
    %104 = arith.addf %102, %103 : vector<8x128xf32>
    %105 = math.tanh %104 : vector<8x128xf32>
    %106 = arith.mulf %100, %105 : vector<8x128xf32>
    %c0_46 = arith.constant 0 : index
    %c0_47 = arith.constant 0 : index
    %107 = vector.load %arg10[%c0_46, %c0_47] : memref<8x128xf32, #tpu.memory_space<vmem>>, vector<8x128xf32>
    tpu.vector_store %arg10[%c0_46, %c0_47], %104 {strides = array<i32>} : memref<8x128xf32, #tpu.memory_space<vmem>>, vector<8x128xf32>,
    %c0_48 = arith.constant 0 : index
    %c0_49 = arith.constant 0 : index
    %108 = vector.load %arg9[%c0_48, %c0_49] : memref<8x128xf32, #tpu.memory_space<vmem>>, vector<8x128xf32>
    tpu.vector_store %arg9[%c0_48, %c0_49], %106 {strides = array<i32>} : memref<8x128xf32, #tpu.memory_space<vmem>>, vector<8x128xf32>,
    %109 = vector.extract_strided_slice %9 {offsets = [24, 0], sizes = [8, 512], strides = [1, 1]} : vector<64x512xf32> to vector<8x512xf32>
    %c0_50 = arith.constant 0 : index
    %c0_51 = arith.constant 0 : index
    %110 = vector.load %arg9[%c0_50, %c0_51] : memref<8x128xf32, #tpu.memory_space<vmem>>, vector<8x128xf32>
    %c0_52 = arith.constant 0 : index
    %c0_53 = arith.constant 0 : index
    %111 = vector.load %arg4[%c0_52, %c0_53] : memref<128x512xf32, #tpu.memory_space<vmem>>, vector<128x512xf32>
    %cst_54 = arith.constant dense<0.000000e+00> : vector<8x512xf32>
    %112 = tpu.matmul %110, %111, %cst_54 {dimension_numbers = #tpu.dot_dimension_numbers<[1], [0], [0], [1], [0, 0, 1, 1], [], []>} : vector<8x128xf32>, vector<128x512xf32>, vector<8x512xf32> -> vector<8x512xf32>
    %113 = arith.addf %109, %112 : vector<8x512xf32>
    %114 = vector.extract_strided_slice %113 {offsets = [0, 0], sizes = [8, 128], strides = [1, 1]} : vector<8x512xf32> to vector<8x128xf32>
    %115 = arith.negf %114 : vector<8x128xf32>
    %116 = math.exp %115 : vector<8x128xf32>
    %cst_55 = arith.constant 1.000000e+00 : f32
    %117 = vector.broadcast %cst_55 : f32 to vector<8x128xf32>
    %118 = arith.addf %117, %116 : vector<8x128xf32>
    %119 = arith.divf %117, %118 : vector<8x128xf32>
    %120 = vector.extract_strided_slice %113 {offsets = [0, 128], sizes = [8, 128], strides = [1, 1]} : vector<8x512xf32> to vector<8x128xf32>
    %121 = arith.negf %120 : vector<8x128xf32>
    %122 = math.exp %121 : vector<8x128xf32>
    %cst_56 = arith.constant 1.000000e+00 : f32
    %123 = vector.broadcast %cst_56 : f32 to vector<8x128xf32>
    %124 = arith.addf %123, %122 : vector<8x128xf32>
    %125 = arith.divf %123, %124 : vector<8x128xf32>
    %126 = vector.extract_strided_slice %113 {offsets = [0, 256], sizes = [8, 128], strides = [1, 1]} : vector<8x512xf32> to vector<8x128xf32>
    %127 = math.tanh %126 : vector<8x128xf32>
    %128 = vector.extract_strided_slice %113 {offsets = [0, 384], sizes = [8, 128], strides = [1, 1]} : vector<8x512xf32> to vector<8x128xf32>
    %129 = arith.negf %128 : vector<8x128xf32>
    %130 = math.exp %129 : vector<8x128xf32>
    %cst_57 = arith.constant 1.000000e+00 : f32
    %131 = vector.broadcast %cst_57 : f32 to vector<8x128xf32>
    %132 = arith.addf %131, %130 : vector<8x128xf32>
    %133 = arith.divf %131, %132 : vector<8x128xf32>
    %c0_58 = arith.constant 0 : index
    %c0_59 = arith.constant 0 : index
    %134 = vector.load %arg10[%c0_58, %c0_59] : memref<8x128xf32, #tpu.memory_space<vmem>>, vector<8x128xf32>
    %135 = arith.mulf %125, %134 : vector<8x128xf32>
    %136 = arith.mulf %119, %127 : vector<8x128xf32>
    %137 = arith.addf %135, %136 : vector<8x128xf32>
    %138 = math.tanh %137 : vector<8x128xf32>
    %139 = arith.mulf %133, %138 : vector<8x128xf32>
    %c0_60 = arith.constant 0 : index
    %c0_61 = arith.constant 0 : index
    %140 = vector.load %arg10[%c0_60, %c0_61] : memref<8x128xf32, #tpu.memory_space<vmem>>, vector<8x128xf32>
    tpu.vector_store %arg10[%c0_60, %c0_61], %137 {strides = array<i32>} : memref<8x128xf32, #tpu.memory_space<vmem>>, vector<8x128xf32>,
    %c0_62 = arith.constant 0 : index
    %c0_63 = arith.constant 0 : index
    %141 = vector.load %arg9[%c0_62, %c0_63] : memref<8x128xf32, #tpu.memory_space<vmem>>, vector<8x128xf32>
    tpu.vector_store %arg9[%c0_62, %c0_63], %139 {strides = array<i32>} : memref<8x128xf32, #tpu.memory_space<vmem>>, vector<8x128xf32>,
    %142 = vector.extract_strided_slice %9 {offsets = [32, 0], sizes = [8, 512], strides = [1, 1]} : vector<64x512xf32> to vector<8x512xf32>
    %c0_64 = arith.constant 0 : index
    %c0_65 = arith.constant 0 : index
    %143 = vector.load %arg9[%c0_64, %c0_65] : memref<8x128xf32, #tpu.memory_space<vmem>>, vector<8x128xf32>
    %c0_66 = arith.constant 0 : index
    %c0_67 = arith.constant 0 : index
    %144 = vector.load %arg4[%c0_66, %c0_67] : memref<128x512xf32, #tpu.memory_space<vmem>>, vector<128x512xf32>
    %cst_68 = arith.constant dense<0.000000e+00> : vector<8x512xf32>
    %145 = tpu.matmul %143, %144, %cst_68 {dimension_numbers = #tpu.dot_dimension_numbers<[1], [0], [0], [1], [0, 0, 1, 1], [], []>} : vector<8x128xf32>, vector<128x512xf32>, vector<8x512xf32> -> vector<8x512xf32>
    %146 = arith.addf %142, %145 : vector<8x512xf32>
    %147 = vector.extract_strided_slice %146 {offsets = [0, 0], sizes = [8, 128], strides = [1, 1]} : vector<8x512xf32> to vector<8x128xf32>
    %148 = arith.negf %147 : vector<8x128xf32>
    %149 = math.exp %148 : vector<8x128xf32>
    %cst_69 = arith.constant 1.000000e+00 : f32
    %150 = vector.broadcast %cst_69 : f32 to vector<8x128xf32>
    %151 = arith.addf %150, %149 : vector<8x128xf32>
    %152 = arith.divf %150, %151 : vector<8x128xf32>
    %153 = vector.extract_strided_slice %146 {offsets = [0, 128], sizes = [8, 128], strides = [1, 1]} : vector<8x512xf32> to vector<8x128xf32>
    %154 = arith.negf %153 : vector<8x128xf32>
    %155 = math.exp %154 : vector<8x128xf32>
    %cst_70 = arith.constant 1.000000e+00 : f32
    %156 = vector.broadcast %cst_70 : f32 to vector<8x128xf32>
    %157 = arith.addf %156, %155 : vector<8x128xf32>
    %158 = arith.divf %156, %157 : vector<8x128xf32>
    %159 = vector.extract_strided_slice %146 {offsets = [0, 256], sizes = [8, 128], strides = [1, 1]} : vector<8x512xf32> to vector<8x128xf32>
    %160 = math.tanh %159 : vector<8x128xf32>
    %161 = vector.extract_strided_slice %146 {offsets = [0, 384], sizes = [8, 128], strides = [1, 1]} : vector<8x512xf32> to vector<8x128xf32>
    %162 = arith.negf %161 : vector<8x128xf32>
    %163 = math.exp %162 : vector<8x128xf32>
    %cst_71 = arith.constant 1.000000e+00 : f32
    %164 = vector.broadcast %cst_71 : f32 to vector<8x128xf32>
    %165 = arith.addf %164, %163 : vector<8x128xf32>
    %166 = arith.divf %164, %165 : vector<8x128xf32>
    %c0_72 = arith.constant 0 : index
    %c0_73 = arith.constant 0 : index
    %167 = vector.load %arg10[%c0_72, %c0_73] : memref<8x128xf32, #tpu.memory_space<vmem>>, vector<8x128xf32>
    %168 = arith.mulf %158, %167 : vector<8x128xf32>
    %169 = arith.mulf %152, %160 : vector<8x128xf32>
    %170 = arith.addf %168, %169 : vector<8x128xf32>
    %171 = math.tanh %170 : vector<8x128xf32>
    %172 = arith.mulf %166, %171 : vector<8x128xf32>
    %c0_74 = arith.constant 0 : index
    %c0_75 = arith.constant 0 : index
    %173 = vector.load %arg10[%c0_74, %c0_75] : memref<8x128xf32, #tpu.memory_space<vmem>>, vector<8x128xf32>
    tpu.vector_store %arg10[%c0_74, %c0_75], %170 {strides = array<i32>} : memref<8x128xf32, #tpu.memory_space<vmem>>, vector<8x128xf32>,
    %c0_76 = arith.constant 0 : index
    %c0_77 = arith.constant 0 : index
    %174 = vector.load %arg9[%c0_76, %c0_77] : memref<8x128xf32, #tpu.memory_space<vmem>>, vector<8x128xf32>
    tpu.vector_store %arg9[%c0_76, %c0_77], %172 {strides = array<i32>} : memref<8x128xf32, #tpu.memory_space<vmem>>, vector<8x128xf32>,
    %175 = vector.extract_strided_slice %9 {offsets = [40, 0], sizes = [8, 512], strides = [1, 1]} : vector<64x512xf32> to vector<8x512xf32>
    %c0_78 = arith.constant 0 : index
    %c0_79 = arith.constant 0 : index
    %176 = vector.load %arg9[%c0_78, %c0_79] : memref<8x128xf32, #tpu.memory_space<vmem>>, vector<8x128xf32>
    %c0_80 = arith.constant 0 : index
    %c0_81 = arith.constant 0 : index
    %177 = vector.load %arg4[%c0_80, %c0_81] : memref<128x512xf32, #tpu.memory_space<vmem>>, vector<128x512xf32>
    %cst_82 = arith.constant dense<0.000000e+00> : vector<8x512xf32>
    %178 = tpu.matmul %176, %177, %cst_82 {dimension_numbers = #tpu.dot_dimension_numbers<[1], [0], [0], [1], [0, 0, 1, 1], [], []>} : vector<8x128xf32>, vector<128x512xf32>, vector<8x512xf32> -> vector<8x512xf32>
    %179 = arith.addf %175, %178 : vector<8x512xf32>
    %180 = vector.extract_strided_slice %179 {offsets = [0, 0], sizes = [8, 128], strides = [1, 1]} : vector<8x512xf32> to vector<8x128xf32>
    %181 = arith.negf %180 : vector<8x128xf32>
    %182 = math.exp %181 : vector<8x128xf32>
    %cst_83 = arith.constant 1.000000e+00 : f32
    %183 = vector.broadcast %cst_83 : f32 to vector<8x128xf32>
    %184 = arith.addf %183, %182 : vector<8x128xf32>
    %185 = arith.divf %183, %184 : vector<8x128xf32>
    %186 = vector.extract_strided_slice %179 {offsets = [0, 128], sizes = [8, 128], strides = [1, 1]} : vector<8x512xf32> to vector<8x128xf32>
    %187 = arith.negf %186 : vector<8x128xf32>
    %188 = math.exp %187 : vector<8x128xf32>
    %cst_84 = arith.constant 1.000000e+00 : f32
    %189 = vector.broadcast %cst_84 : f32 to vector<8x128xf32>
    %190 = arith.addf %189, %188 : vector<8x128xf32>
    %191 = arith.divf %189, %190 : vector<8x128xf32>
    %192 = vector.extract_strided_slice %179 {offsets = [0, 256], sizes = [8, 128], strides = [1, 1]} : vector<8x512xf32> to vector<8x128xf32>
    %193 = math.tanh %192 : vector<8x128xf32>
    %194 = vector.extract_strided_slice %179 {offsets = [0, 384], sizes = [8, 128], strides = [1, 1]} : vector<8x512xf32> to vector<8x128xf32>
    %195 = arith.negf %194 : vector<8x128xf32>
    %196 = math.exp %195 : vector<8x128xf32>
    %cst_85 = arith.constant 1.000000e+00 : f32
    %197 = vector.broadcast %cst_85 : f32 to vector<8x128xf32>
    %198 = arith.addf %197, %196 : vector<8x128xf32>
    %199 = arith.divf %197, %198 : vector<8x128xf32>
    %c0_86 = arith.constant 0 : index
    %c0_87 = arith.constant 0 : index
    %200 = vector.load %arg10[%c0_86, %c0_87] : memref<8x128xf32, #tpu.memory_space<vmem>>, vector<8x128xf32>
    %201 = arith.mulf %191, %200 : vector<8x128xf32>
    %202 = arith.mulf %185, %193 : vector<8x128xf32>
    %203 = arith.addf %201, %202 : vector<8x128xf32>
    %204 = math.tanh %203 : vector<8x128xf32>
    %205 = arith.mulf %199, %204 : vector<8x128xf32>
    %c0_88 = arith.constant 0 : index
    %c0_89 = arith.constant 0 : index
    %206 = vector.load %arg10[%c0_88, %c0_89] : memref<8x128xf32, #tpu.memory_space<vmem>>, vector<8x128xf32>
    tpu.vector_store %arg10[%c0_88, %c0_89], %203 {strides = array<i32>} : memref<8x128xf32, #tpu.memory_space<vmem>>, vector<8x128xf32>,
    %c0_90 = arith.constant 0 : index
    %c0_91 = arith.constant 0 : index
    %207 = vector.load %arg9[%c0_90, %c0_91] : memref<8x128xf32, #tpu.memory_space<vmem>>, vector<8x128xf32>
    tpu.vector_store %arg9[%c0_90, %c0_91], %205 {strides = array<i32>} : memref<8x128xf32, #tpu.memory_space<vmem>>, vector<8x128xf32>,
    %208 = vector.extract_strided_slice %9 {offsets = [48, 0], sizes = [8, 512], strides = [1, 1]} : vector<64x512xf32> to vector<8x512xf32>
    %c0_92 = arith.constant 0 : index
    %c0_93 = arith.constant 0 : index
    %209 = vector.load %arg9[%c0_92, %c0_93] : memref<8x128xf32, #tpu.memory_space<vmem>>, vector<8x128xf32>
    %c0_94 = arith.constant 0 : index
    %c0_95 = arith.constant 0 : index
    %210 = vector.load %arg4[%c0_94, %c0_95] : memref<128x512xf32, #tpu.memory_space<vmem>>, vector<128x512xf32>
    %cst_96 = arith.constant dense<0.000000e+00> : vector<8x512xf32>
    %211 = tpu.matmul %209, %210, %cst_96 {dimension_numbers = #tpu.dot_dimension_numbers<[1], [0], [0], [1], [0, 0, 1, 1], [], []>} : vector<8x128xf32>, vector<128x512xf32>, vector<8x512xf32> -> vector<8x512xf32>
    %212 = arith.addf %208, %211 : vector<8x512xf32>
    %213 = vector.extract_strided_slice %212 {offsets = [0, 0], sizes = [8, 128], strides = [1, 1]} : vector<8x512xf32> to vector<8x128xf32>
    %214 = arith.negf %213 : vector<8x128xf32>
    %215 = math.exp %214 : vector<8x128xf32>
    %cst_97 = arith.constant 1.000000e+00 : f32
    %216 = vector.broadcast %cst_97 : f32 to vector<8x128xf32>
    %217 = arith.addf %216, %215 : vector<8x128xf32>
    %218 = arith.divf %216, %217 : vector<8x128xf32>
    %219 = vector.extract_strided_slice %212 {offsets = [0, 128], sizes = [8, 128], strides = [1, 1]} : vector<8x512xf32> to vector<8x128xf32>
    %220 = arith.negf %219 : vector<8x128xf32>
    %221 = math.exp %220 : vector<8x128xf32>
    %cst_98 = arith.constant 1.000000e+00 : f32
    %222 = vector.broadcast %cst_98 : f32 to vector<8x128xf32>
    %223 = arith.addf %222, %221 : vector<8x128xf32>
    %224 = arith.divf %222, %223 : vector<8x128xf32>
    %225 = vector.extract_strided_slice %212 {offsets = [0, 256], sizes = [8, 128], strides = [1, 1]} : vector<8x512xf32> to vector<8x128xf32>
    %226 = math.tanh %225 : vector<8x128xf32>
    %227 = vector.extract_strided_slice %212 {offsets = [0, 384], sizes = [8, 128], strides = [1, 1]} : vector<8x512xf32> to vector<8x128xf32>
    %228 = arith.negf %227 : vector<8x128xf32>
    %229 = math.exp %228 : vector<8x128xf32>
    %cst_99 = arith.constant 1.000000e+00 : f32
    %230 = vector.broadcast %cst_99 : f32 to vector<8x128xf32>
    %231 = arith.addf %230, %229 : vector<8x128xf32>
    %232 = arith.divf %230, %231 : vector<8x128xf32>
    %c0_100 = arith.constant 0 : index
    %c0_101 = arith.constant 0 : index
    %233 = vector.load %arg10[%c0_100, %c0_101] : memref<8x128xf32, #tpu.memory_space<vmem>>, vector<8x128xf32>
    %234 = arith.mulf %224, %233 : vector<8x128xf32>
    %235 = arith.mulf %218, %226 : vector<8x128xf32>
    %236 = arith.addf %234, %235 : vector<8x128xf32>
    %237 = math.tanh %236 : vector<8x128xf32>
    %238 = arith.mulf %232, %237 : vector<8x128xf32>
    %c0_102 = arith.constant 0 : index
    %c0_103 = arith.constant 0 : index
    %239 = vector.load %arg10[%c0_102, %c0_103] : memref<8x128xf32, #tpu.memory_space<vmem>>, vector<8x128xf32>
    tpu.vector_store %arg10[%c0_102, %c0_103], %236 {strides = array<i32>} : memref<8x128xf32, #tpu.memory_space<vmem>>, vector<8x128xf32>,
    %c0_104 = arith.constant 0 : index
    %c0_105 = arith.constant 0 : index
    %240 = vector.load %arg9[%c0_104, %c0_105] : memref<8x128xf32, #tpu.memory_space<vmem>>, vector<8x128xf32>
    tpu.vector_store %arg9[%c0_104, %c0_105], %238 {strides = array<i32>} : memref<8x128xf32, #tpu.memory_space<vmem>>, vector<8x128xf32>,
    %241 = vector.extract_strided_slice %9 {offsets = [56, 0], sizes = [8, 512], strides = [1, 1]} : vector<64x512xf32> to vector<8x512xf32>
    %c0_106 = arith.constant 0 : index
    %c0_107 = arith.constant 0 : index
    %242 = vector.load %arg9[%c0_106, %c0_107] : memref<8x128xf32, #tpu.memory_space<vmem>>, vector<8x128xf32>
    %c0_108 = arith.constant 0 : index
    %c0_109 = arith.constant 0 : index
    %243 = vector.load %arg4[%c0_108, %c0_109] : memref<128x512xf32, #tpu.memory_space<vmem>>, vector<128x512xf32>
    %cst_110 = arith.constant dense<0.000000e+00> : vector<8x512xf32>
    %244 = tpu.matmul %242, %243, %cst_110 {dimension_numbers = #tpu.dot_dimension_numbers<[1], [0], [0], [1], [0, 0, 1, 1], [], []>} : vector<8x128xf32>, vector<128x512xf32>, vector<8x512xf32> -> vector<8x512xf32>
    %245 = arith.addf %241, %244 : vector<8x512xf32>
    %246 = vector.extract_strided_slice %245 {offsets = [0, 0], sizes = [8, 128], strides = [1, 1]} : vector<8x512xf32> to vector<8x128xf32>
    %247 = arith.negf %246 : vector<8x128xf32>
    %248 = math.exp %247 : vector<8x128xf32>
    %cst_111 = arith.constant 1.000000e+00 : f32
    %249 = vector.broadcast %cst_111 : f32 to vector<8x128xf32>
    %250 = arith.addf %249, %248 : vector<8x128xf32>
    %251 = arith.divf %249, %250 : vector<8x128xf32>
    %252 = vector.extract_strided_slice %245 {offsets = [0, 128], sizes = [8, 128], strides = [1, 1]} : vector<8x512xf32> to vector<8x128xf32>
    %253 = arith.negf %252 : vector<8x128xf32>
    %254 = math.exp %253 : vector<8x128xf32>
    %cst_112 = arith.constant 1.000000e+00 : f32
    %255 = vector.broadcast %cst_112 : f32 to vector<8x128xf32>
    %256 = arith.addf %255, %254 : vector<8x128xf32>
    %257 = arith.divf %255, %256 : vector<8x128xf32>
    %258 = vector.extract_strided_slice %245 {offsets = [0, 256], sizes = [8, 128], strides = [1, 1]} : vector<8x512xf32> to vector<8x128xf32>
    %259 = math.tanh %258 : vector<8x128xf32>
    %260 = vector.extract_strided_slice %245 {offsets = [0, 384], sizes = [8, 128], strides = [1, 1]} : vector<8x512xf32> to vector<8x128xf32>
    %261 = arith.negf %260 : vector<8x128xf32>
    %262 = math.exp %261 : vector<8x128xf32>
    %cst_113 = arith.constant 1.000000e+00 : f32
    %263 = vector.broadcast %cst_113 : f32 to vector<8x128xf32>
    %264 = arith.addf %263, %262 : vector<8x128xf32>
    %265 = arith.divf %263, %264 : vector<8x128xf32>
    %c0_114 = arith.constant 0 : index
    %c0_115 = arith.constant 0 : index
    %266 = vector.load %arg10[%c0_114, %c0_115] : memref<8x128xf32, #tpu.memory_space<vmem>>, vector<8x128xf32>
    %267 = arith.mulf %257, %266 : vector<8x128xf32>
    %268 = arith.mulf %251, %259 : vector<8x128xf32>
    %269 = arith.addf %267, %268 : vector<8x128xf32>
    %270 = math.tanh %269 : vector<8x128xf32>
    %271 = arith.mulf %265, %270 : vector<8x128xf32>
    %c0_116 = arith.constant 0 : index
    %c0_117 = arith.constant 0 : index
    %272 = vector.load %arg10[%c0_116, %c0_117] : memref<8x128xf32, #tpu.memory_space<vmem>>, vector<8x128xf32>
    tpu.vector_store %arg10[%c0_116, %c0_117], %269 {strides = array<i32>} : memref<8x128xf32, #tpu.memory_space<vmem>>, vector<8x128xf32>,
    %c0_118 = arith.constant 0 : index
    %c0_119 = arith.constant 0 : index
    %273 = vector.load %arg9[%c0_118, %c0_119] : memref<8x128xf32, #tpu.memory_space<vmem>>, vector<8x128xf32>
    tpu.vector_store %arg9[%c0_118, %c0_119], %271 {strides = array<i32>} : memref<8x128xf32, #tpu.memory_space<vmem>>, vector<8x128xf32>,
    %c0_i32_120 = arith.constant 0 : i32
    %274 = arith.cmpi eq, %arg1, %c0_i32_120 : i32
    %275 = arith.extui %274 : i1 to i32
    %c0_i32_121 = arith.constant 0 : i32
    %276 = arith.cmpi ne, %275, %c0_i32_121 : i32
    scf.if %276 {
      %c0_122 = arith.constant 0 : index
      %c0_123 = arith.constant 0 : index
      %277 = vector.load %arg9[%c0_122, %c0_123] : memref<8x128xf32, #tpu.memory_space<vmem>>, vector<8x128xf32>
      %c0_124 = arith.constant 0 : index
      %c0_125 = arith.constant 0 : index
      %278 = vector.load %arg6[%c0_124, %c0_125] : memref<128x128xf32, #tpu.memory_space<vmem>>, vector<128x128xf32>
      %cst_126 = arith.constant dense<0.000000e+00> : vector<8x128xf32>
      %279 = tpu.matmul %277, %278, %cst_126 {dimension_numbers = #tpu.dot_dimension_numbers<[1], [0], [0], [1], [0, 0, 1, 1], [], []>} : vector<8x128xf32>, vector<128x128xf32>, vector<8x128xf32> -> vector<8x128xf32>
      %c0_127 = arith.constant 0 : index
      %c0_128 = arith.constant 0 : index
      %280 = vector.load %arg7[%c0_127, %c0_128] : memref<1x128xf32, #tpu.memory_space<vmem>>, vector<1x128xf32>
      %281 = vector.broadcast %280 : vector<1x128xf32> to vector<8x128xf32>
      %282 = arith.addf %279, %281 : vector<8x128xf32>
      %c0_129 = arith.constant 0 : index
      %c0_130 = arith.constant 0 : index
      %283 = vector.load %arg8[%c0_129, %c0_130] : memref<8x128xf32, #tpu.memory_space<vmem>>, vector<8x128xf32>
      tpu.vector_store %arg8[%c0_129, %c0_130], %282 {strides = array<i32>} : memref<8x128xf32, #tpu.memory_space<vmem>>, vector<8x128xf32>,
    } else {
    }
    return
  }
  func.func @transform_0(%arg0: i32, %arg1: i32) -> (i32, i32, i32, i32) {
    %c0_i32 = arith.constant 0 : i32
    %c0_i32_0 = arith.constant 0 : i32
    %c0_i32_1 = arith.constant 0 : i32
    return %arg0, %arg1, %c0_i32, %c0_i32_0 : i32, i32, i32, i32
  }
  func.func @transform_1(%arg0: i32, %arg1: i32) -> (i32, i32) {
    %c0_i32 = arith.constant 0 : i32
    %c0_i32_0 = arith.constant 0 : i32
    %c0_i32_1 = arith.constant 0 : i32
    return %c0_i32, %c0_i32_0 : i32, i32
  }
  func.func @transform_2(%arg0: i32, %arg1: i32) -> (i32, i32) {
    %c0_i32 = arith.constant 0 : i32
    %c0_i32_0 = arith.constant 0 : i32
    %c0_i32_1 = arith.constant 0 : i32
    return %c0_i32, %c0_i32_0 : i32, i32
  }
  func.func @transform_3(%arg0: i32, %arg1: i32) -> (i32, i32) {
    %c0_i32 = arith.constant 0 : i32
    %c0_i32_0 = arith.constant 0 : i32
    %c0_i32_1 = arith.constant 0 : i32
    return %c0_i32, %c0_i32_0 : i32, i32
  }
  func.func @transform_4(%arg0: i32, %arg1: i32) -> (i32, i32) {
    %c0_i32 = arith.constant 0 : i32
    %c0_i32_0 = arith.constant 0 : i32
    %c0_i32_1 = arith.constant 0 : i32
    return %c0_i32, %c0_i32_0 : i32, i32
  }
  func.func @transform_5(%arg0: i32, %arg1: i32) -> (i32, i32) {
    %c0_i32 = arith.constant 0 : i32
    %c0_i32_0 = arith.constant 0 : i32
    %c0_i32_1 = arith.constant 0 : i32
    return %c0_i32, %c0_i32_0 : i32, i32
  }
  func.func @transform_6(%arg0: i32, %arg1: i32) -> (i32, i32) {
    %c0_i32 = arith.constant 0 : i32
    %c0_i32_0 = arith.constant 0 : i32
    return %arg0, %c0_i32 : i32, i32
  }
}

</mosaic_0001>

<bundles_post_ra>
// kernel: tpu_custom_call.1
= control target key start
LH: loop header
LB: loop body
LE: loop exit
PB: predicated region body
PF: predicated region fallthrough
CT: control target
= control target key end

     0   :  { %11 = vsyncpa [#allocation5], 0  ;;  %s3603_s0 = inlined_call_operand.hbm [shape: f32[1,1,64,128], index: 0, kind: input, shape index: {}]   ;;  %s3604_s1 = inlined_call_operand.hbm [shape: f32[128,512], index: 1, kind: input, shape index: {}]   ;;  %s3605_s2 = inlined_call_operand.hbm [shape: f32[128,512], index: 2, kind: input, shape index: {}]   ;;  %s3606_s3 = inlined_call_operand.hbm [shape: f32[1,512], index: 3, kind: input, shape index: {}]   ;;  %s3607_s4 = inlined_call_operand.hbm [shape: f32[128,128], index: 4, kind: input, shape index: {}]   ;;  %s3608_s5 = inlined_call_operand.vmem [shape: f32[1,128], index: 5, kind: input, shape index: {}]   ;;  %s3609_s6 = inlined_call_operand.hbm [shape: f32[8,128], index: 6, kind: output, shape index: {}]  }
   0x1   :  { %12 = vsyncpa [#allocation8], 0 }
   0x2   :  { %13 = vsyncpa [#allocation11], 0  ;;  %s32_s23 = sshll.u32 %s3604_s1, 4  ;;  %s33_s23 = int_to_ptr.hbm [resolvable:$true] %s32_s23 }
   0x3   :  { %14 = vsyncpa [#allocation6], 0  ;;  %s2452_s24 = smov [#allocation7]   ;;  %s59_s28 = sshll.u32 %s3606_s3, 4  ;;  %s60_s28 = int_to_ptr.hbm [resolvable:$true] %s59_s28 }
   0x4   :  { %s34_s25 = sshll.u32 %s2452_s24, 4  ;;  %s2453_s29 = smov 512   ;;  %s35_s25 = int_to_ptr.vmem [resolvable:$true] %s34_s25 }
   0x5   :  { %s2454_s30 = smov 32   ;;  %s2455_s7 = smov [#allocation10]  }
   0x6   :  { %40 = dma.hbm_to_vmem [thread:$0]  %s33_s23, 8192, %s35_s25, [#allocation8], %s2453_s29, %s2453_s29, %s2454_s30  }
   0x7   :  { %s61_s8 = sshll.u32 %s2455_s7, 4  ;;  %s19_s11 = sshll.u32 %s3603_s0, 4  ;;  %s62_s8 = int_to_ptr.vmem [resolvable:$true] %s61_s8  ;;  %s20_s11 = int_to_ptr.hbm [resolvable:$true] %s19_s11 }
   0x8   :  { %64 = dma.hbm_to_vmem [thread:$0]  %s60_s28, 64, %s62_s8, [#allocation11]  }
   0x9   :  { %s2456_s1 = smov [#allocation4]   ;;  %s45_s3 = sshll.u32 %s3605_s2, 4  ;;  %s46_s3 = int_to_ptr.hbm [resolvable:$true] %s45_s3 }
   0xa   :  { %s21_s12 = sshll.u32 %s2456_s1, 4  ;;  %s2457_s15 = smov 128   ;;  %s22_s12 = int_to_ptr.vmem [resolvable:$true] %s21_s12 }
   0xb   :  { %s2458_s16 = smov 8   ;;  %s2459_s17 = smov [#allocation9]  }
   0xc   :  { %27 = dma.hbm_to_vmem [thread:$0]  %s20_s11, 1024, %s22_s12, [#allocation5], %s2457_s15, %s2457_s15, %s2458_s16  }
   0xd   :  { %s47_s18 = sshll.u32 %s2459_s17, 4  ;;  %s69_s0 = sshll.u32 %s3607_s4, 4  ;;  %s48_s18 = int_to_ptr.vmem [resolvable:$true] %s47_s18  ;;  %s70_s0 = int_to_ptr.hbm [resolvable:$true] %s69_s0 }
   0xe   :  { %53 = dma.hbm_to_vmem [thread:$0]  %s46_s3, 8192, %s48_s18, [#allocation8], %s2453_s29, %s2453_s29, %s2454_s30  }
   0xf   :  { %s2460_s21 = smov [#allocation12]  }
  0x10   :  { %s71_s22 = sshll.u32 %s2460_s21, 4  ;;  %s72_s22 = int_to_ptr.vmem [resolvable:$true] %s71_s22 }
  0x11   :  { %77 = dma.hbm_to_vmem [thread:$0]  %s70_s0, 2048, %s72_s22, [#allocation11], %s2457_s15, %s2457_s15, %s2458_s16  }
  0x12   :  { %2444 = dma.done.wait [#allocation5], 1024  }
  0x13   :  { %2445 = vsyncadd [#allocation5], 4294966272 }
  0x14   :  { %2446 = dma.done.wait [#allocation8], 16384  }
  0x15   :  { %2447 = vsyncadd [#allocation8], 4294950912 }
  0x16   :  { %2448 = dma.done.wait [#allocation11], 2112  }
  0x17   :  { %2449 = vsyncadd [#allocation11], 4294965184  ;;  %v174_v0 = vld [vmem:[#allocation7 + $0x1e0] sm:$0xff]  ;;  %v175_v1 = vld [vmem:[#allocation7 + $0x1e8] sm:$0xff]  ;;  %s2462_s23 = smov [#allocation13]   ;;  %s2124_s27 = sshll.u32 %s3609_s6, 4  ;;  %s2125_s27 = int_to_ptr.hbm [resolvable:$true] %s2124_s27 }
  0x18   :  { %v176_v2 = vld [vmem:[#allocation7 + $0x1f0] sm:$0xff]  ;;  %188 = vmatpush.msra.mxu0 %v174_v0  ;;  %229 = vmatpush.msra.mxu1 %v175_v1  ;;  %v177_v3 = vld [vmem:[#allocation7 + $0x1f8] sm:$0xff]  ;;  %v170_v4 = vld [vmem:[#allocation7 + $0x1c0] sm:$0xff]  ;;  %s2122_s24 = sshll.u32 %s2462_s23, 4  ;;  %s2123_s24 = int_to_ptr.vmem [resolvable:$true] %s2122_s24 }
  0x19   :  { %v171_v5 = vld [vmem:[#allocation7 + $0x1c8] sm:$0xff]  ;;  %270 = vmatpush.msra.mxu2 %v176_v2  ;;  %311 = vmatpush.msra.mxu3 %v177_v3  ;;  %v172_v6 = vld [vmem:[#allocation7 + $0x1d0] sm:$0xff]  ;;  %v173_v7 = vld [vmem:[#allocation7 + $0x1d8] sm:$0xff] }
  0x1a   :  { %v166_v8 = vld [vmem:[#allocation7 + $0x1a0] sm:$0xff]  ;;  %189 = vmatpush.msra.mxu0 %v170_v4  ;;  %230 = vmatpush.msra.mxu1 %v171_v5  ;;  %v167_v9 = vld [vmem:[#allocation7 + $0x1a8] sm:$0xff]  ;;  %v168_v10 = vld [vmem:[#allocation7 + $0x1b0] sm:$0xff] }
  0x1b   :  { %v169_v11 = vld [vmem:[#allocation7 + $0x1b8] sm:$0xff]  ;;  %271 = vmatpush.msra.mxu2 %v172_v6  ;;  %312 = vmatpush.msra.mxu3 %v173_v7  ;;  %v162_v12 = vld [vmem:[#allocation7 + $0x180] sm:$0xff]  ;;  %v163_v13 = vld [vmem:[#allocation7 + $0x188] sm:$0xff] }
  0x1c   :  { %190 = vmatpush.msra.mxu0 %v166_v8  ;;  %231 = vmatpush.msra.mxu1 %v167_v9  ;;  %v164_v14 = vld [vmem:[#allocation7 + $0x190] sm:$0xff]  ;;  %v165_v15 = vld [vmem:[#allocation7 + $0x198] sm:$0xff]  ;;  %v158_v16 = vld [vmem:[#allocation7 + $0x160] sm:$0xff] }
  0x1d   :  { %272 = vmatpush.msra.mxu2 %v168_v10  ;;  %313 = vmatpush.msra.mxu3 %v169_v11  ;;  %v159_v17 = vld [vmem:[#allocation7 + $0x168] sm:$0xff]  ;;  %v160_v18 = vld [vmem:[#allocation7 + $0x170] sm:$0xff]  ;;  %v161_v19 = vld [vmem:[#allocation7 + $0x178] sm:$0xff] }
  0x1e   :  { %191 = vmatpush.msra.mxu0 %v162_v12  ;;  %232 = vmatpush.msra.mxu1 %v163_v13  ;;  %v154_v20 = vld [vmem:[#allocation7 + $0x140] sm:$0xff]  ;;  %v155_v21 = vld [vmem:[#allocation7 + $0x148] sm:$0xff]  ;;  %v156_v22 = vld [vmem:[#allocation7 + $0x150] sm:$0xff] }
  0x1f   :  { %273 = vmatpush.msra.mxu2 %v164_v14  ;;  %314 = vmatpush.msra.mxu3 %v165_v15  ;;  %v157_v23 = vld [vmem:[#allocation7 + $0x158] sm:$0xff]  ;;  %v150_v24 = vld [vmem:[#allocation7 + $0x120] sm:$0xff]  ;;  %v151_v25 = vld [vmem:[#allocation7 + $0x128] sm:$0xff] }
  0x20   :  { %192 = vmatpush.msra.mxu0 %v158_v16  ;;  %233 = vmatpush.msra.mxu1 %v159_v17  ;;  %v152_v26 = vld [vmem:[#allocation7 + $0x130] sm:$0xff]  ;;  %v153_v27 = vld [vmem:[#allocation7 + $0x138] sm:$0xff]  ;;  %v146_v28 = vld [vmem:[#allocation7 + $0x100] sm:$0xff] }
  0x21   :  { %274 = vmatpush.msra.mxu2 %v160_v18  ;;  %315 = vmatpush.msra.mxu3 %v161_v19  ;;  %v147_v29 = vld [vmem:[#allocation7 + $0x108] sm:$0xff]  ;;  %v148_v30 = vld [vmem:[#allocation7 + $0x110] sm:$0xff]  ;;  %v149_v31 = vld [vmem:[#allocation7 + $0x118] sm:$0xff] }
  0x22   :  { %193 = vmatpush.msra.mxu0 %v154_v20  ;;  %234 = vmatpush.msra.mxu1 %v155_v21  ;;  %v142_v32 = vld [vmem:[#allocation7 + $0xe0] sm:$0xff]  ;;  %v143_v33 = vld [vmem:[#allocation7 + $0xe8] sm:$0xff]  ;;  %v144_v34 = vld [vmem:[#allocation7 + $0xf0] sm:$0xff] }
  0x23   :  { %275 = vmatpush.msra.mxu2 %v156_v22  ;;  %316 = vmatpush.msra.mxu3 %v157_v23  ;;  %v145_v35 = vld [vmem:[#allocation7 + $0xf8] sm:$0xff]  ;;  %v138_v36 = vld [vmem:[#allocation7 + $0xc0] sm:$0xff]  ;;  %v139_v37 = vld [vmem:[#allocation7 + $0xc8] sm:$0xff] }
  0x24   :  { %194 = vmatpush.msra.mxu0 %v150_v24  ;;  %235 = vmatpush.msra.mxu1 %v151_v25  ;;  %v140_v38 = vld [vmem:[#allocation7 + $0xd0] sm:$0xff]  ;;  %v141_v39 = vld [vmem:[#allocation7 + $0xd8] sm:$0xff]  ;;  %v134_v40 = vld [vmem:[#allocation7 + $0xa0] sm:$0xff] }
  0x25   :  { %276 = vmatpush.msra.mxu2 %v152_v26  ;;  %317 = vmatpush.msra.mxu3 %v153_v27  ;;  %v135_v41 = vld [vmem:[#allocation7 + $0xa8] sm:$0xff]  ;;  %v136_v42 = vld [vmem:[#allocation7 + $0xb0] sm:$0xff]  ;;  %v137_v43 = vld [vmem:[#allocation7 + $0xb8] sm:$0xff] }
  0x26   :  { %195 = vmatpush.msra.mxu0 %v146_v28  ;;  %236 = vmatpush.msra.mxu1 %v147_v29  ;;  %v130_v44 = vld [vmem:[#allocation7 + $0x80] sm:$0xff]  ;;  %v131_v45 = vld [vmem:[#allocation7 + $0x88] sm:$0xff]  ;;  %v132_v46 = vld [vmem:[#allocation7 + $0x90] sm:$0xff] }
  0x27   :  { %277 = vmatpush.msra.mxu2 %v148_v30  ;;  %318 = vmatpush.msra.mxu3 %v149_v31  ;;  %v133_v47 = vld [vmem:[#allocation7 + $0x98] sm:$0xff]  ;;  %v126_v48 = vld [vmem:[#allocation7 + $0x60] sm:$0xff]  ;;  %v127_v49 = vld [vmem:[#allocation7 + $0x68] sm:$0xff] }
  0x28   :  { %196 = vmatpush.msra.mxu0 %v142_v32  ;;  %237 = vmatpush.msra.mxu1 %v143_v33  ;;  %v128_v50 = vld [vmem:[#allocation7 + $0x70] sm:$0xff]  ;;  %v129_v51 = vld [vmem:[#allocation7 + $0x78] sm:$0xff]  ;;  %v122_v52 = vld [vmem:[#allocation7 + $0x40] sm:$0xff] }
  0x29   :  { %278 = vmatpush.msra.mxu2 %v144_v34  ;;  %319 = vmatpush.msra.mxu3 %v145_v35  ;;  %v123_v53 = vld [vmem:[#allocation7 + $0x48] sm:$0xff]  ;;  %v124_v54 = vld [vmem:[#allocation7 + $0x50] sm:$0xff]  ;;  %v125_v55 = vld [vmem:[#allocation7 + $0x58] sm:$0xff] }
  0x2a   :  { %197 = vmatpush.msra.mxu0 %v138_v36  ;;  %238 = vmatpush.msra.mxu1 %v139_v37  ;;  %v118_v56 = vld [vmem:[#allocation7 + $0x20] sm:$0xff]  ;;  %v119_v57 = vld [vmem:[#allocation7 + $0x28] sm:$0xff]  ;;  %v120_v58 = vld [vmem:[#allocation7 + $0x30] sm:$0xff] }
  0x2b   :  { %279 = vmatpush.msra.mxu2 %v140_v38  ;;  %320 = vmatpush.msra.mxu3 %v141_v39  ;;  %v121_v59 = vld [vmem:[#allocation7 + $0x38] sm:$0xff]  ;;  %v114_v60 = vld [vmem:[#allocation7] sm:$0xff]  ;;  %v115_v61 = vld [vmem:[#allocation7 + $0x8] sm:$0xff] }
  0x2c   :  { %198 = vmatpush.msra.mxu0 %v134_v40  ;;  %239 = vmatpush.msra.mxu1 %v135_v41  ;;  %v116_v62 = vld [vmem:[#allocation7 + $0x10] sm:$0xff]  ;;  %v117_v63 = vld [vmem:[#allocation7 + $0x18] sm:$0xff]  ;;  %v106_v0 = vld [vmem:[#allocation4] sm:$0xff] }
  0x2d   :  { %280 = vmatpush.msra.mxu2 %v136_v42  ;;  %321 = vmatpush.msra.mxu3 %v137_v43  ;;  %v2513_v1 = vld [vmem:[#allocation9 + $0x1e0] sm:$0xff]  ;;  %v2515_v2 = vld [vmem:[#allocation9 + $0x1e8] sm:$0xff]  ;;  %v2517_v3 = vld [vmem:[#allocation9 + $0x1f8] sm:$0xff] }
  0x2e   :  { %199 = vmatpush.msra.mxu0 %v130_v44  ;;  %240 = vmatpush.msra.mxu1 %v131_v45  ;;  %v2519_v4 = vld [vmem:[#allocation9 + $0x1f0] sm:$0xff]  ;;  %v2521_v5 = vld [vmem:[#allocation9 + $0x1c0] sm:$0xff]  ;;  %v2523_v6 = vld [vmem:[#allocation9 + $0x1c8] sm:$0xff] }
  0x2f   :  { %281 = vmatpush.msra.mxu2 %v132_v46  ;;  %322 = vmatpush.msra.mxu3 %v133_v47  ;;  %v2527_v7 = vld [vmem:[#allocation9 + $0x1d8] sm:$0xff]  ;;  %v2529_v8 = vld [vmem:[#allocation9 + $0x1d0] sm:$0xff]  ;;  %v2532_v9 = vld [vmem:[#allocation9 + $0x1a0] sm:$0xff] }
  0x30   :  { %200 = vmatpush.msra.mxu0 %v126_v48  ;;  %241 = vmatpush.msra.mxu1 %v127_v49  ;;  %v2534_v10 = vld [vmem:[#allocation9 + $0x1a8] sm:$0xff]  ;;  %v2539_v11 = vld [vmem:[#allocation9 + $0x1b8] sm:$0xff]  ;;  %v2541_v12 = vld [vmem:[#allocation9 + $0x1b0] sm:$0xff] }
  0x31   :  { %282 = vmatpush.msra.mxu2 %v128_v50  ;;  %323 = vmatpush.msra.mxu3 %v129_v51  ;;  %v107_v13 = vld [vmem:[#allocation4 + $0x8] sm:$0xff]  ;;  %v2547_v14 = vld [vmem:[#allocation9 + $0x180] sm:$0xff]  ;;  %v2553_v16 = vld [vmem:[#allocation9 + $0x198] sm:$0xff] }
  0x32   :  { %201 = vmatpush.msra.mxu0 %v122_v52  ;;  %242 = vmatpush.msra.mxu1 %v123_v53  ;;  %v2549_v15 = vld [vmem:[#allocation9 + $0x188] sm:$0xff]  ;;  %v2555_v17 = vld [vmem:[#allocation9 + $0x190] sm:$0xff]  ;;  %v2557_v18 = vld [vmem:[#allocation9 + $0x160] sm:$0xff] }
  0x33   :  { %283 = vmatpush.msra.mxu2 %v124_v54  ;;  %324 = vmatpush.msra.mxu3 %v125_v55  ;;  %v2559_v19 = vld [vmem:[#allocation9 + $0x168] sm:$0xff]  ;;  %v2563_v20 = vld [vmem:[#allocation9 + $0x178] sm:$0xff]  ;;  %v2565_v21 = vld [vmem:[#allocation9 + $0x170] sm:$0xff] }
  0x34   :  { %202 = vmatpush.msra.mxu0 %v118_v56  ;;  %243 = vmatpush.msra.mxu1 %v119_v57  ;;  %v2568_v22 = vld [vmem:[#allocation9 + $0x140] sm:$0xff]  ;;  %v2570_v23 = vld [vmem:[#allocation9 + $0x148] sm:$0xff]  ;;  %v2575_v24 = vld [vmem:[#allocation9 + $0x158] sm:$0xff] }
  0x35   :  { %284 = vmatpush.msra.mxu2 %v120_v58  ;;  %325 = vmatpush.msra.mxu3 %v121_v59  ;;  %v2577_v25 = vld [vmem:[#allocation9 + $0x150] sm:$0xff]  ;;  %v2583_v27 = vld [vmem:[#allocation9 + $0x120] sm:$0xff]  ;;  %v2585_v28 = vld [vmem:[#allocation9 + $0x128] sm:$0xff] }
  0x36   :  { %203 = vmatpush.msra.mxu0 %v114_v60  ;;  %244 = vmatpush.msra.mxu1 %v115_v61  ;;  %v108_v26 = vld [vmem:[#allocation4 + $0x10] sm:$0xff]  ;;  %v2589_v29 = vld [vmem:[#allocation9 + $0x138] sm:$0xff]  ;;  %v2593_v31 = vld [vmem:[#allocation9 + $0x100] sm:$0xff] }
  0x37   :  { %285 = vmatpush.msra.mxu2 %v116_v62  ;;  %326 = vmatpush.msra.mxu3 %v117_v63  ;;  %v2591_v30 = vld [vmem:[#allocation9 + $0x130] sm:$0xff]  ;;  %v2595_v32 = vld [vmem:[#allocation9 + $0x108] sm:$0xff]  ;;  %v2599_v33 = vld [vmem:[#allocation9 + $0x118] sm:$0xff] }
  0x38   :  { %204 = vmatmul.f32.vlgmr.msra.gmra.mxu0 %v106_v0  ;;  %245 = vmatmul.f32.vlgmr.msra.gmra.mxu1 %v106_v0  ;;  %v2601_v34 = vld [vmem:[#allocation9 + $0x110] sm:$0xff]  ;;  %v2604_v35 = vld [vmem:[#allocation9 + $0xe0] sm:$0xff]  ;;  %v2606_v36 = vld [vmem:[#allocation9 + $0xe8] sm:$0xff] }
  0x39   :  { %286 = vmatmul.f32.vlgmr.msra.gmra.mxu2 %v106_v0  ;;  %327 = vmatmul.f32.vlgmr.msra.gmra.mxu3 %v106_v0  ;;  %v2611_v37 = vld [vmem:[#allocation9 + $0xf8] sm:$0xff]  ;;  %v2613_v38 = vld [vmem:[#allocation9 + $0xf0] sm:$0xff]  ;;  %v2619_v40 = vld [vmem:[#allocation9 + $0xc0] sm:$0xff] }
  0x3a   :  { %417 = vmatpush.msrb.mxu0 %v2513_v1  ;;  %437 = vmatpush.msrb.mxu1 %v2515_v2  ;;  %v109_v39 = vld [vmem:[#allocation4 + $0x18] sm:$0xff]  ;;  %v2621_v41 = vld [vmem:[#allocation9 + $0xc8] sm:$0xff]  ;;  %v2627_v43 = vld [vmem:[#allocation9 + $0xd0] sm:$0xff] }
  0x3b   :  { %477 = vmatpush.msrb.mxu3 %v2517_v3  ;;  %457 = vmatpush.msrb.mxu2 %v2519_v4  ;;  %v2625_v42 = vld [vmem:[#allocation9 + $0xd8] sm:$0xff]  ;;  %v2629_v44 = vld [vmem:[#allocation9 + $0xa0] sm:$0xff]  ;;  %v2631_v45 = vld [vmem:[#allocation9 + $0xa8] sm:$0xff] }
  0x3c   :  { %418 = vmatpush.msrb.mxu0 %v2521_v5  ;;  %438 = vmatpush.msrb.mxu1 %v2523_v6  ;;  %v2635_v46 = vld [vmem:[#allocation9 + $0xb8] sm:$0xff]  ;;  %v2637_v47 = vld [vmem:[#allocation9 + $0xb0] sm:$0xff]  ;;  %v2640_v48 = vld [vmem:[#allocation9 + $0x80] sm:$0xff] }
  0x3d   :  { %478 = vmatpush.msrb.mxu3 %v2527_v7  ;;  %458 = vmatpush.msrb.mxu2 %v2529_v8  ;;  %v2642_v49 = vld [vmem:[#allocation9 + $0x88] sm:$0xff]  ;;  %v2647_v50 = vld [vmem:[#allocation9 + $0x98] sm:$0xff]  ;;  %v2649_v51 = vld [vmem:[#allocation9 + $0x90] sm:$0xff] }
  0x3e   :  { %419 = vmatpush.msrb.mxu0 %v2532_v9  ;;  %439 = vmatpush.msrb.mxu1 %v2534_v10  ;;  %v110_v52 = vld [vmem:[#allocation4 + $0x20] sm:$0xff]  ;;  %v2657_v54 = vld [vmem:[#allocation9 + $0x68] sm:$0xff]  ;;  %v2661_v55 = vld [vmem:[#allocation9 + $0x78] sm:$0xff] }
  0x3f   :  { %479 = vmatpush.msrb.mxu3 %v2539_v11  ;;  %459 = vmatpush.msrb.mxu2 %v2541_v12  ;;  %v2655_v53 = vld [vmem:[#allocation9 + $0x60] sm:$0xff]  ;;  %v2663_v56 = vld [vmem:[#allocation9 + $0x70] sm:$0xff]  ;;  %v2667_v58 = vld [vmem:[#allocation9 + $0x48] sm:$0xff] }
  0x40   :  { %207 = vmatmul.f32.gmra.mxu0 %v107_v13  ;;  %248 = vmatmul.f32.gmra.mxu1 %v107_v13  ;;  %v2665_v57 = vld [vmem:[#allocation9 + $0x40] sm:$0xff]  ;;  %3647 = vst [vmem:[#allocation18_spill] sm:$0xff] %v2667_v58  ;;  %v2671_v59 = vld [vmem:[#allocation9 + $0x58] sm:$0xff]  ;;  %v2673_v60 = vld [vmem:[#allocation9 + $0x50] sm:$0xff] }
  0x41   :  { %289 = vmatmul.f32.gmra.mxu2 %v107_v13  ;;  %330 = vmatmul.f32.gmra.mxu3 %v107_v13  ;;  %v2676_v61 = vld [vmem:[#allocation9 + $0x20] sm:$0xff]  ;;  %v2678_v62 = vld [vmem:[#allocation9 + $0x28] sm:$0xff]  ;;  %v2683_v63 = vld [vmem:[#allocation9 + $0x30] sm:$0xff] }
  0x42   :  { %420 = vmatpush.msrb.mxu0 %v2547_v14  ;;  %440 = vmatpush.msrb.mxu1 %v2549_v15  ;;  %v2685_v0 = vld [vmem:[#allocation9 + $0x38] sm:$0xff]  ;;  %v111_v13 = vld [vmem:[#allocation4 + $0x28] sm:$0xff] }
  0x43   :  { %480 = vmatpush.msrb.mxu3 %v2553_v16  ;;  %460 = vmatpush.msrb.mxu2 %v2555_v17  ;;  %3648 = vst [vmem:[#allocation19_spill] sm:$0xff] %v2685_v0 }
  0x44   :  { %421 = vmatpush.msrb.mxu0 %v2557_v18  ;;  %441 = vmatpush.msrb.mxu1 %v2559_v19 }
  0x45   :  { %481 = vmatpush.msrb.mxu3 %v2563_v20  ;;  %461 = vmatpush.msrb.mxu2 %v2565_v21 }
  0x46   :  { %422 = vmatpush.msrb.mxu0 %v2568_v22  ;;  %442 = vmatpush.msrb.mxu1 %v2570_v23 }
  0x47   :  { %482 = vmatpush.msrb.mxu3 %v2575_v24  ;;  %462 = vmatpush.msrb.mxu2 %v2577_v25 }
  0x48   :  { %210 = vmatmul.f32.gmra.mxu0 %v108_v26  ;;  %251 = vmatmul.f32.gmra.mxu1 %v108_v26 }
  0x49   :  { %292 = vmatmul.f32.gmra.mxu2 %v108_v26  ;;  %333 = vmatmul.f32.gmra.mxu3 %v108_v26  ;;  %v2691_v26 = vld [vmem:[#allocation9] sm:$0xff] }
  0x4a   :  { %423 = vmatpush.msrb.mxu0 %v2583_v27  ;;  %443 = vmatpush.msrb.mxu1 %v2585_v28 }
  0x4b   :  { %483 = vmatpush.msrb.mxu3 %v2589_v29  ;;  %463 = vmatpush.msrb.mxu2 %v2591_v30 }
  0x4c   :  { %424 = vmatpush.msrb.mxu0 %v2593_v31  ;;  %444 = vmatpush.msrb.mxu1 %v2595_v32 }
  0x4d   :  { %484 = vmatpush.msrb.mxu3 %v2599_v33  ;;  %464 = vmatpush.msrb.mxu2 %v2601_v34 }
  0x4e   :  { %425 = vmatpush.msrb.mxu0 %v2604_v35  ;;  %445 = vmatpush.msrb.mxu1 %v2606_v36 }
  0x4f   :  { %485 = vmatpush.msrb.mxu3 %v2611_v37  ;;  %465 = vmatpush.msrb.mxu2 %v2613_v38 }
  0x50   :  { %213 = vmatmul.f32.gmra.mxu0 %v109_v39  ;;  %254 = vmatmul.f32.gmra.mxu1 %v109_v39 }
  0x51   :  { %295 = vmatmul.f32.gmra.mxu2 %v109_v39  ;;  %336 = vmatmul.f32.gmra.mxu3 %v109_v39  ;;  %v2693_v39 = vld [vmem:[#allocation9 + $0x8] sm:$0xff] }
  0x52   :  { %426 = vmatpush.msrb.mxu0 %v2619_v40  ;;  %446 = vmatpush.msrb.mxu1 %v2621_v41 }
  0x53   :  { %486 = vmatpush.msrb.mxu3 %v2625_v42  ;;  %466 = vmatpush.msrb.mxu2 %v2627_v43 }
  0x54   :  { %427 = vmatpush.msrb.mxu0 %v2629_v44  ;;  %447 = vmatpush.msrb.mxu1 %v2631_v45 }
  0x55   :  { %487 = vmatpush.msrb.mxu3 %v2635_v46  ;;  %467 = vmatpush.msrb.mxu2 %v2637_v47 }
  0x56   :  { %428 = vmatpush.msrb.mxu0 %v2640_v48  ;;  %448 = vmatpush.msrb.mxu1 %v2642_v49 }
  0x57   :  { %488 = vmatpush.msrb.mxu3 %v2647_v50  ;;  %468 = vmatpush.msrb.mxu2 %v2649_v51 }
  0x58   :  { %216 = vmatmul.f32.gmra.mxu0 %v110_v52  ;;  %257 = vmatmul.f32.gmra.mxu1 %v110_v52 }
  0x59   :  { %298 = vmatmul.f32.gmra.mxu2 %v110_v52  ;;  %339 = vmatmul.f32.gmra.mxu3 %v110_v52  ;;  %v2697_v52 = vld [vmem:[#allocation9 + $0x10] sm:$0xff] }
  0x5a   :  { %429 = vmatpush.msrb.mxu0 %v2655_v53  ;;  %449 = vmatpush.msrb.mxu1 %v2657_v54 }
  0x5b   :  { %489 = vmatpush.msrb.mxu3 %v2661_v55  ;;  %469 = vmatpush.msrb.mxu2 %v2663_v56 }
  0x5c   :  { %430 = vmatpush.msrb.mxu0 %v2665_v57  ;;  %450 = vmatpush.msrb.mxu1 %v2667_v58  ;;  %v2699_v58 = vld [vmem:[#allocation9 + $0x18] sm:$0xff] }
  0x5d   :  { %490 = vmatpush.msrb.mxu3 %v2671_v59  ;;  %470 = vmatpush.msrb.mxu2 %v2673_v60 }
  0x5e   :  { %431 = vmatpush.msrb.mxu0 %v2676_v61  ;;  %451 = vmatpush.msrb.mxu1 %v2678_v62 }
  0x5f   :  { %471 = vmatpush.msrb.mxu2 %v2683_v63  ;;  %491 = vmatpush.msrb.mxu3 %v2685_v0  ;;  %v112_v0 = vld [vmem:[#allocation4 + $0x30] sm:$0xff] }
  0x60   :  { %219 = vmatmul.f32.gmra.mxu0 %v111_v13  ;;  %260 = vmatmul.f32.gmra.mxu1 %v111_v13 }
  0x61   :  { %301 = vmatmul.f32.gmra.mxu2 %v111_v13  ;;  %342 = vmatmul.f32.gmra.mxu3 %v111_v13  ;;  %v113_v13 = vld [vmem:[#allocation4 + $0x38] sm:$0xff] }
  0x62   :  { %432 = vmatpush.msrb.mxu0 %v2691_v26  ;;  %452 = vmatpush.msrb.mxu1 %v2693_v39 }
  0x63   :  { %472 = vmatpush.msrb.mxu2 %v2697_v52  ;;  %492 = vmatpush.msrb.mxu3 %v2699_v58 }
  0x64   :  { %632 = vmatpush.msra.mxu0 %v2513_v1  ;;  %652 = vmatpush.msra.mxu1 %v2515_v2 }
  0x65   :  { %672 = vmatpush.msra.mxu2 %v2519_v4  ;;  %692 = vmatpush.msra.mxu3 %v2517_v3 }
  0x66   :  { %633 = vmatpush.msra.mxu0 %v2521_v5  ;;  %653 = vmatpush.msra.mxu1 %v2523_v6 }
  0x67   :  { %673 = vmatpush.msra.mxu2 %v2529_v8  ;;  %693 = vmatpush.msra.mxu3 %v2527_v7 }
  0x68   :  { %222 = vmatmul.f32.gmra.mxu0 %v112_v0  ;;  %263 = vmatmul.f32.gmra.mxu1 %v112_v0 }
  0x69   :  { %304 = vmatmul.f32.gmra.mxu2 %v112_v0  ;;  %345 = vmatmul.f32.gmra.mxu3 %v112_v0  ;;  %v2461_v0 = vmov 0.0  }
  0x6a   :  { %634 = vmatpush.msra.mxu0 %v2532_v9  ;;  %654 = vmatpush.msra.mxu1 %v2534_v10 }
  0x6b   :  { %674 = vmatpush.msra.mxu2 %v2541_v12  ;;  %694 = vmatpush.msra.mxu3 %v2539_v11 }
  0x6c   :  { %635 = vmatpush.msra.mxu0 %v2547_v14  ;;  %655 = vmatpush.msra.mxu1 %v2549_v15 }
  0x6d   :  { %675 = vmatpush.msra.mxu2 %v2555_v17  ;;  %695 = vmatpush.msra.mxu3 %v2553_v16 }
  0x6e   :  { %636 = vmatpush.msra.mxu0 %v2557_v18  ;;  %656 = vmatpush.msra.mxu1 %v2559_v19 }
  0x6f   :  { %676 = vmatpush.msra.mxu2 %v2565_v21  ;;  %696 = vmatpush.msra.mxu3 %v2563_v20 }
  0x70   :  { %225 = vmatmul.f32.gmra.mxu0 %v113_v13  ;;  %266 = vmatmul.f32.gmra.mxu1 %v113_v13 }
  0x71   :  { %307 = vmatmul.f32.gmra.mxu2 %v113_v13  ;;  %348 = vmatmul.f32.gmra.mxu3 %v113_v13  ;;  %v3649_v13 = vld [vmem:[#allocation18_spill] sm:$0xff] }
  0x72   :  { %637 = vmatpush.msra.mxu0 %v2568_v22  ;;  %657 = vmatpush.msra.mxu1 %v2570_v23 }
  0x73   :  { %677 = vmatpush.msra.mxu2 %v2577_v25  ;;  %697 = vmatpush.msra.mxu3 %v2575_v24 }
  0x74   :  { %638 = vmatpush.msra.mxu0 %v2583_v27  ;;  %658 = vmatpush.msra.mxu1 %v2585_v28 }
  0x75   :  { %678 = vmatpush.msra.mxu2 %v2591_v30  ;;  %698 = vmatpush.msra.mxu3 %v2589_v29 }
  0x76   :  { %639 = vmatpush.msra.mxu0 %v2593_v31  ;;  %659 = vmatpush.msra.mxu1 %v2595_v32 }
  0x77   :  { %679 = vmatpush.msra.mxu2 %v2601_v34  ;;  %699 = vmatpush.msra.mxu3 %v2599_v33 }
  0x78   :  { %433 = vmatmul.f32.vlgmr.msrb.gmra.mxu0 %v2461_v0  ;;  %453 = vmatmul.f32.vlgmr.msrb.gmra.mxu1 %v2461_v0 }
  0x79   :  { %473 = vmatmul.f32.vlgmr.msrb.gmra.mxu2 %v2461_v0  ;;  %493 = vmatmul.f32.vlgmr.msrb.gmra.mxu3 %v2461_v0  ;;  %v3650_v0 = vld [vmem:[#allocation19_spill] sm:$0xff] }
  0x7a   :  { %640 = vmatpush.msra.mxu0 %v2604_v35  ;;  %660 = vmatpush.msra.mxu1 %v2606_v36 }
  0x7b   :  { %680 = vmatpush.msra.mxu2 %v2613_v38  ;;  %700 = vmatpush.msra.mxu3 %v2611_v37 }
  0x7c   :  { %641 = vmatpush.msra.mxu0 %v2619_v40  ;;  %661 = vmatpush.msra.mxu1 %v2621_v41 }
  0x7d   :  { %681 = vmatpush.msra.mxu2 %v2627_v43  ;;  %701 = vmatpush.msra.mxu3 %v2625_v42 }
  0x7e   :  { %642 = vmatpush.msra.mxu0 %v2629_v44  ;;  %662 = vmatpush.msra.mxu1 %v2631_v45 }
  0x7f   :  { %682 = vmatpush.msra.mxu2 %v2637_v47  ;;  %702 = vmatpush.msra.mxu3 %v2635_v46 }
  0x80   :  { %643 = vmatpush.msra.mxu0 %v2640_v48  ;;  %663 = vmatpush.msra.mxu1 %v2642_v49 }
  0x81   :  { %683 = vmatpush.msra.mxu2 %v2649_v51  ;;  %703 = vmatpush.msra.mxu3 %v2647_v50 }
  0x82   :  { %644 = vmatpush.msra.mxu0 %v2655_v53  ;;  %664 = vmatpush.msra.mxu1 %v2657_v54 }
  0x83   :  { %684 = vmatpush.msra.mxu2 %v2663_v56  ;;  %704 = vmatpush.msra.mxu3 %v2661_v55 }
  0x84   :  { %645 = vmatpush.msra.mxu0 %v2665_v57  ;;  %665 = vmatpush.msra.mxu1 %v3649_v13 }
  0x85   :  { %685 = vmatpush.msra.mxu2 %v2673_v60  ;;  %705 = vmatpush.msra.mxu3 %v2671_v59 }
  0x86   :  { %646 = vmatpush.msra.mxu0 %v2676_v61  ;;  %666 = vmatpush.msra.mxu1 %v2678_v62 }
  0x87   :  { %686 = vmatpush.msra.mxu2 %v2683_v63  ;;  %706 = vmatpush.msra.mxu3 %v3650_v0 }
  0x88   :  { %647 = vmatpush.msra.mxu0 %v2691_v26  ;;  %667 = vmatpush.msra.mxu1 %v2693_v39 }
  0x89   :  { %687 = vmatpush.msra.mxu2 %v2697_v52  ;;  %707 = vmatpush.msra.mxu3 %v2699_v58 }
  0x8a   :  { %847 = vmatpush.msrb.mxu0 %v2513_v1  ;;  %867 = vmatpush.msrb.mxu1 %v2515_v2 }
  0x8b   :  { %887 = vmatpush.msrb.mxu2 %v2519_v4  ;;  %907 = vmatpush.msrb.mxu3 %v2517_v3  ;;  %v178_v3 = vld [vmem:[#allocation10] sm:$0xf] }
  0x8c   :  { %848 = vmatpush.msrb.mxu0 %v2521_v5  ;;  %868 = vmatpush.msrb.mxu1 %v2523_v6  ;;  %v180_v4 = vperm.slane %v178_v3, 0  ;;  %v181_v5 = vperm.slane %v178_v3, 1 }
  0x8d   :  { %888 = vmatpush.msrb.mxu2 %v2529_v8  ;;  %908 = vmatpush.msrb.mxu3 %v2527_v7 }
  0x8e   :  { %849 = vmatpush.msrb.mxu0 %v2532_v9  ;;  %869 = vmatpush.msrb.mxu1 %v2534_v10 }
  0x8f   :  { %889 = vmatpush.msrb.mxu2 %v2541_v12  ;;  %909 = vmatpush.msrb.mxu3 %v2539_v11  ;;  %v2841_v12 = vperm.slane %v178_v3, 2 }
  0x90   :  { %850 = vmatpush.msrb.mxu0 %v2547_v14  ;;  %870 = vmatpush.msrb.mxu1 %v2549_v15  ;;  %v183_v14 = vperm.slane %v178_v3, 3 }
  0x91   :  { %890 = vmatpush.msrb.mxu2 %v2555_v17  ;;  %910 = vmatpush.msrb.mxu3 %v2553_v16 }
  0x92   :  { %851 = vmatpush.msrb.mxu0 %v2557_v18  ;;  %871 = vmatpush.msrb.mxu1 %v2559_v19 }
  0x93   :  { %891 = vmatpush.msrb.mxu2 %v2565_v21  ;;  %911 = vmatpush.msrb.mxu3 %v2563_v20 }
  0x94   :  { %852 = vmatpush.msrb.mxu0 %v2568_v22  ;;  %872 = vmatpush.msrb.mxu1 %v2570_v23 }
  0x95   :  { %892 = vmatpush.msrb.mxu2 %v2577_v25  ;;  %912 = vmatpush.msrb.mxu3 %v2575_v24 }
  0x96   :  { %853 = vmatpush.msrb.mxu0 %v2583_v27  ;;  %873 = vmatpush.msrb.mxu1 %v2585_v28 }
  0x97   :  { %893 = vmatpush.msrb.mxu2 %v2591_v30  ;;  %913 = vmatpush.msrb.mxu3 %v2589_v29 }
  0x98   :  { %854 = vmatpush.msrb.mxu0 %v2593_v31  ;;  %874 = vmatpush.msrb.mxu1 %v2595_v32 }
  0x99   :  { %894 = vmatpush.msrb.mxu2 %v2601_v34  ;;  %914 = vmatpush.msrb.mxu3 %v2599_v33 }
  0x9a   :  { %855 = vmatpush.msrb.mxu0 %v2604_v35  ;;  %875 = vmatpush.msrb.mxu1 %v2606_v36 }
  0x9b   :  { %895 = vmatpush.msrb.mxu2 %v2613_v38  ;;  %915 = vmatpush.msrb.mxu3 %v2611_v37 }
  0x9c   :  { %856 = vmatpush.msrb.mxu0 %v2619_v40  ;;  %876 = vmatpush.msrb.mxu1 %v2621_v41 }
  0x9d   :  { %896 = vmatpush.msrb.mxu2 %v2627_v43  ;;  %916 = vmatpush.msrb.mxu3 %v2625_v42 }
  0x9e   :  { %857 = vmatpush.msrb.mxu0 %v2629_v44  ;;  %877 = vmatpush.msrb.mxu1 %v2631_v45 }
  0x9f   :  { %897 = vmatpush.msrb.mxu2 %v2637_v47  ;;  %917 = vmatpush.msrb.mxu3 %v2635_v46 }
  0xa0   :  { %858 = vmatpush.msrb.mxu0 %v2640_v48  ;;  %878 = vmatpush.msrb.mxu1 %v2642_v49 }
  0xa1   :  { %898 = vmatpush.msrb.mxu2 %v2649_v51  ;;  %918 = vmatpush.msrb.mxu3 %v2647_v50 }
  0xa2   :  { %859 = vmatpush.msrb.mxu0 %v2655_v53  ;;  %879 = vmatpush.msrb.mxu1 %v2657_v54 }
  0xa3   :  { %899 = vmatpush.msrb.mxu2 %v2663_v56  ;;  %919 = vmatpush.msrb.mxu3 %v2661_v55 }
  0xa4   :  { %860 = vmatpush.msrb.mxu0 %v2665_v57  ;;  %880 = vmatpush.msrb.mxu1 %v3649_v13 }
  0xa5   :  { %900 = vmatpush.msrb.mxu2 %v2673_v60  ;;  %920 = vmatpush.msrb.mxu3 %v2671_v59 }
  0xa6   :  { %861 = vmatpush.msrb.mxu0 %v2676_v61  ;;  %881 = vmatpush.msrb.mxu1 %v2678_v62 }
  0xa7   :  { %901 = vmatpush.msrb.mxu2 %v2683_v63  ;;  %921 = vmatpush.msrb.mxu3 %v3650_v0 }
  0xa8   :  { %862 = vmatpush.msrb.mxu0 %v2691_v26  ;;  %882 = vmatpush.msrb.mxu1 %v2693_v39 }
  0xa9   :  { %902 = vmatpush.msrb.mxu2 %v2697_v52  ;;  %922 = vmatpush.msrb.mxu3 %v2699_v58 }
  0xb5   :  { %v205_v1 = vpop.f32.mrf.mxu0  ;;  %v246_v2 = vpop.f32.mrf.mxu1 }
  0xb6   :  { %v206_v52 = vadd.f32 %v205_v1, %v180_v4  ;;  %v247_v13 = vadd.f32 %v246_v2, %v181_v5 }
  0xbc   :  { %v2833_v6 = vpop.f32.mrf.mxu2  ;;  %v2835_v7 = vpop.f32.mrf.mxu3 }
  0xbd   :  { %v208_v8 = vpop.f32.mrf.mxu0  ;;  %v249_v9 = vpop.f32.mrf.mxu1 }
  0xbe   :  { %v2837_v10 = vadd.f32 %v208_v8, %v180_v4  ;;  %v2839_v11 = vadd.f32 %v249_v9, %v181_v5 }
  0xc4   :  { %v290_v15 = vpop.f32.mrf.mxu2  ;;  %v331_v16 = vpop.f32.mrf.mxu3 }
  0xc5   :  { %v2844_v17 = vadd.f32 %v290_v15, %v2841_v12  ;;  %v2846_v18 = vadd.f32 %v331_v16, %v183_v14  ;;  %v211_v19 = vpop.f32.mrf.mxu0  ;;  %v252_v20 = vpop.f32.mrf.mxu1 }
  0xc6   :  { %v2848_v21 = vadd.f32 %v211_v19, %v180_v4  ;;  %v2850_v22 = vadd.f32 %v252_v20, %v181_v5 }
  0xcc   :  { %v293_v23 = vpop.f32.mrf.mxu2  ;;  %v334_v24 = vpop.f32.mrf.mxu3 }
  0xcd   :  { %v2853_v25 = vadd.f32 %v293_v23, %v2841_v12  ;;  %v2855_v27 = vadd.f32 %v334_v24, %v183_v14  ;;  %v214_v28 = vpop.f32.mrf.mxu0  ;;  %v255_v29 = vpop.f32.mrf.mxu1 }
  0xce   :  { %v2857_v30 = vadd.f32 %v214_v28, %v180_v4  ;;  %v2859_v31 = vadd.f32 %v255_v29, %v181_v5  ;;  %v329_v28 = vadd.f32 %v2835_v7, %v183_v14 }
  0xd0   :  { %3651 = vst [vmem:[#allocation18_spill] sm:$0xff] %v2857_v30  ;;  %v3089_v30 = vld [vmem:[#allocation9 + $0x30] sm:$0xff] }
  0xd1   :  { %3652 = vst [vmem:[#allocation19_spill] sm:$0xff] %v2859_v31 }
  0xd4   :  { %v296_v32 = vpop.f32.mrf.mxu2  ;;  %v337_v33 = vpop.f32.mrf.mxu3 }
  0xd5   :  { %v2862_v34 = vadd.f32 %v296_v32, %v2841_v12  ;;  %v2864_v35 = vadd.f32 %v337_v33, %v183_v14  ;;  %v217_v36 = vpop.f32.mrf.mxu0  ;;  %v258_v37 = vpop.f32.mrf.mxu1 }
  0xd6   :  { %v2866_v38 = vadd.f32 %v217_v36, %v180_v4  ;;  %v2868_v40 = vadd.f32 %v258_v37, %v181_v5 }
  0xd7   :  { %3653 = vst [vmem:[#allocation20_spill] sm:$0xff] %v2862_v34  ;;  %v3080_v34 = vld [vmem:[#allocation9 + $0x58] sm:$0xff] }
  0xd8   :  { %3654 = vst [vmem:[#allocation21_spill] sm:$0xff] %v2864_v35  ;;  %v3082_v35 = vld [vmem:[#allocation9 + $0x20] sm:$0xff] }
  0xd9   :  { %3655 = vst [vmem:[#allocation22_spill] sm:$0xff] %v2866_v38 }
  0xda   :  { %3656 = vst [vmem:[#allocation23_spill] sm:$0xff] %v2868_v40  ;;  %v3074_v40 = vld [vmem:[#allocation9 + $0x48] sm:$0xff] }
  0xdb   :  { %3688 = vst [vmem:[#allocation55_spill] sm:$0xff] %v3074_v40 }
  0xdc   :  { %v299_v41 = vpop.f32.mrf.mxu2  ;;  %v340_v42 = vpop.f32.mrf.mxu3  ;;  %3690 = vst [vmem:[#allocation57_spill] sm:$0xff] %v3080_v34 }
  0xdd   :  { %v2871_v43 = vadd.f32 %v299_v41, %v2841_v12  ;;  %v2873_v44 = vadd.f32 %v340_v42, %v183_v14  ;;  %v220_v45 = vpop.f32.mrf.mxu0  ;;  %v261_v46 = vpop.f32.mrf.mxu1  ;;  %v288_v41 = vadd.f32 %v2833_v6, %v2841_v12 }
  0xde   :  { %v2875_v47 = vadd.f32 %v220_v45, %v180_v4  ;;  %v2877_v48 = vadd.f32 %v261_v46, %v181_v5 }
  0xdf   :  { %3657 = vst [vmem:[#allocation24_spill] sm:$0xff] %v2871_v43  ;;  %v3068_v43 = vld [vmem:[#allocation9 + $0x78] sm:$0xff] }
  0xe0   :  { %3658 = vst [vmem:[#allocation25_spill] sm:$0xff] %v2873_v44  ;;  %v3072_v44 = vld [vmem:[#allocation9 + $0x40] sm:$0xff] }
  0xe1   :  { %3659 = vst [vmem:[#allocation26_spill] sm:$0xff] %v2875_v47  ;;  %v3060_v47 = vld [vmem:[#allocation9 + $0x60] sm:$0xff] }
  0xe2   :  { %3660 = vst [vmem:[#allocation27_spill] sm:$0xff] %v2877_v48  ;;  %v3058_v48 = vld [vmem:[#allocation9 + $0x98] sm:$0xff] }
  0xe3   :  { %3684 = vst [vmem:[#allocation51_spill] sm:$0xff] %v3060_v47 }
  0xe4   :  { %v302_v49 = vpop.f32.mrf.mxu2  ;;  %v343_v50 = vpop.f32.mrf.mxu3  ;;  %3687 = vst [vmem:[#allocation54_spill] sm:$0xff] %v3068_v43 }
  0xe5   :  { %v2880_v51 = vadd.f32 %v302_v49, %v2841_v12  ;;  %v2882_v53 = vadd.f32 %v343_v50, %v183_v14  ;;  %v223_v54 = vpop.f32.mrf.mxu0  ;;  %v264_v55 = vpop.f32.mrf.mxu1 }
  0xe6   :  { %v2884_v56 = vadd.f32 %v223_v54, %v180_v4  ;;  %v2886_v57 = vadd.f32 %v264_v55, %v181_v5 }
  0xe7   :  { %3661 = vst [vmem:[#allocation28_spill] sm:$0xff] %v2880_v51  ;;  %v3046_v51 = vld [vmem:[#allocation9 + $0xb8] sm:$0xff] }
  0xe8   :  { %3662 = vst [vmem:[#allocation29_spill] sm:$0xff] %v2882_v53 }
  0xe9   :  { %3663 = vst [vmem:[#allocation30_spill] sm:$0xff] %v2884_v56  ;;  %v3042_v56 = vld [vmem:[#allocation9 + $0xb0] sm:$0xff] }
  0xea   :  { %3664 = vst [vmem:[#allocation31_spill] sm:$0xff] %v2886_v57  ;;  %v3040_v57 = vld [vmem:[#allocation9 + $0xa8] sm:$0xff] }
  0xec   :  { %v305_v58 = vpop.f32.mrf.mxu2  ;;  %v346_v59 = vpop.f32.mrf.mxu3 }
  0xed   :  { %v2889_v60 = vadd.f32 %v305_v58, %v2841_v12  ;;  %v2891_v61 = vadd.f32 %v346_v59, %v183_v14  ;;  %v226_v62 = vpop.f32.mrf.mxu0  ;;  %v267_v63 = vpop.f32.mrf.mxu1 }
  0xee   :  { %v2893_v26 = vadd.f32 %v226_v62, %v180_v4  ;;  %v2895_v39 = vadd.f32 %v267_v63, %v181_v5 }
  0xef   :  { %3665 = vst [vmem:[#allocation32_spill] sm:$0xff] %v2889_v60 }
  0xf0   :  { %3666 = vst [vmem:[#allocation33_spill] sm:$0xff] %v2891_v61  ;;  %v3038_v61 = vld [vmem:[#allocation9 + $0xa0] sm:$0xff] }
  0xf1   :  { %3667 = vst [vmem:[#allocation34_spill] sm:$0xff] %v2893_v26 }
  0xf2   :  { %3668 = vst [vmem:[#allocation35_spill] sm:$0xff] %v2895_v39  ;;  %v3032_v39 = vld [vmem:[#allocation9 + $0xd8] sm:$0xff] }
  0xf4   :  { %v308_v0 = vpop.f32.mrf.mxu2  ;;  %v349_v3 = vpop.f32.mrf.mxu3 }
  0xf5   :  { %v2898_v8 = vadd.f32 %v308_v0, %v2841_v12  ;;  %v2900_v9 = vadd.f32 %v349_v3, %v183_v14  ;;  %v434_v15 = vpop.f32.mrf.mxu0  ;;  %v454_v16 = vpop.f32.mrf.mxu1 }
  0xf6   :  { %v497_v19 = vadd.f32 %v434_v15, %v206_v52  ;;  %v498_v20 = vadd.f32 %v454_v16, %v247_v13 }
  0xf7   :  { %3669 = vst [vmem:[#allocation36_spill] sm:$0xff] %v2898_v8 }
  0xf8   :  { %3670 = vst [vmem:[#allocation37_spill] sm:$0xff] %v2900_v9  ;;  %v2136_v23 = vmul.f32 -1.442695, %v497_v19  ;;  %v2137_v24 = vmul.f32 -1.442695, %v498_v20 }
  0xfa   :  { %2172 = vpow2.f32 %v2136_v23 }
  0xfb   :  { %2174 = vpow2.f32 %v2137_v24 }
  0xfc   :  { %v494_v29 = vpop.f32.mrf.mxu3  ;;  %v474_v36 = vpop.f32.mrf.mxu2 }
  0xfd   :  { %v500_v1 = vadd.f32 %v494_v29, %v329_v28  ;;  %v499_v46 = vadd.f32 %v474_v36, %v288_v41 }
  0xff   :  { %v2138_v2 = vmul.f32 -1.442695, %v500_v1 }
 0x100   :  { %v2173_v4 = vpop.eup %2172 }
 0x101   :  { %v2175_v5 = vpop.eup %2174  ;;  %v504_v32 = vadd.f32 1.0, %v2173_v4  ;;  %2176 = vpow2.f32 %v2138_v2 }
 0x102   :  { %v523_v33 = vadd.f32 1.0, %v2175_v5 }
 0x103   :  { %2178 = vrcp.f32 %v504_v32  ;;  %v516_v55 = vand.u32 2147483648, %v504_v32  ;;  %v514_v62 = vand.u32 2147483647, %v504_v32  ;;  %vm510_vm2 = vweird.f32 %v504_v32 }
 0x104   :  { %2180 = vrcp.f32 %v523_v33  ;;  %v535_v58 = vand.u32 2147483648, %v523_v33  ;;  %v533_v52 = vand.u32 2147483647, %v523_v33  ;;  %vm529_vm3 = vweird.f32 %v523_v33 }
 0x105   :  { %v517_v12 = vor.u32 1.1754944e-38, %v516_v55  ;;  %vm515_vm5 = vcmp.eq.f32.partialorder %v514_v62, 8.507059e+37 }
 0x106   :  { %v536_v15 = vor.u32 1.1754944e-38, %v535_v58  ;;  %vm534_vm7 = vcmp.eq.f32.partialorder %v533_v52, 8.507059e+37 }
 0x107   :  { %v2177_v37 = vpop.eup %2176 }
 0x108   :  { %v543_v42 = vadd.f32 1.0, %v2177_v37 }
 0x109   :  { %v2179_v45 = vpop.eup %2178 }
 0x10a   :  { %v2181_v7 = vpop.eup %2180  ;;  %v506_v14 = vmul.f32 %v2179_v45, %v504_v32  ;;  %2182 = vrcp.f32 %v543_v42  ;;  %vm511_vm0 = vweird.f32 %v2179_v45  ;;  %v555_v32 = vand.u32 2147483648, %v543_v42 }
 0x10b   :  { %v525_v49 = vmul.f32 %v2181_v7, %v523_v33  ;;  %2184 = vtanh.f32 %v499_v46  ;;  %vm530_vm1 = vweird.f32 %v2181_v7  ;;  %vm512_vm4 = vmor %vm510_vm2, %vm511_vm0  ;;  %vm549_vm9 = vweird.f32 %v543_v42 }
 0x10c   :  { %v507_v50 = vsub.f32 1.0, %v506_v14  ;;  %vm531_vm6 = vmor %vm529_vm3, %vm530_vm1  ;;  %v553_v33 = vand.u32 2147483647, %v543_v42  ;;  %v556_v37 = vor.u32 1.1754944e-38, %v555_v32 }
 0x10d   :  { %v526_v54 = vsub.f32 1.0, %v525_v49 }
 0x10e   :  { %v508_v59 = vmul.f32 %v2179_v45, %v507_v50  ;;  %vm554_vm11 = vcmp.eq.f32.partialorder %v553_v33, 8.507059e+37 }
 0x10f   :  { %v527_v63 = vmul.f32 %v2181_v7, %v526_v54 }
 0x110   :  { %v2183_v13 = vpop.eup %2182  ;;  %v509_v6 = vadd.f32 %v2179_v45, %v508_v59 }
 0x111   :  { %v528_v0 = vadd.f32 %v2181_v7, %v527_v63  ;;  %v545_v3 = vmul.f32 %v2183_v13, %v543_v42  ;;  %v2185_v19 = vpop.eup %2184  ;;  %vm550_vm8 = vweird.f32 %v2183_v13 }
 0x112   :  { %v513_v16 = vsel %vm512_vm4, %v2179_v45, %v509_v6  ;;  %vm551_vm10 = vmor %vm549_vm9, %vm550_vm8 }
 0x113   :  { %v518_v20 = vsel %vm515_vm5, %v517_v12, %v513_v16  ;;  %v532_v23 = vsel %vm531_vm6, %v2181_v7, %v528_v0  ;;  %v546_v24 = vsub.f32 1.0, %v545_v3 }
 0x114   :  { %v537_v28 = vsel %vm534_vm7, %v536_v15, %v532_v23  ;;  %v561_v29 = vmul.f32 %v2185_v19, %v518_v20 }
 0x115   :  { %v560_v1 = vmul.f32 0.0, %v537_v28  ;;  %v547_v2 = vmul.f32 %v2183_v13, %v546_v24 }
 0x117   :  { %v2905_v4 = vadd.f32 %v561_v29, %v560_v1  ;;  %v548_v5 = vadd.f32 %v2183_v13, %v547_v2 }
 0x119   :  { %2186 = vtanh.f32 %v2905_v4  ;;  %v552_v36 = vsel %vm551_vm10, %v2183_v13, %v548_v5 }
 0x11a   :  { %v557_v45 = vsel %vm554_vm11, %v556_v37, %v552_v36 }
 0x11f   :  { %v2187_v41 = vpop.eup %2186 }
 0x120   :  { %v564_v46 = vmul.f32 %v2187_v41, %v557_v45 }
 0x122   :  { %648 = vmatmul.f32.vlgmr.msra.gmra.mxu0 %v564_v46  ;;  %668 = vmatmul.f32.vlgmr.msra.gmra.mxu1 %v564_v46 }
 0x123   :  { %688 = vmatmul.f32.vlgmr.msra.gmra.mxu2 %v564_v46  ;;  %708 = vmatmul.f32.vlgmr.msra.gmra.mxu3 %v564_v46 }
 0x19f   :  { %v649_v7 = vpop.f32.mrf.mxu0  ;;  %v669_v14 = vpop.f32.mrf.mxu1 }
 0x1a0   :  { %v712_v49 = vadd.f32 %v649_v7, %v2837_v10  ;;  %v713_v50 = vadd.f32 %v669_v14, %v2839_v11 }
 0x1a2   :  { %v2139_v54 = vmul.f32 -1.442695, %v712_v49  ;;  %v2140_v55 = vmul.f32 -1.442695, %v713_v50 }
 0x1a4   :  { %2188 = vpow2.f32 %v2139_v54 }
 0x1a5   :  { %2190 = vpow2.f32 %v2140_v55 }
 0x1a6   :  { %v709_v42 = vpop.f32.mrf.mxu3  ;;  %v689_v6 = vpop.f32.mrf.mxu2 }
 0x1a7   :  { %v715_v58 = vadd.f32 %v709_v42, %v2846_v18  ;;  %v714_v11 = vadd.f32 %v689_v6, %v2844_v17 }
 0x1a9   :  { %v2141_v59 = vmul.f32 -1.442695, %v715_v58 }
 0x1aa   :  { %v2189_v62 = vpop.eup %2188 }
 0x1ab   :  { %v2191_v63 = vpop.eup %2190  ;;  %v719_v52 = vadd.f32 1.0, %v2189_v62  ;;  %2192 = vpow2.f32 %v2141_v59 }
 0x1ac   :  { %v738_v13 = vadd.f32 1.0, %v2191_v63 }
 0x1ad   :  { %2194 = vrcp.f32 %v719_v52  ;;  %v731_v20 = vand.u32 2147483648, %v719_v52  ;;  %v729_v28 = vand.u32 2147483647, %v719_v52  ;;  %vm725_vm14 = vweird.f32 %v719_v52 }
 0x1ae   :  { %2196 = vrcp.f32 %v738_v13  ;;  %v750_v23 = vand.u32 2147483648, %v738_v13  ;;  %v748_v1 = vand.u32 2147483647, %v738_v13  ;;  %vm744_vm15 = vweird.f32 %v738_v13 }
 0x1af   :  { %v732_v17 = vor.u32 1.1754944e-38, %v731_v20  ;;  %vm730_vm2 = vcmp.eq.f32.partialorder %v729_v28, 8.507059e+37  ;;  %v2944_v20 = vld [vmem:[#allocation9 + $0x1b0] sm:$0xff]  ;;  %v2954_v28 = vld [vmem:[#allocation9 + $0x188] sm:$0xff] }
 0x1b0   :  { %v751_v36 = vor.u32 1.1754944e-38, %v750_v23  ;;  %vm749_vm3 = vcmp.eq.f32.partialorder %v748_v1, 8.507059e+37  ;;  %v2948_v23 = vld [vmem:[#allocation9 + $0x1b8] sm:$0xff]  ;;  %3675 = vst [vmem:[#allocation42_spill] sm:$0xff] %v2954_v28 }
 0x1b1   :  { %v2193_v12 = vpop.eup %2192  ;;  %v2960_v1 = vld [vmem:[#allocation9 + $0x198] sm:$0xff] }
 0x1b2   :  { %v758_v10 = vadd.f32 1.0, %v2193_v12  ;;  %v2918_v12 = vld [vmem:[#allocation9 + $0x1e8] sm:$0xff]  ;;  %3677 = vst [vmem:[#allocation44_spill] sm:$0xff] %v2960_v1 }
 0x1b3   :  { %v2195_v0 = vpop.eup %2194  ;;  %1082 = vmatpush.msra.mxu1 %v2918_v12 }
 0x1b4   :  { %v2197_v3 = vpop.eup %2196  ;;  %v721_v15 = vmul.f32 %v2195_v0, %v719_v52  ;;  %2198 = vrcp.f32 %v758_v10  ;;  %vm726_vm12 = vweird.f32 %v2195_v0  ;;  %v770_v58 = vand.u32 2147483648, %v758_v10 }
 0x1b5   :  { %v740_v16 = vmul.f32 %v2197_v3, %v738_v13  ;;  %2200 = vtanh.f32 %v714_v11  ;;  %vm745_vm13 = vweird.f32 %v2197_v3  ;;  %vm727_vm0 = vmor %vm725_vm14, %vm726_vm12  ;;  %vm764_vm5 = vweird.f32 %v758_v10  ;;  %v2928_v11 = vld [vmem:[#allocation9 + $0x1c0] sm:$0xff] }
 0x1b6   :  { %v722_v19 = vsub.f32 1.0, %v721_v15  ;;  %vm746_vm1 = vmor %vm744_vm15, %vm745_vm13  ;;  %v768_v59 = vand.u32 2147483647, %v758_v10  ;;  %v771_v63 = vor.u32 1.1754944e-38, %v770_v58  ;;  %3672 = vst [vmem:[#allocation39_spill] sm:$0xff] %v2928_v11  ;;  %v2932_v15 = vld [vmem:[#allocation9 + $0x1d0] sm:$0xff] }
 0x1b7   :  { %v741_v18 = vsub.f32 1.0, %v740_v16  ;;  %3673 = vst [vmem:[#allocation40_spill] sm:$0xff] %v2932_v15  ;;  %v2936_v16 = vld [vmem:[#allocation9 + $0x1d8] sm:$0xff]  ;;  %v3012_v58 = vld [vmem:[#allocation9 + $0xe0] sm:$0xff] }
 0x1b8   :  { %v723_v24 = vmul.f32 %v2195_v0, %v722_v19  ;;  %vm769_vm7 = vcmp.eq.f32.partialorder %v768_v59, 8.507059e+37  ;;  %3674 = vst [vmem:[#allocation41_spill] sm:$0xff] %v2936_v16  ;;  %v2940_v19 = vld [vmem:[#allocation9 + $0x1a0] sm:$0xff]  ;;  %v3014_v59 = vld [vmem:[#allocation9 + $0xe8] sm:$0xff] }
 0x1b9   :  { %v742_v29 = vmul.f32 %v2197_v3, %v741_v18  ;;  %v2942_v18 = vld [vmem:[#allocation9 + $0x1a8] sm:$0xff] }
 0x1ba   :  { %v2199_v2 = vpop.eup %2198  ;;  %v724_v5 = vadd.f32 %v2195_v0, %v723_v24  ;;  %v2952_v24 = vld [vmem:[#allocation9 + $0x180] sm:$0xff] }
 0x1bb   :  { %v743_v32 = vadd.f32 %v2197_v3, %v742_v29  ;;  %v760_v33 = vmul.f32 %v2199_v2, %v758_v10  ;;  %v2201_v41 = vpop.eup %2200  ;;  %vm765_vm4 = vweird.f32 %v2199_v2  ;;  %v2924_v10 = vld [vmem:[#allocation9 + $0x1f8] sm:$0xff]  ;;  %v2956_v29 = vld [vmem:[#allocation9 + $0x190] sm:$0xff] }
 0x1bc   :  { %v728_v37 = vsel %vm727_vm0, %v2195_v0, %v724_v5  ;;  %vm766_vm6 = vmor %vm764_vm5, %vm765_vm4  ;;  %v2920_v0 = vld [vmem:[#allocation9 + $0x1f0] sm:$0xff]  ;;  %3671 = vst [vmem:[#allocation38_spill] sm:$0xff] %v2924_v10  ;;  %1122 = vmatpush.msra.mxu3 %v2924_v10  ;;  %v2966_v5 = vld [vmem:[#allocation9 + $0x168] sm:$0xff] }
 0x1bd   :  { %v733_v45 = vsel %vm730_vm2, %v732_v17, %v728_v37  ;;  %v747_v46 = vsel %vm746_vm1, %v2197_v3, %v743_v32  ;;  %v761_v7 = vsub.f32 1.0, %v760_v33  ;;  %1102 = vmatpush.msra.mxu2 %v2920_v0  ;;  %v2930_v3 = vld [vmem:[#allocation9 + $0x1c8] sm:$0xff]  ;;  %3676 = vst [vmem:[#allocation43_spill] sm:$0xff] %v2956_v29  ;;  %v2968_v17 = vld [vmem:[#allocation9 + $0x170] sm:$0xff]  ;;  %v2972_v32 = vld [vmem:[#allocation9 + $0x178] sm:$0xff] }
 0x1be   :  { %v752_v14 = vsel %vm749_vm3, %v751_v36, %v747_v46  ;;  %v776_v49 = vmul.f32 %v2201_v41, %v733_v45  ;;  %1083 = vmatpush.msra.mxu1 %v2930_v3  ;;  %1123 = vmatpush.msra.mxu3 %v2936_v16  ;;  %v2976_v33 = vld [vmem:[#allocation9 + $0x140] sm:$0xff]  ;;  %v2978_v36 = vld [vmem:[#allocation9 + $0x148] sm:$0xff]  ;;  %v2980_v37 = vld [vmem:[#allocation9 + $0x150] sm:$0xff] }
 0x1bf   :  { %v775_v50 = vmul.f32 %v752_v14, %v2905_v4  ;;  %v762_v54 = vmul.f32 %v2199_v2, %v761_v7  ;;  %v2916_v4 = vld [vmem:[#allocation9 + $0x1e0] sm:$0xff]  ;;  %1103 = vmatpush.msra.mxu2 %v2932_v15  ;;  %3679 = vst [vmem:[#allocation46_spill] sm:$0xff] %v2978_v36  ;;  %v2984_v41 = vld [vmem:[#allocation9 + $0x158] sm:$0xff]  ;;  %v2990_v46 = vld [vmem:[#allocation9 + $0x128] sm:$0xff] }
 0x1c0   :  { %1062 = vmatpush.msra.mxu0 %v2916_v4  ;;  %1084 = vmatpush.msra.mxu1 %v2942_v18  ;;  %v2988_v45 = vld [vmem:[#allocation9 + $0x120] sm:$0xff]  ;;  %v2992_v7 = vld [vmem:[#allocation9 + $0x130] sm:$0xff]  ;;  %v2996_v14 = vld [vmem:[#allocation9 + $0x138] sm:$0xff] }
 0x1c1   :  { %v2913_v55 = vadd.f32 %v776_v49, %v775_v50  ;;  %v763_v42 = vadd.f32 %v2199_v2, %v762_v54  ;;  %1104 = vmatpush.msra.mxu2 %v2944_v20  ;;  %1124 = vmatpush.msra.mxu3 %v2948_v23  ;;  %3680 = vst [vmem:[#allocation47_spill] sm:$0xff] %v2988_v45  ;;  %v3000_v49 = vld [vmem:[#allocation9 + $0x100] sm:$0xff]  ;;  %v3002_v50 = vld [vmem:[#allocation9 + $0x108] sm:$0xff]  ;;  %v3004_v54 = vld [vmem:[#allocation9 + $0x110] sm:$0xff] }
 0x1c2   :  { %1063 = vmatpush.msra.mxu0 %v2928_v11  ;;  %1085 = vmatpush.msra.mxu1 %v2954_v28  ;;  %3681 = vst [vmem:[#allocation48_spill] sm:$0xff] %v2996_v14 }
 0x1c3   :  { %2202 = vtanh.f32 %v2913_v55  ;;  %v767_v62 = vsel %vm766_vm6, %v2199_v2, %v763_v42  ;;  %1105 = vmatpush.msra.mxu2 %v2956_v29  ;;  %1125 = vmatpush.msra.mxu3 %v2960_v1  ;;  %v2964_v2 = vld [vmem:[#allocation9 + $0x160] sm:$0xff]  ;;  %3682 = vst [vmem:[#allocation49_spill] sm:$0xff] %v3000_v49  ;;  %v3008_v42 = vld [vmem:[#allocation9 + $0x118] sm:$0xff] }
 0x1c4   :  { %v772_v13 = vsel %vm769_vm7, %v771_v63, %v767_v62  ;;  %1064 = vmatpush.msra.mxu0 %v2940_v19  ;;  %3678 = vst [vmem:[#allocation45_spill] sm:$0xff] %v2964_v2  ;;  %1086 = vmatpush.msra.mxu1 %v2966_v5  ;;  %v3016_v62 = vld [vmem:[#allocation9 + $0xf0] sm:$0xff]  ;;  %v3020_v63 = vld [vmem:[#allocation9 + $0xf8] sm:$0xff] }
 0x1c5   :  { %1106 = vmatpush.msra.mxu2 %v2968_v17  ;;  %1126 = vmatpush.msra.mxu3 %v2972_v32  ;;  %3683 = vst [vmem:[#allocation50_spill] sm:$0xff] %v3002_v50 }
 0x1c6   :  { %1065 = vmatpush.msra.mxu0 %v2952_v24  ;;  %1087 = vmatpush.msra.mxu1 %v2978_v36 }
 0x1c7   :  { %1107 = vmatpush.msra.mxu2 %v2980_v37  ;;  %1127 = vmatpush.msra.mxu3 %v2984_v41 }
 0x1c8   :  { %1066 = vmatpush.msra.mxu0 %v2964_v2  ;;  %1088 = vmatpush.msra.mxu1 %v2990_v46 }
 0x1c9   :  { %v2203_v52 = vpop.eup %2202  ;;  %1108 = vmatpush.msra.mxu2 %v2992_v7  ;;  %1128 = vmatpush.msra.mxu3 %v2996_v14 }
 0x1ca   :  { %v779_v6 = vmul.f32 %v2203_v52, %v772_v13  ;;  %1067 = vmatpush.msra.mxu0 %v2976_v33  ;;  %1089 = vmatpush.msra.mxu1 %v3002_v50  ;;  %v3024_v52 = vld [vmem:[#allocation9 + $0xc0] sm:$0xff]  ;;  %v3026_v13 = vld [vmem:[#allocation9 + $0xc8] sm:$0xff] }
 0x1cb   :  { %1109 = vmatpush.msra.mxu2 %v3004_v54  ;;  %1129 = vmatpush.msra.mxu3 %v3008_v42 }
 0x1cc   :  { %863 = vmatmul.f32.vlgmr.msrb.gmra.mxu0 %v779_v6  ;;  %883 = vmatmul.f32.vlgmr.msrb.gmra.mxu1 %v779_v6 }
 0x1cd   :  { %903 = vmatmul.f32.vlgmr.msrb.gmra.mxu2 %v779_v6  ;;  %923 = vmatmul.f32.vlgmr.msrb.gmra.mxu3 %v779_v6  ;;  %v3028_v6 = vld [vmem:[#allocation9 + $0xd0] sm:$0xff] }
 0x1ce   :  { %1068 = vmatpush.msra.mxu0 %v2988_v45  ;;  %1090 = vmatpush.msra.mxu1 %v3014_v59 }
 0x1cf   :  { %1110 = vmatpush.msra.mxu2 %v3016_v62  ;;  %1130 = vmatpush.msra.mxu3 %v3020_v63 }
 0x1d0   :  { %1069 = vmatpush.msra.mxu0 %v3000_v49  ;;  %1091 = vmatpush.msra.mxu1 %v3026_v13 }
 0x1d1   :  { %1111 = vmatpush.msra.mxu2 %v3028_v6  ;;  %1131 = vmatpush.msra.mxu3 %v3032_v39 }
 0x1d2   :  { %1070 = vmatpush.msra.mxu0 %v3012_v58  ;;  %1092 = vmatpush.msra.mxu1 %v3040_v57 }
 0x1d3   :  { %1112 = vmatpush.msra.mxu2 %v3042_v56  ;;  %1132 = vmatpush.msra.mxu3 %v3046_v51 }
 0x1d4   :  { %1071 = vmatpush.msra.mxu0 %v3024_v52 }
 0x1d5   :  { %1133 = vmatpush.msra.mxu3 %v3058_v48 }
 0x1d6   :  { %1072 = vmatpush.msra.mxu0 %v3038_v61 }
 0x1d7   :  { %1134 = vmatpush.msra.mxu3 %v3068_v43  ;;  %v3095_v43 = vld [vmem:[#allocation9] sm:$0xff] }
 0x1d9   :  { %1135 = vmatpush.msra.mxu3 %v3080_v34 }
 0x249   :  { %v864_v8 = vpop.f32.mrf.mxu0  ;;  %v884_v9 = vpop.f32.mrf.mxu1 }
 0x24a   :  { %v927_v26 = vadd.f32 %v864_v8, %v2848_v21  ;;  %v928_v60 = vadd.f32 %v884_v9, %v2850_v22  ;;  %v3050_v22 = vld [vmem:[#allocation9 + $0x80] sm:$0xff]  ;;  %v3052_v8 = vld [vmem:[#allocation9 + $0x88] sm:$0xff]  ;;  %v3056_v9 = vld [vmem:[#allocation9 + $0x90] sm:$0xff] }
 0x24b   :  { %1073 = vmatpush.msra.mxu0 %v3050_v22  ;;  %1093 = vmatpush.msra.mxu1 %v3052_v8 }
 0x24c   :  { %v2142_v53 = vmul.f32 -1.442695, %v927_v26  ;;  %v2143_v21 = vmul.f32 -1.442695, %v928_v60  ;;  %1113 = vmatpush.msra.mxu2 %v3056_v9  ;;  %v3064_v60 = vld [vmem:[#allocation9 + $0x68] sm:$0xff]  ;;  %v3066_v26 = vld [vmem:[#allocation9 + $0x70] sm:$0xff] }
 0x24d   :  { %3685 = vst [vmem:[#allocation52_spill] sm:$0xff] %v3064_v60  ;;  %1074 = vmatpush.msra.mxu0 %v3060_v47  ;;  %1094 = vmatpush.msra.mxu1 %v3064_v60  ;;  %v3091_v60 = vld [vmem:[#allocation9 + $0x38] sm:$0xff] }
 0x24e   :  { %2204 = vpow2.f32 %v2142_v53  ;;  %3686 = vst [vmem:[#allocation53_spill] sm:$0xff] %v3066_v26  ;;  %v3076_v53 = vld [vmem:[#allocation9 + $0x50] sm:$0xff]  ;;  %1114 = vmatpush.msra.mxu2 %v3066_v26  ;;  %v3097_v26 = vld [vmem:[#allocation9 + $0x8] sm:$0xff]  ;;  %1136 = vmatpush.msra.mxu3 %v3091_v60 }
 0x24f   :  { %2206 = vpow2.f32 %v2143_v21  ;;  %3689 = vst [vmem:[#allocation56_spill] sm:$0xff] %v3076_v53  ;;  %v3084_v21 = vld [vmem:[#allocation9 + $0x28] sm:$0xff]  ;;  %1075 = vmatpush.msra.mxu0 %v3072_v44  ;;  %1095 = vmatpush.msra.mxu1 %v3074_v40 }
 0x250   :  { %v924_v38 = vpop.f32.mrf.mxu3  ;;  %1115 = vmatpush.msra.mxu2 %v3076_v53 }
 0x251   :  { %v930_v31 = vadd.f32 %v924_v38, %v2855_v27  ;;  %1076 = vmatpush.msra.mxu0 %v3082_v35  ;;  %1096 = vmatpush.msra.mxu1 %v3084_v21  ;;  %v3101_v27 = vld [vmem:[#allocation9 + $0x10] sm:$0xff]  ;;  %v3103_v38 = vld [vmem:[#allocation9 + $0x18] sm:$0xff] }
 0x252   :  { %1116 = vmatpush.msra.mxu2 %v3089_v30  ;;  %1137 = vmatpush.msra.mxu3 %v3103_v38 }
 0x253   :  { %v2144_v47 = vmul.f32 -1.442695, %v930_v31  ;;  %1077 = vmatpush.msra.mxu0 %v3095_v43  ;;  %1097 = vmatpush.msra.mxu1 %v3097_v26 }
 0x254   :  { %v2205_v40 = vpop.eup %2204  ;;  %1117 = vmatpush.msra.mxu2 %v3101_v27  ;;  %1337 = vmatpush.msrb.mxu3 %v2924_v10 }
 0x255   :  { %v2207_v53 = vpop.eup %2206  ;;  %v3107_v34 = vadd.f32 1.0, %v2205_v40  ;;  %2208 = vpow2.f32 %v2144_v47  ;;  %1277 = vmatpush.msrb.mxu0 %v2916_v4  ;;  %1297 = vmatpush.msrb.mxu1 %v2918_v12  ;;  %v904_v40 = vpop.f32.mrf.mxu2 }
 0x256   :  { %v3111_v31 = vadd.f32 1.0, %v2207_v53  ;;  %1317 = vmatpush.msrb.mxu2 %v2920_v0  ;;  %1338 = vmatpush.msrb.mxu3 %v2936_v16 }
 0x257   :  { %2210 = vrcp.f32 %v3107_v34  ;;  %1278 = vmatpush.msrb.mxu0 %v2928_v11  ;;  %1298 = vmatpush.msrb.mxu1 %v2930_v3  ;;  %v929_v11 = vadd.f32 %v904_v40, %v2853_v25  ;;  %vm940_vm10 = vweird.f32 %v3107_v34 }
 0x258   :  { %2212 = vrcp.f32 %v3111_v31  ;;  %1318 = vmatpush.msrb.mxu2 %v2932_v15  ;;  %1339 = vmatpush.msrb.mxu3 %v2948_v23  ;;  %vm959_vm11 = vweird.f32 %v3111_v31 }
 0x259   :  { %1279 = vmatpush.msrb.mxu0 %v2940_v19  ;;  %1299 = vmatpush.msrb.mxu1 %v2942_v18 }
 0x25a   :  { %1319 = vmatpush.msrb.mxu2 %v2944_v20  ;;  %1340 = vmatpush.msrb.mxu3 %v2960_v1  ;;  %v965_v1 = vand.u32 2147483648, %v3111_v31 }
 0x25b   :  { %v2209_v47 = vpop.eup %2208  ;;  %1280 = vmatpush.msrb.mxu0 %v2952_v24  ;;  %1300 = vmatpush.msrb.mxu1 %v2954_v28  ;;  %v946_v28 = vand.u32 2147483648, %v3107_v34 }
 0x25c   :  { %v3127_v53 = vadd.f32 1.0, %v2209_v47  ;;  %1320 = vmatpush.msrb.mxu2 %v2956_v29  ;;  %1341 = vmatpush.msrb.mxu3 %v2972_v32 }
 0x25d   :  { %v2211_v10 = vpop.eup %2210  ;;  %1281 = vmatpush.msrb.mxu0 %v2964_v2  ;;  %1301 = vmatpush.msrb.mxu1 %v2966_v5  ;;  %v944_v2 = vand.u32 2147483647, %v3107_v34 }
 0x25e   :  { %v2213_v15 = vpop.eup %2212  ;;  %v936_v16 = vmul.f32 %v2211_v10, %v3107_v34  ;;  %2214 = vrcp.f32 %v3127_v53  ;;  %1321 = vmatpush.msrb.mxu2 %v2968_v17  ;;  %vm941_vm8 = vweird.f32 %v2211_v10  ;;  %1342 = vmatpush.msrb.mxu3 %v2984_v41  ;;  %v966_v34 = vor.u32 1.1754944e-38, %v965_v1 }
 0x25f   :  { %v955_v47 = vmul.f32 %v2213_v15, %v3111_v31  ;;  %2216 = vtanh.f32 %v929_v11  ;;  %1282 = vmatpush.msrb.mxu0 %v2976_v33  ;;  %1302 = vmatpush.msrb.mxu1 %v2978_v36  ;;  %vm960_vm9 = vweird.f32 %v2213_v15  ;;  %vm942_vm12 = vmor %vm940_vm10, %vm941_vm8  ;;  %vm945_vm14 = vcmp.eq.f32.partialorder %v944_v2, 8.507059e+37 }
 0x260   :  { %v937_v25 = vsub.f32 1.0, %v936_v16  ;;  %1322 = vmatpush.msrb.mxu2 %v2980_v37  ;;  %1343 = vmatpush.msrb.mxu3 %v2996_v14  ;;  %vm961_vm13 = vmor %vm959_vm11, %vm960_vm9  ;;  %vm979_vm1 = vweird.f32 %v3127_v53 }
 0x261   :  { %v956_v40 = vsub.f32 1.0, %v955_v47  ;;  %v963_v47 = vand.u32 2147483647, %v3111_v31  ;;  %1283 = vmatpush.msrb.mxu0 %v2988_v45  ;;  %1303 = vmatpush.msrb.mxu1 %v2990_v46 }
 0x262   :  { %v938_v29 = vmul.f32 %v2211_v10, %v937_v25  ;;  %1323 = vmatpush.msrb.mxu2 %v2992_v7  ;;  %v947_v25 = vor.u32 1.1754944e-38, %v946_v28  ;;  %1344 = vmatpush.msrb.mxu3 %v3008_v42 }
 0x263   :  { %v957_v16 = vmul.f32 %v2213_v15, %v956_v40  ;;  %1284 = vmatpush.msrb.mxu0 %v3000_v49  ;;  %1304 = vmatpush.msrb.mxu1 %v3002_v50  ;;  %vm964_vm15 = vcmp.eq.f32.partialorder %v963_v47, 8.507059e+37  ;;  %v3694_v47 = vld [vmem:[#allocation54_spill] sm:$0xff] }
 0x264   :  { %v3153_v11 = vpop.eup %2214  ;;  %v939_v36 = vadd.f32 %v2211_v10, %v938_v29  ;;  %1324 = vmatpush.msrb.mxu2 %v3004_v54  ;;  %1345 = vmatpush.msrb.mxu3 %v3020_v63 }
 0x265   :  { %v958_v40 = vadd.f32 %v2213_v15, %v957_v16  ;;  %v975_v45 = vmul.f32 %v3153_v11, %v3127_v53  ;;  %v2217_v31 = vpop.eup %2216  ;;  %1285 = vmatpush.msrb.mxu0 %v3012_v58  ;;  %1305 = vmatpush.msrb.mxu1 %v3014_v59  ;;  %vm980_vm0 = vweird.f32 %v3153_v11 }
 0x266   :  { %v943_v29 = vsel %vm942_vm12, %v2211_v10, %v939_v36  ;;  %1325 = vmatpush.msrb.mxu2 %v3016_v62  ;;  %1346 = vmatpush.msrb.mxu3 %v3032_v39  ;;  %v983_v36 = vand.u32 2147483647, %v3127_v53  ;;  %vm981_vm2 = vmor %vm979_vm1, %vm980_vm0 }
 0x267   :  { %v948_v14 = vsel %vm945_vm14, %v947_v25, %v943_v29  ;;  %v962_v28 = vsel %vm961_vm13, %v2213_v15, %v958_v40  ;;  %v976_v16 = vsub.f32 1.0, %v975_v45  ;;  %1286 = vmatpush.msrb.mxu0 %v3024_v52  ;;  %1306 = vmatpush.msrb.mxu1 %v3026_v13  ;;  %v3691_v45 = vld [vmem:[#allocation51_spill] sm:$0xff] }
 0x268   :  { %v967_v49 = vsel %vm964_vm15, %v966_v34, %v962_v28  ;;  %v991_v50 = vmul.f32 %v2217_v31, %v948_v14  ;;  %1326 = vmatpush.msrb.mxu2 %v3028_v6  ;;  %1347 = vmatpush.msrb.mxu3 %v3046_v51  ;;  %v3692_v14 = vld [vmem:[#allocation52_spill] sm:$0xff]  ;;  %v3695_v40 = vld [vmem:[#allocation55_spill] sm:$0xff]  ;;  %vm984_vm3 = vcmp.eq.f32.partialorder %v983_v36, 8.507059e+37  ;;  %v3697_v34 = vld [vmem:[#allocation57_spill] sm:$0xff] }
 0x269   :  { %v990_v10 = vmul.f32 %v967_v49, %v2913_v55  ;;  %v977_v1 = vmul.f32 %v3153_v11, %v976_v16  ;;  %1287 = vmatpush.msrb.mxu0 %v3038_v61  ;;  %1307 = vmatpush.msrb.mxu1 %v3040_v57  ;;  %v985_v55 = vand.u32 2147483648, %v3127_v53  ;;  %v3696_v53 = vld [vmem:[#allocation56_spill] sm:$0xff]  ;;  %v3698_v28 = vld [vmem:[#allocation38_spill] sm:$0xff]  ;;  %v3699_v16 = vld [vmem:[#allocation39_spill] sm:$0xff] }
 0x26a   :  { %1327 = vmatpush.msrb.mxu2 %v3042_v56  ;;  %1348 = vmatpush.msrb.mxu3 %v3058_v48 }
 0x26b   :  { %v3177_v15 = vadd.f32 %v991_v50, %v990_v10  ;;  %v978_v2 = vadd.f32 %v3153_v11, %v977_v1  ;;  %1288 = vmatpush.msrb.mxu0 %v3050_v22  ;;  %1308 = vmatpush.msrb.mxu1 %v3052_v8  ;;  %v3693_v50 = vld [vmem:[#allocation53_spill] sm:$0xff]  ;;  %v986_v25 = vor.u32 1.1754944e-38, %v985_v55  ;;  %v3700_v10 = vld [vmem:[#allocation40_spill] sm:$0xff] }
 0x26c   :  { %1328 = vmatpush.msrb.mxu2 %v3056_v9  ;;  %1349 = vmatpush.msrb.mxu3 %v3694_v47  ;;  %v3701_v1 = vld [vmem:[#allocation41_spill] sm:$0xff] }
 0x26d   :  { %2218 = vtanh.f32 %v3177_v15  ;;  %1289 = vmatpush.msrb.mxu0 %v3691_v45  ;;  %1309 = vmatpush.msrb.mxu1 %v3692_v14  ;;  %v982_v49 = vsel %vm981_vm2, %v3153_v11, %v978_v2 }
 0x26e   :  { %1329 = vmatpush.msrb.mxu2 %v3693_v50  ;;  %1350 = vmatpush.msrb.mxu3 %v3697_v34  ;;  %v987_v31 = vsel %vm984_vm3, %v986_v25, %v982_v49 }
 0x26f   :  { %1290 = vmatpush.msrb.mxu0 %v3072_v44  ;;  %1310 = vmatpush.msrb.mxu1 %v3695_v40 }
 0x270   :  { %1330 = vmatpush.msrb.mxu2 %v3696_v53  ;;  %1351 = vmatpush.msrb.mxu3 %v3091_v60 }
 0x271   :  { %1291 = vmatpush.msrb.mxu0 %v3082_v35  ;;  %1311 = vmatpush.msrb.mxu1 %v3084_v21 }
 0x272   :  { %1331 = vmatpush.msrb.mxu2 %v3089_v30  ;;  %1352 = vmatpush.msrb.mxu3 %v3103_v38 }
 0x273   :  { %v2219_v29 = vpop.eup %2218  ;;  %1292 = vmatpush.msrb.mxu0 %v3095_v43  ;;  %1312 = vmatpush.msrb.mxu1 %v3097_v26 }
 0x274   :  { %v994_v11 = vmul.f32 %v2219_v29, %v987_v31  ;;  %1332 = vmatpush.msrb.mxu2 %v3101_v27 }
 0x276   :  { %1078 = vmatmul.f32.vlgmr.msra.gmra.mxu0 %v994_v11  ;;  %1098 = vmatmul.f32.vlgmr.msra.gmra.mxu1 %v994_v11 }
 0x277   :  { %1118 = vmatmul.f32.vlgmr.msra.gmra.mxu2 %v994_v11  ;;  %1138 = vmatmul.f32.vlgmr.msra.gmra.mxu3 %v994_v11 }
 0x278   :  { %1492 = vmatpush.msra.mxu0 %v2916_v4  ;;  %1512 = vmatpush.msra.mxu1 %v2918_v12  ;;  %v3702_v4 = vld [vmem:[#allocation42_spill] sm:$0xff]  ;;  %v3703_v12 = vld [vmem:[#allocation43_spill] sm:$0xff] }
 0x279   :  { %1532 = vmatpush.msra.mxu2 %v2920_v0  ;;  %1552 = vmatpush.msra.mxu3 %v3698_v28  ;;  %v3704_v0 = vld [vmem:[#allocation44_spill] sm:$0xff] }
 0x27a   :  { %1493 = vmatpush.msra.mxu0 %v3699_v16  ;;  %1513 = vmatpush.msra.mxu1 %v2930_v3  ;;  %v3705_v3 = vld [vmem:[#allocation45_spill] sm:$0xff] }
 0x27b   :  { %1533 = vmatpush.msra.mxu2 %v3700_v10  ;;  %1553 = vmatpush.msra.mxu3 %v3701_v1 }
 0x27c   :  { %1494 = vmatpush.msra.mxu0 %v2940_v19  ;;  %1514 = vmatpush.msra.mxu1 %v2942_v18  ;;  %v3706_v19 = vld [vmem:[#allocation46_spill] sm:$0xff]  ;;  %v3707_v18 = vld [vmem:[#allocation47_spill] sm:$0xff] }
 0x27d   :  { %1534 = vmatpush.msra.mxu2 %v2944_v20  ;;  %1554 = vmatpush.msra.mxu3 %v2948_v23  ;;  %v3708_v20 = vld [vmem:[#allocation48_spill] sm:$0xff]  ;;  %v3709_v23 = vld [vmem:[#allocation49_spill] sm:$0xff] }
 0x27e   :  { %1495 = vmatpush.msra.mxu0 %v2952_v24  ;;  %1515 = vmatpush.msra.mxu1 %v3702_v4  ;;  %v3710_v24 = vld [vmem:[#allocation50_spill] sm:$0xff] }
 0x27f   :  { %1535 = vmatpush.msra.mxu2 %v3703_v12  ;;  %1555 = vmatpush.msra.mxu3 %v3704_v0 }
 0x280   :  { %1496 = vmatpush.msra.mxu0 %v3705_v3  ;;  %1516 = vmatpush.msra.mxu1 %v2966_v5  ;;  %v3713_v5 = vld [vmem:[#allocation21_spill] sm:$0xff] }
 0x281   :  { %1536 = vmatpush.msra.mxu2 %v2968_v17  ;;  %1556 = vmatpush.msra.mxu3 %v2972_v32 }
 0x282   :  { %1497 = vmatpush.msra.mxu0 %v2976_v33  ;;  %1517 = vmatpush.msra.mxu1 %v3706_v19  ;;  %v3715_v19 = vld [vmem:[#allocation22_spill] sm:$0xff] }
 0x283   :  { %1537 = vmatpush.msra.mxu2 %v2980_v37  ;;  %1557 = vmatpush.msra.mxu3 %v2984_v41 }
 0x284   :  { %1498 = vmatpush.msra.mxu0 %v3707_v18  ;;  %1518 = vmatpush.msra.mxu1 %v2990_v46 }
 0x285   :  { %1538 = vmatpush.msra.mxu2 %v2992_v7  ;;  %1558 = vmatpush.msra.mxu3 %v3708_v20  ;;  %v3716_v20 = vld [vmem:[#allocation23_spill] sm:$0xff] }
 0x286   :  { %1499 = vmatpush.msra.mxu0 %v3709_v23  ;;  %1519 = vmatpush.msra.mxu1 %v3710_v24 }
 0x287   :  { %1539 = vmatpush.msra.mxu2 %v3004_v54  ;;  %1559 = vmatpush.msra.mxu3 %v3008_v42 }
 0x288   :  { %1500 = vmatpush.msra.mxu0 %v3012_v58  ;;  %1520 = vmatpush.msra.mxu1 %v3014_v59  ;;  %v3714_v58 = vld [vmem:[#allocation20_spill] sm:$0xff] }
 0x289   :  { %1540 = vmatpush.msra.mxu2 %v3016_v62  ;;  %1560 = vmatpush.msra.mxu3 %v3020_v63 }
 0x28a   :  { %1501 = vmatpush.msra.mxu0 %v3024_v52  ;;  %1521 = vmatpush.msra.mxu1 %v3026_v13 }
 0x28b   :  { %1541 = vmatpush.msra.mxu2 %v3028_v6  ;;  %1561 = vmatpush.msra.mxu3 %v3032_v39 }
 0x28c   :  { %1502 = vmatpush.msra.mxu0 %v3038_v61  ;;  %1522 = vmatpush.msra.mxu1 %v3040_v57  ;;  %v3712_v57 = vld [vmem:[#allocation19_spill] sm:$0xff] }
 0x28d   :  { %1542 = vmatpush.msra.mxu2 %v3042_v56  ;;  %1562 = vmatpush.msra.mxu3 %v3046_v51  ;;  %v3711_v51 = vld [vmem:[#allocation18_spill] sm:$0xff] }
 0x28e   :  { %1503 = vmatpush.msra.mxu0 %v3050_v22  ;;  %1523 = vmatpush.msra.mxu1 %v3052_v8 }
 0x28f   :  { %1543 = vmatpush.msra.mxu2 %v3056_v9  ;;  %1563 = vmatpush.msra.mxu3 %v3058_v48 }
 0x290   :  { %1504 = vmatpush.msra.mxu0 %v3691_v45  ;;  %1524 = vmatpush.msra.mxu1 %v3692_v14 }
 0x291   :  { %1544 = vmatpush.msra.mxu2 %v3693_v50  ;;  %1564 = vmatpush.msra.mxu3 %v3694_v47 }
 0x292   :  { %1505 = vmatpush.msra.mxu0 %v3072_v44  ;;  %1525 = vmatpush.msra.mxu1 %v3695_v40 }
 0x293   :  { %1545 = vmatpush.msra.mxu2 %v3696_v53  ;;  %1565 = vmatpush.msra.mxu3 %v3697_v34 }
 0x294   :  { %1506 = vmatpush.msra.mxu0 %v3082_v35  ;;  %1526 = vmatpush.msra.mxu1 %v3084_v21 }
 0x295   :  { %1546 = vmatpush.msra.mxu2 %v3089_v30  ;;  %1566 = vmatpush.msra.mxu3 %v3091_v60 }
 0x296   :  { %1507 = vmatpush.msra.mxu0 %v3095_v43  ;;  %1527 = vmatpush.msra.mxu1 %v3097_v26 }
 0x297   :  { %1547 = vmatpush.msra.mxu2 %v3101_v27  ;;  %1567 = vmatpush.msra.mxu3 %v3103_v38 }
 0x2f3   :  { %v1079_v44 = vpop.f32.mrf.mxu0  ;;  %v1099_v48 = vpop.f32.mrf.mxu1 }
 0x2f4   :  { %v1142_v56 = vadd.f32 %v1079_v44, %v3711_v51  ;;  %v1143_v35 = vadd.f32 %v1099_v48, %v3712_v57  ;;  %v3717_v51 = vld [vmem:[#allocation25_spill] sm:$0xff] }
 0x2f6   :  { %v2145_v61 = vmul.f32 -1.442695, %v1142_v56  ;;  %v2146_v39 = vmul.f32 -1.442695, %v1143_v35 }
 0x2f8   :  { %2220 = vpow2.f32 %v2145_v61 }
 0x2f9   :  { %2222 = vpow2.f32 %v2146_v39 }
 0x2fa   :  { %v1139_v30 = vpop.f32.mrf.mxu3  ;;  %v1119_v46 = vpop.f32.mrf.mxu2 }
 0x2fb   :  { %v1145_v17 = vadd.f32 %v1139_v30, %v3713_v5  ;;  %v1144_v59 = vadd.f32 %v1119_v46, %v3714_v58 }
 0x2fd   :  { %v2147_v43 = vmul.f32 -1.442695, %v1145_v17 }
 0x2fe   :  { %v2221_v32 = vpop.eup %2220 }
 0x2ff   :  { %v2223_v33 = vpop.eup %2222  ;;  %v1149_v37 = vadd.f32 1.0, %v2221_v32  ;;  %2224 = vpow2.f32 %v2147_v43 }
 0x300   :  { %v1168_v41 = vadd.f32 1.0, %v2223_v33  ;;  %v3718_v33 = vld [vmem:[#allocation24_spill] sm:$0xff] }
 0x301   :  { %2226 = vrcp.f32 %v1149_v37  ;;  %v1161_v22 = vand.u32 2147483648, %v1149_v37  ;;  %v1159_v60 = vand.u32 2147483647, %v1149_v37  ;;  %vm1155_vm6 = vweird.f32 %v1149_v37 }
 0x302   :  { %2228 = vrcp.f32 %v1168_v41  ;;  %v1180_v8 = vand.u32 2147483648, %v1168_v41  ;;  %v1178_v21 = vand.u32 2147483647, %v1168_v41  ;;  %vm1174_vm7 = vweird.f32 %v1168_v41 }
 0x303   :  { %v1162_v2 = vor.u32 1.1754944e-38, %v1161_v22  ;;  %vm1160_vm10 = vcmp.eq.f32.partialorder %v1159_v60, 8.507059e+37 }
 0x304   :  { %v1181_v45 = vor.u32 1.1754944e-38, %v1180_v8  ;;  %vm1179_vm11 = vcmp.eq.f32.partialorder %v1178_v21, 8.507059e+37 }
 0x305   :  { %v2225_v7 = vpop.eup %2224 }
 0x306   :  { %v1188_v54 = vadd.f32 1.0, %v2225_v7 }
 0x307   :  { %v2227_v42 = vpop.eup %2226 }
 0x308   :  { %v2229_v62 = vpop.eup %2228  ;;  %v1151_v63 = vmul.f32 %v2227_v42, %v1149_v37  ;;  %2230 = vrcp.f32 %v1188_v54  ;;  %vm1156_vm4 = vweird.f32 %v2227_v42  ;;  %v1200_v28 = vand.u32 2147483648, %v1188_v54 }
 0x309   :  { %v1170_v52 = vmul.f32 %v2229_v62, %v1168_v41  ;;  %2232 = vtanh.f32 %v1144_v59  ;;  %vm1175_vm5 = vweird.f32 %v2229_v62  ;;  %vm1157_vm8 = vmor %vm1155_vm6, %vm1156_vm4  ;;  %vm1194_vm13 = vweird.f32 %v1188_v54 }
 0x30a   :  { %v1152_v13 = vsub.f32 1.0, %v1151_v63  ;;  %vm1176_vm9 = vmor %vm1174_vm7, %vm1175_vm5  ;;  %v1198_v16 = vand.u32 2147483647, %v1188_v54  ;;  %v1201_v1 = vor.u32 1.1754944e-38, %v1200_v28 }
 0x30b   :  { %v1171_v6 = vsub.f32 1.0, %v1170_v52 }
 0x30c   :  { %v1153_v9 = vmul.f32 %v2227_v42, %v1152_v13  ;;  %vm1199_vm15 = vcmp.eq.f32.partialorder %v1198_v16, 8.507059e+37  ;;  %v3292_v16 = vld [vmem:[#allocation9 + $0x1e8] sm:$0xff] }
 0x30d   :  { %v1172_v26 = vmul.f32 %v2229_v62, %v1171_v6 }
 0x30e   :  { %v2231_v27 = vpop.eup %2230  ;;  %v1154_v38 = vadd.f32 %v2227_v42, %v1153_v9 }
 0x30f   :  { %v1173_v55 = vadd.f32 %v2229_v62, %v1172_v26  ;;  %v1190_v36 = vmul.f32 %v2231_v27, %v1188_v54  ;;  %v2233_v49 = vpop.eup %2232  ;;  %vm1195_vm12 = vweird.f32 %v2231_v27 }
 0x310   :  { %v1158_v14 = vsel %vm1157_vm8, %v2227_v42, %v1154_v38  ;;  %vm1196_vm14 = vmor %vm1194_vm13, %vm1195_vm12 }
 0x311   :  { %v1163_v50 = vsel %vm1160_vm10, %v1162_v2, %v1158_v14  ;;  %v1177_v47 = vsel %vm1176_vm9, %v2229_v62, %v1173_v55  ;;  %v1191_v25 = vsub.f32 1.0, %v1190_v36 }
 0x312   :  { %v1182_v40 = vsel %vm1179_vm11, %v1181_v45, %v1177_v47  ;;  %v1206_v53 = vmul.f32 %v2233_v49, %v1163_v50 }
 0x313   :  { %v1205_v34 = vmul.f32 %v1182_v40, %v3177_v15  ;;  %v1192_v29 = vmul.f32 %v2231_v27, %v1191_v25 }
 0x315   :  { %v3279_v31 = vadd.f32 %v1206_v53, %v1205_v34  ;;  %v1193_v11 = vadd.f32 %v2231_v27, %v1192_v29 }
 0x317   :  { %2234 = vtanh.f32 %v3279_v31  ;;  %v1197_v10 = vsel %vm1196_vm14, %v2231_v27, %v1193_v11 }
 0x318   :  { %v1202_v12 = vsel %vm1199_vm15, %v1201_v1, %v1197_v10  ;;  %v3294_v10 = vld [vmem:[#allocation9 + $0x1f0] sm:$0xff]  ;;  %v3298_v1 = vld [vmem:[#allocation9 + $0x1f8] sm:$0xff] }
 0x31d   :  { %v2235_v4 = vpop.eup %2234 }
 0x31e   :  { %v1209_v0 = vmul.f32 %v2235_v4, %v1202_v12  ;;  %v3302_v4 = vld [vmem:[#allocation9 + $0x1c0] sm:$0xff]  ;;  %v3304_v12 = vld [vmem:[#allocation9 + $0x1c8] sm:$0xff] }
 0x320   :  { %1293 = vmatmul.f32.vlgmr.msrb.gmra.mxu0 %v1209_v0  ;;  %1313 = vmatmul.f32.vlgmr.msrb.gmra.mxu1 %v1209_v0 }
 0x321   :  { %1333 = vmatmul.f32.vlgmr.msrb.gmra.mxu2 %v1209_v0  ;;  %1353 = vmatmul.f32.vlgmr.msrb.gmra.mxu3 %v1209_v0  ;;  %v3306_v0 = vld [vmem:[#allocation9 + $0x1d0] sm:$0xff] }
 0x322   :  { %1727 = vmatpush.msrb.mxu1 %v3292_v16  ;;  %1747 = vmatpush.msrb.mxu2 %v3294_v10 }
 0x323   :  { %1767 = vmatpush.msrb.mxu3 %v3298_v1 }
 0x324   :  { %1728 = vmatpush.msrb.mxu1 %v3304_v12  ;;  %1748 = vmatpush.msrb.mxu2 %v3306_v0 }
 0x39d   :  { %v1294_v15 = vpop.f32.mrf.mxu0  ;;  %v1314_v3 = vpop.f32.mrf.mxu1 }
 0x39e   :  { %v1357_v18 = vadd.f32 %v1294_v15, %v3715_v19  ;;  %v1358_v23 = vadd.f32 %v1314_v3, %v3716_v20  ;;  %v3310_v15 = vld [vmem:[#allocation9 + $0x1d8] sm:$0xff]  ;;  %v3314_v3 = vld [vmem:[#allocation9 + $0x1a0] sm:$0xff]  ;;  %v3316_v19 = vld [vmem:[#allocation9 + $0x1a8] sm:$0xff] }
 0x39f   :  { %1768 = vmatpush.msrb.mxu3 %v3310_v15  ;;  %1729 = vmatpush.msrb.mxu1 %v3316_v19  ;;  %v3322_v20 = vld [vmem:[#allocation9 + $0x1b8] sm:$0xff] }
 0x3a0   :  { %v2148_v24 = vmul.f32 -1.442695, %v1357_v18  ;;  %v2149_v44 = vmul.f32 -1.442695, %v1358_v23  ;;  %v3318_v18 = vld [vmem:[#allocation9 + $0x1b0] sm:$0xff]  ;;  %v3326_v23 = vld [vmem:[#allocation9 + $0x180] sm:$0xff] }
 0x3a1   :  { %1749 = vmatpush.msrb.mxu2 %v3318_v18  ;;  %1769 = vmatpush.msrb.mxu3 %v3322_v20 }
 0x3a2   :  { %2236 = vpow2.f32 %v2148_v24  ;;  %v3328_v24 = vld [vmem:[#allocation9 + $0x188] sm:$0xff] }
 0x3a3   :  { %2238 = vpow2.f32 %v2149_v44  ;;  %v3330_v44 = vld [vmem:[#allocation9 + $0x190] sm:$0xff]  ;;  %1730 = vmatpush.msrb.mxu1 %v3328_v24 }
 0x3a4   :  { %v1354_v48 = vpop.f32.mrf.mxu3  ;;  %v1334_v5 = vpop.f32.mrf.mxu2  ;;  %1750 = vmatpush.msrb.mxu2 %v3330_v44 }
 0x3a5   :  { %v1360_v56 = vadd.f32 %v1354_v48, %v3717_v51  ;;  %v1359_v37 = vadd.f32 %v1334_v5, %v3718_v33  ;;  %v3334_v48 = vld [vmem:[#allocation9 + $0x198] sm:$0xff]  ;;  %v3338_v51 = vld [vmem:[#allocation9 + $0x160] sm:$0xff] }
 0x3a6   :  { %1770 = vmatpush.msrb.mxu3 %v3334_v48  ;;  %v3358_v5 = vld [vmem:[#allocation9 + $0x158] sm:$0xff] }
 0x3a7   :  { %v2150_v57 = vmul.f32 -1.442695, %v1360_v56  ;;  %v3340_v56 = vld [vmem:[#allocation9 + $0x168] sm:$0xff]  ;;  %v3370_v33 = vld [vmem:[#allocation9 + $0x138] sm:$0xff] }
 0x3a8   :  { %v2237_v35 = vpop.eup %2236  ;;  %1731 = vmatpush.msrb.mxu1 %v3340_v56 }
 0x3a9   :  { %v2239_v61 = vpop.eup %2238  ;;  %v1364_v39 = vadd.f32 1.0, %v2237_v35  ;;  %2240 = vpow2.f32 %v2150_v57  ;;  %v3342_v57 = vld [vmem:[#allocation9 + $0x170] sm:$0xff]  ;;  %v3346_v35 = vld [vmem:[#allocation9 + $0x178] sm:$0xff] }
 0x3aa   :  { %v1383_v30 = vadd.f32 1.0, %v2239_v61  ;;  %1751 = vmatpush.msrb.mxu2 %v3342_v57  ;;  %1771 = vmatpush.msrb.mxu3 %v3346_v35  ;;  %v3350_v61 = vld [vmem:[#allocation9 + $0x140] sm:$0xff] }
 0x3ab   :  { %2242 = vrcp.f32 %v1364_v39  ;;  %v1376_v58 = vand.u32 2147483648, %v1364_v39  ;;  %v1374_v63 = vand.u32 2147483647, %v1364_v39  ;;  %vm1370_vm2 = vweird.f32 %v1364_v39 }
 0x3ac   :  { %2244 = vrcp.f32 %v1383_v30  ;;  %v1395_v59 = vand.u32 2147483648, %v1383_v30  ;;  %v1393_v13 = vand.u32 2147483647, %v1383_v30  ;;  %vm1389_vm3 = vweird.f32 %v1383_v30  ;;  %1772 = vmatpush.msrb.mxu3 %v3358_v5 }
 0x3ad   :  { %v1377_v8 = vor.u32 1.1754944e-38, %v1376_v58  ;;  %vm1375_vm6 = vcmp.eq.f32.partialorder %v1374_v63, 8.507059e+37  ;;  %v3390_v58 = vld [vmem:[#allocation9 + $0xf0] sm:$0xff]  ;;  %v3400_v63 = vld [vmem:[#allocation9 + $0xc8] sm:$0xff] }
 0x3ae   :  { %v1396_v26 = vor.u32 1.1754944e-38, %v1395_v59  ;;  %vm1394_vm7 = vcmp.eq.f32.partialorder %v1393_v13, 8.507059e+37  ;;  %1773 = vmatpush.msrb.mxu3 %v3370_v33  ;;  %v3394_v59 = vld [vmem:[#allocation9 + $0xf8] sm:$0xff] }
 0x3af   :  { %v2241_v17 = vpop.eup %2240 }
 0x3b0   :  { %v1403_v43 = vadd.f32 1.0, %v2241_v17  ;;  %v3362_v17 = vld [vmem:[#allocation9 + $0x120] sm:$0xff] }
 0x3b1   :  { %v2243_v32 = vpop.eup %2242 }
 0x3b2   :  { %v2245_v41 = vpop.eup %2244  ;;  %v1366_v46 = vmul.f32 %v2243_v32, %v1364_v39  ;;  %2246 = vrcp.f32 %v1403_v43  ;;  %vm1371_vm0 = vweird.f32 %v2243_v32  ;;  %v1415_v25 = vand.u32 2147483648, %v1403_v43  ;;  %v3352_v39 = vld [vmem:[#allocation9 + $0x148] sm:$0xff] }
 0x3b3   :  { %v1385_v7 = vmul.f32 %v2245_v41, %v1383_v30  ;;  %2248 = vtanh.f32 %v1359_v37  ;;  %vm1390_vm1 = vweird.f32 %v2245_v41  ;;  %vm1372_vm4 = vmor %vm1370_vm2, %vm1371_vm0  ;;  %vm1409_vm9 = vweird.f32 %v1403_v43  ;;  %v3354_v30 = vld [vmem:[#allocation9 + $0x150] sm:$0xff]  ;;  %1732 = vmatpush.msrb.mxu1 %v3352_v39  ;;  %v3374_v37 = vld [vmem:[#allocation9 + $0x100] sm:$0xff] }
 0x3b4   :  { %v1367_v54 = vsub.f32 1.0, %v1366_v46  ;;  %vm1391_vm5 = vmor %vm1389_vm3, %vm1390_vm1  ;;  %v1413_v40 = vand.u32 2147483647, %v1403_v43  ;;  %v1416_v34 = vor.u32 1.1754944e-38, %v1415_v25  ;;  %1752 = vmatpush.msrb.mxu2 %v3354_v30  ;;  %v3378_v46 = vld [vmem:[#allocation9 + $0x110] sm:$0xff]  ;;  %v3434_v25 = vld [vmem:[#allocation9 + $0x60] sm:$0xff] }
 0x3b5   :  { %v1386_v42 = vsub.f32 1.0, %v1385_v7  ;;  %v3382_v7 = vld [vmem:[#allocation9 + $0x118] sm:$0xff] }
 0x3b6   :  { %v1368_v62 = vmul.f32 %v2243_v32, %v1367_v54  ;;  %vm1414_vm11 = vcmp.eq.f32.partialorder %v1413_v40, 8.507059e+37  ;;  %1774 = vmatpush.msrb.mxu3 %v3382_v7  ;;  %v3386_v54 = vld [vmem:[#allocation9 + $0xe0] sm:$0xff]  ;;  %v3438_v40 = vld [vmem:[#allocation9 + $0x68] sm:$0xff] }
 0x3b7   :  { %v1387_v52 = vmul.f32 %v2245_v41, %v1386_v42  ;;  %v3388_v42 = vld [vmem:[#allocation9 + $0xe8] sm:$0xff]  ;;  %3721 = vst [vmem:[#allocation51_spill] sm:$0xff] %v3438_v40 }
 0x3b8   :  { %v2247_v6 = vpop.eup %2246  ;;  %v1369_v22 = vadd.f32 %v2243_v32, %v1368_v62  ;;  %1775 = vmatpush.msrb.mxu3 %v3394_v59  ;;  %v3398_v62 = vld [vmem:[#allocation9 + $0xc0] sm:$0xff] }
 0x3b9   :  { %v1388_v9 = vadd.f32 %v2245_v41, %v1387_v52  ;;  %v1405_v60 = vmul.f32 %v2247_v6, %v1403_v43  ;;  %v2249_v27 = vpop.eup %2248  ;;  %vm1410_vm8 = vweird.f32 %v2247_v6  ;;  %v3364_v43 = vld [vmem:[#allocation9 + $0x128] sm:$0xff]  ;;  %v3402_v52 = vld [vmem:[#allocation9 + $0xd0] sm:$0xff] }
 0x3ba   :  { %v1373_v21 = vsel %vm1372_vm4, %v2243_v32, %v1369_v22  ;;  %vm1411_vm10 = vmor %vm1409_vm9, %vm1410_vm8  ;;  %v3366_v32 = vld [vmem:[#allocation9 + $0x130] sm:$0xff]  ;;  %1733 = vmatpush.msrb.mxu1 %v3364_v43  ;;  %v3406_v22 = vld [vmem:[#allocation9 + $0xd8] sm:$0xff] }
 0x3bb   :  { %v1378_v38 = vsel %vm1375_vm6, %v1377_v8, %v1373_v21  ;;  %v1392_v2 = vsel %vm1391_vm5, %v2245_v41, %v1388_v9  ;;  %v1406_v55 = vsub.f32 1.0, %v1405_v60  ;;  %1753 = vmatpush.msrb.mxu2 %v3366_v32  ;;  %v3376_v41 = vld [vmem:[#allocation9 + $0x108] sm:$0xff]  ;;  %v3720_v60 = vld [vmem:[#allocation27_spill] sm:$0xff]  ;;  %1776 = vmatpush.msrb.mxu3 %v3406_v22  ;;  %v3412_v21 = vld [vmem:[#allocation9 + $0xa0] sm:$0xff] }
 0x3bc   :  { %v1397_v36 = vsel %vm1394_vm7, %v1396_v26, %v1392_v2  ;;  %v1421_v45 = vmul.f32 %v2249_v27, %v1378_v38  ;;  %1734 = vmatpush.msrb.mxu1 %v3376_v41  ;;  %v3719_v8 = vld [vmem:[#allocation26_spill] sm:$0xff]  ;;  %v3420_v2 = vld [vmem:[#allocation9 + $0xb8] sm:$0xff] }
 0x3bd   :  { %v1420_v14 = vmul.f32 %v1397_v36, %v3279_v31  ;;  %v1407_v49 = vmul.f32 %v2247_v6, %v1406_v55  ;;  %v3290_v31 = vld [vmem:[#allocation9 + $0x1e0] sm:$0xff]  ;;  %1754 = vmatpush.msrb.mxu2 %v3378_v46  ;;  %v3414_v27 = vld [vmem:[#allocation9 + $0xa8] sm:$0xff]  ;;  %v3416_v38 = vld [vmem:[#allocation9 + $0xb0] sm:$0xff]  ;;  %1777 = vmatpush.msrb.mxu3 %v3420_v2 }
 0x3be   :  { %1707 = vmatpush.msrb.mxu0 %v3290_v31  ;;  %1735 = vmatpush.msrb.mxu1 %v3388_v42 }
 0x3bf   :  { %v3287_v50 = vadd.f32 %v1421_v45, %v1420_v14  ;;  %v1408_v47 = vadd.f32 %v2247_v6, %v1407_v49  ;;  %1755 = vmatpush.msrb.mxu2 %v3390_v58  ;;  %v3424_v45 = vld [vmem:[#allocation9 + $0x80] sm:$0xff]  ;;  %v3426_v14 = vld [vmem:[#allocation9 + $0x88] sm:$0xff]  ;;  %v3430_v49 = vld [vmem:[#allocation9 + $0x90] sm:$0xff] }
 0x3c0   :  { %1708 = vmatpush.msrb.mxu0 %v3302_v4  ;;  %1736 = vmatpush.msrb.mxu1 %v3400_v63 }
 0x3c1   :  { %2250 = vtanh.f32 %v3287_v50  ;;  %v1412_v53 = vsel %vm1411_vm10, %v2247_v6, %v1408_v47  ;;  %1756 = vmatpush.msrb.mxu2 %v3402_v52  ;;  %v3432_v47 = vld [vmem:[#allocation9 + $0x98] sm:$0xff] }
 0x3c2   :  { %v1417_v11 = vsel %vm1414_vm11, %v1416_v34, %v1412_v53  ;;  %1709 = vmatpush.msrb.mxu0 %v3314_v3  ;;  %1737 = vmatpush.msrb.mxu1 %v3414_v27  ;;  %v3440_v53 = vld [vmem:[#allocation9 + $0x70] sm:$0xff]  ;;  %v3442_v34 = vld [vmem:[#allocation9 + $0x78] sm:$0xff] }
 0x3c3   :  { %1757 = vmatpush.msrb.mxu2 %v3416_v38  ;;  %1778 = vmatpush.msrb.mxu3 %v3432_v47  ;;  %3722 = vst [vmem:[#allocation52_spill] sm:$0xff] %v3440_v53 }
 0x3c4   :  { %1710 = vmatpush.msrb.mxu0 %v3326_v23  ;;  %1738 = vmatpush.msrb.mxu1 %v3426_v14  ;;  %3723 = vst [vmem:[#allocation53_spill] sm:$0xff] %v3442_v34 }
 0x3c5   :  { %1758 = vmatpush.msrb.mxu2 %v3430_v49  ;;  %1779 = vmatpush.msrb.mxu3 %v3442_v34  ;;  %v3469_v34 = vld [vmem:[#allocation9] sm:$0xff] }
 0x3c6   :  { %1711 = vmatpush.msrb.mxu0 %v3338_v51  ;;  %1739 = vmatpush.msrb.mxu1 %v3438_v40 }
 0x3c7   :  { %v2251_v29 = vpop.eup %2250  ;;  %1759 = vmatpush.msrb.mxu2 %v3440_v53  ;;  %v3471_v53 = vld [vmem:[#allocation9 + $0x8] sm:$0xff] }
 0x3c8   :  { %v1424_v28 = vmul.f32 %v2251_v29, %v1417_v11  ;;  %1712 = vmatpush.msrb.mxu0 %v3350_v61  ;;  %v3446_v29 = vld [vmem:[#allocation9 + $0x40] sm:$0xff]  ;;  %v3448_v11 = vld [vmem:[#allocation9 + $0x48] sm:$0xff] }
 0x3c9   :  { %3724 = vst [vmem:[#allocation54_spill] sm:$0xff] %v3448_v11  ;;  %1740 = vmatpush.msrb.mxu1 %v3448_v11 }
 0x3ca   :  { %1508 = vmatmul.f32.vlgmr.msra.gmra.mxu0 %v1424_v28  ;;  %1528 = vmatmul.f32.vlgmr.msra.gmra.mxu1 %v1424_v28 }
 0x3cb   :  { %1548 = vmatmul.f32.vlgmr.msra.gmra.mxu2 %v1424_v28  ;;  %1568 = vmatmul.f32.vlgmr.msra.gmra.mxu3 %v1424_v28  ;;  %v3450_v28 = vld [vmem:[#allocation9 + $0x50] sm:$0xff] }
 0x3cc   :  { %1713 = vmatpush.msrb.mxu0 %v3362_v17  ;;  %3725 = vst [vmem:[#allocation55_spill] sm:$0xff] %v3450_v28  ;;  %1760 = vmatpush.msrb.mxu2 %v3450_v28 }
 0x3ce   :  { %1714 = vmatpush.msrb.mxu0 %v3374_v37 }
 0x3d0   :  { %1715 = vmatpush.msrb.mxu0 %v3386_v54 }
 0x3d2   :  { %1716 = vmatpush.msrb.mxu0 %v3398_v62 }
 0x3d4   :  { %1717 = vmatpush.msrb.mxu0 %v3412_v21 }
 0x3d6   :  { %1718 = vmatpush.msrb.mxu0 %v3424_v45 }
 0x3d8   :  { %1719 = vmatpush.msrb.mxu0 %v3434_v25 }
 0x3da   :  { %1720 = vmatpush.msrb.mxu0 %v3446_v29 }
 0x447   :  { %v1509_v13 = vpop.f32.mrf.mxu0  ;;  %v1529_v6 = vpop.f32.mrf.mxu1 }
 0x448   :  { %v1572_v9 = vadd.f32 %v1509_v13, %v3719_v8  ;;  %v1573_v26 = vadd.f32 %v1529_v6, %v3720_v60  ;;  %v3454_v6 = vld [vmem:[#allocation9 + $0x58] sm:$0xff]  ;;  %v3456_v8 = vld [vmem:[#allocation9 + $0x20] sm:$0xff] }
 0x449   :  { %3726 = vst [vmem:[#allocation56_spill] sm:$0xff] %v3454_v6  ;;  %v3727_v60 = vld [vmem:[#allocation29_spill] sm:$0xff]  ;;  %1780 = vmatpush.msrb.mxu3 %v3454_v6  ;;  %1721 = vmatpush.msrb.mxu0 %v3456_v8 }
 0x44a   :  { %v2151_v55 = vmul.f32 -1.442695, %v1572_v9  ;;  %v2152_v36 = vmul.f32 -1.442695, %v1573_v26  ;;  %v3458_v9 = vld [vmem:[#allocation9 + $0x28] sm:$0xff] }
 0x44b   :  { %1741 = vmatpush.msrb.mxu1 %v3458_v9  ;;  %1722 = vmatpush.msrb.mxu0 %v3469_v34 }
 0x44c   :  { %2252 = vpow2.f32 %v2151_v55  ;;  %v3463_v55 = vld [vmem:[#allocation9 + $0x30] sm:$0xff] }
 0x44d   :  { %2254 = vpow2.f32 %v2152_v36  ;;  %v3465_v36 = vld [vmem:[#allocation9 + $0x38] sm:$0xff]  ;;  %1761 = vmatpush.msrb.mxu2 %v3463_v55  ;;  %1742 = vmatpush.msrb.mxu1 %v3471_v53 }
 0x44e   :  { %v1569_v13 = vpop.f32.mrf.mxu3  ;;  %1781 = vmatpush.msrb.mxu3 %v3465_v36  ;;  %1922 = vmatpush.msra.mxu0 %v3290_v31 }
 0x44f   :  { %v1575_v26 = vadd.f32 %v1569_v13, %v3727_v60  ;;  %v3475_v13 = vld [vmem:[#allocation9 + $0x10] sm:$0xff]  ;;  %v3477_v60 = vld [vmem:[#allocation9 + $0x18] sm:$0xff]  ;;  %1942 = vmatpush.msra.mxu1 %v3292_v16 }
 0x450   :  { %1762 = vmatpush.msrb.mxu2 %v3475_v13  ;;  %1782 = vmatpush.msrb.mxu3 %v3477_v60 }
 0x451   :  { %v2153_v40 = vmul.f32 -1.442695, %v1575_v26  ;;  %1923 = vmatpush.msra.mxu0 %v3302_v4  ;;  %1943 = vmatpush.msra.mxu1 %v3304_v12 }
 0x452   :  { %v2253_v11 = vpop.eup %2252  ;;  %1962 = vmatpush.msra.mxu2 %v3294_v10  ;;  %1982 = vmatpush.msra.mxu3 %v3298_v1  ;;  %v3728_v10 = vld [vmem:[#allocation28_spill] sm:$0xff] }
 0x453   :  { %v2255_v28 = vpop.eup %2254  ;;  %v3481_v6 = vadd.f32 1.0, %v2253_v11  ;;  %2256 = vpow2.f32 %v2153_v40  ;;  %v1549_v40 = vpop.f32.mrf.mxu2  ;;  %1924 = vmatpush.msra.mxu0 %v3314_v3  ;;  %1944 = vmatpush.msra.mxu1 %v3316_v19 }
 0x454   :  { %v3485_v26 = vadd.f32 1.0, %v2255_v28  ;;  %1963 = vmatpush.msra.mxu2 %v3306_v0  ;;  %1983 = vmatpush.msra.mxu3 %v3310_v15  ;;  %v1574_v1 = vadd.f32 %v1549_v40, %v3728_v10 }
 0x455   :  { %2258 = vrcp.f32 %v3481_v6  ;;  %1925 = vmatpush.msra.mxu0 %v3326_v23  ;;  %1945 = vmatpush.msra.mxu1 %v3328_v24  ;;  %v1591_v19 = vand.u32 2147483648, %v3481_v6  ;;  %v1589_v23 = vand.u32 2147483647, %v3481_v6  ;;  %vm1585_vm14 = vweird.f32 %v3481_v6 }
 0x456   :  { %2260 = vrcp.f32 %v3485_v26  ;;  %1964 = vmatpush.msra.mxu2 %v3318_v18  ;;  %1984 = vmatpush.msra.mxu3 %v3322_v20  ;;  %v1610_v18 = vand.u32 2147483648, %v3485_v26  ;;  %vm1604_vm15 = vweird.f32 %v3485_v26 }
 0x457   :  { %1926 = vmatpush.msra.mxu0 %v3338_v51  ;;  %1946 = vmatpush.msra.mxu1 %v3340_v56  ;;  %v1592_v56 = vor.u32 1.1754944e-38, %v1591_v19  ;;  %vm1590_vm2 = vcmp.eq.f32.partialorder %v1589_v23, 8.507059e+37 }
 0x458   :  { %1965 = vmatpush.msra.mxu2 %v3330_v44  ;;  %1985 = vmatpush.msra.mxu3 %v3334_v48  ;;  %v1608_v44 = vand.u32 2147483647, %v3485_v26 }
 0x459   :  { %v2257_v11 = vpop.eup %2256  ;;  %1927 = vmatpush.msra.mxu0 %v3350_v61  ;;  %1947 = vmatpush.msra.mxu1 %v3352_v39  ;;  %v1611_v61 = vor.u32 1.1754944e-38, %v1610_v18 }
 0x45a   :  { %v3501_v31 = vadd.f32 1.0, %v2257_v11  ;;  %1966 = vmatpush.msra.mxu2 %v3342_v57  ;;  %1986 = vmatpush.msra.mxu3 %v3346_v35  ;;  %vm1609_vm3 = vcmp.eq.f32.partialorder %v1608_v44, 8.507059e+37 }
 0x45b   :  { %v2259_v16 = vpop.eup %2258  ;;  %1928 = vmatpush.msra.mxu0 %v3362_v17  ;;  %1948 = vmatpush.msra.mxu1 %v3364_v43 }
 0x45c   :  { %v2261_v4 = vpop.eup %2260  ;;  %v1581_v12 = vmul.f32 %v2259_v16, %v3481_v6  ;;  %2262 = vrcp.f32 %v3501_v31  ;;  %vm1586_vm12 = vweird.f32 %v2259_v16  ;;  %1967 = vmatpush.msra.mxu2 %v3354_v30  ;;  %1987 = vmatpush.msra.mxu3 %v3358_v5  ;;  %vm1624_vm5 = vweird.f32 %v3501_v31 }
 0x45d   :  { %v1600_v0 = vmul.f32 %v2261_v4, %v3485_v26  ;;  %2264 = vtanh.f32 %v1574_v1  ;;  %vm1605_vm13 = vweird.f32 %v2261_v4  ;;  %vm1587_vm0 = vmor %vm1585_vm14, %vm1586_vm12  ;;  %1929 = vmatpush.msra.mxu0 %v3374_v37  ;;  %1949 = vmatpush.msra.mxu1 %v3376_v41 }
 0x45e   :  { %v1582_v15 = vsub.f32 1.0, %v1581_v12  ;;  %1968 = vmatpush.msra.mxu2 %v3366_v32  ;;  %1988 = vmatpush.msra.mxu3 %v3370_v33  ;;  %vm1606_vm1 = vmor %vm1604_vm15, %vm1605_vm13 }
 0x45f   :  { %v1601_v3 = vsub.f32 1.0, %v1600_v0  ;;  %1930 = vmatpush.msra.mxu0 %v3386_v54  ;;  %1950 = vmatpush.msra.mxu1 %v3388_v42  ;;  %v1628_v54 = vand.u32 2147483647, %v3501_v31  ;;  %v3729_v42 = vld [vmem:[#allocation51_spill] sm:$0xff] }
 0x460   :  { %v1583_v20 = vmul.f32 %v2259_v16, %v1582_v15  ;;  %1969 = vmatpush.msra.mxu2 %v3378_v46  ;;  %1989 = vmatpush.msra.mxu3 %v3382_v7 }
 0x461   :  { %v1602_v24 = vmul.f32 %v2261_v4, %v1601_v3  ;;  %1931 = vmatpush.msra.mxu0 %v3398_v62  ;;  %1951 = vmatpush.msra.mxu1 %v3400_v63  ;;  %v3731_v62 = vld [vmem:[#allocation53_spill] sm:$0xff]  ;;  %vm1629_vm7 = vcmp.eq.f32.partialorder %v1628_v54, 8.507059e+37 }
 0x462   :  { %v3527_v48 = vpop.eup %2262  ;;  %v1584_v51 = vadd.f32 %v2259_v16, %v1583_v20  ;;  %1970 = vmatpush.msra.mxu2 %v3390_v58  ;;  %1990 = vmatpush.msra.mxu3 %v3394_v59  ;;  %v3730_v59 = vld [vmem:[#allocation52_spill] sm:$0xff] }
 0x463   :  { %v1603_v57 = vadd.f32 %v2261_v4, %v1602_v24  ;;  %v1620_v35 = vmul.f32 %v3527_v48, %v3501_v31  ;;  %v2265_v30 = vpop.eup %2264  ;;  %1932 = vmatpush.msra.mxu0 %v3412_v21  ;;  %1952 = vmatpush.msra.mxu1 %v3414_v27  ;;  %vm1625_vm4 = vweird.f32 %v3527_v48  ;;  %v3734_v21 = vld [vmem:[#allocation56_spill] sm:$0xff] }
 0x464   :  { %v1588_v39 = vsel %vm1587_vm0, %v2259_v16, %v1584_v51  ;;  %1971 = vmatpush.msra.mxu2 %v3402_v52  ;;  %1991 = vmatpush.msra.mxu3 %v3406_v22  ;;  %vm1626_vm6 = vmor %vm1624_vm5, %vm1625_vm4  ;;  %v3732_v52 = vld [vmem:[#allocation54_spill] sm:$0xff]  ;;  %v3733_v22 = vld [vmem:[#allocation55_spill] sm:$0xff] }
 0x465   :  { %v1593_v5 = vsel %vm1590_vm2, %v1592_v56, %v1588_v39  ;;  %v1607_v17 = vsel %vm1606_vm1, %v2261_v4, %v1603_v57  ;;  %v1621_v43 = vsub.f32 1.0, %v1620_v35  ;;  %1933 = vmatpush.msra.mxu0 %v3424_v45  ;;  %1953 = vmatpush.msra.mxu1 %v3426_v14  ;;  %v3738_v16 = vld [vmem:[#allocation32_spill] sm:$0xff] }
 0x466   :  { %v1612_v32 = vsel %vm1609_vm3, %v1611_v61, %v1607_v17  ;;  %v1636_v33 = vmul.f32 %v2265_v30, %v1593_v5  ;;  %1972 = vmatpush.msra.mxu2 %v3416_v38  ;;  %1992 = vmatpush.msra.mxu3 %v3420_v2 }
 0x467   :  { %v1635_v37 = vmul.f32 %v1612_v32, %v3287_v50  ;;  %v1622_v41 = vmul.f32 %v3527_v48, %v1621_v43  ;;  %v1630_v50 = vand.u32 2147483648, %v3501_v31  ;;  %1934 = vmatpush.msra.mxu0 %v3434_v25  ;;  %1954 = vmatpush.msra.mxu1 %v3729_v42  ;;  %v3736_v25 = vld [vmem:[#allocation31_spill] sm:$0xff] }
 0x468   :  { %1973 = vmatpush.msra.mxu2 %v3430_v49  ;;  %1993 = vmatpush.msra.mxu3 %v3432_v47  ;;  %v3735_v49 = vld [vmem:[#allocation30_spill] sm:$0xff] }
 0x469   :  { %v3551_v46 = vadd.f32 %v1636_v33, %v1635_v37  ;;  %v1623_v7 = vadd.f32 %v3527_v48, %v1622_v41  ;;  %v1631_v63 = vor.u32 1.1754944e-38, %v1630_v50  ;;  %1935 = vmatpush.msra.mxu0 %v3446_v29  ;;  %1955 = vmatpush.msra.mxu1 %v3732_v52  ;;  %v2090_v52 = vld [vmem:[#allocation12 + $0x70] sm:$0xff] }
 0x46a   :  { %1974 = vmatpush.msra.mxu2 %v3730_v59  ;;  %1994 = vmatpush.msra.mxu3 %v3731_v62 }
 0x46b   :  { %2266 = vtanh.f32 %v3551_v46  ;;  %v1627_v58 = vsel %vm1626_vm6, %v3527_v48, %v1623_v7  ;;  %1936 = vmatpush.msra.mxu0 %v3456_v8  ;;  %1956 = vmatpush.msra.mxu1 %v3458_v9 }
 0x46c   :  { %1975 = vmatpush.msra.mxu2 %v3733_v22  ;;  %1995 = vmatpush.msra.mxu3 %v3734_v21  ;;  %v1632_v38 = vsel %vm1629_vm7, %v1631_v63, %v1627_v58  ;;  %v2089_v22 = vld [vmem:[#allocation12 + $0x68] sm:$0xff]  ;;  %v2088_v21 = vld [vmem:[#allocation12 + $0x60] sm:$0xff] }
 0x46d   :  { %1937 = vmatpush.msra.mxu0 %v3469_v34  ;;  %1957 = vmatpush.msra.mxu1 %v3471_v53  ;;  %v3737_v53 = vld [vmem:[#allocation33_spill] sm:$0xff] }
 0x46e   :  { %1976 = vmatpush.msra.mxu2 %v3463_v55  ;;  %1996 = vmatpush.msra.mxu3 %v3465_v36 }
 0x470   :  { %1977 = vmatpush.msra.mxu2 %v3475_v13  ;;  %1997 = vmatpush.msra.mxu3 %v3477_v60 }
 0x471   :  { %v2267_v27 = vpop.eup %2266 }
 0x472   :  { %v1639_v2 = vmul.f32 %v2267_v27, %v1632_v38  ;;  %v2087_v27 = vld [vmem:[#allocation12 + $0x58] sm:$0xff]  ;;  %v2086_v38 = vld [vmem:[#allocation12 + $0x50] sm:$0xff] }
 0x474   :  { %1723 = vmatmul.f32.vlgmr.msrb.gmra.mxu0 %v1639_v2  ;;  %1743 = vmatmul.f32.vlgmr.msrb.gmra.mxu1 %v1639_v2 }
 0x475   :  { %1763 = vmatmul.f32.vlgmr.msrb.gmra.mxu2 %v1639_v2  ;;  %1783 = vmatmul.f32.vlgmr.msrb.gmra.mxu3 %v1639_v2  ;;  %v2085_v2 = vld [vmem:[#allocation12 + $0x48] sm:$0xff] }
 0x4f1   :  { %v1724_v45 = vpop.f32.mrf.mxu0  ;;  %v1744_v14 = vpop.f32.mrf.mxu1 }
 0x4f2   :  { %v1787_v47 = vadd.f32 %v1724_v45, %v3735_v49  ;;  %v1788_v29 = vadd.f32 %v1744_v14, %v3736_v25  ;;  %v2084_v45 = vld [vmem:[#allocation12 + $0x40] sm:$0xff]  ;;  %v2083_v14 = vld [vmem:[#allocation12 + $0x38] sm:$0xff]  ;;  %v2082_v49 = vld [vmem:[#allocation12 + $0x30] sm:$0xff] }
 0x4f4   :  { %v2154_v28 = vmul.f32 -1.442695, %v1787_v47  ;;  %v2155_v6 = vmul.f32 -1.442695, %v1788_v29  ;;  %v3739_v29 = vld [vmem:[#allocation34_spill] sm:$0xff] }
 0x4f6   :  { %2268 = vpow2.f32 %v2154_v28 }
 0x4f7   :  { %2270 = vpow2.f32 %v2155_v6  ;;  %v3740_v6 = vld [vmem:[#allocation35_spill] sm:$0xff] }
 0x4f8   :  { %v1784_v34 = vpop.f32.mrf.mxu3  ;;  %v1764_v60 = vpop.f32.mrf.mxu2 }
 0x4f9   :  { %v1790_v8 = vadd.f32 %v1784_v34, %v3737_v53  ;;  %v1789_v10 = vadd.f32 %v1764_v60, %v3738_v16  ;;  %v2081_v53 = vld [vmem:[#allocation12 + $0x28] sm:$0xff] }
 0x4fa   :  { %v2077_v60 = vld [vmem:[#allocation12 + $0x8] sm:$0xff] }
 0x4fb   :  { %v2156_v9 = vmul.f32 -1.442695, %v1790_v8 }
 0x4fc   :  { %v2269_v55 = vpop.eup %2268 }
 0x4fd   :  { %v2271_v36 = vpop.eup %2270  ;;  %v1794_v26 = vadd.f32 1.0, %v2269_v55  ;;  %2272 = vpow2.f32 %v2156_v9  ;;  %v2080_v55 = vld [vmem:[#allocation12 + $0x20] sm:$0xff] }
 0x4fe   :  { %v1813_v13 = vadd.f32 1.0, %v2271_v36  ;;  %v2079_v36 = vld [vmem:[#allocation12 + $0x18] sm:$0xff] }
 0x4ff   :  { %2274 = vrcp.f32 %v1794_v26  ;;  %v1806_v3 = vand.u32 2147483648, %v1794_v26  ;;  %v1804_v20 = vand.u32 2147483647, %v1794_v26  ;;  %vm1800_vm10 = vweird.f32 %v1794_v26 }
 0x500   :  { %2276 = vrcp.f32 %v1813_v13  ;;  %v1825_v19 = vand.u32 2147483648, %v1813_v13  ;;  %v1823_v24 = vand.u32 2147483647, %v1813_v13  ;;  %vm1819_vm11 = vweird.f32 %v1813_v13 }
 0x501   :  { %v1807_v51 = vor.u32 1.1754944e-38, %v1806_v3  ;;  %vm1805_vm14 = vcmp.eq.f32.partialorder %v1804_v20, 8.507059e+37 }
 0x502   :  { %v1826_v35 = vor.u32 1.1754944e-38, %v1825_v19  ;;  %vm1824_vm15 = vcmp.eq.f32.partialorder %v1823_v24, 8.507059e+37 }
 0x503   :  { %v2273_v40 = vpop.eup %2272 }
 0x504   :  { %v1833_v11 = vadd.f32 1.0, %v2273_v40  ;;  %v3741_v40 = vld [vmem:[#allocation37_spill] sm:$0xff] }
 0x505   :  { %v2275_v31 = vpop.eup %2274 }
 0x506   :  { %v2277_v1 = vpop.eup %2276  ;;  %v1796_v4 = vmul.f32 %v2275_v31, %v1794_v26  ;;  %2278 = vrcp.f32 %v1833_v11  ;;  %vm1801_vm8 = vweird.f32 %v2275_v31  ;;  %v1845_v50 = vand.u32 2147483648, %v1833_v11  ;;  %v2078_v26 = vld [vmem:[#allocation12 + $0x10] sm:$0xff] }
 0x507   :  { %v1815_v12 = vmul.f32 %v2277_v1, %v1813_v13  ;;  %2280 = vtanh.f32 %v1789_v10  ;;  %vm1820_vm9 = vweird.f32 %v2277_v1  ;;  %vm1802_vm12 = vmor %vm1800_vm10, %vm1801_vm8  ;;  %vm1839_vm1 = vweird.f32 %v1833_v11 }
 0x508   :  { %v1797_v0 = vsub.f32 1.0, %v1796_v4  ;;  %vm1821_vm13 = vmor %vm1819_vm11, %vm1820_vm9  ;;  %v1843_v54 = vand.u32 2147483647, %v1833_v11  ;;  %v1846_v58 = vor.u32 1.1754944e-38, %v1845_v50 }
 0x509   :  { %v1816_v15 = vsub.f32 1.0, %v1815_v12 }
 0x50a   :  { %v1798_v18 = vmul.f32 %v2275_v31, %v1797_v0  ;;  %vm1844_vm3 = vcmp.eq.f32.partialorder %v1843_v54, 8.507059e+37 }
 0x50b   :  { %v1817_v23 = vmul.f32 %v2277_v1, %v1816_v15 }
 0x50c   :  { %v2279_v44 = vpop.eup %2278  ;;  %v1799_v48 = vadd.f32 %v2275_v31, %v1798_v18  ;;  %v3742_v18 = vld [vmem:[#allocation36_spill] sm:$0xff] }
 0x50d   :  { %v1818_v56 = vadd.f32 %v2277_v1, %v1817_v23  ;;  %v1835_v57 = vmul.f32 %v2279_v44, %v1833_v11  ;;  %v2281_v39 = vpop.eup %2280  ;;  %vm1840_vm0 = vweird.f32 %v2279_v44 }
 0x50e   :  { %v1803_v61 = vsel %vm1802_vm12, %v2275_v31, %v1799_v48  ;;  %vm1841_vm2 = vmor %vm1839_vm1, %vm1840_vm0  ;;  %v2076_v31 = vld [vmem:[#allocation12] sm:$0xff] }
 0x50f   :  { %v1808_v30 = vsel %vm1805_vm14, %v1807_v51, %v1803_v61  ;;  %v1822_v5 = vsel %vm1821_vm13, %v2277_v1, %v1818_v56  ;;  %v1836_v17 = vsub.f32 1.0, %v1835_v57 }
 0x510   :  { %v1827_v43 = vsel %vm1824_vm15, %v1826_v35, %v1822_v5  ;;  %v1851_v32 = vmul.f32 %v2281_v39, %v1808_v30 }
 0x511   :  { %v1850_v33 = vmul.f32 %v1827_v43, %v3551_v46  ;;  %v1837_v37 = vmul.f32 %v2279_v44, %v1836_v17  ;;  %v2091_v46 = vld [vmem:[#allocation12 + $0x78] sm:$0xff] }
 0x512   :  { %2096 = vmatpush.msrb.mxu0 %v2091_v46 }
 0x513   :  { %v3589_v41 = vadd.f32 %v1851_v32, %v1850_v33  ;;  %v1838_v7 = vadd.f32 %v2279_v44, %v1837_v37 }
 0x514   :  { %2097 = vmatpush.msrb.mxu0 %v2090_v52 }
 0x515   :  { %2282 = vtanh.f32 %v3589_v41  ;;  %v1842_v42 = vsel %vm1841_vm2, %v2279_v44, %v1838_v7 }
 0x516   :  { %v1847_v62 = vsel %vm1844_vm3, %v1846_v58, %v1842_v42  ;;  %2098 = vmatpush.msrb.mxu0 %v2089_v22 }
 0x518   :  { %2099 = vmatpush.msrb.mxu0 %v2088_v21 }
 0x51a   :  { %2100 = vmatpush.msrb.mxu0 %v2087_v27 }
 0x51b   :  { %v2283_v59 = vpop.eup %2282 }
 0x51c   :  { %v1854_v63 = vmul.f32 %v2283_v59, %v1847_v62  ;;  %2101 = vmatpush.msrb.mxu0 %v2086_v38 }
 0x51e   :  { %1938 = vmatmul.f32.vlgmr.msra.gmra.mxu0 %v1854_v63  ;;  %1958 = vmatmul.f32.vlgmr.msra.gmra.mxu1 %v1854_v63 }
 0x51f   :  { %1978 = vmatmul.f32.vlgmr.msra.gmra.mxu2 %v1854_v63  ;;  %1998 = vmatmul.f32.vlgmr.msra.gmra.mxu3 %v1854_v63 }
 0x520   :  { %2102 = vmatpush.msrb.mxu0 %v2085_v2 }
 0x522   :  { %2103 = vmatpush.msrb.mxu0 %v2084_v45 }
 0x524   :  { %2104 = vmatpush.msrb.mxu0 %v2083_v14 }
 0x526   :  { %2105 = vmatpush.msrb.mxu0 %v2082_v49 }
 0x528   :  { %2106 = vmatpush.msrb.mxu0 %v2081_v53 }
 0x52a   :  { %2107 = vmatpush.msrb.mxu0 %v2080_v55 }
 0x52c   :  { %2108 = vmatpush.msrb.mxu0 %v2079_v36 }
 0x52e   :  { %2109 = vmatpush.msrb.mxu0 %v2078_v26 }
 0x530   :  { %2110 = vmatpush.msrb.mxu0 %v2077_v60 }
 0x532   :  { %2111 = vmatpush.msrb.mxu0 %v2076_v31 }
 0x59b   :  { %v1939_v47 = vpop.f32.mrf.mxu0  ;;  %v1959_v25 = vpop.f32.mrf.mxu1 }
 0x59c   :  { %v2002_v28 = vadd.f32 %v1939_v47, %v3739_v29  ;;  %v2003_v34 = vadd.f32 %v1959_v25, %v3740_v6 }
 0x59e   :  { %v2157_v8 = vmul.f32 -1.442695, %v2002_v28  ;;  %v2158_v9 = vmul.f32 -1.442695, %v2003_v34 }
 0x5a0   :  { %2284 = vpow2.f32 %v2157_v8 }
 0x5a1   :  { %2286 = vpow2.f32 %v2158_v9 }
 0x5a2   :  { %v1999_v13 = vpop.f32.mrf.mxu3  ;;  %v1979_v0 = vpop.f32.mrf.mxu2 }
 0x5a3   :  { %v2005_v11 = vadd.f32 %v1999_v13, %v3741_v40  ;;  %v2004_v20 = vadd.f32 %v1979_v0, %v3742_v18 }
 0x5a5   :  { %v2159_v16 = vmul.f32 -1.442695, %v2005_v11 }
 0x5a6   :  { %v2285_v10 = vpop.eup %2284 }
 0x5a7   :  { %v2287_v1 = vpop.eup %2286  ;;  %v2009_v4 = vadd.f32 1.0, %v2285_v10  ;;  %2288 = vpow2.f32 %v2159_v16 }
 0x5a8   :  { %v2028_v12 = vadd.f32 1.0, %v2287_v1 }
 0x5a9   :  { %2290 = vrcp.f32 %v2009_v4  ;;  %v2021_v56 = vand.u32 2147483648, %v2009_v4  ;;  %v2019_v61 = vand.u32 2147483647, %v2009_v4  ;;  %vm2015_vm6 = vweird.f32 %v2009_v4 }
 0x5aa   :  { %2292 = vrcp.f32 %v2028_v12  ;;  %v2040_v57 = vand.u32 2147483648, %v2028_v12  ;;  %v2038_v30 = vand.u32 2147483647, %v2028_v12  ;;  %vm2034_vm7 = vweird.f32 %v2028_v12 }
 0x5ab   :  { %v2022_v43 = vor.u32 1.1754944e-38, %v2021_v56  ;;  %vm2020_vm10 = vcmp.eq.f32.partialorder %v2019_v61, 8.507059e+37 }
 0x5ac   :  { %v2041_v37 = vor.u32 1.1754944e-38, %v2040_v57  ;;  %vm2039_vm11 = vcmp.eq.f32.partialorder %v2038_v30, 8.507059e+37 }
 0x5ad   :  { %v2289_v15 = vpop.eup %2288 }
 0x5ae   :  { %v2048_v3 = vadd.f32 1.0, %v2289_v15 }
 0x5af   :  { %v2291_v19 = vpop.eup %2290 }
 0x5b0   :  { %v2293_v23 = vpop.eup %2292  ;;  %v2011_v24 = vmul.f32 %v2291_v19, %v2009_v4  ;;  %2294 = vrcp.f32 %v2048_v3  ;;  %vm2016_vm4 = vweird.f32 %v2291_v19  ;;  %v2060_v21 = vand.u32 2147483648, %v2048_v3 }
 0x5b1   :  { %v2030_v44 = vmul.f32 %v2293_v23, %v2028_v12  ;;  %2296 = vtanh.f32 %v2004_v20  ;;  %vm2035_vm5 = vweird.f32 %v2293_v23  ;;  %vm2017_vm8 = vmor %vm2015_vm6, %vm2016_vm4  ;;  %vm2054_vm13 = vweird.f32 %v2048_v3 }
 0x5b2   :  { %v2012_v48 = vsub.f32 1.0, %v2011_v24  ;;  %vm2036_vm9 = vmor %vm2034_vm7, %vm2035_vm5  ;;  %v2058_v27 = vand.u32 2147483647, %v2048_v3  ;;  %v2061_v2 = vor.u32 1.1754944e-38, %v2060_v21 }
 0x5b3   :  { %v2031_v51 = vsub.f32 1.0, %v2030_v44 }
 0x5b4   :  { %v2013_v35 = vmul.f32 %v2291_v19, %v2012_v48  ;;  %vm2059_vm15 = vcmp.eq.f32.partialorder %v2058_v27, 8.507059e+37 }
 0x5b5   :  { %v2032_v39 = vmul.f32 %v2293_v23, %v2031_v51 }
 0x5b6   :  { %v2295_v5 = vpop.eup %2294  ;;  %v2014_v17 = vadd.f32 %v2291_v19, %v2013_v35 }
 0x5b7   :  { %v2033_v32 = vadd.f32 %v2293_v23, %v2032_v39  ;;  %v2050_v33 = vmul.f32 %v2295_v5, %v2048_v3  ;;  %v2297_v50 = vpop.eup %2296  ;;  %vm2055_vm12 = vweird.f32 %v2295_v5 }
 0x5b8   :  { %v2018_v7 = vsel %vm2017_vm8, %v2291_v19, %v2014_v17  ;;  %vm2056_vm14 = vmor %vm2054_vm13, %vm2055_vm12 }
 0x5b9   :  { %v2023_v54 = vsel %vm2020_vm10, %v2022_v43, %v2018_v7  ;;  %v2037_v42 = vsel %vm2036_vm9, %v2293_v23, %v2033_v32  ;;  %v2051_v58 = vsub.f32 1.0, %v2050_v33 }
 0x5ba   :  { %v2042_v59 = vsel %vm2039_vm11, %v2041_v37, %v2037_v42  ;;  %v2066_v62 = vmul.f32 %v2297_v50, %v2023_v54 }
 0x5bb   :  { %v2065_v63 = vmul.f32 %v2042_v59, %v3589_v41  ;;  %v2052_v46 = vmul.f32 %v2295_v5, %v2051_v58  ;;  %v2171_v41 = vld [vmem:[%s3608_s5] ss:$0 sm:$0xff] }
 0x5bd   :  { %v2067_v52 = vadd.f32 %v2066_v62, %v2065_v63  ;;  %v2053_v22 = vadd.f32 %v2295_v5, %v2052_v46 }
 0x5bf   :  { %2298 = vtanh.f32 %v2067_v52  ;;  %v2057_v38 = vsel %vm2056_vm14, %v2295_v5, %v2053_v22 }
 0x5c0   :  { %v2062_v14 = vsel %vm2059_vm15, %v2061_v2, %v2057_v38 }
 0x5c5   :  { %v2299_v45 = vpop.eup %2298 }
 0x5c6   :  { %v2069_v49 = vmul.f32 %v2299_v45, %v2062_v14 }
 0x5c8   :  { %2112 = vmatmul.f32.vlgmr.msrb.gmra.mxu0 %v2069_v49 }
 0x645   :  { %v2113_v47 = vpop.f32.mrf.mxu0 }
 0x646   :  { %v2114_v25 = vadd.f32 %v2171_v41, %v2113_v47 }
 0x648   :  { %2116 = vst [vmem:[#allocation13] sm:$0xff] %v2114_v25 }
 0x649   :  { %2127 = dma.vmem_to_hbm [thread:$0]  %s2123_s24, 128, %s2125_s27, [#allocation6]  }
 0x64a   :  { %2450 = dma.done.wait [#allocation6], 128  }
 0x64b   :  { %2451 = vsyncadd [#allocation6], 4294967168 }
 0x64c   :  { %2132 = vsyncpa [#allocation5], 1 }
 0x64d   :  { %2133 = vsyncpa [#allocation8], 1 }
 0x64e   :  { %2134 = vsyncpa [#allocation11], 1 }
 0x64f   :  { %2135 = vsyncpa [#allocation6], 1 }

// kernel: tpu_custom_call.1
= control target key start
LH: loop header
LB: loop body
LE: loop exit
PB: predicated region body
PF: predicated region fallthrough
CT: control target
= control target key end

     0   :  { %11 = vsyncpa [#allocation5], 0  ;;  %s3603_s0 = inlined_call_operand.hbm [shape: f32[1,1,64,128], index: 0, kind: input, shape index: {}]   ;;  %s3604_s1 = inlined_call_operand.hbm [shape: f32[128,512], index: 1, kind: input, shape index: {}]   ;;  %s3605_s2 = inlined_call_operand.hbm [shape: f32[128,512], index: 2, kind: input, shape index: {}]   ;;  %s3606_s3 = inlined_call_operand.hbm [shape: f32[1,512], index: 3, kind: input, shape index: {}]   ;;  %s3607_s4 = inlined_call_operand.hbm [shape: f32[128,128], index: 4, kind: input, shape index: {}]   ;;  %s3608_s5 = inlined_call_operand.vmem [shape: f32[1,128], index: 5, kind: input, shape index: {}]   ;;  %s3609_s6 = inlined_call_operand.hbm [shape: f32[8,128], index: 6, kind: output, shape index: {}]  }
   0x1   :  { %12 = vsyncpa [#allocation8], 0 }
   0x2   :  { %13 = vsyncpa [#allocation11], 0  ;;  %s32_s23 = sshll.u32 %s3604_s1, 4  ;;  %s33_s23 = int_to_ptr.hbm [resolvable:$true] %s32_s23 }
   0x3   :  { %14 = vsyncpa [#allocation6], 0  ;;  %s2452_s24 = smov [#allocation7]   ;;  %s59_s28 = sshll.u32 %s3606_s3, 4  ;;  %s60_s28 = int_to_ptr.hbm [resolvable:$true] %s59_s28 }
   0x4   :  { %s34_s25 = sshll.u32 %s2452_s24, 4  ;;  %s2453_s29 = smov 512   ;;  %s35_s25 = int_to_ptr.vmem [resolvable:$true] %s34_s25 }
   0x5   :  { %s2454_s30 = smov 32   ;;  %s2455_s7 = smov [#allocation10]  }
   0x6   :  { %40 = dma.hbm_to_vmem [thread:$0]  %s33_s23, 8192, %s35_s25, [#allocation8], %s2453_s29, %s2453_s29, %s2454_s30  }
   0x7   :  { %s61_s8 = sshll.u32 %s2455_s7, 4  ;;  %s19_s11 = sshll.u32 %s3603_s0, 4  ;;  %s62_s8 = int_to_ptr.vmem [resolvable:$true] %s61_s8  ;;  %s20_s11 = int_to_ptr.hbm [resolvable:$true] %s19_s11 }
   0x8   :  { %64 = dma.hbm_to_vmem [thread:$0]  %s60_s28, 64, %s62_s8, [#allocation11]  }
   0x9   :  { %s2456_s1 = smov [#allocation4]   ;;  %s45_s3 = sshll.u32 %s3605_s2, 4  ;;  %s46_s3 = int_to_ptr.hbm [resolvable:$true] %s45_s3 }
   0xa   :  { %s21_s12 = sshll.u32 %s2456_s1, 4  ;;  %s2457_s15 = smov 128   ;;  %s22_s12 = int_to_ptr.vmem [resolvable:$true] %s21_s12 }
   0xb   :  { %s2458_s16 = smov 8   ;;  %s2459_s17 = smov [#allocation9]  }
   0xc   :  { %27 = dma.hbm_to_vmem [thread:$0]  %s20_s11, 1024, %s22_s12, [#allocation5], %s2457_s15, %s2457_s15, %s2458_s16  }
   0xd   :  { %s47_s18 = sshll.u32 %s2459_s17, 4  ;;  %s69_s0 = sshll.u32 %s3607_s4, 4  ;;  %s48_s18 = int_to_ptr.vmem [resolvable:$true] %s47_s18  ;;  %s70_s0 = int_to_ptr.hbm [resolvable:$true] %s69_s0 }
   0xe   :  { %53 = dma.hbm_to_vmem [thread:$0]  %s46_s3, 8192, %s48_s18, [#allocation8], %s2453_s29, %s2453_s29, %s2454_s30  }
   0xf   :  { %s2460_s21 = smov [#allocation12]  }
  0x10   :  { %s71_s22 = sshll.u32 %s2460_s21, 4  ;;  %s72_s22 = int_to_ptr.vmem [resolvable:$true] %s71_s22 }
  0x11   :  { %77 = dma.hbm_to_vmem [thread:$0]  %s70_s0, 2048, %s72_s22, [#allocation11], %s2457_s15, %s2457_s15, %s2458_s16  }
  0x12   :  { %2444 = dma.done.wait [#allocation5], 1024  }
  0x13   :  { %2445 = vsyncadd [#allocation5], 4294966272 }
  0x14   :  { %2446 = dma.done.wait [#allocation8], 16384  }
  0x15   :  { %2447 = vsyncadd [#allocation8], 4294950912 }
  0x16   :  { %2448 = dma.done.wait [#allocation11], 2112  }
  0x17   :  { %2449 = vsyncadd [#allocation11], 4294965184  ;;  %v174_v0 = vld [vmem:[#allocation7 + $0x1e0] sm:$0xff]  ;;  %v175_v1 = vld [vmem:[#allocation7 + $0x1e8] sm:$0xff]  ;;  %s2462_s23 = smov [#allocation13]   ;;  %s2124_s27 = sshll.u32 %s3609_s6, 4  ;;  %s2125_s27 = int_to_ptr.hbm [resolvable:$true] %s2124_s27 }
  0x18   :  { %v176_v2 = vld [vmem:[#allocation7 + $0x1f0] sm:$0xff]  ;;  %188 = vmatpush.msra.mxu0 %v174_v0  ;;  %229 = vmatpush.msra.mxu1 %v175_v1  ;;  %v177_v3 = vld [vmem:[#allocation7 + $0x1f8] sm:$0xff]  ;;  %v170_v4 = vld [vmem:[#allocation7 + $0x1c0] sm:$0xff]  ;;  %s2122_s24 = sshll.u32 %s2462_s23, 4  ;;  %s2123_s24 = int_to_ptr.vmem [resolvable:$true] %s2122_s24 }
  0x19   :  { %v171_v5 = vld [vmem:[#allocation7 + $0x1c8] sm:$0xff]  ;;  %270 = vmatpush.msra.mxu2 %v176_v2  ;;  %311 = vmatpush.msra.mxu3 %v177_v3  ;;  %v172_v6 = vld [vmem:[#allocation7 + $0x1d0] sm:$0xff]  ;;  %v173_v7 = vld [vmem:[#allocation7 + $0x1d8] sm:$0xff] }
  0x1a   :  { %v166_v8 = vld [vmem:[#allocation7 + $0x1a0] sm:$0xff]  ;;  %189 = vmatpush.msra.mxu0 %v170_v4  ;;  %230 = vmatpush.msra.mxu1 %v171_v5  ;;  %v167_v9 = vld [vmem:[#allocation7 + $0x1a8] sm:$0xff]  ;;  %v168_v10 = vld [vmem:[#allocation7 + $0x1b0] sm:$0xff] }
  0x1b   :  { %v169_v11 = vld [vmem:[#allocation7 + $0x1b8] sm:$0xff]  ;;  %271 = vmatpush.msra.mxu2 %v172_v6  ;;  %312 = vmatpush.msra.mxu3 %v173_v7  ;;  %v162_v12 = vld [vmem:[#allocation7 + $0x180] sm:$0xff]  ;;  %v163_v13 = vld [vmem:[#allocation7 + $0x188] sm:$0xff] }
  0x1c   :  { %190 = vmatpush.msra.mxu0 %v166_v8  ;;  %231 = vmatpush.msra.mxu1 %v167_v9  ;;  %v164_v14 = vld [vmem:[#allocation7 + $0x190] sm:$0xff]  ;;  %v165_v15 = vld [vmem:[#allocation7 + $0x198] sm:$0xff]  ;;  %v158_v16 = vld [vmem:[#allocation7 + $0x160] sm:$0xff] }
  0x1d   :  { %272 = vmatpush.msra.mxu2 %v168_v10  ;;  %313 = vmatpush.msra.mxu3 %v169_v11  ;;  %v159_v17 = vld [vmem:[#allocation7 + $0x168] sm:$0xff]  ;;  %v160_v18 = vld [vmem:[#allocation7 + $0x170] sm:$0xff]  ;;  %v161_v19 = vld [vmem:[#allocation7 + $0x178] sm:$0xff] }
  0x1e   :  { %191 = vmatpush.msra.mxu0 %v162_v12  ;;  %232 = vmatpush.msra.mxu1 %v163_v13  ;;  %v154_v20 = vld [vmem:[#allocation7 + $0x140] sm:$0xff]  ;;  %v155_v21 = vld [vmem:[#allocation7 + $0x148] sm:$0xff]  ;;  %v156_v22 = vld [vmem:[#allocation7 + $0x150] sm:$0xff] }
  0x1f   :  { %273 = vmatpush.msra.mxu2 %v164_v14  ;;  %314 = vmatpush.msra.mxu3 %v165_v15  ;;  %v157_v23 = vld [vmem:[#allocation7 + $0x158] sm:$0xff]  ;;  %v150_v24 = vld [vmem:[#allocation7 + $0x120] sm:$0xff]  ;;  %v151_v25 = vld [vmem:[#allocation7 + $0x128] sm:$0xff] }
  0x20   :  { %192 = vmatpush.msra.mxu0 %v158_v16  ;;  %233 = vmatpush.msra.mxu1 %v159_v17  ;;  %v152_v26 = vld [vmem:[#allocation7 + $0x130] sm:$0xff]  ;;  %v153_v27 = vld [vmem:[#allocation7 + $0x138] sm:$0xff]  ;;  %v146_v28 = vld [vmem:[#allocation7 + $0x100] sm:$0xff] }
  0x21   :  { %274 = vmatpush.msra.mxu2 %v160_v18  ;;  %315 = vmatpush.msra.mxu3 %v161_v19  ;;  %v147_v29 = vld [vmem:[#allocation7 + $0x108] sm:$0xff]  ;;  %v148_v30 = vld [vmem:[#allocation7 + $0x110] sm:$0xff]  ;;  %v149_v31 = vld [vmem:[#allocation7 + $0x118] sm:$0xff] }
  0x22   :  { %193 = vmatpush.msra.mxu0 %v154_v20  ;;  %234 = vmatpush.msra.mxu1 %v155_v21  ;;  %v142_v32 = vld [vmem:[#allocation7 + $0xe0] sm:$0xff]  ;;  %v143_v33 = vld [vmem:[#allocation7 + $0xe8] sm:$0xff]  ;;  %v144_v34 = vld [vmem:[#allocation7 + $0xf0] sm:$0xff] }
  0x23   :  { %275 = vmatpush.msra.mxu2 %v156_v22  ;;  %316 = vmatpush.msra.mxu3 %v157_v23  ;;  %v145_v35 = vld [vmem:[#allocation7 + $0xf8] sm:$0xff]  ;;  %v138_v36 = vld [vmem:[#allocation7 + $0xc0] sm:$0xff]  ;;  %v139_v37 = vld [vmem:[#allocation7 + $0xc8] sm:$0xff] }
  0x24   :  { %194 = vmatpush.msra.mxu0 %v150_v24  ;;  %235 = vmatpush.msra.mxu1 %v151_v25  ;;  %v140_v38 = vld [vmem:[#allocation7 + $0xd0] sm:$0xff]  ;;  %v141_v39 = vld [vmem:[#allocation7 + $0xd8] sm:$0xff]  ;;  %v134_v40 = vld [vmem:[#allocation7 + $0xa0] sm:$0xff] }
  0x25   :  { %276 = vmatpush.msra.mxu2 %v152_v26  ;;  %317 = vmatpush.msra.mxu3 %v153_v27  ;;  %v135_v41 = vld [vmem:[#allocation7 + $0xa8] sm:$0xff]  ;;  %v136_v42 = vld [vmem:[#allocation7 + $0xb0] sm:$0xff]  ;;  %v137_v43 = vld [vmem:[#allocation7 + $0xb8] sm:$0xff] }
  0x26   :  { %195 = vmatpush.msra.mxu0 %v146_v28  ;;  %236 = vmatpush.msra.mxu1 %v147_v29  ;;  %v130_v44 = vld [vmem:[#allocation7 + $0x80] sm:$0xff]  ;;  %v131_v45 = vld [vmem:[#allocation7 + $0x88] sm:$0xff]  ;;  %v132_v46 = vld [vmem:[#allocation7 + $0x90] sm:$0xff] }
  0x27   :  { %277 = vmatpush.msra.mxu2 %v148_v30  ;;  %318 = vmatpush.msra.mxu3 %v149_v31  ;;  %v133_v47 = vld [vmem:[#allocation7 + $0x98] sm:$0xff]  ;;  %v126_v48 = vld [vmem:[#allocation7 + $0x60] sm:$0xff]  ;;  %v127_v49 = vld [vmem:[#allocation7 + $0x68] sm:$0xff] }
  0x28   :  { %196 = vmatpush.msra.mxu0 %v142_v32  ;;  %237 = vmatpush.msra.mxu1 %v143_v33  ;;  %v128_v50 = vld [vmem:[#allocation7 + $0x70] sm:$0xff]  ;;  %v129_v51 = vld [vmem:[#allocation7 + $0x78] sm:$0xff]  ;;  %v122_v52 = vld [vmem:[#allocation7 + $0x40] sm:$0xff] }
  0x29   :  { %278 = vmatpush.msra.mxu2 %v144_v34  ;;  %319 = vmatpush.msra.mxu3 %v145_v35  ;;  %v123_v53 = vld [vmem:[#allocation7 + $0x48] sm:$0xff]  ;;  %v124_v54 = vld [vmem:[#allocation7 + $0x50] sm:$0xff]  ;;  %v125_v55 = vld [vmem:[#allocation7 + $0x58] sm:$0xff] }
  0x2a   :  { %197 = vmatpush.msra.mxu0 %v138_v36  ;;  %238 = vmatpush.msra.mxu1 %v139_v37  ;;  %v118_v56 = vld [vmem:[#allocation7 + $0x20] sm:$0xff]  ;;  %v119_v57 = vld [vmem:[#allocation7 + $0x28] sm:$0xff]  ;;  %v120_v58 = vld [vmem:[#allocation7 + $0x30] sm:$0xff] }
  0x2b   :  { %279 = vmatpush.msra.mxu2 %v140_v38  ;;  %320 = vmatpush.msra.mxu3 %v141_v39  ;;  %v121_v59 = vld [vmem:[#allocation7 + $0x38] sm:$0xff]  ;;  %v114_v60 = vld [vmem:[#allocation7] sm:$0xff]  ;;  %v115_v61 = vld [vmem:[#allocation7 + $0x8] sm:$0xff] }
  0x2c   :  { %198 = vmatpush.msra.mxu0 %v134_v40  ;;  %239 = vmatpush.msra.mxu1 %v135_v41  ;;  %v116_v62 = vld [vmem:[#allocation7 + $0x10] sm:$0xff]  ;;  %v117_v63 = vld [vmem:[#allocation7 + $0x18] sm:$0xff]  ;;  %v106_v0 = vld [vmem:[#allocation4] sm:$0xff] }
  0x2d   :  { %280 = vmatpush.msra.mxu2 %v136_v42  ;;  %321 = vmatpush.msra.mxu3 %v137_v43  ;;  %v2513_v1 = vld [vmem:[#allocation9 + $0x1e0] sm:$0xff]  ;;  %v2515_v2 = vld [vmem:[#allocation9 + $0x1e8] sm:$0xff]  ;;  %v2517_v3 = vld [vmem:[#allocation9 + $0x1f8] sm:$0xff] }
  0x2e   :  { %199 = vmatpush.msra.mxu0 %v130_v44  ;;  %240 = vmatpush.msra.mxu1 %v131_v45  ;;  %v2519_v4 = vld [vmem:[#allocation9 + $0x1f0] sm:$0xff]  ;;  %v2521_v5 = vld [vmem:[#allocation9 + $0x1c0] sm:$0xff]  ;;  %v2523_v6 = vld [vmem:[#allocation9 + $0x1c8] sm:$0xff] }
  0x2f   :  { %281 = vmatpush.msra.mxu2 %v132_v46  ;;  %322 = vmatpush.msra.mxu3 %v133_v47  ;;  %v2527_v7 = vld [vmem:[#allocation9 + $0x1d8] sm:$0xff]  ;;  %v2529_v8 = vld [vmem:[#allocation9 + $0x1d0] sm:$0xff]  ;;  %v2532_v9 = vld [vmem:[#allocation9 + $0x1a0] sm:$0xff] }
  0x30   :  { %200 = vmatpush.msra.mxu0 %v126_v48  ;;  %241 = vmatpush.msra.mxu1 %v127_v49  ;;  %v2534_v10 = vld [vmem:[#allocation9 + $0x1a8] sm:$0xff]  ;;  %v2539_v11 = vld [vmem:[#allocation9 + $0x1b8] sm:$0xff]  ;;  %v2541_v12 = vld [vmem:[#allocation9 + $0x1b0] sm:$0xff] }
  0x31   :  { %282 = vmatpush.msra.mxu2 %v128_v50  ;;  %323 = vmatpush.msra.mxu3 %v129_v51  ;;  %v107_v13 = vld [vmem:[#allocation4 + $0x8] sm:$0xff]  ;;  %v2547_v14 = vld [vmem:[#allocation9 + $0x180] sm:$0xff]  ;;  %v2553_v16 = vld [vmem:[#allocation9 + $0x198] sm:$0xff] }
  0x32   :  { %201 = vmatpush.msra.mxu0 %v122_v52  ;;  %242 = vmatpush.msra.mxu1 %v123_v53  ;;  %v2549_v15 = vld [vmem:[#allocation9 + $0x188] sm:$0xff]  ;;  %v2555_v17 = vld [vmem:[#allocation9 + $0x190] sm:$0xff]  ;;  %v2557_v18 = vld [vmem:[#allocation9 + $0x160] sm:$0xff] }
  0x33   :  { %283 = vmatpush.msra.mxu2 %v124_v54  ;;  %324 = vmatpush.msra.mxu3 %v125_v55  ;;  %v2559_v19 = vld [vmem:[#allocation9 + $0x168] sm:$0xff]  ;;  %v2563_v20 = vld [vmem:[#allocation9 + $0x178] sm:$0xff]  ;;  %v2565_v21 = vld [vmem:[#allocation9 + $0x170] sm:$0xff] }
  0x34   :  { %202 = vmatpush.msra.mxu0 %v118_v56  ;;  %243 = vmatpush.msra.mxu1 %v119_v57  ;;  %v2568_v22 = vld [vmem:[#allocation9 + $0x140] sm:$0xff]  ;;  %v2570_v23 = vld [vmem:[#allocation9 + $0x148] sm:$0xff]  ;;  %v2575_v24 = vld [vmem:[#allocation9 + $0x158] sm:$0xff] }
  0x35   :  { %284 = vmatpush.msra.mxu2 %v120_v58  ;;  %325 = vmatpush.msra.mxu3 %v121_v59  ;;  %v2577_v25 = vld [vmem:[#allocation9 + $0x150] sm:$0xff]  ;;  %v2583_v27 = vld [vmem:[#allocation9 + $0x120] sm:$0xff]  ;;  %v2585_v28 = vld [vmem:[#allocation9 + $0x128] sm:$0xff] }
  0x36   :  { %203 = vmatpush.msra.mxu0 %v114_v60  ;;  %244 = vmatpush.msra.mxu1 %v115_v61  ;;  %v108_v26 = vld [vmem:[#allocation4 + $0x10] sm:$0xff]  ;;  %v2589_v29 = vld [vmem:[#allocation9 + $0x138] sm:$0xff]  ;;  %v2593_v31 = vld [vmem:[#allocation9 + $0x100] sm:$0xff] }
  0x37   :  { %285 = vmatpush.msra.mxu2 %v116_v62  ;;  %326 = vmatpush.msra.mxu3 %v117_v63  ;;  %v2591_v30 = vld [vmem:[#allocation9 + $0x130] sm:$0xff]  ;;  %v2595_v32 = vld [vmem:[#allocation9 + $0x108] sm:$0xff]  ;;  %v2599_v33 = vld [vmem:[#allocation9 + $0x118] sm:$0xff] }
  0x38   :  { %204 = vmatmul.f32.vlgmr.msra.gmra.mxu0 %v106_v0  ;;  %245 = vmatmul.f32.vlgmr.msra.gmra.mxu1 %v106_v0  ;;  %v2601_v34 = vld [vmem:[#allocation9 + $0x110] sm:$0xff]  ;;  %v2604_v35 = vld [vmem:[#allocation9 + $0xe0] sm:$0xff]  ;;  %v2606_v36 = vld [vmem:[#allocation9 + $0xe8] sm:$0xff] }
  0x39   :  { %286 = vmatmul.f32.vlgmr.msra.gmra.mxu2 %v106_v0  ;;  %327 = vmatmul.f32.vlgmr.msra.gmra.mxu3 %v106_v0  ;;  %v2611_v37 = vld [vmem:[#allocation9 + $0xf8] sm:$0xff]  ;;  %v2613_v38 = vld [vmem:[#allocation9 + $0xf0] sm:$0xff]  ;;  %v2619_v40 = vld [vmem:[#allocation9 + $0xc0] sm:$0xff] }
  0x3a   :  { %417 = vmatpush.msrb.mxu0 %v2513_v1  ;;  %437 = vmatpush.msrb.mxu1 %v2515_v2  ;;  %v109_v39 = vld [vmem:[#allocation4 + $0x18] sm:$0xff]  ;;  %v2621_v41 = vld [vmem:[#allocation9 + $0xc8] sm:$0xff]  ;;  %v2627_v43 = vld [vmem:[#allocation9 + $0xd0] sm:$0xff] }
  0x3b   :  { %477 = vmatpush.msrb.mxu3 %v2517_v3  ;;  %457 = vmatpush.msrb.mxu2 %v2519_v4  ;;  %v2625_v42 = vld [vmem:[#allocation9 + $0xd8] sm:$0xff]  ;;  %v2629_v44 = vld [vmem:[#allocation9 + $0xa0] sm:$0xff]  ;;  %v2631_v45 = vld [vmem:[#allocation9 + $0xa8] sm:$0xff] }
  0x3c   :  { %418 = vmatpush.msrb.mxu0 %v2521_v5  ;;  %438 = vmatpush.msrb.mxu1 %v2523_v6  ;;  %v2635_v46 = vld [vmem:[#allocation9 + $0xb8] sm:$0xff]  ;;  %v2637_v47 = vld [vmem:[#allocation9 + $0xb0] sm:$0xff]  ;;  %v2640_v48 = vld [vmem:[#allocation9 + $0x80] sm:$0xff] }
  0x3d   :  { %478 = vmatpush.msrb.mxu3 %v2527_v7  ;;  %458 = vmatpush.msrb.mxu2 %v2529_v8  ;;  %v2642_v49 = vld [vmem:[#allocation9 + $0x88] sm:$0xff]  ;;  %v2647_v50 = vld [vmem:[#allocation9 + $0x98] sm:$0xff]  ;;  %v2649_v51 = vld [vmem:[#allocation9 + $0x90] sm:$0xff] }
  0x3e   :  { %419 = vmatpush.msrb.mxu0 %v2532_v9  ;;  %439 = vmatpush.msrb.mxu1 %v2534_v10  ;;  %v110_v52 = vld [vmem:[#allocation4 + $0x20] sm:$0xff]  ;;  %v2657_v54 = vld [vmem:[#allocation9 + $0x68] sm:$0xff]  ;;  %v2661_v55 = vld [vmem:[#allocation9 + $0x78] sm:$0xff] }
  0x3f   :  { %479 = vmatpush.msrb.mxu3 %v2539_v11  ;;  %459 = vmatpush.msrb.mxu2 %v2541_v12  ;;  %v2655_v53 = vld [vmem:[#allocation9 + $0x60] sm:$0xff]  ;;  %v2663_v56 = vld [vmem:[#allocation9 + $0x70] sm:$0xff]  ;;  %v2667_v58 = vld [vmem:[#allocation9 + $0x48] sm:$0xff] }
  0x40   :  { %207 = vmatmul.f32.gmra.mxu0 %v107_v13  ;;  %248 = vmatmul.f32.gmra.mxu1 %v107_v13  ;;  %v2665_v57 = vld [vmem:[#allocation9 + $0x40] sm:$0xff]  ;;  %3647 = vst [vmem:[#allocation18_spill] sm:$0xff] %v2667_v58  ;;  %v2671_v59 = vld [vmem:[#allocation9 + $0x58] sm:$0xff]  ;;  %v2673_v60 = vld [vmem:[#allocation9 + $0x50] sm:$0xff] }
  0x41   :  { %289 = vmatmul.f32.gmra.mxu2 %v107_v13  ;;  %330 = vmatmul.f32.gmra.mxu3 %v107_v13  ;;  %v2676_v61 = vld [vmem:[#allocation9 + $0x20] sm:$0xff]  ;;  %v2678_v62 = vld [vmem:[#allocation9 + $0x28] sm:$0xff]  ;;  %v2683_v63 = vld [vmem:[#allocation9 + $0x30] sm:$0xff] }
  0x42   :  { %420 = vmatpush.msrb.mxu0 %v2547_v14  ;;  %440 = vmatpush.msrb.mxu1 %v2549_v15  ;;  %v2685_v0 = vld [vmem:[#allocation9 + $0x38] sm:$0xff]  ;;  %v111_v13 = vld [vmem:[#allocation4 + $0x28] sm:$0xff] }
  0x43   :  { %480 = vmatpush.msrb.mxu3 %v2553_v16  ;;  %460 = vmatpush.msrb.mxu2 %v2555_v17  ;;  %3648 = vst [vmem:[#allocation19_spill] sm:$0xff] %v2685_v0 }
  0x44   :  { %421 = vmatpush.msrb.mxu0 %v2557_v18  ;;  %441 = vmatpush.msrb.mxu1 %v2559_v19 }
  0x45   :  { %481 = vmatpush.msrb.mxu3 %v2563_v20  ;;  %461 = vmatpush.msrb.mxu2 %v2565_v21 }
  0x46   :  { %422 = vmatpush.msrb.mxu0 %v2568_v22  ;;  %442 = vmatpush.msrb.mxu1 %v2570_v23 }
  0x47   :  { %482 = vmatpush.msrb.mxu3 %v2575_v24  ;;  %462 = vmatpush.msrb.mxu2 %v2577_v25 }
  0x48   :  { %210 = vmatmul.f32.gmra.mxu0 %v108_v26  ;;  %251 = vmatmul.f32.gmra.mxu1 %v108_v26 }
  0x49   :  { %292 = vmatmul.f32.gmra.mxu2 %v108_v26  ;;  %333 = vmatmul.f32.gmra.mxu3 %v108_v26  ;;  %v2691_v26 = vld [vmem:[#allocation9] sm:$0xff] }
  0x4a   :  { %423 = vmatpush.msrb.mxu0 %v2583_v27  ;;  %443 = vmatpush.msrb.mxu1 %v2585_v28 }
  0x4b   :  { %483 = vmatpush.msrb.mxu3 %v2589_v29  ;;  %463 = vmatpush.msrb.mxu2 %v2591_v30 }
  0x4c   :  { %424 = vmatpush.msrb.mxu0 %v2593_v31  ;;  %444 = vmatpush.msrb.mxu1 %v2595_v32 }
  0x4d   :  { %484 = vmatpush.msrb.mxu3 %v2599_v33  ;;  %464 = vmatpush.msrb.mxu2 %v2601_v34 }
  0x4e   :  { %425 = vmatpush.msrb.mxu0 %v2604_v35  ;;  %445 = vmatpush.msrb.mxu1 %v2606_v36 }
  0x4f   :  { %485 = vmatpush.msrb.mxu3 %v2611_v37  ;;  %465 = vmatpush.msrb.mxu2 %v2613_v38 }
  0x50   :  { %213 = vmatmul.f32.gmra.mxu0 %v109_v39  ;;  %254 = vmatmul.f32.gmra.mxu1 %v109_v39 }
  0x51   :  { %295 = vmatmul.f32.gmra.mxu2 %v109_v39  ;;  %336 = vmatmul.f32.gmra.mxu3 %v109_v39  ;;  %v2693_v39 = vld [vmem:[#allocation9 + $0x8] sm:$0xff] }
  0x52   :  { %426 = vmatpush.msrb.mxu0 %v2619_v40  ;;  %446 = vmatpush.msrb.mxu1 %v2621_v41 }
  0x53   :  { %486 = vmatpush.msrb.mxu3 %v2625_v42  ;;  %466 = vmatpush.msrb.mxu2 %v2627_v43 }
  0x54   :  { %427 = vmatpush.msrb.mxu0 %v2629_v44  ;;  %447 = vmatpush.msrb.mxu1 %v2631_v45 }
  0x55   :  { %487 = vmatpush.msrb.mxu3 %v2635_v46  ;;  %467 = vmatpush.msrb.mxu2 %v2637_v47 }
  0x56   :  { %428 = vmatpush.msrb.mxu0 %v2640_v48  ;;  %448 = vmatpush.msrb.mxu1 %v2642_v49 }
  0x57   :  { %488 = vmatpush.msrb.mxu3 %v2647_v50  ;;  %468 = vmatpush.msrb.mxu2 %v2649_v51 }
  0x58   :  { %216 = vmatmul.f32.gmra.mxu0 %v110_v52  ;;  %257 = vmatmul.f32.gmra.mxu1 %v110_v52 }
  0x59   :  { %298 = vmatmul.f32.gmra.mxu2 %v110_v52  ;;  %339 = vmatmul.f32.gmra.mxu3 %v110_v52  ;;  %v2697_v52 = vld [vmem:[#allocation9 + $0x10] sm:$0xff] }
  0x5a   :  { %429 = vmatpush.msrb.mxu0 %v2655_v53  ;;  %449 = vmatpush.msrb.mxu1 %v2657_v54 }
  0x5b   :  { %489 = vmatpush.msrb.mxu3 %v2661_v55  ;;  %469 = vmatpush.msrb.mxu2 %v2663_v56 }
  0x5c   :  { %430 = vmatpush.msrb.mxu0 %v2665_v57  ;;  %450 = vmatpush.msrb.mxu1 %v2667_v58  ;;  %v2699_v58 = vld [vmem:[#allocation9 + $0x18] sm:$0xff] }
  0x5d   :  { %490 = vmatpush.msrb.mxu3 %v2671_v59  ;;  %470 = vmatpush.msrb.mxu2 %v2673_v60 }
  0x5e   :  { %431 = vmatpush.msrb.mxu0 %v2676_v61  ;;  %451 = vmatpush.msrb.mxu1 %v2678_v62 }
  0x5f   :  { %471 = vmatpush.msrb.mxu2 %v2683_v63  ;;  %491 = vmatpush.msrb.mxu3 %v2685_v0  ;;  %v112_v0 = vld [vmem:[#allocation4 + $0x30] sm:$0xff] }
  0x60   :  { %219 = vmatmul.f32.gmra.mxu0 %v111_v13  ;;  %260 = vmatmul.f32.gmra.mxu1 %v111_v13 }
  0x61   :  { %301 = vmatmul.f32.gmra.mxu2 %v111_v13  ;;  %342 = vmatmul.f32.gmra.mxu3 %v111_v13  ;;  %v113_v13 = vld [vmem:[#allocation4 + $0x38] sm:$0xff] }
  0x62   :  { %432 = vmatpush.msrb.mxu0 %v2691_v26  ;;  %452 = vmatpush.msrb.mxu1 %v2693_v39 }
  0x63   :  { %472 = vmatpush.msrb.mxu2 %v2697_v52  ;;  %492 = vmatpush.msrb.mxu3 %v2699_v58 }
  0x64   :  { %632 = vmatpush.msra.mxu0 %v2513_v1  ;;  %652 = vmatpush.msra.mxu1 %v2515_v2 }
  0x65   :  { %672 = vmatpush.msra.mxu2 %v2519_v4  ;;  %692 = vmatpush.msra.mxu3 %v2517_v3 }
  0x66   :  { %633 = vmatpush.msra.mxu0 %v2521_v5  ;;  %653 = vmatpush.msra.mxu1 %v2523_v6 }
  0x67   :  { %673 = vmatpush.msra.mxu2 %v2529_v8  ;;  %693 = vmatpush.msra.mxu3 %v2527_v7 }
  0x68   :  { %222 = vmatmul.f32.gmra.mxu0 %v112_v0  ;;  %263 = vmatmul.f32.gmra.mxu1 %v112_v0 }
  0x69   :  { %304 = vmatmul.f32.gmra.mxu2 %v112_v0  ;;  %345 = vmatmul.f32.gmra.mxu3 %v112_v0  ;;  %v2461_v0 = vmov 0.0  }
  0x6a   :  { %634 = vmatpush.msra.mxu0 %v2532_v9  ;;  %654 = vmatpush.msra.mxu1 %v2534_v10 }
  0x6b   :  { %674 = vmatpush.msra.mxu2 %v2541_v12  ;;  %694 = vmatpush.msra.mxu3 %v2539_v11 }
  0x6c   :  { %635 = vmatpush.msra.mxu0 %v2547_v14  ;;  %655 = vmatpush.msra.mxu1 %v2549_v15 }
  0x6d   :  { %675 = vmatpush.msra.mxu2 %v2555_v17  ;;  %695 = vmatpush.msra.mxu3 %v2553_v16 }
  0x6e   :  { %636 = vmatpush.msra.mxu0 %v2557_v18  ;;  %656 = vmatpush.msra.mxu1 %v2559_v19 }
  0x6f   :  { %676 = vmatpush.msra.mxu2 %v2565_v21  ;;  %696 = vmatpush.msra.mxu3 %v2563_v20 }
  0x70   :  { %225 = vmatmul.f32.gmra.mxu0 %v113_v13  ;;  %266 = vmatmul.f32.gmra.mxu1 %v113_v13 }
  0x71   :  { %307 = vmatmul.f32.gmra.mxu2 %v113_v13  ;;  %348 = vmatmul.f32.gmra.mxu3 %v113_v13  ;;  %v3649_v13 = vld [vmem:[#allocation18_spill] sm:$0xff] }
  0x72   :  { %637 = vmatpush.msra.mxu0 %v2568_v22  ;;  %657 = vmatpush.msra.mxu1 %v2570_v23 }
  0x73   :  { %677 = vmatpush.msra.mxu2 %v2577_v25  ;;  %697 = vmatpush.msra.mxu3 %v2575_v24 }
  0x74   :  { %638 = vmatpush.msra.mxu0 %v2583_v27  ;;  %658 = vmatpush.msra.mxu1 %v2585_v28 }
  0x75   :  { %678 = vmatpush.msra.mxu2 %v2591_v30  ;;  %698 = vmatpush.msra.mxu3 %v2589_v29 }
  0x76   :  { %639 = vmatpush.msra.mxu0 %v2593_v31  ;;  %659 = vmatpush.msra.mxu1 %v2595_v32 }
  0x77   :  { %679 = vmatpush.msra.mxu2 %v2601_v34  ;;  %699 = vmatpush.msra.mxu3 %v2599_v33 }
  0x78   :  { %433 = vmatmul.f32.vlgmr.msrb.gmra.mxu0 %v2461_v0  ;;  %453 = vmatmul.f32.vlgmr.msrb.gmra.mxu1 %v2461_v0 }
  0x79   :  { %473 = vmatmul.f32.vlgmr.msrb.gmra.mxu2 %v2461_v0  ;;  %493 = vmatmul.f32.vlgmr.msrb.gmra.mxu3 %v2461_v0  ;;  %v3650_v0 = vld [vmem:[#allocation19_spill] sm:$0xff] }
  0x7a   :  { %640 = vmatpush.msra.mxu0 %v2604_v35  ;;  %660 = vmatpush.msra.mxu1 %v2606_v36 }
  0x7b   :  { %680 = vmatpush.msra.mxu2 %v2613_v38  ;;  %700 = vmatpush.msra.mxu3 %v2611_v37 }
  0x7c   :  { %641 = vmatpush.msra.mxu0 %v2619_v40  ;;  %661 = vmatpush.msra.mxu1 %v2621_v41 }
  0x7d   :  { %681 = vmatpush.msra.mxu2 %v2627_v43  ;;  %701 = vmatpush.msra.mxu3 %v2625_v42 }
  0x7e   :  { %642 = vmatpush.msra.mxu0 %v2629_v44  ;;  %662 = vmatpush.msra.mxu1 %v2631_v45 }
  0x7f   :  { %682 = vmatpush.msra.mxu2 %v2637_v47  ;;  %702 = vmatpush.msra.mxu3 %v2635_v46 }
  0x80   :  { %643 = vmatpush.msra.mxu0 %v2640_v48  ;;  %663 = vmatpush.msra.mxu1 %v2642_v49 }
  0x81   :  { %683 = vmatpush.msra.mxu2 %v2649_v51  ;;  %703 = vmatpush.msra.mxu3 %v2647_v50 }
  0x82   :  { %644 = vmatpush.msra.mxu0 %v2655_v53  ;;  %664 = vmatpush.msra.mxu1 %v2657_v54 }
  0x83   :  { %684 = vmatpush.msra.mxu2 %v2663_v56  ;;  %704 = vmatpush.msra.mxu3 %v2661_v55 }
  0x84   :  { %645 = vmatpush.msra.mxu0 %v2665_v57  ;;  %665 = vmatpush.msra.mxu1 %v3649_v13 }
  0x85   :  { %685 = vmatpush.msra.mxu2 %v2673_v60  ;;  %705 = vmatpush.msra.mxu3 %v2671_v59 }
  0x86   :  { %646 = vmatpush.msra.mxu0 %v2676_v61  ;;  %666 = vmatpush.msra.mxu1 %v2678_v62 }
  0x87   :  { %686 = vmatpush.msra.mxu2 %v2683_v63  ;;  %706 = vmatpush.msra.mxu3 %v3650_v0 }
  0x88   :  { %647 = vmatpush.msra.mxu0 %v2691_v26  ;;  %667 = vmatpush.msra.mxu1 %v2693_v39 }
  0x89   :  { %687 = vmatpush.msra.mxu2 %v2697_v52  ;;  %707 = vmatpush.msra.mxu3 %v2699_v58 }
  0x8a   :  { %847 = vmatpush.msrb.mxu0 %v2513_v1  ;;  %867 = vmatpush.msrb.mxu1 %v2515_v2 }
  0x8b   :  { %887 = vmatpush.msrb.mxu2 %v2519_v4  ;;  %907 = vmatpush.msrb.mxu3 %v2517_v3  ;;  %v178_v3 = vld [vmem:[#allocation10] sm:$0xf] }
  0x8c   :  { %848 = vmatpush.msrb.mxu0 %v2521_v5  ;;  %868 = vmatpush.msrb.mxu1 %v2523_v6  ;;  %v180_v4 = vperm.slane %v178_v3, 0  ;;  %v181_v5 = vperm.slane %v178_v3, 1 }
  0x8d   :  { %888 = vmatpush.msrb.mxu2 %v2529_v8  ;;  %908 = vmatpush.msrb.mxu3 %v2527_v7 }
  0x8e   :  { %849 = vmatpush.msrb.mxu0 %v2532_v9  ;;  %869 = vmatpush.msrb.mxu1 %v2534_v10 }
  0x8f   :  { %889 = vmatpush.msrb.mxu2 %v2541_v12  ;;  %909 = vmatpush.msrb.mxu3 %v2539_v11  ;;  %v2841_v12 = vperm.slane %v178_v3, 2 }
  0x90   :  { %850 = vmatpush.msrb.mxu0 %v2547_v14  ;;  %870 = vmatpush.msrb.mxu1 %v2549_v15  ;;  %v183_v14 = vperm.slane %v178_v3, 3 }
  0x91   :  { %890 = vmatpush.msrb.mxu2 %v2555_v17  ;;  %910 = vmatpush.msrb.mxu3 %v2553_v16 }
  0x92   :  { %851 = vmatpush.msrb.mxu0 %v2557_v18  ;;  %871 = vmatpush.msrb.mxu1 %v2559_v19 }
  0x93   :  { %891 = vmatpush.msrb.mxu2 %v2565_v21  ;;  %911 = vmatpush.msrb.mxu3 %v2563_v20 }
  0x94   :  { %852 = vmatpush.msrb.mxu0 %v2568_v22  ;;  %872 = vmatpush.msrb.mxu1 %v2570_v23 }
  0x95   :  { %892 = vmatpush.msrb.mxu2 %v2577_v25  ;;  %912 = vmatpush.msrb.mxu3 %v2575_v24 }
  0x96   :  { %853 = vmatpush.msrb.mxu0 %v2583_v27  ;;  %873 = vmatpush.msrb.mxu1 %v2585_v28 }
  0x97   :  { %893 = vmatpush.msrb.mxu2 %v2591_v30  ;;  %913 = vmatpush.msrb.mxu3 %v2589_v29 }
  0x98   :  { %854 = vmatpush.msrb.mxu0 %v2593_v31  ;;  %874 = vmatpush.msrb.mxu1 %v2595_v32 }
  0x99   :  { %894 = vmatpush.msrb.mxu2 %v2601_v34  ;;  %914 = vmatpush.msrb.mxu3 %v2599_v33 }
  0x9a   :  { %855 = vmatpush.msrb.mxu0 %v2604_v35  ;;  %875 = vmatpush.msrb.mxu1 %v2606_v36 }
  0x9b   :  { %895 = vmatpush.msrb.mxu2 %v2613_v38  ;;  %915 = vmatpush.msrb.mxu3 %v2611_v37 }
  0x9c   :  { %856 = vmatpush.msrb.mxu0 %v2619_v40  ;;  %876 = vmatpush.msrb.mxu1 %v2621_v41 }
  0x9d   :  { %896 = vmatpush.msrb.mxu2 %v2627_v43  ;;  %916 = vmatpush.msrb.mxu3 %v2625_v42 }
  0x9e   :  { %857 = vmatpush.msrb.mxu0 %v2629_v44  ;;  %877 = vmatpush.msrb.mxu1 %v2631_v45 }
  0x9f   :  { %897 = vmatpush.msrb.mxu2 %v2637_v47  ;;  %917 = vmatpush.msrb.mxu3 %v2635_v46 }
  0xa0   :  { %858 = vmatpush.msrb.mxu0 %v2640_v48  ;;  %878 = vmatpush.msrb.mxu1 %v2642_v49 }
  0xa1   :  { %898 = vmatpush.msrb.mxu2 %v2649_v51  ;;  %918 = vmatpush.msrb.mxu3 %v2647_v50 }
  0xa2   :  { %859 = vmatpush.msrb.mxu0 %v2655_v53  ;;  %879 = vmatpush.msrb.mxu1 %v2657_v54 }
  0xa3   :  { %899 = vmatpush.msrb.mxu2 %v2663_v56  ;;  %919 = vmatpush.msrb.mxu3 %v2661_v55 }
  0xa4   :  { %860 = vmatpush.msrb.mxu0 %v2665_v57  ;;  %880 = vmatpush.msrb.mxu1 %v3649_v13 }
  0xa5   :  { %900 = vmatpush.msrb.mxu2 %v2673_v60  ;;  %920 = vmatpush.msrb.mxu3 %v2671_v59 }
  0xa6   :  { %861 = vmatpush.msrb.mxu0 %v2676_v61  ;;  %881 = vmatpush.msrb.mxu1 %v2678_v62 }
  0xa7   :  { %901 = vmatpush.msrb.mxu2 %v2683_v63  ;;  %921 = vmatpush.msrb.mxu3 %v3650_v0 }
  0xa8   :  { %862 = vmatpush.msrb.mxu0 %v2691_v26  ;;  %882 = vmatpush.msrb.mxu1 %v2693_v39 }
  0xa9   :  { %902 = vmatpush.msrb.mxu2 %v2697_v52  ;;  %922 = vmatpush.msrb.mxu3 %v2699_v58 }
  0xb5   :  { %v205_v1 = vpop.f32.mrf.mxu0  ;;  %v246_v2 = vpop.f32.mrf.mxu1 }
  0xb6   :  { %v206_v52 = vadd.f32 %v205_v1, %v180_v4  ;;  %v247_v13 = vadd.f32 %v246_v2, %v181_v5 }
  0xbc   :  { %v2833_v6 = vpop.f32.mrf.mxu2  ;;  %v2835_v7 = vpop.f32.mrf.mxu3 }
  0xbd   :  { %v208_v8 = vpop.f32.mrf.mxu0  ;;  %v249_v9 = vpop.f32.mrf.mxu1 }
  0xbe   :  { %v2837_v10 = vadd.f32 %v208_v8, %v180_v4  ;;  %v2839_v11 = vadd.f32 %v249_v9, %v181_v5 }
  0xc4   :  { %v290_v15 = vpop.f32.mrf.mxu2  ;;  %v331_v16 = vpop.f32.mrf.mxu3 }
  0xc5   :  { %v2844_v17 = vadd.f32 %v290_v15, %v2841_v12  ;;  %v2846_v18 = vadd.f32 %v331_v16, %v183_v14  ;;  %v211_v19 = vpop.f32.mrf.mxu0  ;;  %v252_v20 = vpop.f32.mrf.mxu1 }
  0xc6   :  { %v2848_v21 = vadd.f32 %v211_v19, %v180_v4  ;;  %v2850_v22 = vadd.f32 %v252_v20, %v181_v5 }
  0xcc   :  { %v293_v23 = vpop.f32.mrf.mxu2  ;;  %v334_v24 = vpop.f32.mrf.mxu3 }
  0xcd   :  { %v2853_v25 = vadd.f32 %v293_v23, %v2841_v12  ;;  %v2855_v27 = vadd.f32 %v334_v24, %v183_v14  ;;  %v214_v28 = vpop.f32.mrf.mxu0  ;;  %v255_v29 = vpop.f32.mrf.mxu1 }
  0xce   :  { %v2857_v30 = vadd.f32 %v214_v28, %v180_v4  ;;  %v2859_v31 = vadd.f32 %v255_v29, %v181_v5  ;;  %v329_v28 = vadd.f32 %v2835_v7, %v183_v14 }
  0xd0   :  { %3651 = vst [vmem:[#allocation18_spill] sm:$0xff] %v2857_v30  ;;  %v3089_v30 = vld [vmem:[#allocation9 + $0x30] sm:$0xff] }
  0xd1   :  { %3652 = vst [vmem:[#allocation19_spill] sm:$0xff] %v2859_v31 }
  0xd4   :  { %v296_v32 = vpop.f32.mrf.mxu2  ;;  %v337_v33 = vpop.f32.mrf.mxu3 }
  0xd5   :  { %v2862_v34 = vadd.f32 %v296_v32, %v2841_v12  ;;  %v2864_v35 = vadd.f32 %v337_v33, %v183_v14  ;;  %v217_v36 = vpop.f32.mrf.mxu0  ;;  %v258_v37 = vpop.f32.mrf.mxu1 }
  0xd6   :  { %v2866_v38 = vadd.f32 %v217_v36, %v180_v4  ;;  %v2868_v40 = vadd.f32 %v258_v37, %v181_v5 }
  0xd7   :  { %3653 = vst [vmem:[#allocation20_spill] sm:$0xff] %v2862_v34  ;;  %v3080_v34 = vld [vmem:[#allocation9 + $0x58] sm:$0xff] }
  0xd8   :  { %3654 = vst [vmem:[#allocation21_spill] sm:$0xff] %v2864_v35  ;;  %v3082_v35 = vld [vmem:[#allocation9 + $0x20] sm:$0xff] }
  0xd9   :  { %3655 = vst [vmem:[#allocation22_spill] sm:$0xff] %v2866_v38 }
  0xda   :  { %3656 = vst [vmem:[#allocation23_spill] sm:$0xff] %v2868_v40  ;;  %v3074_v40 = vld [vmem:[#allocation9 + $0x48] sm:$0xff] }
  0xdb   :  { %3688 = vst [vmem:[#allocation55_spill] sm:$0xff] %v3074_v40 }
  0xdc   :  { %v299_v41 = vpop.f32.mrf.mxu2  ;;  %v340_v42 = vpop.f32.mrf.mxu3  ;;  %3690 = vst [vmem:[#allocation57_spill] sm:$0xff] %v3080_v34 }
  0xdd   :  { %v2871_v43 = vadd.f32 %v299_v41, %v2841_v12  ;;  %v2873_v44 = vadd.f32 %v340_v42, %v183_v14  ;;  %v220_v45 = vpop.f32.mrf.mxu0  ;;  %v261_v46 = vpop.f32.mrf.mxu1  ;;  %v288_v41 = vadd.f32 %v2833_v6, %v2841_v12 }
  0xde   :  { %v2875_v47 = vadd.f32 %v220_v45, %v180_v4  ;;  %v2877_v48 = vadd.f32 %v261_v46, %v181_v5 }
  0xdf   :  { %3657 = vst [vmem:[#allocation24_spill] sm:$0xff] %v2871_v43  ;;  %v3068_v43 = vld [vmem:[#allocation9 + $0x78] sm:$0xff] }
  0xe0   :  { %3658 = vst [vmem:[#allocation25_spill] sm:$0xff] %v2873_v44  ;;  %v3072_v44 = vld [vmem:[#allocation9 + $0x40] sm:$0xff] }
  0xe1   :  { %3659 = vst [vmem:[#allocation26_spill] sm:$0xff] %v2875_v47  ;;  %v3060_v47 = vld [vmem:[#allocation9 + $0x60] sm:$0xff] }
  0xe2   :  { %3660 = vst [vmem:[#allocation27_spill] sm:$0xff] %v2877_v48  ;;  %v3058_v48 = vld [vmem:[#allocation9 + $0x98] sm:$0xff] }
  0xe3   :  { %3684 = vst [vmem:[#allocation51_spill] sm:$0xff] %v3060_v47 }
  0xe4   :  { %v302_v49 = vpop.f32.mrf.mxu2  ;;  %v343_v50 = vpop.f32.mrf.mxu3  ;;  %3687 = vst [vmem:[#allocation54_spill] sm:$0xff] %v3068_v43 }
  0xe5   :  { %v2880_v51 = vadd.f32 %v302_v49, %v2841_v12  ;;  %v2882_v53 = vadd.f32 %v343_v50, %v183_v14  ;;  %v223_v54 = vpop.f32.mrf.mxu0  ;;  %v264_v55 = vpop.f32.mrf.mxu1 }
  0xe6   :  { %v2884_v56 = vadd.f32 %v223_v54, %v180_v4  ;;  %v2886_v57 = vadd.f32 %v264_v55, %v181_v5 }
  0xe7   :  { %3661 = vst [vmem:[#allocation28_spill] sm:$0xff] %v2880_v51  ;;  %v3046_v51 = vld [vmem:[#allocation9 + $0xb8] sm:$0xff] }
  0xe8   :  { %3662 = vst [vmem:[#allocation29_spill] sm:$0xff] %v2882_v53 }
  0xe9   :  { %3663 = vst [vmem:[#allocation30_spill] sm:$0xff] %v2884_v56  ;;  %v3042_v56 = vld [vmem:[#allocation9 + $0xb0] sm:$0xff] }
  0xea   :  { %3664 = vst [vmem:[#allocation31_spill] sm:$0xff] %v2886_v57  ;;  %v3040_v57 = vld [vmem:[#allocation9 + $0xa8] sm:$0xff] }
  0xec   :  { %v305_v58 = vpop.f32.mrf.mxu2  ;;  %v346_v59 = vpop.f32.mrf.mxu3 }
  0xed   :  { %v2889_v60 = vadd.f32 %v305_v58, %v2841_v12  ;;  %v2891_v61 = vadd.f32 %v346_v59, %v183_v14  ;;  %v226_v62 = vpop.f32.mrf.mxu0  ;;  %v267_v63 = vpop.f32.mrf.mxu1 }
  0xee   :  { %v2893_v26 = vadd.f32 %v226_v62, %v180_v4  ;;  %v2895_v39 = vadd.f32 %v267_v63, %v181_v5 }
  0xef   :  { %3665 = vst [vmem:[#allocation32_spill] sm:$0xff] %v2889_v60 }
  0xf0   :  { %3666 = vst [vmem:[#allocation33_spill] sm:$0xff] %v2891_v61  ;;  %v3038_v61 = vld [vmem:[#allocation9 + $0xa0] sm:$0xff] }
  0xf1   :  { %3667 = vst [vmem:[#allocation34_spill] sm:$0xff] %v2893_v26 }
  0xf2   :  { %3668 = vst [vmem:[#allocation35_spill] sm:$0xff] %v2895_v39  ;;  %v3032_v39 = vld [vmem:[#allocation9 + $0xd8] sm:$0xff] }
  0xf4   :  { %v308_v0 = vpop.f32.mrf.mxu2  ;;  %v349_v3 = vpop.f32.mrf.mxu3 }
  0xf5   :  { %v2898_v8 = vadd.f32 %v308_v0, %v2841_v12  ;;  %v2900_v9 = vadd.f32 %v349_v3, %v183_v14  ;;  %v434_v15 = vpop.f32.mrf.mxu0  ;;  %v454_v16 = vpop.f32.mrf.mxu1 }
  0xf6   :  { %v497_v19 = vadd.f32 %v434_v15, %v206_v52  ;;  %v498_v20 = vadd.f32 %v454_v16, %v247_v13 }
  0xf7   :  { %3669 = vst [vmem:[#allocation36_spill] sm:$0xff] %v2898_v8 }
  0xf8   :  { %3670 = vst [vmem:[#allocation37_spill] sm:$0xff] %v2900_v9  ;;  %v2136_v23 = vmul.f32 -1.442695, %v497_v19  ;;  %v2137_v24 = vmul.f32 -1.442695, %v498_v20 }
  0xfa   :  { %2172 = vpow2.f32 %v2136_v23 }
  0xfb   :  { %2174 = vpow2.f32 %v2137_v24 }
  0xfc   :  { %v494_v29 = vpop.f32.mrf.mxu3  ;;  %v474_v36 = vpop.f32.mrf.mxu2 }
  0xfd   :  { %v500_v1 = vadd.f32 %v494_v29, %v329_v28  ;;  %v499_v46 = vadd.f32 %v474_v36, %v288_v41 }
  0xff   :  { %v2138_v2 = vmul.f32 -1.442695, %v500_v1 }
 0x100   :  { %v2173_v4 = vpop.eup %2172 }
 0x101   :  { %v2175_v5 = vpop.eup %2174  ;;  %v504_v32 = vadd.f32 1.0, %v2173_v4  ;;  %2176 = vpow2.f32 %v2138_v2 }
 0x102   :  { %v523_v33 = vadd.f32 1.0, %v2175_v5 }
 0x103   :  { %2178 = vrcp.f32 %v504_v32  ;;  %v516_v55 = vand.u32 2147483648, %v504_v32  ;;  %v514_v62 = vand.u32 2147483647, %v504_v32  ;;  %vm510_vm2 = vweird.f32 %v504_v32 }
 0x104   :  { %2180 = vrcp.f32 %v523_v33  ;;  %v535_v58 = vand.u32 2147483648, %v523_v33  ;;  %v533_v52 = vand.u32 2147483647, %v523_v33  ;;  %vm529_vm3 = vweird.f32 %v523_v33 }
 0x105   :  { %v517_v12 = vor.u32 1.1754944e-38, %v516_v55  ;;  %vm515_vm5 = vcmp.eq.f32.partialorder %v514_v62, 8.507059e+37 }
 0x106   :  { %v536_v15 = vor.u32 1.1754944e-38, %v535_v58  ;;  %vm534_vm7 = vcmp.eq.f32.partialorder %v533_v52, 8.507059e+37 }
 0x107   :  { %v2177_v37 = vpop.eup %2176 }
 0x108   :  { %v543_v42 = vadd.f32 1.0, %v2177_v37 }
 0x109   :  { %v2179_v45 = vpop.eup %2178 }
 0x10a   :  { %v2181_v7 = vpop.eup %2180  ;;  %v506_v14 = vmul.f32 %v2179_v45, %v504_v32  ;;  %2182 = vrcp.f32 %v543_v42  ;;  %vm511_vm0 = vweird.f32 %v2179_v45  ;;  %v555_v32 = vand.u32 2147483648, %v543_v42 }
 0x10b   :  { %v525_v49 = vmul.f32 %v2181_v7, %v523_v33  ;;  %2184 = vtanh.f32 %v499_v46  ;;  %vm530_vm1 = vweird.f32 %v2181_v7  ;;  %vm512_vm4 = vmor %vm510_vm2, %vm511_vm0  ;;  %vm549_vm9 = vweird.f32 %v543_v42 }
 0x10c   :  { %v507_v50 = vsub.f32 1.0, %v506_v14  ;;  %vm531_vm6 = vmor %vm529_vm3, %vm530_vm1  ;;  %v553_v33 = vand.u32 2147483647, %v543_v42  ;;  %v556_v37 = vor.u32 1.1754944e-38, %v555_v32 }
 0x10d   :  { %v526_v54 = vsub.f32 1.0, %v525_v49 }
 0x10e   :  { %v508_v59 = vmul.f32 %v2179_v45, %v507_v50  ;;  %vm554_vm11 = vcmp.eq.f32.partialorder %v553_v33, 8.507059e+37 }
 0x10f   :  { %v527_v63 = vmul.f32 %v2181_v7, %v526_v54 }
 0x110   :  { %v2183_v13 = vpop.eup %2182  ;;  %v509_v6 = vadd.f32 %v2179_v45, %v508_v59 }
 0x111   :  { %v528_v0 = vadd.f32 %v2181_v7, %v527_v63  ;;  %v545_v3 = vmul.f32 %v2183_v13, %v543_v42  ;;  %v2185_v19 = vpop.eup %2184  ;;  %vm550_vm8 = vweird.f32 %v2183_v13 }
 0x112   :  { %v513_v16 = vsel %vm512_vm4, %v2179_v45, %v509_v6  ;;  %vm551_vm10 = vmor %vm549_vm9, %vm550_vm8 }
 0x113   :  { %v518_v20 = vsel %vm515_vm5, %v517_v12, %v513_v16  ;;  %v532_v23 = vsel %vm531_vm6, %v2181_v7, %v528_v0  ;;  %v546_v24 = vsub.f32 1.0, %v545_v3 }
 0x114   :  { %v537_v28 = vsel %vm534_vm7, %v536_v15, %v532_v23  ;;  %v561_v29 = vmul.f32 %v2185_v19, %v518_v20 }
 0x115   :  { %v560_v1 = vmul.f32 0.0, %v537_v28  ;;  %v547_v2 = vmul.f32 %v2183_v13, %v546_v24 }
 0x117   :  { %v2905_v4 = vadd.f32 %v561_v29, %v560_v1  ;;  %v548_v5 = vadd.f32 %v2183_v13, %v547_v2 }
 0x119   :  { %2186 = vtanh.f32 %v2905_v4  ;;  %v552_v36 = vsel %vm551_vm10, %v2183_v13, %v548_v5 }
 0x11a   :  { %v557_v45 = vsel %vm554_vm11, %v556_v37, %v552_v36 }
 0x11f   :  { %v2187_v41 = vpop.eup %2186 }
 0x120   :  { %v564_v46 = vmul.f32 %v2187_v41, %v557_v45 }
 0x122   :  { %648 = vmatmul.f32.vlgmr.msra.gmra.mxu0 %v564_v46  ;;  %668 = vmatmul.f32.vlgmr.msra.gmra.mxu1 %v564_v46 }
 0x123   :  { %688 = vmatmul.f32.vlgmr.msra.gmra.mxu2 %v564_v46  ;;  %708 = vmatmul.f32.vlgmr.msra.gmra.mxu3 %v564_v46 }
 0x19f   :  { %v649_v7 = vpop.f32.mrf.mxu0  ;;  %v669_v14 = vpop.f32.mrf.mxu1 }
 0x1a0   :  { %v712_v49 = vadd.f32 %v649_v7, %v2837_v10  ;;  %v713_v50 = vadd.f32 %v669_v14, %v2839_v11 }
 0x1a2   :  { %v2139_v54 = vmul.f32 -1.442695, %v712_v49  ;;  %v2140_v55 = vmul.f32 -1.442695, %v713_v50 }
 0x1a4   :  { %2188 = vpow2.f32 %v2139_v54 }
 0x1a5   :  { %2190 = vpow2.f32 %v2140_v55 }
 0x1a6   :  { %v709_v42 = vpop.f32.mrf.mxu3  ;;  %v689_v6 = vpop.f32.mrf.mxu2 }
 0x1a7   :  { %v715_v58 = vadd.f32 %v709_v42, %v2846_v18  ;;  %v714_v11 = vadd.f32 %v689_v6, %v2844_v17 }
 0x1a9   :  { %v2141_v59 = vmul.f32 -1.442695, %v715_v58 }
 0x1aa   :  { %v2189_v62 = vpop.eup %2188 }
 0x1ab   :  { %v2191_v63 = vpop.eup %2190  ;;  %v719_v52 = vadd.f32 1.0, %v2189_v62  ;;  %2192 = vpow2.f32 %v2141_v59 }
 0x1ac   :  { %v738_v13 = vadd.f32 1.0, %v2191_v63 }
 0x1ad   :  { %2194 = vrcp.f32 %v719_v52  ;;  %v731_v20 = vand.u32 2147483648, %v719_v52  ;;  %v729_v28 = vand.u32 2147483647, %v719_v52  ;;  %vm725_vm14 = vweird.f32 %v719_v52 }
 0x1ae   :  { %2196 = vrcp.f32 %v738_v13  ;;  %v750_v23 = vand.u32 2147483648, %v738_v13  ;;  %v748_v1 = vand.u32 2147483647, %v738_v13  ;;  %vm744_vm15 = vweird.f32 %v738_v13 }
 0x1af   :  { %v732_v17 = vor.u32 1.1754944e-38, %v731_v20  ;;  %vm730_vm2 = vcmp.eq.f32.partialorder %v729_v28, 8.507059e+37  ;;  %v2944_v20 = vld [vmem:[#allocation9 + $0x1b0] sm:$0xff]  ;;  %v2954_v28 = vld [vmem:[#allocation9 + $0x188] sm:$0xff] }
 0x1b0   :  { %v751_v36 = vor.u32 1.1754944e-38, %v750_v23  ;;  %vm749_vm3 = vcmp.eq.f32.partialorder %v748_v1, 8.507059e+37  ;;  %v2948_v23 = vld [vmem:[#allocation9 + $0x1b8] sm:$0xff]  ;;  %3675 = vst [vmem:[#allocation42_spill] sm:$0xff] %v2954_v28 }
 0x1b1   :  { %v2193_v12 = vpop.eup %2192  ;;  %v2960_v1 = vld [vmem:[#allocation9 + $0x198] sm:$0xff] }
 0x1b2   :  { %v758_v10 = vadd.f32 1.0, %v2193_v12  ;;  %v2918_v12 = vld [vmem:[#allocation9 + $0x1e8] sm:$0xff]  ;;  %3677 = vst [vmem:[#allocation44_spill] sm:$0xff] %v2960_v1 }
 0x1b3   :  { %v2195_v0 = vpop.eup %2194  ;;  %1082 = vmatpush.msra.mxu1 %v2918_v12 }
 0x1b4   :  { %v2197_v3 = vpop.eup %2196  ;;  %v721_v15 = vmul.f32 %v2195_v0, %v719_v52  ;;  %2198 = vrcp.f32 %v758_v10  ;;  %vm726_vm12 = vweird.f32 %v2195_v0  ;;  %v770_v58 = vand.u32 2147483648, %v758_v10 }
 0x1b5   :  { %v740_v16 = vmul.f32 %v2197_v3, %v738_v13  ;;  %2200 = vtanh.f32 %v714_v11  ;;  %vm745_vm13 = vweird.f32 %v2197_v3  ;;  %vm727_vm0 = vmor %vm725_vm14, %vm726_vm12  ;;  %vm764_vm5 = vweird.f32 %v758_v10  ;;  %v2928_v11 = vld [vmem:[#allocation9 + $0x1c0] sm:$0xff] }
 0x1b6   :  { %v722_v19 = vsub.f32 1.0, %v721_v15  ;;  %vm746_vm1 = vmor %vm744_vm15, %vm745_vm13  ;;  %v768_v59 = vand.u32 2147483647, %v758_v10  ;;  %v771_v63 = vor.u32 1.1754944e-38, %v770_v58  ;;  %3672 = vst [vmem:[#allocation39_spill] sm:$0xff] %v2928_v11  ;;  %v2932_v15 = vld [vmem:[#allocation9 + $0x1d0] sm:$0xff] }
 0x1b7   :  { %v741_v18 = vsub.f32 1.0, %v740_v16  ;;  %3673 = vst [vmem:[#allocation40_spill] sm:$0xff] %v2932_v15  ;;  %v2936_v16 = vld [vmem:[#allocation9 + $0x1d8] sm:$0xff]  ;;  %v3012_v58 = vld [vmem:[#allocation9 + $0xe0] sm:$0xff] }
 0x1b8   :  { %v723_v24 = vmul.f32 %v2195_v0, %v722_v19  ;;  %vm769_vm7 = vcmp.eq.f32.partialorder %v768_v59, 8.507059e+37  ;;  %3674 = vst [vmem:[#allocation41_spill] sm:$0xff] %v2936_v16  ;;  %v2940_v19 = vld [vmem:[#allocation9 + $0x1a0] sm:$0xff]  ;;  %v3014_v59 = vld [vmem:[#allocation9 + $0xe8] sm:$0xff] }
 0x1b9   :  { %v742_v29 = vmul.f32 %v2197_v3, %v741_v18  ;;  %v2942_v18 = vld [vmem:[#allocation9 + $0x1a8] sm:$0xff] }
 0x1ba   :  { %v2199_v2 = vpop.eup %2198  ;;  %v724_v5 = vadd.f32 %v2195_v0, %v723_v24  ;;  %v2952_v24 = vld [vmem:[#allocation9 + $0x180] sm:$0xff] }
 0x1bb   :  { %v743_v32 = vadd.f32 %v2197_v3, %v742_v29  ;;  %v760_v33 = vmul.f32 %v2199_v2, %v758_v10  ;;  %v2201_v41 = vpop.eup %2200  ;;  %vm765_vm4 = vweird.f32 %v2199_v2  ;;  %v2924_v10 = vld [vmem:[#allocation9 + $0x1f8] sm:$0xff]  ;;  %v2956_v29 = vld [vmem:[#allocation9 + $0x190] sm:$0xff] }
 0x1bc   :  { %v728_v37 = vsel %vm727_vm0, %v2195_v0, %v724_v5  ;;  %vm766_vm6 = vmor %vm764_vm5, %vm765_vm4  ;;  %v2920_v0 = vld [vmem:[#allocation9 + $0x1f0] sm:$0xff]  ;;  %3671 = vst [vmem:[#allocation38_spill] sm:$0xff] %v2924_v10  ;;  %1122 = vmatpush.msra.mxu3 %v2924_v10  ;;  %v2966_v5 = vld [vmem:[#allocation9 + $0x168] sm:$0xff] }
 0x1bd   :  { %v733_v45 = vsel %vm730_vm2, %v732_v17, %v728_v37  ;;  %v747_v46 = vsel %vm746_vm1, %v2197_v3, %v743_v32  ;;  %v761_v7 = vsub.f32 1.0, %v760_v33  ;;  %1102 = vmatpush.msra.mxu2 %v2920_v0  ;;  %v2930_v3 = vld [vmem:[#allocation9 + $0x1c8] sm:$0xff]  ;;  %3676 = vst [vmem:[#allocation43_spill] sm:$0xff] %v2956_v29  ;;  %v2968_v17 = vld [vmem:[#allocation9 + $0x170] sm:$0xff]  ;;  %v2972_v32 = vld [vmem:[#allocation9 + $0x178] sm:$0xff] }
 0x1be   :  { %v752_v14 = vsel %vm749_vm3, %v751_v36, %v747_v46  ;;  %v776_v49 = vmul.f32 %v2201_v41, %v733_v45  ;;  %1083 = vmatpush.msra.mxu1 %v2930_v3  ;;  %1123 = vmatpush.msra.mxu3 %v2936_v16  ;;  %v2976_v33 = vld [vmem:[#allocation9 + $0x140] sm:$0xff]  ;;  %v2978_v36 = vld [vmem:[#allocation9 + $0x148] sm:$0xff]  ;;  %v2980_v37 = vld [vmem:[#allocation9 + $0x150] sm:$0xff] }
 0x1bf   :  { %v775_v50 = vmul.f32 %v752_v14, %v2905_v4  ;;  %v762_v54 = vmul.f32 %v2199_v2, %v761_v7  ;;  %v2916_v4 = vld [vmem:[#allocation9 + $0x1e0] sm:$0xff]  ;;  %1103 = vmatpush.msra.mxu2 %v2932_v15  ;;  %3679 = vst [vmem:[#allocation46_spill] sm:$0xff] %v2978_v36  ;;  %v2984_v41 = vld [vmem:[#allocation9 + $0x158] sm:$0xff]  ;;  %v2990_v46 = vld [vmem:[#allocation9 + $0x128] sm:$0xff] }
 0x1c0   :  { %1062 = vmatpush.msra.mxu0 %v2916_v4  ;;  %1084 = vmatpush.msra.mxu1 %v2942_v18  ;;  %v2988_v45 = vld [vmem:[#allocation9 + $0x120] sm:$0xff]  ;;  %v2992_v7 = vld [vmem:[#allocation9 + $0x130] sm:$0xff]  ;;  %v2996_v14 = vld [vmem:[#allocation9 + $0x138] sm:$0xff] }
 0x1c1   :  { %v2913_v55 = vadd.f32 %v776_v49, %v775_v50  ;;  %v763_v42 = vadd.f32 %v2199_v2, %v762_v54  ;;  %1104 = vmatpush.msra.mxu2 %v2944_v20  ;;  %1124 = vmatpush.msra.mxu3 %v2948_v23  ;;  %3680 = vst [vmem:[#allocation47_spill] sm:$0xff] %v2988_v45  ;;  %v3000_v49 = vld [vmem:[#allocation9 + $0x100] sm:$0xff]  ;;  %v3002_v50 = vld [vmem:[#allocation9 + $0x108] sm:$0xff]  ;;  %v3004_v54 = vld [vmem:[#allocation9 + $0x110] sm:$0xff] }
 0x1c2   :  { %1063 = vmatpush.msra.mxu0 %v2928_v11  ;;  %1085 = vmatpush.msra.mxu1 %v2954_v28  ;;  %3681 = vst [vmem:[#allocation48_spill] sm:$0xff] %v2996_v14 }
 0x1c3   :  { %2202 = vtanh.f32 %v2913_v55  ;;  %v767_v62 = vsel %vm766_vm6, %v2199_v2, %v763_v42  ;;  %1105 = vmatpush.msra.mxu2 %v2956_v29  ;;  %1125 = vmatpush.msra.mxu3 %v2960_v1  ;;  %v2964_v2 = vld [vmem:[#allocation9 + $0x160] sm:$0xff]  ;;  %3682 = vst [vmem:[#allocation49_spill] sm:$0xff] %v3000_v49  ;;  %v3008_v42 = vld [vmem:[#allocation9 + $0x118] sm:$0xff] }
 0x1c4   :  { %v772_v13 = vsel %vm769_vm7, %v771_v63, %v767_v62  ;;  %1064 = vmatpush.msra.mxu0 %v2940_v19  ;;  %3678 = vst [vmem:[#allocation45_spill] sm:$0xff] %v2964_v2  ;;  %1086 = vmatpush.msra.mxu1 %v2966_v5  ;;  %v3016_v62 = vld [vmem:[#allocation9 + $0xf0] sm:$0xff]  ;;  %v3020_v63 = vld [vmem:[#allocation9 + $0xf8] sm:$0xff] }
 0x1c5   :  { %1106 = vmatpush.msra.mxu2 %v2968_v17  ;;  %1126 = vmatpush.msra.mxu3 %v2972_v32  ;;  %3683 = vst [vmem:[#allocation50_spill] sm:$0xff] %v3002_v50 }
 0x1c6   :  { %1065 = vmatpush.msra.mxu0 %v2952_v24  ;;  %1087 = vmatpush.msra.mxu1 %v2978_v36 }
 0x1c7   :  { %1107 = vmatpush.msra.mxu2 %v2980_v37  ;;  %1127 = vmatpush.msra.mxu3 %v2984_v41 }
 0x1c8   :  { %1066 = vmatpush.msra.mxu0 %v2964_v2  ;;  %1088 = vmatpush.msra.mxu1 %v2990_v46 }
 0x1c9   :  { %v2203_v52 = vpop.eup %2202  ;;  %1108 = vmatpush.msra.mxu2 %v2992_v7  ;;  %1128 = vmatpush.msra.mxu3 %v2996_v14 }
 0x1ca   :  { %v779_v6 = vmul.f32 %v2203_v52, %v772_v13  ;;  %1067 = vmatpush.msra.mxu0 %v2976_v33  ;;  %1089 = vmatpush.msra.mxu1 %v3002_v50  ;;  %v3024_v52 = vld [vmem:[#allocation9 + $0xc0] sm:$0xff]  ;;  %v3026_v13 = vld [vmem:[#allocation9 + $0xc8] sm:$0xff] }
 0x1cb   :  { %1109 = vmatpush.msra.mxu2 %v3004_v54  ;;  %1129 = vmatpush.msra.mxu3 %v3008_v42 }
 0x1cc   :  { %863 = vmatmul.f32.vlgmr.msrb.gmra.mxu0 %v779_v6  ;;  %883 = vmatmul.f32.vlgmr.msrb.gmra.mxu1 %v779_v6 }
 0x1cd   :  { %903 = vmatmul.f32.vlgmr.msrb.gmra.mxu2 %v779_v6  ;;  %923 = vmatmul.f32.vlgmr.msrb.gmra.mxu3 %v779_v6  ;;  %v3028_v6 = vld [vmem:[#allocation9 + $0xd0] sm:$0xff] }
 0x1ce   :  { %1068 = vmatpush.msra.mxu0 %v2988_v45  ;;  %1090 = vmatpush.msra.mxu1 %v3014_v59 }
 0x1cf   :  { %1110 = vmatpush.msra.mxu2 %v3016_v62  ;;  %1130 = vmatpush.msra.mxu3 %v3020_v63 }
 0x1d0   :  { %1069 = vmatpush.msra.mxu0 %v3000_v49  ;;  %1091 = vmatpush.msra.mxu1 %v3026_v13 }
 0x1d1   :  { %1111 = vmatpush.msra.mxu2 %v3028_v6  ;;  %1131 = vmatpush.msra.mxu3 %v3032_v39 }
 0x1d2   :  { %1070 = vmatpush.msra.mxu0 %v3012_v58  ;;  %1092 = vmatpush.msra.mxu1 %v3040_v57 }
 0x1d3   :  { %1112 = vmatpush.msra.mxu2 %v3042_v56  ;;  %1132 = vmatpush.msra.mxu3 %v3046_v51 }
 0x1d4   :  { %1071 = vmatpush.msra.mxu0 %v3024_v52 }
 0x1d5   :  { %1133 = vmatpush.msra.mxu3 %v3058_v48 }
 0x1d6   :  { %1072 = vmatpush.msra.mxu0 %v3038_v61 }
 0x1d7   :  { %1134 = vmatpush.msra.mxu3 %v3068_v43  ;;  %v3095_v43 = vld [vmem:[#allocation9] sm:$0xff] }
 0x1d9   :  { %1135 = vmatpush.msra.mxu3 %v3080_v34 }
 0x249   :  { %v864_v8 = vpop.f32.mrf.mxu0  ;;  %v884_v9 = vpop.f32.mrf.mxu1 }
 0x24a   :  { %v927_v26 = vadd.f32 %v864_v8, %v2848_v21  ;;  %v928_v60 = vadd.f32 %v884_v9, %v2850_v22  ;;  %v3050_v22 = vld [vmem:[#allocation9 + $0x80] sm:$0xff]  ;;  %v3052_v8 = vld [vmem:[#allocation9 + $0x88] sm:$0xff]  ;;  %v3056_v9 = vld [vmem:[#allocation9 + $0x90] sm:$0xff] }
 0x24b   :  { %1073 = vmatpush.msra.mxu0 %v3050_v22  ;;  %1093 = vmatpush.msra.mxu1 %v3052_v8 }
 0x24c   :  { %v2142_v53 = vmul.f32 -1.442695, %v927_v26  ;;  %v2143_v21 = vmul.f32 -1.442695, %v928_v60  ;;  %1113 = vmatpush.msra.mxu2 %v3056_v9  ;;  %v3064_v60 = vld [vmem:[#allocation9 + $0x68] sm:$0xff]  ;;  %v3066_v26 = vld [vmem:[#allocation9 + $0x70] sm:$0xff] }
 0x24d   :  { %3685 = vst [vmem:[#allocation52_spill] sm:$0xff] %v3064_v60  ;;  %1074 = vmatpush.msra.mxu0 %v3060_v47  ;;  %1094 = vmatpush.msra.mxu1 %v3064_v60  ;;  %v3091_v60 = vld [vmem:[#allocation9 + $0x38] sm:$0xff] }
 0x24e   :  { %2204 = vpow2.f32 %v2142_v53  ;;  %3686 = vst [vmem:[#allocation53_spill] sm:$0xff] %v3066_v26  ;;  %v3076_v53 = vld [vmem:[#allocation9 + $0x50] sm:$0xff]  ;;  %1114 = vmatpush.msra.mxu2 %v3066_v26  ;;  %v3097_v26 = vld [vmem:[#allocation9 + $0x8] sm:$0xff]  ;;  %1136 = vmatpush.msra.mxu3 %v3091_v60 }
 0x24f   :  { %2206 = vpow2.f32 %v2143_v21  ;;  %3689 = vst [vmem:[#allocation56_spill] sm:$0xff] %v3076_v53  ;;  %v3084_v21 = vld [vmem:[#allocation9 + $0x28] sm:$0xff]  ;;  %1075 = vmatpush.msra.mxu0 %v3072_v44  ;;  %1095 = vmatpush.msra.mxu1 %v3074_v40 }
 0x250   :  { %v924_v38 = vpop.f32.mrf.mxu3  ;;  %1115 = vmatpush.msra.mxu2 %v3076_v53 }
 0x251   :  { %v930_v31 = vadd.f32 %v924_v38, %v2855_v27  ;;  %1076 = vmatpush.msra.mxu0 %v3082_v35  ;;  %1096 = vmatpush.msra.mxu1 %v3084_v21  ;;  %v3101_v27 = vld [vmem:[#allocation9 + $0x10] sm:$0xff]  ;;  %v3103_v38 = vld [vmem:[#allocation9 + $0x18] sm:$0xff] }
 0x252   :  { %1116 = vmatpush.msra.mxu2 %v3089_v30  ;;  %1137 = vmatpush.msra.mxu3 %v3103_v38 }
 0x253   :  { %v2144_v47 = vmul.f32 -1.442695, %v930_v31  ;;  %1077 = vmatpush.msra.mxu0 %v3095_v43  ;;  %1097 = vmatpush.msra.mxu1 %v3097_v26 }
 0x254   :  { %v2205_v40 = vpop.eup %2204  ;;  %1117 = vmatpush.msra.mxu2 %v3101_v27  ;;  %1337 = vmatpush.msrb.mxu3 %v2924_v10 }
 0x255   :  { %v2207_v53 = vpop.eup %2206  ;;  %v3107_v34 = vadd.f32 1.0, %v2205_v40  ;;  %2208 = vpow2.f32 %v2144_v47  ;;  %1277 = vmatpush.msrb.mxu0 %v2916_v4  ;;  %1297 = vmatpush.msrb.mxu1 %v2918_v12  ;;  %v904_v40 = vpop.f32.mrf.mxu2 }
 0x256   :  { %v3111_v31 = vadd.f32 1.0, %v2207_v53  ;;  %1317 = vmatpush.msrb.mxu2 %v2920_v0  ;;  %1338 = vmatpush.msrb.mxu3 %v2936_v16 }
 0x257   :  { %2210 = vrcp.f32 %v3107_v34  ;;  %1278 = vmatpush.msrb.mxu0 %v2928_v11  ;;  %1298 = vmatpush.msrb.mxu1 %v2930_v3  ;;  %v929_v11 = vadd.f32 %v904_v40, %v2853_v25  ;;  %vm940_vm10 = vweird.f32 %v3107_v34 }
 0x258   :  { %2212 = vrcp.f32 %v3111_v31  ;;  %1318 = vmatpush.msrb.mxu2 %v2932_v15  ;;  %1339 = vmatpush.msrb.mxu3 %v2948_v23  ;;  %vm959_vm11 = vweird.f32 %v3111_v31 }
 0x259   :  { %1279 = vmatpush.msrb.mxu0 %v2940_v19  ;;  %1299 = vmatpush.msrb.mxu1 %v2942_v18 }
 0x25a   :  { %1319 = vmatpush.msrb.mxu2 %v2944_v20  ;;  %1340 = vmatpush.msrb.mxu3 %v2960_v1  ;;  %v965_v1 = vand.u32 2147483648, %v3111_v31 }
 0x25b   :  { %v2209_v47 = vpop.eup %2208  ;;  %1280 = vmatpush.msrb.mxu0 %v2952_v24  ;;  %1300 = vmatpush.msrb.mxu1 %v2954_v28  ;;  %v946_v28 = vand.u32 2147483648, %v3107_v34 }
 0x25c   :  { %v3127_v53 = vadd.f32 1.0, %v2209_v47  ;;  %1320 = vmatpush.msrb.mxu2 %v2956_v29  ;;  %1341 = vmatpush.msrb.mxu3 %v2972_v32 }
 0x25d   :  { %v2211_v10 = vpop.eup %2210  ;;  %1281 = vmatpush.msrb.mxu0 %v2964_v2  ;;  %1301 = vmatpush.msrb.mxu1 %v2966_v5  ;;  %v944_v2 = vand.u32 2147483647, %v3107_v34 }
 0x25e   :  { %v2213_v15 = vpop.eup %2212  ;;  %v936_v16 = vmul.f32 %v2211_v10, %v3107_v34  ;;  %2214 = vrcp.f32 %v3127_v53  ;;  %1321 = vmatpush.msrb.mxu2 %v2968_v17  ;;  %vm941_vm8 = vweird.f32 %v2211_v10  ;;  %1342 = vmatpush.msrb.mxu3 %v2984_v41  ;;  %v966_v34 = vor.u32 1.1754944e-38, %v965_v1 }
 0x25f   :  { %v955_v47 = vmul.f32 %v2213_v15, %v3111_v31  ;;  %2216 = vtanh.f32 %v929_v11  ;;  %1282 = vmatpush.msrb.mxu0 %v2976_v33  ;;  %1302 = vmatpush.msrb.mxu1 %v2978_v36  ;;  %vm960_vm9 = vweird.f32 %v2213_v15  ;;  %vm942_vm12 = vmor %vm940_vm10, %vm941_vm8  ;;  %vm945_vm14 = vcmp.eq.f32.partialorder %v944_v2, 8.507059e+37 }
 0x260   :  { %v937_v25 = vsub.f32 1.0, %v936_v16  ;;  %1322 = vmatpush.msrb.mxu2 %v2980_v37  ;;  %1343 = vmatpush.msrb.mxu3 %v2996_v14  ;;  %vm961_vm13 = vmor %vm959_vm11, %vm960_vm9  ;;  %vm979_vm1 = vweird.f32 %v3127_v53 }
 0x261   :  { %v956_v40 = vsub.f32 1.0, %v955_v47  ;;  %v963_v47 = vand.u32 2147483647, %v3111_v31  ;;  %1283 = vmatpush.msrb.mxu0 %v2988_v45  ;;  %1303 = vmatpush.msrb.mxu1 %v2990_v46 }
 0x262   :  { %v938_v29 = vmul.f32 %v2211_v10, %v937_v25  ;;  %1323 = vmatpush.msrb.mxu2 %v2992_v7  ;;  %v947_v25 = vor.u32 1.1754944e-38, %v946_v28  ;;  %1344 = vmatpush.msrb.mxu3 %v3008_v42 }
 0x263   :  { %v957_v16 = vmul.f32 %v2213_v15, %v956_v40  ;;  %1284 = vmatpush.msrb.mxu0 %v3000_v49  ;;  %1304 = vmatpush.msrb.mxu1 %v3002_v50  ;;  %vm964_vm15 = vcmp.eq.f32.partialorder %v963_v47, 8.507059e+37  ;;  %v3694_v47 = vld [vmem:[#allocation54_spill] sm:$0xff] }
 0x264   :  { %v3153_v11 = vpop.eup %2214  ;;  %v939_v36 = vadd.f32 %v2211_v10, %v938_v29  ;;  %1324 = vmatpush.msrb.mxu2 %v3004_v54  ;;  %1345 = vmatpush.msrb.mxu3 %v3020_v63 }
 0x265   :  { %v958_v40 = vadd.f32 %v2213_v15, %v957_v16  ;;  %v975_v45 = vmul.f32 %v3153_v11, %v3127_v53  ;;  %v2217_v31 = vpop.eup %2216  ;;  %1285 = vmatpush.msrb.mxu0 %v3012_v58  ;;  %1305 = vmatpush.msrb.mxu1 %v3014_v59  ;;  %vm980_vm0 = vweird.f32 %v3153_v11 }
 0x266   :  { %v943_v29 = vsel %vm942_vm12, %v2211_v10, %v939_v36  ;;  %1325 = vmatpush.msrb.mxu2 %v3016_v62  ;;  %1346 = vmatpush.msrb.mxu3 %v3032_v39  ;;  %v983_v36 = vand.u32 2147483647, %v3127_v53  ;;  %vm981_vm2 = vmor %vm979_vm1, %vm980_vm0 }
 0x267   :  { %v948_v14 = vsel %vm945_vm14, %v947_v25, %v943_v29  ;;  %v962_v28 = vsel %vm961_vm13, %v2213_v15, %v958_v40  ;;  %v976_v16 = vsub.f32 1.0, %v975_v45  ;;  %1286 = vmatpush.msrb.mxu0 %v3024_v52  ;;  %1306 = vmatpush.msrb.mxu1 %v3026_v13  ;;  %v3691_v45 = vld [vmem:[#allocation51_spill] sm:$0xff] }
 0x268   :  { %v967_v49 = vsel %vm964_vm15, %v966_v34, %v962_v28  ;;  %v991_v50 = vmul.f32 %v2217_v31, %v948_v14  ;;  %1326 = vmatpush.msrb.mxu2 %v3028_v6  ;;  %1347 = vmatpush.msrb.mxu3 %v3046_v51  ;;  %v3692_v14 = vld [vmem:[#allocation52_spill] sm:$0xff]  ;;  %v3695_v40 = vld [vmem:[#allocation55_spill] sm:$0xff]  ;;  %vm984_vm3 = vcmp.eq.f32.partialorder %v983_v36, 8.507059e+37  ;;  %v3697_v34 = vld [vmem:[#allocation57_spill] sm:$0xff] }
 0x269   :  { %v990_v10 = vmul.f32 %v967_v49, %v2913_v55  ;;  %v977_v1 = vmul.f32 %v3153_v11, %v976_v16  ;;  %1287 = vmatpush.msrb.mxu0 %v3038_v61  ;;  %1307 = vmatpush.msrb.mxu1 %v3040_v57  ;;  %v985_v55 = vand.u32 2147483648, %v3127_v53  ;;  %v3696_v53 = vld [vmem:[#allocation56_spill] sm:$0xff]  ;;  %v3698_v28 = vld [vmem:[#allocation38_spill] sm:$0xff]  ;;  %v3699_v16 = vld [vmem:[#allocation39_spill] sm:$0xff] }
 0x26a   :  { %1327 = vmatpush.msrb.mxu2 %v3042_v56  ;;  %1348 = vmatpush.msrb.mxu3 %v3058_v48 }
 0x26b   :  { %v3177_v15 = vadd.f32 %v991_v50, %v990_v10  ;;  %v978_v2 = vadd.f32 %v3153_v11, %v977_v1  ;;  %1288 = vmatpush.msrb.mxu0 %v3050_v22  ;;  %1308 = vmatpush.msrb.mxu1 %v3052_v8  ;;  %v3693_v50 = vld [vmem:[#allocation53_spill] sm:$0xff]  ;;  %v986_v25 = vor.u32 1.1754944e-38, %v985_v55  ;;  %v3700_v10 = vld [vmem:[#allocation40_spill] sm:$0xff] }
 0x26c   :  { %1328 = vmatpush.msrb.mxu2 %v3056_v9  ;;  %1349 = vmatpush.msrb.mxu3 %v3694_v47  ;;  %v3701_v1 = vld [vmem:[#allocation41_spill] sm:$0xff] }
 0x26d   :  { %2218 = vtanh.f32 %v3177_v15  ;;  %1289 = vmatpush.msrb.mxu0 %v3691_v45  ;;  %1309 = vmatpush.msrb.mxu1 %v3692_v14  ;;  %v982_v49 = vsel %vm981_vm2, %v3153_v11, %v978_v2 }
 0x26e   :  { %1329 = vmatpush.msrb.mxu2 %v3693_v50  ;;  %1350 = vmatpush.msrb.mxu3 %v3697_v34  ;;  %v987_v31 = vsel %vm984_vm3, %v986_v25, %v982_v49 }
 0x26f   :  { %1290 = vmatpush.msrb.mxu0 %v3072_v44  ;;  %1310 = vmatpush.msrb.mxu1 %v3695_v40 }
 0x270   :  { %1330 = vmatpush.msrb.mxu2 %v3696_v53  ;;  %1351 = vmatpush.msrb.mxu3 %v3091_v60 }
 0x271   :  { %1291 = vmatpush.msrb.mxu0 %v3082_v35  ;;  %1311 = vmatpush.msrb.mxu1 %v3084_v21 }
 0x272   :  { %1331 = vmatpush.msrb.mxu2 %v3089_v30  ;;  %1352 = vmatpush.msrb.mxu3 %v3103_v38 }
 0x273   :  { %v2219_v29 = vpop.eup %2218  ;;  %1292 = vmatpush.msrb.mxu0 %v3095_v43  ;;  %1312 = vmatpush.msrb.mxu1 %v3097_v26 }
 0x274   :  { %v994_v11 = vmul.f32 %v2219_v29, %v987_v31  ;;  %1332 = vmatpush.msrb.mxu2 %v3101_v27 }
 0x276   :  { %1078 = vmatmul.f32.vlgmr.msra.gmra.mxu0 %v994_v11  ;;  %1098 = vmatmul.f32.vlgmr.msra.gmra.mxu1 %v994_v11 }
 0x277   :  { %1118 = vmatmul.f32.vlgmr.msra.gmra.mxu2 %v994_v11  ;;  %1138 = vmatmul.f32.vlgmr.msra.gmra.mxu3 %v994_v11 }
 0x278   :  { %1492 = vmatpush.msra.mxu0 %v2916_v4  ;;  %1512 = vmatpush.msra.mxu1 %v2918_v12  ;;  %v3702_v4 = vld [vmem:[#allocation42_spill] sm:$0xff]  ;;  %v3703_v12 = vld [vmem:[#allocation43_spill] sm:$0xff] }
 0x279   :  { %1532 = vmatpush.msra.mxu2 %v2920_v0  ;;  %1552 = vmatpush.msra.mxu3 %v3698_v28  ;;  %v3704_v0 = vld [vmem:[#allocation44_spill] sm:$0xff] }
 0x27a   :  { %1493 = vmatpush.msra.mxu0 %v3699_v16  ;;  %1513 = vmatpush.msra.mxu1 %v2930_v3  ;;  %v3705_v3 = vld [vmem:[#allocation45_spill] sm:$0xff] }
 0x27b   :  { %1533 = vmatpush.msra.mxu2 %v3700_v10  ;;  %1553 = vmatpush.msra.mxu3 %v3701_v1 }
 0x27c   :  { %1494 = vmatpush.msra.mxu0 %v2940_v19  ;;  %1514 = vmatpush.msra.mxu1 %v2942_v18  ;;  %v3706_v19 = vld [vmem:[#allocation46_spill] sm:$0xff]  ;;  %v3707_v18 = vld [vmem:[#allocation47_spill] sm:$0xff] }
 0x27d   :  { %1534 = vmatpush.msra.mxu2 %v2944_v20  ;;  %1554 = vmatpush.msra.mxu3 %v2948_v23  ;;  %v3708_v20 = vld [vmem:[#allocation48_spill] sm:$0xff]  ;;  %v3709_v23 = vld [vmem:[#allocation49_spill] sm:$0xff] }
 0x27e   :  { %1495 = vmatpush.msra.mxu0 %v2952_v24  ;;  %1515 = vmatpush.msra.mxu1 %v3702_v4  ;;  %v3710_v24 = vld [vmem:[#allocation50_spill] sm:$0xff] }
 0x27f   :  { %1535 = vmatpush.msra.mxu2 %v3703_v12  ;;  %1555 = vmatpush.msra.mxu3 %v3704_v0 }
 0x280   :  { %1496 = vmatpush.msra.mxu0 %v3705_v3  ;;  %1516 = vmatpush.msra.mxu1 %v2966_v5  ;;  %v3713_v5 = vld [vmem:[#allocation21_spill] sm:$0xff] }
 0x281   :  { %1536 = vmatpush.msra.mxu2 %v2968_v17  ;;  %1556 = vmatpush.msra.mxu3 %v2972_v32 }
 0x282   :  { %1497 = vmatpush.msra.mxu0 %v2976_v33  ;;  %1517 = vmatpush.msra.mxu1 %v3706_v19  ;;  %v3715_v19 = vld [vmem:[#allocation22_spill] sm:$0xff] }
 0x283   :  { %1537 = vmatpush.msra.mxu2 %v2980_v37  ;;  %1557 = vmatpush.msra.mxu3 %v2984_v41 }
 0x284   :  { %1498 = vmatpush.msra.mxu0 %v3707_v18  ;;  %1518 = vmatpush.msra.mxu1 %v2990_v46 }
 0x285   :  { %1538 = vmatpush.msra.mxu2 %v2992_v7  ;;  %1558 = vmatpush.msra.mxu3 %v3708_v20  ;;  %v3716_v20 = vld [vmem:[#allocation23_spill] sm:$0xff] }
 0x286   :  { %1499 = vmatpush.msra.mxu0 %v3709_v23  ;;  %1519 = vmatpush.msra.mxu1 %v3710_v24 }
 0x287   :  { %1539 = vmatpush.msra.mxu2 %v3004_v54  ;;  %1559 = vmatpush.msra.mxu3 %v3008_v42 }
 0x288   :  { %1500 = vmatpush.msra.mxu0 %v3012_v58  ;;  %1520 = vmatpush.msra.mxu1 %v3014_v59  ;;  %v3714_v58 = vld [vmem:[#allocation20_spill] sm:$0xff] }
 0x289   :  { %1540 = vmatpush.msra.mxu2 %v3016_v62  ;;  %1560 = vmatpush.msra.mxu3 %v3020_v63 }
 0x28a   :  { %1501 = vmatpush.msra.mxu0 %v3024_v52  ;;  %1521 = vmatpush.msra.mxu1 %v3026_v13 }
 0x28b   :  { %1541 = vmatpush.msra.mxu2 %v3028_v6  ;;  %1561 = vmatpush.msra.mxu3 %v3032_v39 }
 0x28c   :  { %1502 = vmatpush.msra.mxu0 %v3038_v61  ;;  %1522 = vmatpush.msra.mxu1 %v3040_v57  ;;  %v3712_v57 = vld [vmem:[#allocation19_spill] sm:$0xff] }
 0x28d   :  { %1542 = vmatpush.msra.mxu2 %v3042_v56  ;;  %1562 = vmatpush.msra.mxu3 %v3046_v51  ;;  %v3711_v51 = vld [vmem:[#allocation18_spill] sm:$0xff] }
 0x28e   :  { %1503 = vmatpush.msra.mxu0 %v3050_v22  ;;  %1523 = vmatpush.msra.mxu1 %v3052_v8 }
 0x28f   :  { %1543 = vmatpush.msra.mxu2 %v3056_v9  ;;  %1563 = vmatpush.msra.mxu3 %v3058_v48 }
 0x290   :  { %1504 = vmatpush.msra.mxu0 %v3691_v45  ;;  %1524 = vmatpush.msra.mxu1 %v3692_v14 }
 0x291   :  { %1544 = vmatpush.msra.mxu2 %v3693_v50  ;;  %1564 = vmatpush.msra.mxu3 %v3694_v47 }
 0x292   :  { %1505 = vmatpush.msra.mxu0 %v3072_v44  ;;  %1525 = vmatpush.msra.mxu1 %v3695_v40 }
 0x293   :  { %1545 = vmatpush.msra.mxu2 %v3696_v53  ;;  %1565 = vmatpush.msra.mxu3 %v3697_v34 }
 0x294   :  { %1506 = vmatpush.msra.mxu0 %v3082_v35  ;;  %1526 = vmatpush.msra.mxu1 %v3084_v21 }
 0x295   :  { %1546 = vmatpush.msra.mxu2 %v3089_v30  ;;  %1566 = vmatpush.msra.mxu3 %v3091_v60 }
 0x296   :  { %1507 = vmatpush.msra.mxu0 %v3095_v43  ;;  %1527 = vmatpush.msra.mxu1 %v3097_v26 }
 0x297   :  { %1547 = vmatpush.msra.mxu2 %v3101_v27  ;;  %1567 = vmatpush.msra.mxu3 %v3103_v38 }
 0x2f3   :  { %v1079_v44 = vpop.f32.mrf.mxu0  ;;  %v1099_v48 = vpop.f32.mrf.mxu1 }
 0x2f4   :  { %v1142_v56 = vadd.f32 %v1079_v44, %v3711_v51  ;;  %v1143_v35 = vadd.f32 %v1099_v48, %v3712_v57  ;;  %v3717_v51 = vld [vmem:[#allocation25_spill] sm:$0xff] }
 0x2f6   :  { %v2145_v61 = vmul.f32 -1.442695, %v1142_v56  ;;  %v2146_v39 = vmul.f32 -1.442695, %v1143_v35 }
 0x2f8   :  { %2220 = vpow2.f32 %v2145_v61 }
 0x2f9   :  { %2222 = vpow2.f32 %v2146_v39 }
 0x2fa   :  { %v1139_v30 = vpop.f32.mrf.mxu3  ;;  %v1119_v46 = vpop.f32.mrf.mxu2 }
 0x2fb   :  { %v1145_v17 = vadd.f32 %v1139_v30, %v3713_v5  ;;  %v1144_v59 = vadd.f32 %v1119_v46, %v3714_v58 }
 0x2fd   :  { %v2147_v43 = vmul.f32 -1.442695, %v1145_v17 }
 0x2fe   :  { %v2221_v32 = vpop.eup %2220 }
 0x2ff   :  { %v2223_v33 = vpop.eup %2222  ;;  %v1149_v37 = vadd.f32 1.0, %v2221_v32  ;;  %2224 = vpow2.f32 %v2147_v43 }
 0x300   :  { %v1168_v41 = vadd.f32 1.0, %v2223_v33  ;;  %v3718_v33 = vld [vmem:[#allocation24_spill] sm:$0xff] }
 0x301   :  { %2226 = vrcp.f32 %v1149_v37  ;;  %v1161_v22 = vand.u32 2147483648, %v1149_v37  ;;  %v1159_v60 = vand.u32 2147483647, %v1149_v37  ;;  %vm1155_vm6 = vweird.f32 %v1149_v37 }
 0x302   :  { %2228 = vrcp.f32 %v1168_v41  ;;  %v1180_v8 = vand.u32 2147483648, %v1168_v41  ;;  %v1178_v21 = vand.u32 2147483647, %v1168_v41  ;;  %vm1174_vm7 = vweird.f32 %v1168_v41 }
 0x303   :  { %v1162_v2 = vor.u32 1.1754944e-38, %v1161_v22  ;;  %vm1160_vm10 = vcmp.eq.f32.partialorder %v1159_v60, 8.507059e+37 }
 0x304   :  { %v1181_v45 = vor.u32 1.1754944e-38, %v1180_v8  ;;  %vm1179_vm11 = vcmp.eq.f32.partialorder %v1178_v21, 8.507059e+37 }
 0x305   :  { %v2225_v7 = vpop.eup %2224 }
 0x306   :  { %v1188_v54 = vadd.f32 1.0, %v2225_v7 }
 0x307   :  { %v2227_v42 = vpop.eup %2226 }
 0x308   :  { %v2229_v62 = vpop.eup %2228  ;;  %v1151_v63 = vmul.f32 %v2227_v42, %v1149_v37  ;;  %2230 = vrcp.f32 %v1188_v54  ;;  %vm1156_vm4 = vweird.f32 %v2227_v42  ;;  %v1200_v28 = vand.u32 2147483648, %v1188_v54 }
 0x309   :  { %v1170_v52 = vmul.f32 %v2229_v62, %v1168_v41  ;;  %2232 = vtanh.f32 %v1144_v59  ;;  %vm1175_vm5 = vweird.f32 %v2229_v62  ;;  %vm1157_vm8 = vmor %vm1155_vm6, %vm1156_vm4  ;;  %vm1194_vm13 = vweird.f32 %v1188_v54 }
 0x30a   :  { %v1152_v13 = vsub.f32 1.0, %v1151_v63  ;;  %vm1176_vm9 = vmor %vm1174_vm7, %vm1175_vm5  ;;  %v1198_v16 = vand.u32 2147483647, %v1188_v54  ;;  %v1201_v1 = vor.u32 1.1754944e-38, %v1200_v28 }
 0x30b   :  { %v1171_v6 = vsub.f32 1.0, %v1170_v52 }
 0x30c   :  { %v1153_v9 = vmul.f32 %v2227_v42, %v1152_v13  ;;  %vm1199_vm15 = vcmp.eq.f32.partialorder %v1198_v16, 8.507059e+37  ;;  %v3292_v16 = vld [vmem:[#allocation9 + $0x1e8] sm:$0xff] }
 0x30d   :  { %v1172_v26 = vmul.f32 %v2229_v62, %v1171_v6 }
 0x30e   :  { %v2231_v27 = vpop.eup %2230  ;;  %v1154_v38 = vadd.f32 %v2227_v42, %v1153_v9 }
 0x30f   :  { %v1173_v55 = vadd.f32 %v2229_v62, %v1172_v26  ;;  %v1190_v36 = vmul.f32 %v2231_v27, %v1188_v54  ;;  %v2233_v49 = vpop.eup %2232  ;;  %vm1195_vm12 = vweird.f32 %v2231_v27 }
 0x310   :  { %v1158_v14 = vsel %vm1157_vm8, %v2227_v42, %v1154_v38  ;;  %vm1196_vm14 = vmor %vm1194_vm13, %vm1195_vm12 }
 0x311   :  { %v1163_v50 = vsel %vm1160_vm10, %v1162_v2, %v1158_v14  ;;  %v1177_v47 = vsel %vm1176_vm9, %v2229_v62, %v1173_v55  ;;  %v1191_v25 = vsub.f32 1.0, %v1190_v36 }
 0x312   :  { %v1182_v40 = vsel %vm1179_vm11, %v1181_v45, %v1177_v47  ;;  %v1206_v53 = vmul.f32 %v2233_v49, %v1163_v50 }
 0x313   :  { %v1205_v34 = vmul.f32 %v1182_v40, %v3177_v15  ;;  %v1192_v29 = vmul.f32 %v2231_v27, %v1191_v25 }
 0x315   :  { %v3279_v31 = vadd.f32 %v1206_v53, %v1205_v34  ;;  %v1193_v11 = vadd.f32 %v2231_v27, %v1192_v29 }
 0x317   :  { %2234 = vtanh.f32 %v3279_v31  ;;  %v1197_v10 = vsel %vm1196_vm14, %v2231_v27, %v1193_v11 }
 0x318   :  { %v1202_v12 = vsel %vm1199_vm15, %v1201_v1, %v1197_v10  ;;  %v3294_v10 = vld [vmem:[#allocation9 + $0x1f0] sm:$0xff]  ;;  %v3298_v1 = vld [vmem:[#allocation9 + $0x1f8] sm:$0xff] }
 0x31d   :  { %v2235_v4 = vpop.eup %2234 }
 0x31e   :  { %v1209_v0 = vmul.f32 %v2235_v4, %v1202_v12  ;;  %v3302_v4 = vld [vmem:[#allocation9 + $0x1c0] sm:$0xff]  ;;  %v3304_v12 = vld [vmem:[#allocation9 + $0x1c8] sm:$0xff] }
 0x320   :  { %1293 = vmatmul.f32.vlgmr.msrb.gmra.mxu0 %v1209_v0  ;;  %1313 = vmatmul.f32.vlgmr.msrb.gmra.mxu1 %v1209_v0 }
 0x321   :  { %1333 = vmatmul.f32.vlgmr.msrb.gmra.mxu2 %v1209_v0  ;;  %1353 = vmatmul.f32.vlgmr.msrb.gmra.mxu3 %v1209_v0  ;;  %v3306_v0 = vld [vmem:[#allocation9 + $0x1d0] sm:$0xff] }
 0x322   :  { %1727 = vmatpush.msrb.mxu1 %v3292_v16  ;;  %1747 = vmatpush.msrb.mxu2 %v3294_v10 }
 0x323   :  { %1767 = vmatpush.msrb.mxu3 %v3298_v1 }
 0x324   :  { %1728 = vmatpush.msrb.mxu1 %v3304_v12  ;;  %1748 = vmatpush.msrb.mxu2 %v3306_v0 }
 0x39d   :  { %v1294_v15 = vpop.f32.mrf.mxu0  ;;  %v1314_v3 = vpop.f32.mrf.mxu1 }
 0x39e   :  { %v1357_v18 = vadd.f32 %v1294_v15, %v3715_v19  ;;  %v1358_v23 = vadd.f32 %v1314_v3, %v3716_v20  ;;  %v3310_v15 = vld [vmem:[#allocation9 + $0x1d8] sm:$0xff]  ;;  %v3314_v3 = vld [vmem:[#allocation9 + $0x1a0] sm:$0xff]  ;;  %v3316_v19 = vld [vmem:[#allocation9 + $0x1a8] sm:$0xff] }
 0x39f   :  { %1768 = vmatpush.msrb.mxu3 %v3310_v15  ;;  %1729 = vmatpush.msrb.mxu1 %v3316_v19  ;;  %v3322_v20 = vld [vmem:[#allocation9 + $0x1b8] sm:$0xff] }
 0x3a0   :  { %v2148_v24 = vmul.f32 -1.442695, %v1357_v18  ;;  %v2149_v44 = vmul.f32 -1.442695, %v1358_v23  ;;  %v3318_v18 = vld [vmem:[#allocation9 + $0x1b0] sm:$0xff]  ;;  %v3326_v23 = vld [vmem:[#allocation9 + $0x180] sm:$0xff] }
 0x3a1   :  { %1749 = vmatpush.msrb.mxu2 %v3318_v18  ;;  %1769 = vmatpush.msrb.mxu3 %v3322_v20 }
 0x3a2   :  { %2236 = vpow2.f32 %v2148_v24  ;;  %v3328_v24 = vld [vmem:[#allocation9 + $0x188] sm:$0xff] }
 0x3a3   :  { %2238 = vpow2.f32 %v2149_v44  ;;  %v3330_v44 = vld [vmem:[#allocation9 + $0x190] sm:$0xff]  ;;  %1730 = vmatpush.msrb.mxu1 %v3328_v24 }
 0x3a4   :  { %v1354_v48 = vpop.f32.mrf.mxu3  ;;  %v1334_v5 = vpop.f32.mrf.mxu2  ;;  %1750 = vmatpush.msrb.mxu2 %v3330_v44 }
 0x3a5   :  { %v1360_v56 = vadd.f32 %v1354_v48, %v3717_v51  ;;  %v1359_v37 = vadd.f32 %v1334_v5, %v3718_v33  ;;  %v3334_v48 = vld [vmem:[#allocation9 + $0x198] sm:$0xff]  ;;  %v3338_v51 = vld [vmem:[#allocation9 + $0x160] sm:$0xff] }
 0x3a6   :  { %1770 = vmatpush.msrb.mxu3 %v3334_v48  ;;  %v3358_v5 = vld [vmem:[#allocation9 + $0x158] sm:$0xff] }
 0x3a7   :  { %v2150_v57 = vmul.f32 -1.442695, %v1360_v56  ;;  %v3340_v56 = vld [vmem:[#allocation9 + $0x168] sm:$0xff]  ;;  %v3370_v33 = vld [vmem:[#allocation9 + $0x138] sm:$0xff] }
 0x3a8   :  { %v2237_v35 = vpop.eup %2236  ;;  %1731 = vmatpush.msrb.mxu1 %v3340_v56 }
 0x3a9   :  { %v2239_v61 = vpop.eup %2238  ;;  %v1364_v39 = vadd.f32 1.0, %v2237_v35  ;;  %2240 = vpow2.f32 %v2150_v57  ;;  %v3342_v57 = vld [vmem:[#allocation9 + $0x170] sm:$0xff]  ;;  %v3346_v35 = vld [vmem:[#allocation9 + $0x178] sm:$0xff] }
 0x3aa   :  { %v1383_v30 = vadd.f32 1.0, %v2239_v61  ;;  %1751 = vmatpush.msrb.mxu2 %v3342_v57  ;;  %1771 = vmatpush.msrb.mxu3 %v3346_v35  ;;  %v3350_v61 = vld [vmem:[#allocation9 + $0x140] sm:$0xff] }
 0x3ab   :  { %2242 = vrcp.f32 %v1364_v39  ;;  %v1376_v58 = vand.u32 2147483648, %v1364_v39  ;;  %v1374_v63 = vand.u32 2147483647, %v1364_v39  ;;  %vm1370_vm2 = vweird.f32 %v1364_v39 }
 0x3ac   :  { %2244 = vrcp.f32 %v1383_v30  ;;  %v1395_v59 = vand.u32 2147483648, %v1383_v30  ;;  %v1393_v13 = vand.u32 2147483647, %v1383_v30  ;;  %vm1389_vm3 = vweird.f32 %v1383_v30  ;;  %1772 = vmatpush.msrb.mxu3 %v3358_v5 }
 0x3ad   :  { %v1377_v8 = vor.u32 1.1754944e-38, %v1376_v58  ;;  %vm1375_vm6 = vcmp.eq.f32.partialorder %v1374_v63, 8.507059e+37  ;;  %v3390_v58 = vld [vmem:[#allocation9 + $0xf0] sm:$0xff]  ;;  %v3400_v63 = vld [vmem:[#allocation9 + $0xc8] sm:$0xff] }
 0x3ae   :  { %v1396_v26 = vor.u32 1.1754944e-38, %v1395_v59  ;;  %vm1394_vm7 = vcmp.eq.f32.partialorder %v1393_v13, 8.507059e+37  ;;  %1773 = vmatpush.msrb.mxu3 %v3370_v33  ;;  %v3394_v59 = vld [vmem:[#allocation9 + $0xf8] sm:$0xff] }
 0x3af   :  { %v2241_v17 = vpop.eup %2240 }
 0x3b0   :  { %v1403_v43 = vadd.f32 1.0, %v2241_v17  ;;  %v3362_v17 = vld [vmem:[#allocation9 + $0x120] sm:$0xff] }
 0x3b1   :  { %v2243_v32 = vpop.eup %2242 }
 0x3b2   :  { %v2245_v41 = vpop.eup %2244  ;;  %v1366_v46 = vmul.f32 %v2243_v32, %v1364_v39  ;;  %2246 = vrcp.f32 %v1403_v43  ;;  %vm1371_vm0 = vweird.f32 %v2243_v32  ;;  %v1415_v25 = vand.u32 2147483648, %v1403_v43  ;;  %v3352_v39 = vld [vmem:[#allocation9 + $0x148] sm:$0xff] }
 0x3b3   :  { %v1385_v7 = vmul.f32 %v2245_v41, %v1383_v30  ;;  %2248 = vtanh.f32 %v1359_v37  ;;  %vm1390_vm1 = vweird.f32 %v2245_v41  ;;  %vm1372_vm4 = vmor %vm1370_vm2, %vm1371_vm0  ;;  %vm1409_vm9 = vweird.f32 %v1403_v43  ;;  %v3354_v30 = vld [vmem:[#allocation9 + $0x150] sm:$0xff]  ;;  %1732 = vmatpush.msrb.mxu1 %v3352_v39  ;;  %v3374_v37 = vld [vmem:[#allocation9 + $0x100] sm:$0xff] }
 0x3b4   :  { %v1367_v54 = vsub.f32 1.0, %v1366_v46  ;;  %vm1391_vm5 = vmor %vm1389_vm3, %vm1390_vm1  ;;  %v1413_v40 = vand.u32 2147483647, %v1403_v43  ;;  %v1416_v34 = vor.u32 1.1754944e-38, %v1415_v25  ;;  %1752 = vmatpush.msrb.mxu2 %v3354_v30  ;;  %v3378_v46 = vld [vmem:[#allocation9 + $0x110] sm:$0xff]  ;;  %v3434_v25 = vld [vmem:[#allocation9 + $0x60] sm:$0xff] }
 0x3b5   :  { %v1386_v42 = vsub.f32 1.0, %v1385_v7  ;;  %v3382_v7 = vld [vmem:[#allocation9 + $0x118] sm:$0xff] }
 0x3b6   :  { %v1368_v62 = vmul.f32 %v2243_v32, %v1367_v54  ;;  %vm1414_vm11 = vcmp.eq.f32.partialorder %v1413_v40, 8.507059e+37  ;;  %1774 = vmatpush.msrb.mxu3 %v3382_v7  ;;  %v3386_v54 = vld [vmem:[#allocation9 + $0xe0] sm:$0xff]  ;;  %v3438_v40 = vld [vmem:[#allocation9 + $0x68] sm:$0xff] }
 0x3b7   :  { %v1387_v52 = vmul.f32 %v2245_v41, %v1386_v42  ;;  %v3388_v42 = vld [vmem:[#allocation9 + $0xe8] sm:$0xff]  ;;  %3721 = vst [vmem:[#allocation51_spill] sm:$0xff] %v3438_v40 }
 0x3b8   :  { %v2247_v6 = vpop.eup %2246  ;;  %v1369_v22 = vadd.f32 %v2243_v32, %v1368_v62  ;;  %1775 = vmatpush.msrb.mxu3 %v3394_v59  ;;  %v3398_v62 = vld [vmem:[#allocation9 + $0xc0] sm:$0xff] }
 0x3b9   :  { %v1388_v9 = vadd.f32 %v2245_v41, %v1387_v52  ;;  %v1405_v60 = vmul.f32 %v2247_v6, %v1403_v43  ;;  %v2249_v27 = vpop.eup %2248  ;;  %vm1410_vm8 = vweird.f32 %v2247_v6  ;;  %v3364_v43 = vld [vmem:[#allocation9 + $0x128] sm:$0xff]  ;;  %v3402_v52 = vld [vmem:[#allocation9 + $0xd0] sm:$0xff] }
 0x3ba   :  { %v1373_v21 = vsel %vm1372_vm4, %v2243_v32, %v1369_v22  ;;  %vm1411_vm10 = vmor %vm1409_vm9, %vm1410_vm8  ;;  %v3366_v32 = vld [vmem:[#allocation9 + $0x130] sm:$0xff]  ;;  %1733 = vmatpush.msrb.mxu1 %v3364_v43  ;;  %v3406_v22 = vld [vmem:[#allocation9 + $0xd8] sm:$0xff] }
 0x3bb   :  { %v1378_v38 = vsel %vm1375_vm6, %v1377_v8, %v1373_v21  ;;  %v1392_v2 = vsel %vm1391_vm5, %v2245_v41, %v1388_v9  ;;  %v1406_v55 = vsub.f32 1.0, %v1405_v60  ;;  %1753 = vmatpush.msrb.mxu2 %v3366_v32  ;;  %v3376_v41 = vld [vmem:[#allocation9 + $0x108] sm:$0xff]  ;;  %v3720_v60 = vld [vmem:[#allocation27_spill] sm:$0xff]  ;;  %1776 = vmatpush.msrb.mxu3 %v3406_v22  ;;  %v3412_v21 = vld [vmem:[#allocation9 + $0xa0] sm:$0xff] }
 0x3bc   :  { %v1397_v36 = vsel %vm1394_vm7, %v1396_v26, %v1392_v2  ;;  %v1421_v45 = vmul.f32 %v2249_v27, %v1378_v38  ;;  %1734 = vmatpush.msrb.mxu1 %v3376_v41  ;;  %v3719_v8 = vld [vmem:[#allocation26_spill] sm:$0xff]  ;;  %v3420_v2 = vld [vmem:[#allocation9 + $0xb8] sm:$0xff] }
 0x3bd   :  { %v1420_v14 = vmul.f32 %v1397_v36, %v3279_v31  ;;  %v1407_v49 = vmul.f32 %v2247_v6, %v1406_v55  ;;  %v3290_v31 = vld [vmem:[#allocation9 + $0x1e0] sm:$0xff]  ;;  %1754 = vmatpush.msrb.mxu2 %v3378_v46  ;;  %v3414_v27 = vld [vmem:[#allocation9 + $0xa8] sm:$0xff]  ;;  %v3416_v38 = vld [vmem:[#allocation9 + $0xb0] sm:$0xff]  ;;  %1777 = vmatpush.msrb.mxu3 %v3420_v2 }
 0x3be   :  { %1707 = vmatpush.msrb.mxu0 %v3290_v31  ;;  %1735 = vmatpush.msrb.mxu1 %v3388_v42 }
 0x3bf   :  { %v3287_v50 = vadd.f32 %v1421_v45, %v1420_v14  ;;  %v1408_v47 = vadd.f32 %v2247_v6, %v1407_v49  ;;  %1755 = vmatpush.msrb.mxu2 %v3390_v58  ;;  %v3424_v45 = vld [vmem:[#allocation9 + $0x80] sm:$0xff]  ;;  %v3426_v14 = vld [vmem:[#allocation9 + $0x88] sm:$0xff]  ;;  %v3430_v49 = vld [vmem:[#allocation9 + $0x90] sm:$0xff] }
 0x3c0   :  { %1708 = vmatpush.msrb.mxu0 %v3302_v4  ;;  %1736 = vmatpush.msrb.mxu1 %v3400_v63 }
 0x3c1   :  { %2250 = vtanh.f32 %v3287_v50  ;;  %v1412_v53 = vsel %vm1411_vm10, %v2247_v6, %v1408_v47  ;;  %1756 = vmatpush.msrb.mxu2 %v3402_v52  ;;  %v3432_v47 = vld [vmem:[#allocation9 + $0x98] sm:$0xff] }
 0x3c2   :  { %v1417_v11 = vsel %vm1414_vm11, %v1416_v34, %v1412_v53  ;;  %1709 = vmatpush.msrb.mxu0 %v3314_v3  ;;  %1737 = vmatpush.msrb.mxu1 %v3414_v27  ;;  %v3440_v53 = vld [vmem:[#allocation9 + $0x70] sm:$0xff]  ;;  %v3442_v34 = vld [vmem:[#allocation9 + $0x78] sm:$0xff] }
 0x3c3   :  { %1757 = vmatpush.msrb.mxu2 %v3416_v38  ;;  %1778 = vmatpush.msrb.mxu3 %v3432_v47  ;;  %3722 = vst [vmem:[#allocation52_spill] sm:$0xff] %v3440_v53 }
 0x3c4   :  { %1710 = vmatpush.msrb.mxu0 %v3326_v23  ;;  %1738 = vmatpush.msrb.mxu1 %v3426_v14  ;;  %3723 = vst [vmem:[#allocation53_spill] sm:$0xff] %v3442_v34 }
 0x3c5   :  { %1758 = vmatpush.msrb.mxu2 %v3430_v49  ;;  %1779 = vmatpush.msrb.mxu3 %v3442_v34  ;;  %v3469_v34 = vld [vmem:[#allocation9] sm:$0xff] }
 0x3c6   :  { %1711 = vmatpush.msrb.mxu0 %v3338_v51  ;;  %1739 = vmatpush.msrb.mxu1 %v3438_v40 }
 0x3c7   :  { %v2251_v29 = vpop.eup %2250  ;;  %1759 = vmatpush.msrb.mxu2 %v3440_v53  ;;  %v3471_v53 = vld [vmem:[#allocation9 + $0x8] sm:$0xff] }
 0x3c8   :  { %v1424_v28 = vmul.f32 %v2251_v29, %v1417_v11  ;;  %1712 = vmatpush.msrb.mxu0 %v3350_v61  ;;  %v3446_v29 = vld [vmem:[#allocation9 + $0x40] sm:$0xff]  ;;  %v3448_v11 = vld [vmem:[#allocation9 + $0x48] sm:$0xff] }
 0x3c9   :  { %3724 = vst [vmem:[#allocation54_spill] sm:$0xff] %v3448_v11  ;;  %1740 = vmatpush.msrb.mxu1 %v3448_v11 }
 0x3ca   :  { %1508 = vmatmul.f32.vlgmr.msra.gmra.mxu0 %v1424_v28  ;;  %1528 = vmatmul.f32.vlgmr.msra.gmra.mxu1 %v1424_v28 }
 0x3cb   :  { %1548 = vmatmul.f32.vlgmr.msra.gmra.mxu2 %v1424_v28  ;;  %1568 = vmatmul.f32.vlgmr.msra.gmra.mxu3 %v1424_v28  ;;  %v3450_v28 = vld [vmem:[#allocation9 + $0x50] sm:$0xff] }
 0x3cc   :  { %1713 = vmatpush.msrb.mxu0 %v3362_v17  ;;  %3725 = vst [vmem:[#allocation55_spill] sm:$0xff] %v3450_v28  ;;  %1760 = vmatpush.msrb.mxu2 %v3450_v28 }
 0x3ce   :  { %1714 = vmatpush.msrb.mxu0 %v3374_v37 }
 0x3d0   :  { %1715 = vmatpush.msrb.mxu0 %v3386_v54 }
 0x3d2   :  { %1716 = vmatpush.msrb.mxu0 %v3398_v62 }
 0x3d4   :  { %1717 = vmatpush.msrb.mxu0 %v3412_v21 }
 0x3d6   :  { %1718 = vmatpush.msrb.mxu0 %v3424_v45 }
 0x3d8   :  { %1719 = vmatpush.msrb.mxu0 %v3434_v25 }
 0x3da   :  { %1720 = vmatpush.msrb.mxu0 %v3446_v29 }
 0x447   :  { %v1509_v13 = vpop.f32.mrf.mxu0  ;;  %v1529_v6 = vpop.f32.mrf.mxu1 }
 0x448   :  { %v1572_v9 = vadd.f32 %v1509_v13, %v3719_v8  ;;  %v1573_v26 = vadd.f32 %v1529_v6, %v3720_v60  ;;  %v3454_v6 = vld [vmem:[#allocation9 + $0x58] sm:$0xff]  ;;  %v3456_v8 = vld [vmem:[#allocation9 + $0x20] sm:$0xff] }
 0x449   :  { %3726 = vst [vmem:[#allocation56_spill] sm:$0xff] %v3454_v6  ;;  %v3727_v60 = vld [vmem:[#allocation29_spill] sm:$0xff]  ;;  %1780 = vmatpush.msrb.mxu3 %v3454_v6  ;;  %1721 = vmatpush.msrb.mxu0 %v3456_v8 }
 0x44a   :  { %v2151_v55 = vmul.f32 -1.442695, %v1572_v9  ;;  %v2152_v36 = vmul.f32 -1.442695, %v1573_v26  ;;  %v3458_v9 = vld [vmem:[#allocation9 + $0x28] sm:$0xff] }
 0x44b   :  { %1741 = vmatpush.msrb.mxu1 %v3458_v9  ;;  %1722 = vmatpush.msrb.mxu0 %v3469_v34 }
 0x44c   :  { %2252 = vpow2.f32 %v2151_v55  ;;  %v3463_v55 = vld [vmem:[#allocation9 + $0x30] sm:$0xff] }
 0x44d   :  { %2254 = vpow2.f32 %v2152_v36  ;;  %v3465_v36 = vld [vmem:[#allocation9 + $0x38] sm:$0xff]  ;;  %1761 = vmatpush.msrb.mxu2 %v3463_v55  ;;  %1742 = vmatpush.msrb.mxu1 %v3471_v53 }
 0x44e   :  { %v1569_v13 = vpop.f32.mrf.mxu3  ;;  %1781 = vmatpush.msrb.mxu3 %v3465_v36  ;;  %1922 = vmatpush.msra.mxu0 %v3290_v31 }
 0x44f   :  { %v1575_v26 = vadd.f32 %v1569_v13, %v3727_v60  ;;  %v3475_v13 = vld [vmem:[#allocation9 + $0x10] sm:$0xff]  ;;  %v3477_v60 = vld [vmem:[#allocation9 + $0x18] sm:$0xff]  ;;  %1942 = vmatpush.msra.mxu1 %v3292_v16 }
 0x450   :  { %1762 = vmatpush.msrb.mxu2 %v3475_v13  ;;  %1782 = vmatpush.msrb.mxu3 %v3477_v60 }
 0x451   :  { %v2153_v40 = vmul.f32 -1.442695, %v1575_v26  ;;  %1923 = vmatpush.msra.mxu0 %v3302_v4  ;;  %1943 = vmatpush.msra.mxu1 %v3304_v12 }
 0x452   :  { %v2253_v11 = vpop.eup %2252  ;;  %1962 = vmatpush.msra.mxu2 %v3294_v10  ;;  %1982 = vmatpush.msra.mxu3 %v3298_v1  ;;  %v3728_v10 = vld [vmem:[#allocation28_spill] sm:$0xff] }
 0x453   :  { %v2255_v28 = vpop.eup %2254  ;;  %v3481_v6 = vadd.f32 1.0, %v2253_v11  ;;  %2256 = vpow2.f32 %v2153_v40  ;;  %v1549_v40 = vpop.f32.mrf.mxu2  ;;  %1924 = vmatpush.msra.mxu0 %v3314_v3  ;;  %1944 = vmatpush.msra.mxu1 %v3316_v19 }
 0x454   :  { %v3485_v26 = vadd.f32 1.0, %v2255_v28  ;;  %1963 = vmatpush.msra.mxu2 %v3306_v0  ;;  %1983 = vmatpush.msra.mxu3 %v3310_v15  ;;  %v1574_v1 = vadd.f32 %v1549_v40, %v3728_v10 }
 0x455   :  { %2258 = vrcp.f32 %v3481_v6  ;;  %1925 = vmatpush.msra.mxu0 %v3326_v23  ;;  %1945 = vmatpush.msra.mxu1 %v3328_v24  ;;  %v1591_v19 = vand.u32 2147483648, %v3481_v6  ;;  %v1589_v23 = vand.u32 2147483647, %v3481_v6  ;;  %vm1585_vm14 = vweird.f32 %v3481_v6 }
 0x456   :  { %2260 = vrcp.f32 %v3485_v26  ;;  %1964 = vmatpush.msra.mxu2 %v3318_v18  ;;  %1984 = vmatpush.msra.mxu3 %v3322_v20  ;;  %v1610_v18 = vand.u32 2147483648, %v3485_v26  ;;  %vm1604_vm15 = vweird.f32 %v3485_v26 }
 0x457   :  { %1926 = vmatpush.msra.mxu0 %v3338_v51  ;;  %1946 = vmatpush.msra.mxu1 %v3340_v56  ;;  %v1592_v56 = vor.u32 1.1754944e-38, %v1591_v19  ;;  %vm1590_vm2 = vcmp.eq.f32.partialorder %v1589_v23, 8.507059e+37 }
 0x458   :  { %1965 = vmatpush.msra.mxu2 %v3330_v44  ;;  %1985 = vmatpush.msra.mxu3 %v3334_v48  ;;  %v1608_v44 = vand.u32 2147483647, %v3485_v26 }
 0x459   :  { %v2257_v11 = vpop.eup %2256  ;;  %1927 = vmatpush.msra.mxu0 %v3350_v61  ;;  %1947 = vmatpush.msra.mxu1 %v3352_v39  ;;  %v1611_v61 = vor.u32 1.1754944e-38, %v1610_v18 }
 0x45a   :  { %v3501_v31 = vadd.f32 1.0, %v2257_v11  ;;  %1966 = vmatpush.msra.mxu2 %v3342_v57  ;;  %1986 = vmatpush.msra.mxu3 %v3346_v35  ;;  %vm1609_vm3 = vcmp.eq.f32.partialorder %v1608_v44, 8.507059e+37 }
 0x45b   :  { %v2259_v16 = vpop.eup %2258  ;;  %1928 = vmatpush.msra.mxu0 %v3362_v17  ;;  %1948 = vmatpush.msra.mxu1 %v3364_v43 }
 0x45c   :  { %v2261_v4 = vpop.eup %2260  ;;  %v1581_v12 = vmul.f32 %v2259_v16, %v3481_v6  ;;  %2262 = vrcp.f32 %v3501_v31  ;;  %vm1586_vm12 = vweird.f32 %v2259_v16  ;;  %1967 = vmatpush.msra.mxu2 %v3354_v30  ;;  %1987 = vmatpush.msra.mxu3 %v3358_v5  ;;  %vm1624_vm5 = vweird.f32 %v3501_v31 }
 0x45d   :  { %v1600_v0 = vmul.f32 %v2261_v4, %v3485_v26  ;;  %2264 = vtanh.f32 %v1574_v1  ;;  %vm1605_vm13 = vweird.f32 %v2261_v4  ;;  %vm1587_vm0 = vmor %vm1585_vm14, %vm1586_vm12  ;;  %1929 = vmatpush.msra.mxu0 %v3374_v37  ;;  %1949 = vmatpush.msra.mxu1 %v3376_v41 }
 0x45e   :  { %v1582_v15 = vsub.f32 1.0, %v1581_v12  ;;  %1968 = vmatpush.msra.mxu2 %v3366_v32  ;;  %1988 = vmatpush.msra.mxu3 %v3370_v33  ;;  %vm1606_vm1 = vmor %vm1604_vm15, %vm1605_vm13 }
 0x45f   :  { %v1601_v3 = vsub.f32 1.0, %v1600_v0  ;;  %1930 = vmatpush.msra.mxu0 %v3386_v54  ;;  %1950 = vmatpush.msra.mxu1 %v3388_v42  ;;  %v1628_v54 = vand.u32 2147483647, %v3501_v31  ;;  %v3729_v42 = vld [vmem:[#allocation51_spill] sm:$0xff] }
 0x460   :  { %v1583_v20 = vmul.f32 %v2259_v16, %v1582_v15  ;;  %1969 = vmatpush.msra.mxu2 %v3378_v46  ;;  %1989 = vmatpush.msra.mxu3 %v3382_v7 }
 0x461   :  { %v1602_v24 = vmul.f32 %v2261_v4, %v1601_v3  ;;  %1931 = vmatpush.msra.mxu0 %v3398_v62  ;;  %1951 = vmatpush.msra.mxu1 %v3400_v63  ;;  %v3731_v62 = vld [vmem:[#allocation53_spill] sm:$0xff]  ;;  %vm1629_vm7 = vcmp.eq.f32.partialorder %v1628_v54, 8.507059e+37 }
 0x462   :  { %v3527_v48 = vpop.eup %2262  ;;  %v1584_v51 = vadd.f32 %v2259_v16, %v1583_v20  ;;  %1970 = vmatpush.msra.mxu2 %v3390_v58  ;;  %1990 = vmatpush.msra.mxu3 %v3394_v59  ;;  %v3730_v59 = vld [vmem:[#allocation52_spill] sm:$0xff] }
 0x463   :  { %v1603_v57 = vadd.f32 %v2261_v4, %v1602_v24  ;;  %v1620_v35 = vmul.f32 %v3527_v48, %v3501_v31  ;;  %v2265_v30 = vpop.eup %2264  ;;  %1932 = vmatpush.msra.mxu0 %v3412_v21  ;;  %1952 = vmatpush.msra.mxu1 %v3414_v27  ;;  %vm1625_vm4 = vweird.f32 %v3527_v48  ;;  %v3734_v21 = vld [vmem:[#allocation56_spill] sm:$0xff] }
 0x464   :  { %v1588_v39 = vsel %vm1587_vm0, %v2259_v16, %v1584_v51  ;;  %1971 = vmatpush.msra.mxu2 %v3402_v52  ;;  %1991 = vmatpush.msra.mxu3 %v3406_v22  ;;  %vm1626_vm6 = vmor %vm1624_vm5, %vm1625_vm4  ;;  %v3732_v52 = vld [vmem:[#allocation54_spill] sm:$0xff]  ;;  %v3733_v22 = vld [vmem:[#allocation55_spill] sm:$0xff] }
 0x465   :  { %v1593_v5 = vsel %vm1590_vm2, %v1592_v56, %v1588_v39  ;;  %v1607_v17 = vsel %vm1606_vm1, %v2261_v4, %v1603_v57  ;;  %v1621_v43 = vsub.f32 1.0, %v1620_v35  ;;  %1933 = vmatpush.msra.mxu0 %v3424_v45  ;;  %1953 = vmatpush.msra.mxu1 %v3426_v14  ;;  %v3738_v16 = vld [vmem:[#allocation32_spill] sm:$0xff] }
 0x466   :  { %v1612_v32 = vsel %vm1609_vm3, %v1611_v61, %v1607_v17  ;;  %v1636_v33 = vmul.f32 %v2265_v30, %v1593_v5  ;;  %1972 = vmatpush.msra.mxu2 %v3416_v38  ;;  %1992 = vmatpush.msra.mxu3 %v3420_v2 }
 0x467   :  { %v1635_v37 = vmul.f32 %v1612_v32, %v3287_v50  ;;  %v1622_v41 = vmul.f32 %v3527_v48, %v1621_v43  ;;  %v1630_v50 = vand.u32 2147483648, %v3501_v31  ;;  %1934 = vmatpush.msra.mxu0 %v3434_v25  ;;  %1954 = vmatpush.msra.mxu1 %v3729_v42  ;;  %v3736_v25 = vld [vmem:[#allocation31_spill] sm:$0xff] }
 0x468   :  { %1973 = vmatpush.msra.mxu2 %v3430_v49  ;;  %1993 = vmatpush.msra.mxu3 %v3432_v47  ;;  %v3735_v49 = vld [vmem:[#allocation30_spill] sm:$0xff] }
 0x469   :  { %v3551_v46 = vadd.f32 %v1636_v33, %v1635_v37  ;;  %v1623_v7 = vadd.f32 %v3527_v48, %v1622_v41  ;;  %v1631_v63 = vor.u32 1.1754944e-38, %v1630_v50  ;;  %1935 = vmatpush.msra.mxu0 %v3446_v29  ;;  %1955 = vmatpush.msra.mxu1 %v3732_v52  ;;  %v2090_v52 = vld [vmem:[#allocation12 + $0x70] sm:$0xff] }
 0x46a   :  { %1974 = vmatpush.msra.mxu2 %v3730_v59  ;;  %1994 = vmatpush.msra.mxu3 %v3731_v62 }
 0x46b   :  { %2266 = vtanh.f32 %v3551_v46  ;;  %v1627_v58 = vsel %vm1626_vm6, %v3527_v48, %v1623_v7  ;;  %1936 = vmatpush.msra.mxu0 %v3456_v8  ;;  %1956 = vmatpush.msra.mxu1 %v3458_v9 }
 0x46c   :  { %1975 = vmatpush.msra.mxu2 %v3733_v22  ;;  %1995 = vmatpush.msra.mxu3 %v3734_v21  ;;  %v1632_v38 = vsel %vm1629_vm7, %v1631_v63, %v1627_v58  ;;  %v2089_v22 = vld [vmem:[#allocation12 + $0x68] sm:$0xff]  ;;  %v2088_v21 = vld [vmem:[#allocation12 + $0x60] sm:$0xff] }
 0x46d   :  { %1937 = vmatpush.msra.mxu0 %v3469_v34  ;;  %1957 = vmatpush.msra.mxu1 %v3471_v53  ;;  %v3737_v53 = vld [vmem:[#allocation33_spill] sm:$0xff] }
 0x46e   :  { %1976 = vmatpush.msra.mxu2 %v3463_v55  ;;  %1996 = vmatpush.msra.mxu3 %v3465_v36 }
 0x470   :  { %1977 = vmatpush.msra.mxu2 %v3475_v13  ;;  %1997 = vmatpush.msra.mxu3 %v3477_v60 }
 0x471   :  { %v2267_v27 = vpop.eup %2266 }
 0x472   :  { %v1639_v2 = vmul.f32 %v2267_v27, %v1632_v38  ;;  %v2087_v27 = vld [vmem:[#allocation12 + $0x58] sm:$0xff]  ;;  %v2086_v38 = vld [vmem:[#allocation12 + $0x50] sm:$0xff] }
 0x474   :  { %1723 = vmatmul.f32.vlgmr.msrb.gmra.mxu0 %v1639_v2  ;;  %1743 = vmatmul.f32.vlgmr.msrb.gmra.mxu1 %v1639_v2 }
 0x475   :  { %1763 = vmatmul.f32.vlgmr.msrb.gmra.mxu2 %v1639_v2  ;;  %1783 = vmatmul.f32.vlgmr.msrb.gmra.mxu3 %v1639_v2  ;;  %v2085_v2 = vld [vmem:[#allocation12 + $0x48] sm:$0xff] }
 0x4f1   :  { %v1724_v45 = vpop.f32.mrf.mxu0  ;;  %v1744_v14 = vpop.f32.mrf.mxu1 }
 0x4f2   :  { %v1787_v47 = vadd.f32 %v1724_v45, %v3735_v49  ;;  %v1788_v29 = vadd.f32 %v1744_v14, %v3736_v25  ;;  %v2084_v45 = vld [vmem:[#allocation12 + $0x40] sm:$0xff]  ;;  %v2083_v14 = vld [vmem:[#allocation12 + $0x38] sm:$0xff]  ;;  %v2082_v49 = vld [vmem:[#allocation12 + $0x30] sm:$0xff] }
 0x4f4   :  { %v2154_v28 = vmul.f32 -1.442695, %v1787_v47  ;;  %v2155_v6 = vmul.f32 -1.442695, %v1788_v29  ;;  %v3739_v29 = vld [vmem:[#allocation34_spill] sm:$0xff] }
 0x4f6   :  { %2268 = vpow2.f32 %v2154_v28 }
 0x4f7   :  { %2270 = vpow2.f32 %v2155_v6  ;;  %v3740_v6 = vld [vmem:[#allocation35_spill] sm:$0xff] }
 0x4f8   :  { %v1784_v34 = vpop.f32.mrf.mxu3  ;;  %v1764_v60 = vpop.f32.mrf.mxu2 }
 0x4f9   :  { %v1790_v8 = vadd.f32 %v1784_v34, %v3737_v53  ;;  %v1789_v10 = vadd.f32 %v1764_v60, %v3738_v16  ;;  %v2081_v53 = vld [vmem:[#allocation12 + $0x28] sm:$0xff] }
 0x4fa   :  { %v2077_v60 = vld [vmem:[#allocation12 + $0x8] sm:$0xff] }
 0x4fb   :  { %v2156_v9 = vmul.f32 -1.442695, %v1790_v8 }
 0x4fc   :  { %v2269_v55 = vpop.eup %2268 }
 0x4fd   :  { %v2271_v36 = vpop.eup %2270  ;;  %v1794_v26 = vadd.f32 1.0, %v2269_v55  ;;  %2272 = vpow2.f32 %v2156_v9  ;;  %v2080_v55 = vld [vmem:[#allocation12 + $0x20] sm:$0xff] }
 0x4fe   :  { %v1813_v13 = vadd.f32 1.0, %v2271_v36  ;;  %v2079_v36 = vld [vmem:[#allocation12 + $0x18] sm:$0xff] }
 0x4ff   :  { %2274 = vrcp.f32 %v1794_v26  ;;  %v1806_v3 = vand.u32 2147483648, %v1794_v26  ;;  %v1804_v20 = vand.u32 2147483647, %v1794_v26  ;;  %vm1800_vm10 = vweird.f32 %v1794_v26 }
 0x500   :  { %2276 = vrcp.f32 %v1813_v13  ;;  %v1825_v19 = vand.u32 2147483648, %v1813_v13  ;;  %v1823_v24 = vand.u32 2147483647, %v1813_v13  ;;  %vm1819_vm11 = vweird.f32 %v1813_v13 }
 0x501   :  { %v1807_v51 = vor.u32 1.1754944e-38, %v1806_v3  ;;  %vm1805_vm14 = vcmp.eq.f32.partialorder %v1804_v20, 8.507059e+37 }
 0x502   :  { %v1826_v35 = vor.u32 1.1754944e-38, %v1825_v19  ;;  %vm1824_vm15 = vcmp.eq.f32.partialorder %v1823_v24, 8.507059e+37 }
 0x503   :  { %v2273_v40 = vpop.eup %2272 }
 0x504   :  { %v1833_v11 = vadd.f32 1.0, %v2273_v40  ;;  %v3741_v40 = vld [vmem:[#allocation37_spill] sm:$0xff] }
 0x505   :  { %v2275_v31 = vpop.eup %2274 }
 0x506   :  { %v2277_v1 = vpop.eup %2276  ;;  %v1796_v4 = vmul.f32 %v2275_v31, %v1794_v26  ;;  %2278 = vrcp.f32 %v1833_v11  ;;  %vm1801_vm8 = vweird.f32 %v2275_v31  ;;  %v1845_v50 = vand.u32 2147483648, %v1833_v11  ;;  %v2078_v26 = vld [vmem:[#allocation12 + $0x10] sm:$0xff] }
 0x507   :  { %v1815_v12 = vmul.f32 %v2277_v1, %v1813_v13  ;;  %2280 = vtanh.f32 %v1789_v10  ;;  %vm1820_vm9 = vweird.f32 %v2277_v1  ;;  %vm1802_vm12 = vmor %vm1800_vm10, %vm1801_vm8  ;;  %vm1839_vm1 = vweird.f32 %v1833_v11 }
 0x508   :  { %v1797_v0 = vsub.f32 1.0, %v1796_v4  ;;  %vm1821_vm13 = vmor %vm1819_vm11, %vm1820_vm9  ;;  %v1843_v54 = vand.u32 2147483647, %v1833_v11  ;;  %v1846_v58 = vor.u32 1.1754944e-38, %v1845_v50 }
 0x509   :  { %v1816_v15 = vsub.f32 1.0, %v1815_v12 }
 0x50a   :  { %v1798_v18 = vmul.f32 %v2275_v31, %v1797_v0  ;;  %vm1844_vm3 = vcmp.eq.f32.partialorder %v1843_v54, 8.507059e+37 }
 0x50b   :  { %v1817_v23 = vmul.f32 %v2277_v1, %v1816_v15 }
 0x50c   :  { %v2279_v44 = vpop.eup %2278  ;;  %v1799_v48 = vadd.f32 %v2275_v31, %v1798_v18  ;;  %v3742_v18 = vld [vmem:[#allocation36_spill] sm:$0xff] }
 0x50d   :  { %v1818_v56 = vadd.f32 %v2277_v1, %v1817_v23  ;;  %v1835_v57 = vmul.f32 %v2279_v44, %v1833_v11  ;;  %v2281_v39 = vpop.eup %2280  ;;  %vm1840_vm0 = vweird.f32 %v2279_v44 }
 0x50e   :  { %v1803_v61 = vsel %vm1802_vm12, %v2275_v31, %v1799_v48  ;;  %vm1841_vm2 = vmor %vm1839_vm1, %vm1840_vm0  ;;  %v2076_v31 = vld [vmem:[#allocation12] sm:$0xff] }
 0x50f   :  { %v1808_v30 = vsel %vm1805_vm14, %v1807_v51, %v1803_v61  ;;  %v1822_v5 = vsel %vm1821_vm13, %v2277_v1, %v1818_v56  ;;  %v1836_v17 = vsub.f32 1.0, %v1835_v57 }
 0x510   :  { %v1827_v43 = vsel %vm1824_vm15, %v1826_v35, %v1822_v5  ;;  %v1851_v32 = vmul.f32 %v2281_v39, %v1808_v30 }
 0x511   :  { %v1850_v33 = vmul.f32 %v1827_v43, %v3551_v46  ;;  %v1837_v37 = vmul.f32 %v2279_v44, %v1836_v17  ;;  %v2091_v46 = vld [vmem:[#allocation12 + $0x78] sm:$0xff] }
 0x512   :  { %2096 = vmatpush.msrb.mxu0 %v2091_v46 }
 0x513   :  { %v3589_v41 = vadd.f32 %v1851_v32, %v1850_v33  ;;  %v1838_v7 = vadd.f32 %v2279_v44, %v1837_v37 }
 0x514   :  { %2097 = vmatpush.msrb.mxu0 %v2090_v52 }
 0x515   :  { %2282 = vtanh.f32 %v3589_v41  ;;  %v1842_v42 = vsel %vm1841_vm2, %v2279_v44, %v1838_v7 }
 0x516   :  { %v1847_v62 = vsel %vm1844_vm3, %v1846_v58, %v1842_v42  ;;  %2098 = vmatpush.msrb.mxu0 %v2089_v22 }
 0x518   :  { %2099 = vmatpush.msrb.mxu0 %v2088_v21 }
 0x51a   :  { %2100 = vmatpush.msrb.mxu0 %v2087_v27 }
 0x51b   :  { %v2283_v59 = vpop.eup %2282 }
 0x51c   :  { %v1854_v63 = vmul.f32 %v2283_v59, %v1847_v62  ;;  %2101 = vmatpush.msrb.mxu0 %v2086_v38 }
 0x51e   :  { %1938 = vmatmul.f32.vlgmr.msra.gmra.mxu0 %v1854_v63  ;;  %1958 = vmatmul.f32.vlgmr.msra.gmra.mxu1 %v1854_v63 }
 0x51f   :  { %1978 = vmatmul.f32.vlgmr.msra.gmra.mxu2 %v1854_v63  ;;  %1998 = vmatmul.f32.vlgmr.msra.gmra.mxu3 %v1854_v63 }
 0x520   :  { %2102 = vmatpush.msrb.mxu0 %v2085_v2 }
 0x522   :  { %2103 = vmatpush.msrb.mxu0 %v2084_v45 }
 0x524   :  { %2104 = vmatpush.msrb.mxu0 %v2083_v14 }
 0x526   :  { %2105 = vmatpush.msrb.mxu0 %v2082_v49 }
 0x528   :  { %2106 = vmatpush.msrb.mxu0 %v2081_v53 }
 0x52a   :  { %2107 = vmatpush.msrb.mxu0 %v2080_v55 }
 0x52c   :  { %2108 = vmatpush.msrb.mxu0 %v2079_v36 }
 0x52e   :  { %2109 = vmatpush.msrb.mxu0 %v2078_v26 }
 0x530   :  { %2110 = vmatpush.msrb.mxu0 %v2077_v60 }
 0x532   :  { %2111 = vmatpush.msrb.mxu0 %v2076_v31 }
 0x59b   :  { %v1939_v47 = vpop.f32.mrf.mxu0  ;;  %v1959_v25 = vpop.f32.mrf.mxu1 }
 0x59c   :  { %v2002_v28 = vadd.f32 %v1939_v47, %v3739_v29  ;;  %v2003_v34 = vadd.f32 %v1959_v25, %v3740_v6 }
 0x59e   :  { %v2157_v8 = vmul.f32 -1.442695, %v2002_v28  ;;  %v2158_v9 = vmul.f32 -1.442695, %v2003_v34 }
 0x5a0   :  { %2284 = vpow2.f32 %v2157_v8 }
 0x5a1   :  { %2286 = vpow2.f32 %v2158_v9 }
 0x5a2   :  { %v1999_v13 = vpop.f32.mrf.mxu3  ;;  %v1979_v0 = vpop.f32.mrf.mxu2 }
 0x5a3   :  { %v2005_v11 = vadd.f32 %v1999_v13, %v3741_v40  ;;  %v2004_v20 = vadd.f32 %v1979_v0, %v3742_v18 }
 0x5a5   :  { %v2159_v16 = vmul.f32 -1.442695, %v2005_v11 }
 0x5a6   :  { %v2285_v10 = vpop.eup %2284 }
 0x5a7   :  { %v2287_v1 = vpop.eup %2286  ;;  %v2009_v4 = vadd.f32 1.0, %v2285_v10  ;;  %2288 = vpow2.f32 %v2159_v16 }
 0x5a8   :  { %v2028_v12 = vadd.f32 1.0, %v2287_v1 }
 0x5a9   :  { %2290 = vrcp.f32 %v2009_v4  ;;  %v2021_v56 = vand.u32 2147483648, %v2009_v4  ;;  %v2019_v61 = vand.u32 2147483647, %v2009_v4  ;;  %vm2015_vm6 = vweird.f32 %v2009_v4 }
 0x5aa   :  { %2292 = vrcp.f32 %v2028_v12  ;;  %v2040_v57 = vand.u32 2147483648, %v2028_v12  ;;  %v2038_v30 = vand.u32 2147483647, %v2028_v12  ;;  %vm2034_vm7 = vweird.f32 %v2028_v12 }
 0x5ab   :  { %v2022_v43 = vor.u32 1.1754944e-38, %v2021_v56  ;;  %vm2020_vm10 = vcmp.eq.f32.partialorder %v2019_v61, 8.507059e+37 }
 0x5ac   :  { %v2041_v37 = vor.u32 1.1754944e-38, %v2040_v57  ;;  %vm2039_vm11 = vcmp.eq.f32.partialorder %v2038_v30, 8.507059e+37 }
 0x5ad   :  { %v2289_v15 = vpop.eup %2288 }
 0x5ae   :  { %v2048_v3 = vadd.f32 1.0, %v2289_v15 }
 0x5af   :  { %v2291_v19 = vpop.eup %2290 }
 0x5b0   :  { %v2293_v23 = vpop.eup %2292  ;;  %v2011_v24 = vmul.f32 %v2291_v19, %v2009_v4  ;;  %2294 = vrcp.f32 %v2048_v3  ;;  %vm2016_vm4 = vweird.f32 %v2291_v19  ;;  %v2060_v21 = vand.u32 2147483648, %v2048_v3 }
 0x5b1   :  { %v2030_v44 = vmul.f32 %v2293_v23, %v2028_v12  ;;  %2296 = vtanh.f32 %v2004_v20  ;;  %vm2035_vm5 = vweird.f32 %v2293_v23  ;;  %vm2017_vm8 = vmor %vm2015_vm6, %vm2016_vm4  ;;  %vm2054_vm13 = vweird.f32 %v2048_v3 }
 0x5b2   :  { %v2012_v48 = vsub.f32 1.0, %v2011_v24  ;;  %vm2036_vm9 = vmor %vm2034_vm7, %vm2035_vm5  ;;  %v2058_v27 = vand.u32 2147483647, %v2048_v3  ;;  %v2061_v2 = vor.u32 1.1754944e-38, %v2060_v21 }
 0x5b3   :  { %v2031_v51 = vsub.f32 1.0, %v2030_v44 }
 0x5b4   :  { %v2013_v35 = vmul.f32 %v2291_v19, %v2012_v48  ;;  %vm2059_vm15 = vcmp.eq.f32.partialorder %v2058_v27, 8.507059e+37 }
 0x5b5   :  { %v2032_v39 = vmul.f32 %v2293_v23, %v2031_v51 }
 0x5b6   :  { %v2295_v5 = vpop.eup %2294  ;;  %v2014_v17 = vadd.f32 %v2291_v19, %v2013_v35 }
 0x5b7   :  { %v2033_v32 = vadd.f32 %v2293_v23, %v2032_v39  ;;  %v2050_v33 = vmul.f32 %v2295_v5, %v2048_v3  ;;  %v2297_v50 = vpop.eup %2296  ;;  %vm2055_vm12 = vweird.f32 %v2295_v5 }
 0x5b8   :  { %v2018_v7 = vsel %vm2017_vm8, %v2291_v19, %v2014_v17  ;;  %vm2056_vm14 = vmor %vm2054_vm13, %vm2055_vm12 }
 0x5b9   :  { %v2023_v54 = vsel %vm2020_vm10, %v2022_v43, %v2018_v7  ;;  %v2037_v42 = vsel %vm2036_vm9, %v2293_v23, %v2033_v32  ;;  %v2051_v58 = vsub.f32 1.0, %v2050_v33 }
 0x5ba   :  { %v2042_v59 = vsel %vm2039_vm11, %v2041_v37, %v2037_v42  ;;  %v2066_v62 = vmul.f32 %v2297_v50, %v2023_v54 }
 0x5bb   :  { %v2065_v63 = vmul.f32 %v2042_v59, %v3589_v41  ;;  %v2052_v46 = vmul.f32 %v2295_v5, %v2051_v58  ;;  %v2171_v41 = vld [vmem:[%s3608_s5] ss:$0 sm:$0xff] }
 0x5bd   :  { %v2067_v52 = vadd.f32 %v2066_v62, %v2065_v63  ;;  %v2053_v22 = vadd.f32 %v2295_v5, %v2052_v46 }
 0x5bf   :  { %2298 = vtanh.f32 %v2067_v52  ;;  %v2057_v38 = vsel %vm2056_vm14, %v2295_v5, %v2053_v22 }
 0x5c0   :  { %v2062_v14 = vsel %vm2059_vm15, %v2061_v2, %v2057_v38 }
 0x5c5   :  { %v2299_v45 = vpop.eup %2298 }
 0x5c6   :  { %v2069_v49 = vmul.f32 %v2299_v45, %v2062_v14 }
 0x5c8   :  { %2112 = vmatmul.f32.vlgmr.msrb.gmra.mxu0 %v2069_v49 }
 0x645   :  { %v2113_v47 = vpop.f32.mrf.mxu0 }
 0x646   :  { %v2114_v25 = vadd.f32 %v2171_v41, %v2113_v47 }
 0x648   :  { %2116 = vst [vmem:[#allocation13] sm:$0xff] %v2114_v25 }
 0x649   :  { %2127 = dma.vmem_to_hbm [thread:$0]  %s2123_s24, 128, %s2125_s27, [#allocation6]  }
 0x64a   :  { %2450 = dma.done.wait [#allocation6], 128  }
 0x64b   :  { %2451 = vsyncadd [#allocation6], 4294967168 }
 0x64c   :  { %2132 = vsyncpa [#allocation5], 1 }
 0x64d   :  { %2133 = vsyncpa [#allocation8], 1 }
 0x64e   :  { %2134 = vsyncpa [#allocation11], 1 }
 0x64f   :  { %2135 = vsyncpa [#allocation6], 1 }

</bundles_post_ra>
